<compile_context>
chip_gen: v6e
topology: v6e:2x2x1
jax: 0.10.0
libtpu: 0.0.40
codegen_flags: <defaults>
</compile_context>

<pallas_src>
import functools

import jax
import jax.numpy as jnp
from jax.experimental import pallas as pl
from jax.experimental.pallas import tpu as pltpu

LANES = 128          # channel dims are padded to a multiple of this (lane width)
_BN_EPS = 1e-5


def _round_up(x, m):
    return (x + m - 1) // m * m


def _default_cout_tile():
    """256-lane Cout tiles fill the 256-wide MXUs on v6e/v7x; 128-wide MXU chips keep 128."""
    try:
        kind = jax.devices()[0].device_kind.lower()
        if any(t in kind for t in ("v2", "v3", "v4", "v5 lite", "v5e", "v5litepod")):
            return 128
    except Exception:
        pass
    return 256


# ---------------------------------------------------------------------------
# Pallas kernel: fused 3x3 conv + folded-BN bias + ReLU (+ optional halo-padded output)
# ---------------------------------------------------------------------------
def _conv3x3_bn_relu_kernel(x_ref, w_ref, b_ref, o_ref, lhs_ref, *,
                            stride, halo_out, n_co):
    # x_ref:   stride==1 -> (1, Hp, Wp, Cin_p)  bf16, halo(+channel)-padded input
    #          stride==2 -> (1, 2, 2, Hph, Wph, Cin_p)  bf16, 4 parity phases of padded input
    # w_ref:   (1, K, TC)  bf16, BN-scale folded in, 9 taps stacked along K = 9*Cin_p
    # b_ref:   (1, TC)     f32 folded BN bias
    # o_ref:   (1, Ho[+2], Wo[+2], TC)  output tile (TC multiple of 128 -> lane-dense stores)
    # lhs_ref: (Ho*Wo, K)  bf16 persistent im2col scratch, reused across Cout tiles
    _, Hob, Wob, TC = o_ref.shape
    Ho, Wo = (Hob - 2, Wob - 2) if halo_out else (Hob, Wob)
    K = lhs_ref.shape[1]

    def build_lhs():
        taps = []
        for dy in range(3):                      # static -> fully unrolled
            for dx in range(3):
                if stride == 1:
                    taps.append(x_ref[0, dy:dy + Ho, dx:dx + Wo, :])
                else:
                    # phase (dy%2, dx%2) holds x_pad[2i+dy%2, 2j+dx%2] -> contiguous slices.
                    taps.append(x_ref[0, dy % 2, dx % 2,
                                      dy // 2:dy // 2 + Ho,
                                      dx // 2:dx // 2 + Wo, :])
        lhs_ref[...] = jnp.concatenate(taps, axis=-1).reshape(Ho * Wo, K)

    # Build the im2col LHS once per image and reuse it for all Cout tiles (co > 0).
    if n_co == 1:
        build_lhs()
    else:
        pl.when(pl.program_id(1) == 0)(build_lhs)

    acc = jnp.dot(lhs_ref[...], w_ref[0], preferred_element_type=jnp.float32)  # (Ho*Wo, TC)
    y = jnp.maximum(acc + b_ref[...], 0.0)                                     # bias bcasts
    y = y.reshape(Ho, Wo, TC).astype(o_ref.dtype)

    if halo_out:
        # Emit the next conv's zero halo directly -> no wrapper-side pad pass over HBM.
        o_ref[0] = jnp.zeros((Hob, Wob, TC), o_ref.dtype)
        o_ref[0, 1:Ho + 1, 1:Wo + 1, :] = y
    else:
        o_ref[0] = y


def conv3x3_bn_relu(x_in, w_tiles, bias, *, stride, halo_out, out_dtype):
    """x_in: halo(+channel)-padded NHWC bf16 (stride==1: (N,Hp,Wp,Cin_p);
    stride==2: (N,2,2,Hph,Wph,Cin_p) parity phases).  w_tiles: (n_co, 9*Cin_p, TC) bf16
    with BN folded in.  bias: (1, Cout_p) f32."""
    n_co, K, TC = w_tiles.shape
    cout_p = n_co * TC

    if stride == 1:
        N, Hp, Wp, cin_p = x_in.shape
        Ho, Wo = Hp - 2, Wp - 2
        in_block = (1, Hp, Wp, cin_p)
        in_map = lambda n, co: (n, 0, 0, 0)
    else:  # stride == 2
        N, _, _, Hph, Wph, cin_p = x_in.shape
        Ho, Wo = Hph - 1, Wph - 1
        in_block = (1, 2, 2, Hph, Wph, cin_p)
        in_map = lambda n, co: (n, 0, 0, 0, 0, 0)
    assert K == 9 * cin_p, (K, cin_p)
    Hob, Wob = (Ho + 2, Wo + 2) if halo_out else (Ho, Wo)

    kernel = functools.partial(_conv3x3_bn_relu_kernel,
                               stride=stride, halo_out=halo_out, n_co=n_co)
    return pl.pallas_call(
        kernel,
        out_shape=jax.ShapeDtypeStruct((N, Hob, Wob, cout_p), out_dtype),
        grid=(N, n_co),
        in_specs=[
            pl.BlockSpec(in_block, in_map),
            pl.BlockSpec((1, K, TC), lambda n, co: (co, 0, 0)),   # contiguous weight slab
            pl.BlockSpec((1, TC), lambda n, co: (0, co)),
        ],
        out_specs=pl.BlockSpec((1, Hob, Wob, TC), lambda n, co: (n, 0, 0, co)),
        scratch_shapes=[pltpu.VMEM((Ho * Wo, K), jnp.bfloat16)],  # persistent im2col LHS
        compiler_params=pltpu.CompilerParams(
            # co must stay innermost + "arbitrary": the im2col scratch built at co==0 is
            # reused by co>0 of the same image.
            dimension_semantics=("parallel", "arbitrary"),
            vmem_limit_bytes=48 * 1024 * 1024),
    )(x_in, w_tiles, bias)


# ---------------------------------------------------------------------------
# Wrapper-side input prep: halo + channel pad (and parity-phase split for stride 2)
# ---------------------------------------------------------------------------
def _pad_and_phase(x_nhwc, cin_p, stride):
    N, H, W, Cin = x_nhwc.shape
    x = x_nhwc.astype(jnp.bfloat16)
    if stride == 1:
        # One bf16 pad combines the 3x3 halo with the lane-dense channel padding.
        return jnp.pad(x, ((0, 0), (1, 1), (1, 1), (0, cin_p - Cin)))
    # stride == 2: split into 4 (h, w) parity phases ONCE so all 9 kernel taps are
    # contiguous slices (no sublane-strided gathers in the kernel).
    Hp_e, Wp_e = _round_up(H + 2, 2), _round_up(W + 2, 2)
    xp = jnp.pad(x, ((0, 0), (1, Hp_e - H - 1), (1, Wp_e - W - 1), (0, cin_p - Cin)))
    xp = xp.reshape(N, Hp_e // 2, 2, Wp_e // 2, 2, cin_p)
    # (N, hphase, wphase, Hph, Wph, C) with x_ph[n,py,px,i,j,:] = x_pad[n, 2i+py, 2j+px, :]
    return jnp.transpose(xp, (0, 2, 4, 1, 3, 5))


# ---------------------------------------------------------------------------
# Parameter setup (raw params + BN-folding / padding / tiling into kernel-ready form)
# ---------------------------------------------------------------------------
def init_basic_block_params(key, in_ch, out_ch):
    ks = jax.random.split(key, 6)

    def bn(k0, k1, ch):
        return {"gamma": 1.0 + 0.1 * jax.random.normal(k0, (ch,), jnp.float32),
                "beta": 0.1 * jax.random.normal(k1, (ch,), jnp.float32),
                "mean": 0.05 * jnp.arange(ch, dtype=jnp.float32),
                "var": 1.0 + 0.01 * jnp.arange(ch, dtype=jnp.float32)}

    return {"w1": 0.1 * jax.random.normal(ks[0], (3, 3, in_ch, out_ch), jnp.float32),
            "w2": 0.1 * jax.random.normal(ks[1], (3, 3, out_ch, out_ch), jnp.float32),
            "bn1": bn(ks[2], ks[3], out_ch),
            "bn2": bn(ks[4], ks[5], out_ch)}


def _fold_bn_into_conv(w_hwio, bn, cin_p, cout_p, tc, eps=_BN_EPS):
    scale = bn["gamma"] / jnp.sqrt(bn["var"] + eps)            # (cout,)
    bias = bn["beta"] - bn["mean"] * scale                     # (cout,)
    w = w_hwio * scale                                         # fold BN scale into weights
    kh, kw, cin, cout = w_hwio.shape
    w = jnp.pad(w, ((0, 0), (0, 0), (0, cin_p - cin), (0, cout_p - cout)))
    K, n_co = kh * kw * cin_p, cout_p // tc
    # Contiguous per-Cout-tile slabs: one clean (unstrided) weight DMA per tile.
    w_tiles = w.reshape(K, n_co, tc).transpose(1, 0, 2).astype(jnp.bfloat16)
    bias_p = jnp.pad(bias, (0, cout_p - cout)).reshape(1, cout_p).astype(jnp.float32)
    return w_tiles, bias_p


def prepare_basic_block_params(raw, in_ch, out_ch, cout_tile=None):
    cin_p = _round_up(in_ch, LANES)
    cout_p = _round_up(out_ch, LANES)
    tc = cout_tile or _default_cout_tile()
    tc = tc if cout_p % tc == 0 else LANES
    w1, b1 = _fold_bn_into_conv(raw["w1"], raw["bn1"], cin_p, cout_p, tc)
    w2, b2 = _fold_bn_into_conv(raw["w2"], raw["bn2"], cout_p, cout_p, tc)
    return {"w1": w1, "b1": b1, "w2": w2, "b2": b2}


# ---------------------------------------------------------------------------
# BasicBlock forward (NCHW in / NCHW out, matching the PyTorch module)
# ---------------------------------------------------------------------------
def basic_block_forward(x_nchw, params, *, stride, out_ch):
    cin_p = params["w1"].shape[1] // 9                         # static (from weight tiles)
    x = jnp.transpose(x_nchw, (0, 2, 3, 1))                    # NCHW -> NHWC
    x_in = _pad_and_phase(x, cin_p, stride)
    # conv1 emits a halo-padded bf16 output -> conv2 needs no wrapper-side pad/HBM pass.
    h = conv3x3_bn_relu(x_in, params["w1"], params["b1"],
                        stride=stride, halo_out=True, out_dtype=jnp.bfloat16)
    y = conv3x3_bn_relu(h, params["w2"], params["b2"],
                        stride=1, halo_out=False, out_dtype=jnp.float32)
    # TODO(synk): keep NHWC / bf16 downstream to drop these two extra full-tensor XLA passes.
    y = y[..., :out_ch]                                        # drop lane padding
    return jnp.transpose(y, (0, 3, 1, 2))                      # NHWC -> NCHW


# ---------------------------------------------------------------------------
# Pure-JAX reference with matching numerics (bf16 inputs/weights, f32 accumulation)
# ---------------------------------------------------------------------------
def basic_block_reference(x_nchw, raw, stride):
    def fold(w, bn):
        scale = bn["gamma"] / jnp.sqrt(bn["var"] + _BN_EPS)
        return (w * scale).astype(jnp.bfloat16), bn["beta"] - bn["mean"] * scale

    w1, b1 = fold(raw["w1"], raw["bn1"])
    w2, b2 = fold(raw["w2"], raw["bn2"])
    x = jnp.transpose(x_nchw, (0, 2, 3, 1)).astype(jnp.bfloat16)

    def conv_bias_relu(x, w, b, s):
        y = jax.lax.conv_general_dilated(
            x, w, window_strides=(s, s), padding=((1, 1), (1, 1)),
            dimension_numbers=("NHWC", "HWIO", "NHWC"),
            preferred_element_type=jnp.float32)
        return jnp.maximum(y + b, 0.0)

    h = conv_bias_relu(x, w1, b1, stride).astype(jnp.bfloat16)  # kernel stores bf16
    y = conv_bias_relu(h, w2, b2, 1)
    return jnp.transpose(y, (0, 3, 1, 2))


if __name__ == "__main__":
    key = jax.random.PRNGKey(0)
    configs = [
        # (N, in_ch, out_ch, H, W, stride)
        (2, 4, 8, 16, 16, 1),      # basic block (single Cout tile)
        (2, 4, 160, 16, 16, 2),    # downsampling block (stride-2 phase path, wide Cout tile)
        (2, 4, 272, 8, 8, 1),      # multiple Cout tiles -> exercises im2col scratch reuse
    ]
    for i, (N, in_ch, out_ch, H, W, stride) in enumerate(configs):
        k_x, k_p = jax.random.split(jax.random.fold_in(key, i))
        x = jax.random.normal(k_x, (N, in_ch, H, W), jnp.float32)   # PyTorch NCHW input
        raw = init_basic_block_params(k_p, in_ch, out_ch)
        params = prepare_basic_block_params(raw, in_ch, out_ch)

        fwd = jax.jit(functools.partial(basic_block_forward, stride=stride, out_ch=out_ch))
        out = jax.block_until_ready(fwd(x, params))

        ref = basic_block_reference(x, raw, stride)
        Ho, Wo = (H - 1) // stride + 1, (W - 1) // stride + 1
        assert out.shape == (N, out_ch, Ho, Wo), (out.shape, (N, out_ch, Ho, Wo))
        assert jnp.allclose(out, ref, atol=2e-2, rtol=2e-2), \
            float(jnp.max(jnp.abs(out - ref)))

    print("KERNEL_OK")
</pallas_src>

<mosaic_0001>
module attributes {stable_mosaic.version = 11 : i64} {
  func.func @_conv3x3_bn_relu_kernel(%arg0: i32, %arg1: i32, %arg2: memref<1x18x18x128xbf16, #tpu.memory_space<vmem>>, %arg3: memref<1x1152x128xbf16, #tpu.memory_space<vmem>>, %arg4: memref<1x128xf32, #tpu.memory_space<vmem>>, %arg5: memref<1x18x18x128xbf16, #tpu.memory_space<vmem>>, %arg6: memref<256x1152xbf16, #tpu.memory_space<vmem>>) attributes {dimension_semantics = [#tpu.dimension_semantics<parallel>, #tpu.dimension_semantics<arbitrary>], iteration_bounds = array<i64: 2, 1>, scalar_prefetch = 0 : i64, scratch_operands = 1 : i64, tpu.core_type = #tpu.core_type<tc>, window_params = [{transform_indices = @transform_0, window_bounds = array<i64: 1, 18, 18, 128>}, {transform_indices = @transform_1, window_bounds = array<i64: 1, 1152, 128>}, {transform_indices = @transform_2, window_bounds = array<i64: 1, 128>}, {transform_indices = @transform_3, window_bounds = array<i64: 1, 18, 18, 128>}]} {
    %c0 = arith.constant 0 : index
    %c0_0 = arith.constant 0 : index
    %c0_1 = arith.constant 0 : index
    %c0_2 = arith.constant 0 : index
    %0 = vector.load %arg2[%c0, %c0_0, %c0_1, %c0_2] : memref<1x18x18x128xbf16, #tpu.memory_space<vmem>>, vector<1x16x16x128xbf16>
    %1 = vector.shape_cast %0 : vector<1x16x16x128xbf16> to vector<16x16x128xbf16>
    %c0_3 = arith.constant 0 : index
    %c0_4 = arith.constant 0 : index
    %c1 = arith.constant 1 : index
    %c0_5 = arith.constant 0 : index
    %2 = vector.load %arg2[%c0_3, %c0_4, %c1, %c0_5] : memref<1x18x18x128xbf16, #tpu.memory_space<vmem>>, vector<1x16x16x128xbf16>
    %3 = vector.shape_cast %2 : vector<1x16x16x128xbf16> to vector<16x16x128xbf16>
    %c0_6 = arith.constant 0 : index
    %c0_7 = arith.constant 0 : index
    %c2 = arith.constant 2 : index
    %c0_8 = arith.constant 0 : index
    %4 = vector.load %arg2[%c0_6, %c0_7, %c2, %c0_8] : memref<1x18x18x128xbf16, #tpu.memory_space<vmem>>, vector<1x16x16x128xbf16>
    %5 = vector.shape_cast %4 : vector<1x16x16x128xbf16> to vector<16x16x128xbf16>
    %c0_9 = arith.constant 0 : index
    %c1_10 = arith.constant 1 : index
    %c0_11 = arith.constant 0 : index
    %c0_12 = arith.constant 0 : index
    %6 = vector.load %arg2[%c0_9, %c1_10, %c0_11, %c0_12] : memref<1x18x18x128xbf16, #tpu.memory_space<vmem>>, vector<1x16x16x128xbf16>
    %7 = vector.shape_cast %6 : vector<1x16x16x128xbf16> to vector<16x16x128xbf16>
    %c0_13 = arith.constant 0 : index
    %c1_14 = arith.constant 1 : index
    %c1_15 = arith.constant 1 : index
    %c0_16 = arith.constant 0 : index
    %8 = vector.load %arg2[%c0_13, %c1_14, %c1_15, %c0_16] : memref<1x18x18x128xbf16, #tpu.memory_space<vmem>>, vector<1x16x16x128xbf16>
    %9 = vector.shape_cast %8 : vector<1x16x16x128xbf16> to vector<16x16x128xbf16>
    %c0_17 = arith.constant 0 : index
    %c1_18 = arith.constant 1 : index
    %c2_19 = arith.constant 2 : index
    %c0_20 = arith.constant 0 : index
    %10 = vector.load %arg2[%c0_17, %c1_18, %c2_19, %c0_20] : memref<1x18x18x128xbf16, #tpu.memory_space<vmem>>, vector<1x16x16x128xbf16>
    %11 = vector.shape_cast %10 : vector<1x16x16x128xbf16> to vector<16x16x128xbf16>
    %c0_21 = arith.constant 0 : index
    %c2_22 = arith.constant 2 : index
    %c0_23 = arith.constant 0 : index
    %c0_24 = arith.constant 0 : index
    %12 = vector.load %arg2[%c0_21, %c2_22, %c0_23, %c0_24] : memref<1x18x18x128xbf16, #tpu.memory_space<vmem>>, vector<1x16x16x128xbf16>
    %13 = vector.shape_cast %12 : vector<1x16x16x128xbf16> to vector<16x16x128xbf16>
    %c0_25 = arith.constant 0 : index
    %c2_26 = arith.constant 2 : index
    %c1_27 = arith.constant 1 : index
    %c0_28 = arith.constant 0 : index
    %14 = vector.load %arg2[%c0_25, %c2_26, %c1_27, %c0_28] : memref<1x18x18x128xbf16, #tpu.memory_space<vmem>>, vector<1x16x16x128xbf16>
    %15 = vector.shape_cast %14 : vector<1x16x16x128xbf16> to vector<16x16x128xbf16>
    %c0_29 = arith.constant 0 : index
    %c2_30 = arith.constant 2 : index
    %c2_31 = arith.constant 2 : index
    %c0_32 = arith.constant 0 : index
    %16 = vector.load %arg2[%c0_29, %c2_30, %c2_31, %c0_32] : memref<1x18x18x128xbf16, #tpu.memory_space<vmem>>, vector<1x16x16x128xbf16>
    %17 = vector.shape_cast %16 : vector<1x16x16x128xbf16> to vector<16x16x128xbf16>
    %18 = tpu.concatenate %1, %3, %5, %7, %9, %11, %13, %15, %17 in 2 : vector<16x16x128xbf16>, vector<16x16x128xbf16>, vector<16x16x128xbf16>, vector<16x16x128xbf16>, vector<16x16x128xbf16>, vector<16x16x128xbf16>, vector<16x16x128xbf16>, vector<16x16x128xbf16>, vector<16x16x128xbf16> -> vector<16x16x1152xbf16>
    %19 = vector.shape_cast %18 : vector<16x16x1152xbf16> to vector<256x1152xbf16>
    %c0_33 = arith.constant 0 : index
    %c0_34 = arith.constant 0 : index
    %20 = vector.load %arg6[%c0_33, %c0_34] : memref<256x1152xbf16, #tpu.memory_space<vmem>>, vector<256x1152xbf16>
    tpu.vector_store %arg6[%c0_33, %c0_34], %19 {strides = array<i32>} : memref<256x1152xbf16, #tpu.memory_space<vmem>>, vector<256x1152xbf16>,
    %c0_35 = arith.constant 0 : index
    %c0_36 = arith.constant 0 : index
    %21 = vector.load %arg6[%c0_35, %c0_36] : memref<256x1152xbf16, #tpu.memory_space<vmem>>, vector<256x1152xbf16>
    %c0_37 = arith.constant 0 : index
    %c0_38 = arith.constant 0 : index
    %c0_39 = arith.constant 0 : index
    %22 = vector.load %arg3[%c0_37, %c0_38, %c0_39] : memref<1x1152x128xbf16, #tpu.memory_space<vmem>>, vector<1x1152x128xbf16>
    %23 = vector.shape_cast %22 : vector<1x1152x128xbf16> to vector<1152x128xbf16>
    %cst = arith.constant dense<0.000000e+00> : vector<256x128xf32>
    %24 = tpu.matmul %21, %23, %cst {dimension_numbers = #tpu.dot_dimension_numbers<[1], [0], [0], [1], [0, 0, 1, 1], [], []>} : vector<256x1152xbf16>, vector<1152x128xbf16>, vector<256x128xf32> -> vector<256x128xf32>
    %c0_40 = arith.constant 0 : index
    %c0_41 = arith.constant 0 : index
    %25 = vector.load %arg4[%c0_40, %c0_41] : memref<1x128xf32, #tpu.memory_space<vmem>>, vector<1x128xf32>
    %26 = vector.broadcast %25 : vector<1x128xf32> to vector<256x128xf32>
    %27 = arith.addf %24, %26 : vector<256x128xf32>
    %cst_42 = arith.constant 0.000000e+00 : f32
    %28 = vector.broadcast %cst_42 : f32 to vector<256x128xf32>
    %29 = arith.maximumf %27, %28 : vector<256x128xf32>
    %30 = vector.shape_cast %29 : vector<256x128xf32> to vector<16x16x128xf32>
    %31 = arith.truncf %30 : vector<16x16x128xf32> to vector<16x16x128xbf16>
    %cst_43 = arith.constant 0.000000e+00 : bf16
    %32 = vector.broadcast %cst_43 : bf16 to vector<18x18x128xbf16>
    %c0_44 = arith.constant 0 : index
    %c0_45 = arith.constant 0 : index
    %c0_46 = arith.constant 0 : index
    %c0_47 = arith.constant 0 : index
    %33 = vector.load %arg5[%c0_44, %c0_45, %c0_46, %c0_47] : memref<1x18x18x128xbf16, #tpu.memory_space<vmem>>, vector<1x18x18x128xbf16>
    %34 = vector.shape_cast %33 : vector<1x18x18x128xbf16> to vector<18x18x128xbf16>
    %35 = vector.shape_cast %32 : vector<18x18x128xbf16> to vector<1x18x18x128xbf16>
    tpu.vector_store %arg5[%c0_44, %c0_45, %c0_46, %c0_47], %35 {strides = array<i32>} : memref<1x18x18x128xbf16, #tpu.memory_space<vmem>>, vector<1x18x18x128xbf16>,
    %c0_48 = arith.constant 0 : index
    %c1_49 = arith.constant 1 : index
    %c1_50 = arith.constant 1 : index
    %c0_51 = arith.constant 0 : index
    %36 = vector.load %arg5[%c0_48, %c1_49, %c1_50, %c0_51] : memref<1x18x18x128xbf16, #tpu.memory_space<vmem>>, vector<1x16x16x128xbf16>
    %37 = vector.shape_cast %36 : vector<1x16x16x128xbf16> to vector<16x16x128xbf16>
    %38 = vector.shape_cast %31 : vector<16x16x128xbf16> to vector<1x16x16x128xbf16>
    tpu.vector_store %arg5[%c0_48, %c1_49, %c1_50, %c0_51], %38 {strides = array<i32>} : memref<1x18x18x128xbf16, #tpu.memory_space<vmem>>, vector<1x16x16x128xbf16>,
    return
  }
  func.func @transform_0(%arg0: i32, %arg1: i32) -> (i32, i32, i32, i32) {
    %c0_i32 = arith.constant 0 : i32
    %c0_i32_0 = arith.constant 0 : i32
    %c0_i32_1 = arith.constant 0 : i32
    %c0_i32_2 = arith.constant 0 : i32
    return %arg0, %c0_i32, %c0_i32_0, %c0_i32_1 : i32, i32, i32, i32
  }
  func.func @transform_1(%arg0: i32, %arg1: i32) -> (i32, i32, i32) {
    %c0_i32 = arith.constant 0 : i32
    %c0_i32_0 = arith.constant 0 : i32
    %c0_i32_1 = arith.constant 0 : i32
    return %arg1, %c0_i32, %c0_i32_0 : i32, i32, i32
  }
  func.func @transform_2(%arg0: i32, %arg1: i32) -> (i32, i32) {
    %c0_i32 = arith.constant 0 : i32
    %c0_i32_0 = arith.constant 0 : i32
    return %c0_i32, %arg1 : i32, i32
  }
  func.func @transform_3(%arg0: i32, %arg1: i32) -> (i32, i32, i32, i32) {
    %c0_i32 = arith.constant 0 : i32
    %c0_i32_0 = arith.constant 0 : i32
    %c0_i32_1 = arith.constant 0 : i32
    return %arg0, %c0_i32, %c0_i32_0, %arg1 : i32, i32, i32, i32
  }
}

module attributes {stable_mosaic.version = 11 : i64} {
  func.func @_conv3x3_bn_relu_kernel(%arg0: i32, %arg1: i32, %arg2: memref<1x18x18x128xbf16, #tpu.memory_space<vmem>>, %arg3: memref<1x1152x128xbf16, #tpu.memory_space<vmem>>, %arg4: memref<1x128xf32, #tpu.memory_space<vmem>>, %arg5: memref<1x16x16x128xf32, #tpu.memory_space<vmem>>, %arg6: memref<256x1152xbf16, #tpu.memory_space<vmem>>) attributes {dimension_semantics = [#tpu.dimension_semantics<parallel>, #tpu.dimension_semantics<arbitrary>], iteration_bounds = array<i64: 2, 1>, scalar_prefetch = 0 : i64, scratch_operands = 1 : i64, tpu.core_type = #tpu.core_type<tc>, window_params = [{transform_indices = @transform_0, window_bounds = array<i64: 1, 18, 18, 128>}, {transform_indices = @transform_1, window_bounds = array<i64: 1, 1152, 128>}, {transform_indices = @transform_2, window_bounds = array<i64: 1, 128>}, {transform_indices = @transform_3, window_bounds = array<i64: 1, 16, 16, 128>}]} {
    %c0 = arith.constant 0 : index
    %c0_0 = arith.constant 0 : index
    %c0_1 = arith.constant 0 : index
    %c0_2 = arith.constant 0 : index
    %0 = vector.load %arg2[%c0, %c0_0, %c0_1, %c0_2] : memref<1x18x18x128xbf16, #tpu.memory_space<vmem>>, vector<1x16x16x128xbf16>
    %1 = vector.shape_cast %0 : vector<1x16x16x128xbf16> to vector<16x16x128xbf16>
    %c0_3 = arith.constant 0 : index
    %c0_4 = arith.constant 0 : index
    %c1 = arith.constant 1 : index
    %c0_5 = arith.constant 0 : index
    %2 = vector.load %arg2[%c0_3, %c0_4, %c1, %c0_5] : memref<1x18x18x128xbf16, #tpu.memory_space<vmem>>, vector<1x16x16x128xbf16>
    %3 = vector.shape_cast %2 : vector<1x16x16x128xbf16> to vector<16x16x128xbf16>
    %c0_6 = arith.constant 0 : index
    %c0_7 = arith.constant 0 : index
    %c2 = arith.constant 2 : index
    %c0_8 = arith.constant 0 : index
    %4 = vector.load %arg2[%c0_6, %c0_7, %c2, %c0_8] : memref<1x18x18x128xbf16, #tpu.memory_space<vmem>>, vector<1x16x16x128xbf16>
    %5 = vector.shape_cast %4 : vector<1x16x16x128xbf16> to vector<16x16x128xbf16>
    %c0_9 = arith.constant 0 : index
    %c1_10 = arith.constant 1 : index
    %c0_11 = arith.constant 0 : index
    %c0_12 = arith.constant 0 : index
    %6 = vector.load %arg2[%c0_9, %c1_10, %c0_11, %c0_12] : memref<1x18x18x128xbf16, #tpu.memory_space<vmem>>, vector<1x16x16x128xbf16>
    %7 = vector.shape_cast %6 : vector<1x16x16x128xbf16> to vector<16x16x128xbf16>
    %c0_13 = arith.constant 0 : index
    %c1_14 = arith.constant 1 : index
    %c1_15 = arith.constant 1 : index
    %c0_16 = arith.constant 0 : index
    %8 = vector.load %arg2[%c0_13, %c1_14, %c1_15, %c0_16] : memref<1x18x18x128xbf16, #tpu.memory_space<vmem>>, vector<1x16x16x128xbf16>
    %9 = vector.shape_cast %8 : vector<1x16x16x128xbf16> to vector<16x16x128xbf16>
    %c0_17 = arith.constant 0 : index
    %c1_18 = arith.constant 1 : index
    %c2_19 = arith.constant 2 : index
    %c0_20 = arith.constant 0 : index
    %10 = vector.load %arg2[%c0_17, %c1_18, %c2_19, %c0_20] : memref<1x18x18x128xbf16, #tpu.memory_space<vmem>>, vector<1x16x16x128xbf16>
    %11 = vector.shape_cast %10 : vector<1x16x16x128xbf16> to vector<16x16x128xbf16>
    %c0_21 = arith.constant 0 : index
    %c2_22 = arith.constant 2 : index
    %c0_23 = arith.constant 0 : index
    %c0_24 = arith.constant 0 : index
    %12 = vector.load %arg2[%c0_21, %c2_22, %c0_23, %c0_24] : memref<1x18x18x128xbf16, #tpu.memory_space<vmem>>, vector<1x16x16x128xbf16>
    %13 = vector.shape_cast %12 : vector<1x16x16x128xbf16> to vector<16x16x128xbf16>
    %c0_25 = arith.constant 0 : index
    %c2_26 = arith.constant 2 : index
    %c1_27 = arith.constant 1 : index
    %c0_28 = arith.constant 0 : index
    %14 = vector.load %arg2[%c0_25, %c2_26, %c1_27, %c0_28] : memref<1x18x18x128xbf16, #tpu.memory_space<vmem>>, vector<1x16x16x128xbf16>
    %15 = vector.shape_cast %14 : vector<1x16x16x128xbf16> to vector<16x16x128xbf16>
    %c0_29 = arith.constant 0 : index
    %c2_30 = arith.constant 2 : index
    %c2_31 = arith.constant 2 : index
    %c0_32 = arith.constant 0 : index
    %16 = vector.load %arg2[%c0_29, %c2_30, %c2_31, %c0_32] : memref<1x18x18x128xbf16, #tpu.memory_space<vmem>>, vector<1x16x16x128xbf16>
    %17 = vector.shape_cast %16 : vector<1x16x16x128xbf16> to vector<16x16x128xbf16>
    %18 = tpu.concatenate %1, %3, %5, %7, %9, %11, %13, %15, %17 in 2 : vector<16x16x128xbf16>, vector<16x16x128xbf16>, vector<16x16x128xbf16>, vector<16x16x128xbf16>, vector<16x16x128xbf16>, vector<16x16x128xbf16>, vector<16x16x128xbf16>, vector<16x16x128xbf16>, vector<16x16x128xbf16> -> vector<16x16x1152xbf16>
    %19 = vector.shape_cast %18 : vector<16x16x1152xbf16> to vector<256x1152xbf16>
    %c0_33 = arith.constant 0 : index
    %c0_34 = arith.constant 0 : index
    %20 = vector.load %arg6[%c0_33, %c0_34] : memref<256x1152xbf16, #tpu.memory_space<vmem>>, vector<256x1152xbf16>
    tpu.vector_store %arg6[%c0_33, %c0_34], %19 {strides = array<i32>} : memref<256x1152xbf16, #tpu.memory_space<vmem>>, vector<256x1152xbf16>,
    %c0_35 = arith.constant 0 : index
    %c0_36 = arith.constant 0 : index
    %21 = vector.load %arg6[%c0_35, %c0_36] : memref<256x1152xbf16, #tpu.memory_space<vmem>>, vector<256x1152xbf16>
    %c0_37 = arith.constant 0 : index
    %c0_38 = arith.constant 0 : index
    %c0_39 = arith.constant 0 : index
    %22 = vector.load %arg3[%c0_37, %c0_38, %c0_39] : memref<1x1152x128xbf16, #tpu.memory_space<vmem>>, vector<1x1152x128xbf16>
    %23 = vector.shape_cast %22 : vector<1x1152x128xbf16> to vector<1152x128xbf16>
    %cst = arith.constant dense<0.000000e+00> : vector<256x128xf32>
    %24 = tpu.matmul %21, %23, %cst {dimension_numbers = #tpu.dot_dimension_numbers<[1], [0], [0], [1], [0, 0, 1, 1], [], []>} : vector<256x1152xbf16>, vector<1152x128xbf16>, vector<256x128xf32> -> vector<256x128xf32>
    %c0_40 = arith.constant 0 : index
    %c0_41 = arith.constant 0 : index
    %25 = vector.load %arg4[%c0_40, %c0_41] : memref<1x128xf32, #tpu.memory_space<vmem>>, vector<1x128xf32>
    %26 = vector.broadcast %25 : vector<1x128xf32> to vector<256x128xf32>
    %27 = arith.addf %24, %26 : vector<256x128xf32>
    %cst_42 = arith.constant 0.000000e+00 : f32
    %28 = vector.broadcast %cst_42 : f32 to vector<256x128xf32>
    %29 = arith.maximumf %27, %28 : vector<256x128xf32>
    %30 = vector.shape_cast %29 : vector<256x128xf32> to vector<16x16x128xf32>
    %c0_43 = arith.constant 0 : index
    %c0_44 = arith.constant 0 : index
    %c0_45 = arith.constant 0 : index
    %c0_46 = arith.constant 0 : index
    %31 = vector.load %arg5[%c0_43, %c0_44, %c0_45, %c0_46] : memref<1x16x16x128xf32, #tpu.memory_space<vmem>>, vector<1x16x16x128xf32>
    %32 = vector.shape_cast %31 : vector<1x16x16x128xf32> to vector<16x16x128xf32>
    %33 = vector.shape_cast %30 : vector<16x16x128xf32> to vector<1x16x16x128xf32>
    tpu.vector_store %arg5[%c0_43, %c0_44, %c0_45, %c0_46], %33 {strides = array<i32>} : memref<1x16x16x128xf32, #tpu.memory_space<vmem>>, vector<1x16x16x128xf32>,
    return
  }
  func.func @transform_0(%arg0: i32, %arg1: i32) -> (i32, i32, i32, i32) {
    %c0_i32 = arith.constant 0 : i32
    %c0_i32_0 = arith.constant 0 : i32
    %c0_i32_1 = arith.constant 0 : i32
    %c0_i32_2 = arith.constant 0 : i32
    return %arg0, %c0_i32, %c0_i32_0, %c0_i32_1 : i32, i32, i32, i32
  }
  func.func @transform_1(%arg0: i32, %arg1: i32) -> (i32, i32, i32) {
    %c0_i32 = arith.constant 0 : i32
    %c0_i32_0 = arith.constant 0 : i32
    %c0_i32_1 = arith.constant 0 : i32
    return %arg1, %c0_i32, %c0_i32_0 : i32, i32, i32
  }
  func.func @transform_2(%arg0: i32, %arg1: i32) -> (i32, i32) {
    %c0_i32 = arith.constant 0 : i32
    %c0_i32_0 = arith.constant 0 : i32
    return %c0_i32, %arg1 : i32, i32
  }
  func.func @transform_3(%arg0: i32, %arg1: i32) -> (i32, i32, i32, i32) {
    %c0_i32 = arith.constant 0 : i32
    %c0_i32_0 = arith.constant 0 : i32
    %c0_i32_1 = arith.constant 0 : i32
    return %arg0, %c0_i32, %c0_i32_0, %arg1 : i32, i32, i32, i32
  }
}

</mosaic_0001>

<bundles_post_ra>
// kernel: basic_block_forward.2
= control target key start
LH: loop header
LB: loop body
LE: loop exit
PB: predicated region body
PF: predicated region fallthrough
CT: control target
= control target key end

     0   :  { %s7064_s12 = smov 0   ;;  %s7066_s13 = smov 0   ;;  %s9566_s0 = inlined_call_operand.vmem [shape: bf16[2,18,18,128], index: 0, kind: input, shape index: {}]   ;;  %s9567_s1 = inlined_call_operand.vmem [shape: bf16[1,1152,128], index: 1, kind: input, shape index: {}]   ;;  %s9568_s2 = inlined_call_operand.vmem [shape: f32[1,128], index: 2, kind: input, shape index: {}]   ;;  %s9569_s3 = inlined_call_operand.vmem [shape: bf16[2,18,18,128], index: 3, kind: output, shape index: {}]  }
   0x1   :  { %s7068_s14 = smov 0  }
   0x2 LB: > { %s25_s15 = sadd.s32 1, %s7037_s13  ;;  %p5360_p0 = scmp.ge.s32.totalorder %s7041_s14, 1  ;;  %s7041_s14 = sphi %s7068_s14, %s13_s14   ;;  %s7037_s13 = sphi %s7066_s13, %s9631_s13   ;;  %s7033_s12 = sphi %s7064_s12, %s9630_s12  }
   0x3   : > { %p27_p1 = scmp.ge.s32.totalorder %s25_s15, 2  ;;  %p169_p2 = scmp.lt.s32.totalorder %s7041_s14, 3 }
   0x5   : > { %s9633_s15 = smov (%p27_p1, %s25_s15), 0  ;;  %p170_p3 = pnand %p5360_p0, %p169_p2 }
   0x7   : > { %173 = sbr.rel (%p170_p3) target bundleno = 556 (0x22c), region = 32 }
   0xc   : > { %v6736_v0 = vld [vmem:[%s9567_s1 + $0x78] sm:$0xff]   ;;  %p204_p4 = scmp.lt.s32.totalorder %s7033_s12, 1  ;;  %v6738_v2 = vld [vmem:[%s9567_s1 + $0x70] sm:$0xff]   ;;  %v6740_v4 = vld [vmem:[%s9567_s1 + $0x68] sm:$0xff]   ;;  %vm548_vm0 = vsmask.f32 7424 }
   0xd   : > { %v6737_v1 = vld [vmem:[%s9567_s1 + $0x38] sm:$0xff]   ;;  %6174 = vmatprep.subr.bf16.mxu0 %v6736_v0  ;;  %6694 = vmatprep.subr.bf16.mxu1 %v6736_v0  ;;  %v6739_v3 = vld [vmem:[%s9567_s1 + $0x30] sm:$0xff]   ;;  %v6741_v5 = vld [vmem:[%s9567_s1 + $0x28] sm:$0xff]   ;;  %vm5640_vm1 = vcmask 1043456  ;;  %vm789_vm2 = vcmask 1046528   ;;  %vm5139_vm6 = vcmask 1040384  }
   0xe   : > { %6175 = vmatpush3.bf16.msra.mxu0 %v6737_v1  ;;  %6702 = vmatpush3.bf16.msra.mxu1 %v6737_v1  ;;  %s9635_s12 = smov (!%p204_p4, %s7033_s12), 1  ;;  %v6742_v6 = vld [vmem:[%s9567_s1 + $0x60] sm:$0xff]   ;;  %v6744_v8 = vld [vmem:[%s9567_s1 + $0x58] sm:$0xff]   ;;  %v6746_v10 = vld [vmem:[%s9567_s1 + $0x50] sm:$0xff]   ;;  %vm5133_vm3 = vsmask.f32 7938 }
   0xf   : > { %6176 = vmatprep.subr.bf16.mxu0 %v6738_v2  ;;  %6695 = vmatprep.subr.bf16.mxu1 %v6738_v2  ;;  %s6710_s30 = smul.u32 216, %s9635_s12  ;;  %v6743_v7 = vld [vmem:[%s9567_s1 + $0x20] sm:$0xff]   ;;  %v6745_v9 = vld [vmem:[%s9567_s1 + $0x18] sm:$0xff]   ;;  %v6747_v17 = vld [vmem:[%s9567_s1 + $0x10] sm:$0xff]   ;;  %vm4808_vm4 = vsmask.f32 256 }
  0x10   : > { %v6748_v23 = vld [vmem:[%s9567_s1 + $0x48] sm:$0xff]   ;;  %v6750_v34 = vld [vmem:[%s9567_s1 + $0x40] sm:$0xff]   ;;  %v6758_v49 = vld [vmem:[%s9567_s1 + $0xf8] sm:$0xff]   ;;  %vm4809_vm5 = vsmask.f32 4368 }
  0x11   : > { %s7117_s10 = scalar_lea.vmem %s9566_s0, %s6710_s30  ;;  %v6749_v30 = vld [vmem:[%s9567_s1 + $0x8] sm:$0xff]   ;;  %v6751_v41 = vld [vmem:[%s9567_s1] sm:$0xff]   ;;  %v6759_v52 = vld [vmem:[%s9567_s1 + $0xb8] sm:$0xff]   ;;  %s8954_s18 = scalar_lea.vmem %s9569_s3, %s6710_s30 }
  0x12   : > { %6177 = vmatpush3.bf16.msra.mxu0 %v6739_v3  ;;  %6703 = vmatpush3.bf16.msra.mxu1 %v6739_v3  ;;  %v7126_v11 = vld [vmem:[%s7117_s10] sm:$0xf]  ;;  %v227_v12 = vld [vmem:[%s7117_s10 + $0x4] sm:$0xf]  ;;  %v7134_v15 = vld [vmem:[%s7117_s10 + $0x90] sm:$0xf] }
  0x13   : > { %6178 = vmatprep.subr.bf16.mxu0 %v6740_v4  ;;  %6696 = vmatprep.subr.bf16.mxu1 %v6740_v4  ;;  %v5491_v13 = vcombine.low %v7126_v11, %v227_v12  ;;  %v7131_v14 = vld [vmem:[%s7117_s10 + $0x8] ss:$0 sps:$4 sm:$0x11]   ;;  %v7137_v16 = vld [vmem:[%s7117_s10 + $0x94] sm:$0xf]  ;;  %v6761_v53 = vld [vmem:[%s9567_s1 + $0x178] sm:$0xff]  }
  0x14   : > { %v274_v18 = vld [vmem:[%s7117_s10] sm:$0xe]  ;;  %v557_v21 = vshll.u32 %v7131_v14, 16  ;;  %v5515_v22 = vcombine.low %v7134_v15, %v7137_v16  ;;  %v7150_v24 = vld [vmem:[%s7117_s10 + $0x98] ss:$0 sps:$4 sm:$0x11]   ;;  %vm9250_vm7 = vmand %vm5640_vm1, %vm5133_vm3 }
  0x15   : > { %v550_v19 = vshrl.u32 %v5491_v13, 16  ;;  %v552_v20 = vshll.u32 %v5491_v13, 16  ;;  %v701_v29 = vshll.u32 %v7150_v24, 16  ;;  %v286_v32 = vld [vmem:[%s7117_s10 + $0x90] sm:$0xe]  ;;  %v5523_v35 = vcombine.low %v274_v18, %v227_v12  ;;  %v6763_v63 = vld [vmem:[%s9567_s1 + $0x138] sm:$0xff]   ;;  %vm9266_vm8 = vmor %vm4808_vm4, %vm4809_vm5 }
  0x16   : > { %6179 = vmatpush3.bf16.msra.mxu0 %v6741_v5  ;;  %6704 = vmatpush3.bf16.msra.mxu1 %v6741_v5  ;;  %v559_v26 = vrot.slane %v557_v21, 1  ;;  %v694_v27 = vshrl.u32 %v5515_v22, 16  ;;  %v696_v28 = vshll.u32 %v5515_v22, 16  ;;  %v7168_v43 = vld [vmem:[%s7117_s10 + $0xc] sm:$0xf]  ;;  %v5535_v47 = vcombine.low %v286_v32, %v7137_v16  ;;  %v6760_v60 = vld [vmem:[%s9567_s1 + $0xf0] sm:$0xff]   ;;  %vm9275_vm9 = vmand %vm5139_vm6, %vm4808_vm4 }
  0x17   : > { %6180 = vmatprep.subr.bf16.mxu0 %v6742_v6  ;;  %6697 = vmatprep.subr.bf16.mxu1 %v6742_v6  ;;  %v554_v25 = vrot.slane %v552_v20, 1  ;;  %v703_v36 = vrot.slane %v701_v29, 1  ;;  %v229_v44 = vld [vmem:[%s7117_s10 + $0x10] sm:$0xf]  ;;  %v7171_v45 = vrot.slane %v5523_v35, 1  ;;  %v6770_v20 = vld [vmem:[%s9567_s1 + $0xe8] sm:$0xff]  }
  0x18   : > { %v698_v33 = vrot.slane %v696_v28, 1  ;;  %v7179_v50 = vld [vmem:[%s7117_s10 + $0x9c] sm:$0xf]  ;;  %v5493_v54 = vcombine.low %v7168_v43, %v229_v44  ;;  %v7191_v55 = vld [vmem:[%s7117_s10 + $0x14] ss:$0 sps:$4 sm:$0x11]  }
  0x19   : > { %v555_v31 = vor.u32 %v554_v25, %v550_v19  ;;  %v253_v56 = vld [vmem:[%s7117_s10 + $0xa0] sm:$0xf]  ;;  %v275_v61 = vld [vmem:[%s7117_s10 + $0xc] sm:$0xe]  ;;  %v569_v2 = vshll.u32 %v7191_v55, 16  ;;  %v7206_v4 = vrot.slane %v5535_v47, 1 }
  0x1a   : > { %6181 = vmatpush3.bf16.msra.mxu0 %v6743_v7  ;;  %6705 = vmatpush3.bf16.msra.mxu1 %v6743_v7  ;;  %v699_v38 = vor.u32 %v698_v33, %v694_v27  ;;  %v5517_v62 = vcombine.low %v7179_v50, %v253_v56  ;;  %v562_v0 = vshrl.u32 %v5493_v54, 16  ;;  %v564_v1 = vshll.u32 %v5493_v54, 16  ;;  %v287_v3 = vld [vmem:[%s7117_s10 + $0x9c] sm:$0xe]  ;;  %v7217_v21 = vld [vmem:[%s7117_s10 + $0x18] sm:$0xf] }
  0x1b   : > { %6182 = vmatprep.subr.bf16.mxu0 %v6744_v8  ;;  %6698 = vmatprep.subr.bf16.mxu1 %v6744_v8  ;;  %v560_v37 = vsel %vm548_vm0, %v555_v31, %v559_v26  ;;  %v6768_v5 = vld [vmem:[%s7117_s10 + $0xa4] ss:$0 sps:$4 sm:$0x11]   ;;  %v5536_v19 = vcombine.low %v287_v3, %v253_v56  ;;  %v231_v22 = vld [vmem:[%s7117_s10 + $0x1c] sm:$0xf]  ;;  %v6781_v47 = vld [vmem:[%s9567_s1 + $0x170] sm:$0xff]  }
  0x1c   : > { %v5635_v39 = vcombine.low %v7126_v11, %v560_v37  ;;  %v5641_v40 = vsel %vm5640_vm1, %v227_v12, %v560_v37  ;;  %v704_v42 = vsel %vm548_vm0, %v699_v38, %v703_v36  ;;  %v706_v6 = vshrl.u32 %v5517_v62, 16  ;;  %v276_v25 = vld [vmem:[%s7117_s10 + $0x18] sm:$0xe]  ;;  %v7224_v27 = vld [vmem:[%s7117_s10 + $0xa8] sm:$0xf] }
  0x1d   : > { %v5767_v48 = vcombine.low %v7134_v15, %v704_v42  ;;  %v5773_v51 = vsel %vm5640_vm1, %v7137_v16, %v704_v42  ;;  %v6971_v57 = vcombine.low %v7126_v11, %v5641_v40  ;;  %v708_v7 = vshll.u32 %v5517_v62, 16  ;;  %v7232_v32 = vld [vmem:[%s7117_s10 + $0x20] ss:$0 sps:$4 sm:$0x11]   ;;  %v7235_v33 = vld [vmem:[%s7117_s10 + $0xac] sm:$0xf] }
  0x1e   : > { %6183 = vmatpush3.bf16.msra.mxu0 %v6745_v9  ;;  %6706 = vmatpush3.bf16.msra.mxu1 %v6745_v9  ;;  %v5813_v46 = vcombine.high %v5635_v39, %v5641_v40  ;;  %v6972_v58 = vcombine.low %v7134_v15, %v5773_v51  ;;  %v566_v8 = vrot.slane %v564_v1, 1  ;;  %v571_v9 = vrot.slane %v569_v2, 1  ;;  %v6771_v36 = vld [vmem:[%s9567_s1 + $0xa8] sm:$0xff]  }
  0x1f   : > { %6184 = vmatprep.subr.bf16.mxu0 %v6746_v10  ;;  %6699 = vmatprep.subr.bf16.mxu1 %v6746_v10  ;;  %v5921_v59 = vcombine.high %v5767_v48, %v5773_v51  ;;  %v6762_v10 = vld [vmem:[%s9567_s1 + $0xb0] sm:$0xff]   ;;  %v5524_v11 = vcombine.low %v275_v61, %v229_v44  ;;  %v710_v12 = vrot.slane %v708_v7, 1  ;;  %v713_v13 = vshll.u32 %v6768_v5, 16  ;;  %v288_v39 = vld [vmem:[%s7117_s10 + $0xa8] sm:$0xe]  ;;  %v6772_v51 = vld [vmem:[%s9567_s1 + $0xe0] sm:$0xff]  }
  0x20   : > { %3853 = vmatprep.mubr.bf16.mxu0 %v5813_v46  ;;  %v791_v15 = vrot.slane %v7131_v14, 1  ;;  %v567_v16 = vor.u32 %v566_v8, %v562_v0  ;;  %v5495_v26 = vcombine.low %v7217_v21, %v231_v22  ;;  %v6778_v46 = vld [vmem:[%s7117_s10 + $0xb0] ss:$0 sps:$4 sm:$0x11]   ;;  %v5525_v54 = vcombine.low %v276_v25, %v231_v22  ;;  %v6780_v5 = vld [vmem:[%s9567_s1 + $0xd8] sm:$0xff]   ;;  %v6794_v14 = vld [vmem:[%s9567_s1 + $0xc0] sm:$0xff]  }
  0x21   : > { %3949 = vmatprep.mubr.bf16.mxu1 %v5921_v59  ;;  %v715_v18 = vrot.slane %v713_v13, 1  ;;  %v7226_v28 = vrot.slane %v5524_v11, 1  ;;  %v6783_v0 = vld [vmem:[%s9567_s1 + $0x130] sm:$0xff]   ;;  %v6782_v8 = vld [vmem:[%s9567_s1 + $0x98] sm:$0xff]  }
  0x22   : > { %6185 = vmatpush3.bf16.msra.mxu0 %v6747_v17  ;;  %6707 = vmatpush3.bf16.msra.mxu1 %v6747_v17  ;;  %v711_v17 = vor.u32 %v710_v12, %v706_v6  ;;  %v574_v37 = vshrl.u32 %v5495_v26, 16  ;;  %v576_v38 = vshll.u32 %v5495_v26, 16  ;;  %v7265_v1 = vrot.slane %v5525_v54, 1  ;;  %v6784_v13 = vld [vmem:[%s9567_s1 + $0xd0] sm:$0xff]   ;;  %v6793_v54 = vld [vmem:[%s9567_s1 + $0x88] sm:$0xff]  }
  0x23   : > { %6186 = vmatprep.subr.bf16.mxu0 %v6748_v23  ;;  %6700 = vmatprep.subr.bf16.mxu1 %v6748_v23  ;;  %v572_v23 = vsel %vm548_vm0, %v567_v16, %v571_v9  ;;  %v7278_v9 = vld [vmem:[%s7117_s10 + $0x24] sm:$0xf] }
  0x24   : > { %v5646_v29 = vcombine.low %v7168_v43, %v572_v23  ;;  %v716_v31 = vsel %vm548_vm0, %v711_v17, %v715_v18  ;;  %v277_v16 = vld [vmem:[%s7117_s10 + $0x24] sm:$0xe]  ;;  %v7288_v18 = vld [vmem:[%s7117_s10 + $0xb4] sm:$0xf] }
  0x25   : > { %v5784_v35 = vsel %vm5640_vm1, %v253_v56, %v716_v31  ;;  %v725_v56 = vshll.u32 %v6778_v46, 16 }
  0x26   : > { %6187 = vmatpush3.bf16.msra.mxu0 %v6749_v30  ;;  %6708 = vmatpush3.bf16.msra.mxu1 %v6749_v30  ;;  %v5652_v30 = vsel %vm5640_vm1, %v229_v44, %v572_v23  ;;  %v581_v44 = vshll.u32 %v7232_v32, 16  ;;  %v257_v23 = vld [vmem:[%s7117_s10 + $0xb8] sm:$0xf] }
  0x27   : > { %6188 = vmatprep.subr.bf16.mxu0 %v6750_v34  ;;  %6701 = vmatprep.subr.bf16.mxu1 %v6750_v34  ;;  %v5778_v34 = vcombine.low %v7179_v50, %v716_v31  ;;  %v5822_v40 = vcombine.high %v5646_v29, %v5652_v30  ;;  %v6973_v42 = vcombine.low %v7168_v43, %v5652_v30  ;;  %v727_v61 = vrot.slane %v725_v56, 1  ;;  %v289_v31 = vld [vmem:[%s7117_s10 + $0xb4] sm:$0xe] }
  0x28   : > { %v583_v43 = vrot.slane %v581_v44, 1  ;;  %v6792_v44 = vld [vmem:[%s9567_s1 + $0xc8] sm:$0xff]   ;;  %v7323_v56 = vsel %vm789_vm2, %v7171_v45, %v791_v15  ;;  %v7337_v15 = vld [vmem:[%s7117_s10 + $0x30] sm:$0xf] }
  0x29   : > { %v5930_v48 = vcombine.high %v5778_v34, %v5784_v35  ;;  %v6785_v34 = vld [vmem:[%s9567_s1 + $0x90] sm:$0xff]   ;;  %v6797_v45 = vld [vmem:[%s9567_s1 + $0x128] sm:$0xff]  }
  0x2a   : > { %6189 = vmatpush3.bf16.msra.mxu0 %v6751_v41  ;;  %6709 = vmatpush3.bf16.msra.mxu1 %v6751_v41  ;;  %v7243_v41 = vrot.slane %v5536_v19, 1 }
  0x2b   : > { %6286 = vmatprep.subr.bf16.mxu1 %v6758_v49  ;;  %6398 = vmatprep.subr.bf16.mxu0 %v6761_v53  ;;  %v6974_v49 = vcombine.low %v7179_v50, %v5784_v35  ;;  %v5519_v53 = vcombine.low %v7224_v27, %v7235_v33  ;;  %v5537_v50 = vcombine.low %v288_v39, %v7235_v33 }
  0x2d   : > { %3854 = vmatmul.mubr.bf16.vlgmr.msra.gmra.mxu0 %v6971_v57  ;;  %3950 = vmatmul.mubr.bf16.vlgmr.msra.gmra.mxu1 %v6972_v58  ;;  %v718_v58 = vshrl.u32 %v5519_v53, 16  ;;  %v720_v59 = vshll.u32 %v5519_v53, 16  ;;  %v7272_v7 = vrot.slane %v5537_v50, 1 }
  0x2e   : > { %6287 = vmatpush3.bf16.msra.mxu1 %v6759_v52  ;;  %6399 = vmatpush3.bf16.msra.mxu0 %v6763_v63  ;;  %v578_v52 = vrot.slane %v576_v38, 1  ;;  %v797_v38 = vrot.slane %v7232_v32, 1 }
  0x2f   : > { %6288 = vmatprep.subr.bf16.mxu1 %v6760_v60  ;;  %3861 = vmatprep.mubr.bf16.mxu0 %v5822_v40  ;;  %v6773_v60 = vld [vmem:[%s9567_s1 + $0xa0] sm:$0xff]   ;;  %v722_v63 = vrot.slane %v720_v59, 1 }
  0x30   : > { %6400 = vmatprep.subr.bf16.mxu0 %v6781_v47  ;;  %3957 = vmatprep.mubr.bf16.mxu1 %v5930_v48  ;;  %v579_v57 = vor.u32 %v578_v52, %v574_v37  ;;  %v6790_v37 = vld [vmem:[%s7117_s10 + $0xbc] ss:$0 sps:$4 sm:$0x11]  }
  0x31   : > { %v723_v6 = vor.u32 %v722_v63, %v718_v58  ;;  %v827_v63 = vrot.slane %v7150_v24, 1 }
  0x32   : > { %6289 = vmatpush3.bf16.msra.mxu1 %v6762_v10  ;;  %v584_v62 = vsel %vm548_vm0, %v579_v57, %v583_v43  ;;  %6401 = vmatpush3.bf16.msra.mxu0 %v6783_v0  ;;  %v233_v10 = vld [vmem:[%s7117_s10 + $0x28] sm:$0xf] }
  0x33   : > { %6290 = vmatprep.subr.bf16.mxu1 %v6770_v20  ;;  %v5657_v2 = vcombine.low %v7217_v21, %v584_v62  ;;  %v5663_v3 = vsel %vm5640_vm1, %v231_v22, %v584_v62  ;;  %v5497_v17 = vcombine.low %v7278_v9, %v233_v10  ;;  %v728_v19 = vsel %vm548_vm0, %v723_v6, %v727_v61  ;;  %v7292_v20 = vld [vmem:[%s7117_s10 + $0x2c] ss:$0 sps:$4 sm:$0x11]   ;;  %v235_v61 = vld [vmem:[%s7117_s10 + $0x34] sm:$0xf] }
  0x34   : > { %v6975_v12 = vcombine.low %v7217_v21, %v5663_v3  ;;  %v5526_v22 = vcombine.low %v277_v16, %v233_v10  ;;  %v794_v21 = vrot.slane %v7191_v55, 1  ;;  %v5789_v25 = vcombine.low %v7224_v27, %v728_v19  ;;  %v7353_v16 = vld [vmem:[%s7117_s10 + $0x10] sm:$0xf] }
  0x35   : > { %3862 = vmatmul.mubr.bf16.gmra.mxu0 %v6973_v42  ;;  %3958 = vmatmul.mubr.bf16.gmra.mxu1 %v6974_v49  ;;  %v5831_v11 = vcombine.high %v5657_v2, %v5663_v3  ;;  %v5795_v26 = vsel %vm5640_vm1, %v7235_v33, %v728_v19  ;;  %v586_v29 = vshrl.u32 %v5497_v17, 16  ;;  %v588_v30 = vshll.u32 %v5497_v17, 16 }
  0x36   : > { %6291 = vmatpush3.bf16.msra.mxu1 %v6771_v36  ;;  %v593_v35 = vshll.u32 %v7292_v20, 16  ;;  %v5521_v36 = vcombine.low %v7288_v18, %v257_v23  ;;  %v5939_v39 = vcombine.high %v5789_v25, %v5795_v26  ;;  %v6976_v40 = vcombine.low %v7224_v27, %v5795_v26  ;;  %v6795_v27 = vld [vmem:[%s9567_s1 + $0x168] sm:$0xff]   ;;  %v6796_v26 = vld [vmem:[%s9567_s1 + $0x80] sm:$0xff]  }
  0x37   : > { %6292 = vmatprep.subr.bf16.mxu1 %v6772_v51  ;;  %3869 = vmatprep.mubr.bf16.mxu0 %v5831_v11  ;;  %v590_v33 = vrot.slane %v588_v30, 1  ;;  %v5538_v42 = vcombine.low %v289_v31, %v257_v23  ;;  %v737_v49 = vshll.u32 %v6790_v37, 16  ;;  %v7311_v52 = vrot.slane %v5526_v22, 1 }
  0x38   : > { %v595_v46 = vrot.slane %v593_v35, 1  ;;  %v730_v47 = vshrl.u32 %v5521_v36, 16  ;;  %v732_v48 = vshll.u32 %v5521_v36, 16  ;;  %3965 = vmatprep.mubr.bf16.mxu1 %v5939_v39  ;;  %6402 = vmatprep.subr.bf16.mxu0 %v6795_v27  ;;  %v1677_v62 = vunpack.c.h.b16 %v7323_v56  ;;  %v7377_v36 = vld [vmem:[%s7117_s10 + $0x3c] sm:$0xf] }
  0x39   : > { %v591_v51 = vor.u32 %v590_v33, %v586_v29  ;;  %v739_v43 = vrot.slane %v737_v49, 1  ;;  %v5499_v6 = vcombine.low %v7337_v15, %v235_v61  ;;  %6403 = vmatpush3.bf16.msra.mxu0 %v6797_v45  ;;  %v871_v19 = vunpack.c.l.b16 %v7353_v16  ;;  %v7381_v39 = vld [vmem:[%s7117_s10 + $0x40] sm:$0xf]  ;;  %v7399_v49 = vld [vmem:[%s7117_s10 + $0x1c] sm:$0xf] }
  0x3a   : > { %6293 = vmatpush3.bf16.msra.mxu1 %v6773_v60  ;;  %v734_v53 = vrot.slane %v732_v48, 1  ;;  %v7328_v60 = vrot.slane %v5538_v42, 1  ;;  %v7369_v30 = vsel %vm789_vm2, %v7226_v28, %v794_v21  ;;  %v800_v37 = vrot.slane %v7292_v20, 1  ;;  %v6808_v28 = vld [vmem:[%s9567_s1 + $0x160] sm:$0xff]   ;;  %v5365_v48 = vld [vmem:[%s7117_s10 + $0x18] sm:$0xf] }
  0x3b   : > { %6294 = vmatprep.subr.bf16.mxu1 %v6780_v5  ;;  %v596_v57 = vsel %vm548_vm0, %v591_v51, %v595_v46  ;;  %v278_v5 = vld [vmem:[%s7117_s10 + $0x30] sm:$0xe]  ;;  %v600_v17 = vshll.u32 %v5499_v6, 16  ;;  %v1868_v35 = vpack.c.b16 %v871_v19, %v1677_v62  ;;  %v7388_v21 = vsel %vm789_vm2, %v7206_v4, %v827_v63  ;;  %v7393_v46 = vld [vmem:[%s7117_s10 + $0x44] ss:$0 sps:$4 sm:$0x11]   ;;  %6404 = vmatprep.subr.bf16.mxu0 %v6808_v28 }
  0x3c   : > { %v5668_v58 = vcombine.low %v7278_v9, %v596_v57  ;;  %v5674_v59 = vsel %vm5640_vm1, %v233_v10, %v596_v57  ;;  %v735_v50 = vor.u32 %v734_v53, %v730_v47  ;;  %9574 = vst [vmem:[#allocation3_spill] sm:$0xff] %v7328_v60  ;;  %v5501_v47 = vcombine.low %v7377_v36, %v7381_v39  ;;  %v279_v63 = vld [vmem:[%s7117_s10 + $0x3c] sm:$0xe]  ;;  %v7740_v60 = vld [vmem:[%s7117_s10 + $0x14] ss:$0 sps:$4 sm:$0x11]  }
  0x3d   : > { %3870 = vmatmul.mubr.bf16.gmra.mxu0 %v6975_v12  ;;  %3966 = vmatmul.mubr.bf16.gmra.mxu1 %v6976_v40  ;;  %v6977_v3 = vcombine.low %v7278_v9, %v5674_v59  ;;  %v7350_v12 = vld [vmem:[%s7117_s10 + $0x38] ss:$0 sps:$4 sm:$0x11]   ;;  %v598_v9 = vshrl.u32 %v5499_v6, 16  ;;  %v602_v31 = vrot.slane %v600_v17, 1  ;;  %v1689_v4 = vunpack.c.h.b16 %v7369_v30 }
  0x3e   : > { %6295 = vmatpush3.bf16.msra.mxu1 %v6782_v8  ;;  %v5840_v0 = vcombine.high %v5668_v58, %v5674_v59  ;;  %v740_v2 = vsel %vm548_vm0, %v735_v50, %v739_v43  ;;  %v5363_v8 = vld [vmem:[%s7117_s10 + $0xc] sm:$0xf]  ;;  %v605_v29 = vshll.u32 %v7350_v12, 16  ;;  %v617_v27 = vshll.u32 %v7393_v46, 16  ;;  %v6809_v43 = vld [vmem:[%s9567_s1 + $0x120] sm:$0xff]  }
  0x3f   : > { %6296 = vmatprep.subr.bf16.mxu1 %v6784_v13  ;;  %v5800_v10 = vcombine.low %v7288_v18, %v740_v2  ;;  %v5806_v11 = vsel %vm5640_vm1, %v257_v23, %v740_v2  ;;  %v5527_v13 = vcombine.low %v278_v5, %v235_v61  ;;  %v5636_v24 = vcombine.low %v7323_v56, %v5363_v8  ;;  %v6803_v2 = vld [vmem:[%s9567_s1 + $0x1b8] sm:$0xff]  }
  0x40   : > { %3877 = vmatprep.mubr.bf16.mxu0 %v5840_v0  ;;  %v7358_v22 = vcombine.low %v5363_v8, %v7353_v16  ;;  %v6978_v25 = vcombine.low %v7288_v18, %v5806_v11  ;;  %v6802_v18 = vld [vmem:[%s9567_s1 + $0x1f8] sm:$0xff]   ;;  %v607_v55 = vrot.slane %v605_v29, 1  ;;  %v603_v40 = vor.u32 %v602_v31, %v598_v9  ;;  %6405 = vmatpush3.bf16.msra.mxu0 %v6809_v43  ;;  %v7437_v8 = vld [vmem:[%s7117_s10 + $0x50] ss:$0 sps:$4 sm:$0x11]  }
  0x41   : > { %v5948_v23 = vcombine.high %v5800_v10, %v5806_v11  ;;  %v873_v53 = vunpack.c.l.b16 %v7399_v49  ;;  %v610_v59 = vshrl.u32 %v5501_v47, 16  ;;  %v612_v50 = vshll.u32 %v5501_v47, 16  ;;  %v5367_v10 = vld [vmem:[%s7117_s10 + $0x24] sm:$0xf]  ;;  %v6814_v11 = vld [vmem:[%s9567_s1 + $0x1f0] sm:$0xff]   ;;  %v6817_v47 = vld [vmem:[%s9567_s1 + $0x118] sm:$0xff]  }
  0x42   : > { %6297 = vmatpush3.bf16.msra.mxu1 %v6785_v34  ;;  %v7371_v34 = vrot.slane %v5527_v13, 1  ;;  %v967_v33 = vshrl.u32 %v7358_v22, 16  ;;  %v969_v42 = vshll.u32 %v7358_v22, 16  ;;  %v608_v51 = vsel %vm548_vm0, %v603_v40, %v607_v55  ;;  %v6816_v55 = vld [vmem:[%s9567_s1 + $0x158] sm:$0xff]   ;;  %v6860_v22 = vld [vmem:[%s9567_s1 + $0x1d0] sm:$0xff]  }
  0x43   : > { %6298 = vmatprep.subr.bf16.mxu1 %v6792_v44  ;;  %3973 = vmatprep.mubr.bf16.mxu1 %v5948_v23  ;;  %v5815_v44 = vcombine.high %v5636_v24, %v1868_v35  ;;  %v5679_v57 = vcombine.low %v7337_v15, %v608_v51  ;;  %v5685_v58 = vsel %vm5640_vm1, %v235_v61, %v608_v51  ;;  %v619_v32 = vrot.slane %v617_v27, 1  ;;  %v7445_v24 = vld [vmem:[%s7117_s10 + $0x28] sm:$0xf]  ;;  %v7473_v27 = vld [vmem:[%s7117_s10 + $0x54] sm:$0xf] }
  0x44   : > { %v7419_v45 = vrot.slane %v969_v42, 1  ;;  %v6979_v62 = vcombine.low %v7323_v56, %v1868_v35  ;;  %v7424_v0 = vcombine.low %v5365_v48, %v7399_v49  ;;  %v6980_v61 = vcombine.low %v7337_v15, %v5685_v58  ;;  %6406 = vmatprep.subr.bf16.mxu0 %v6816_v55  ;;  %v7534_v55 = vld [vmem:[%s7117_s10 + $0x3c] sm:$0xf] }
  0x45   : > { %3878 = vmatmul.mubr.bf16.gmra.mxu0 %v6977_v3  ;;  %3974 = vmatmul.mubr.bf16.gmra.mxu1 %v6978_v25  ;;  %v614_v3 = vrot.slane %v612_v50, 1  ;;  %v5647_v5 = vcombine.low %v7369_v30, %v5365_v48  ;;  %v1878_v56 = vpack.c.b16 %v873_v53, %v1689_v4  ;;  %v5528_v13 = vcombine.low %v279_v63, %v7381_v39  ;;  %v6826_v50 = vld [vmem:[%s9567_s1 + $0x150] sm:$0xff]  }
  0x46   : > { %6299 = vmatpush3.bf16.msra.mxu1 %v6793_v54  ;;  %4014 = vmatprep.mubr.bf16.mxu1 %v5815_v44  ;;  %v7412_v54 = vsel %vm789_vm2, %v7265_v1, %v797_v38  ;;  %v7427_v1 = vld [vmem:[%s7117_s10 + $0x4c] sm:$0xf]  ;;  %v5849_v38 = vcombine.high %v5679_v57, %v5685_v58  ;;  %v981_v29 = vshll.u32 %v7424_v0, 16  ;;  %v629_v31 = vshll.u32 %v7437_v8, 16 }
  0x47   : > { %6300 = vmatprep.subr.bf16.mxu1 %v6794_v14  ;;  %v7417_v14 = vld [vmem:[%s7117_s10 + $0x48] sm:$0xf]  ;;  %v615_v15 = vor.u32 %v614_v3, %v610_v59  ;;  %v1701_v9 = vunpack.c.h.b16 %v7412_v54  ;;  %v5658_v17 = vcombine.low %v7412_v54, %v5367_v10  ;;  %v5824_v19 = vcombine.high %v5647_v5, %v1878_v56  ;;  %6407 = vmatpush3.bf16.msra.mxu0 %v6817_v47  ;;  %v7484_v59 = vld [vmem:[%s7117_s10 + $0x58] sm:$0xf] }
  0x48   : > { %v5503_v6 = vcombine.low %v7417_v14, %v7427_v1  ;;  %3885 = vmatprep.mubr.bf16.mxu0 %v5849_v38  ;;  %v875_v35 = vunpack.c.l.b16 %v7445_v24  ;;  %v7463_v44 = vcombine.low %v5367_v10, %v7445_v24  ;;  %v7468_v48 = vrot.slane %v5528_v13, 1  ;;  %v7502_v38 = vld [vmem:[%s7117_s10 + $0x34] sm:$0xf]  ;;  %6408 = vmatprep.subr.bf16.mxu0 %v6826_v50  ;;  %v280_v10 = vld [vmem:[%s7117_s10 + $0x48] sm:$0xe] }
  0x49   : > { %v631_v4 = vrot.slane %v629_v31, 1  ;;  %v6982_v57 = vcombine.low %v7369_v30, %v1878_v56  ;;  %v5505_v30 = vcombine.low %v7473_v27, %v7484_v59  ;;  %v7510_v56 = vld [vmem:[%s7117_s10 + $0x60] sm:$0xf]  ;;  %v877_v13 = vunpack.c.l.b16 %v7502_v38 }
  0x4a   : > { %6301 = vmatpush3.bf16.msra.mxu1 %v6796_v26  ;;  %v622_v23 = vshrl.u32 %v5503_v6, 16  ;;  %v624_v25 = vshll.u32 %v5503_v6, 16  ;;  %v620_v26 = vsel %vm548_vm0, %v615_v15, %v619_v32  ;;  %v7470_v51 = vpack.c.b16 %v875_v35, %v1701_v9  ;;  %v5369_v32 = vld [vmem:[%s7117_s10 + $0x30] sm:$0xf]  ;;  %v7513_v6 = vld [vmem:[%s7117_s10 + $0x64] sm:$0xf] }
  0x4b   : > { %6510 = vmatprep.subr.bf16.mxu1 %v6802_v18  ;;  %v6815_v18 = vld [vmem:[%s9567_s1 + $0x1b0] sm:$0xff]   ;;  %v5690_v28 = vcombine.low %v7377_v36, %v620_v26  ;;  %v5696_v40 = vsel %vm5640_vm1, %v7381_v39, %v620_v26  ;;  %v7479_v39 = vsel %vm789_vm2, %v7311_v52, %v800_v37  ;;  %v7490_v52 = vrot.slane %v981_v29, 1  ;;  %v6827_v9 = vld [vmem:[%s9567_s1 + $0x1e8] sm:$0xff]   ;;  %v282_v50 = vld [vmem:[%s7117_s10 + $0x60] sm:$0xe] }
  0x4c   : > { %v626_v42 = vrot.slane %v624_v25, 1  ;;  %v6981_v43 = vcombine.low %v7377_v36, %v5696_v40  ;;  %v5833_v37 = vcombine.high %v5658_v17, %v7470_v51  ;;  %v7496_v36 = vld [vmem:[%s7117_s10 + $0x5c] ss:$0 sps:$4 sm:$0x11]   ;;  %v993_v63 = vshll.u32 %v7463_v44, 16  ;;  %v6828_v26 = vld [vmem:[%s9567_s1 + $0x110] sm:$0xff]  }
  0x4d   : > { %3886 = vmatmul.mubr.bf16.gmra.mxu0 %v6980_v61  ;;  %4015 = vmatmul.mubr.bf16.vlgmr.msra.gmra.mxu1 %v6979_v62  ;;  %v5858_v53 = vcombine.high %v5690_v28, %v5696_v40  ;;  %v1713_v61 = vunpack.c.h.b16 %v7479_v39  ;;  %v636_v15 = vshll.u32 %v5505_v30, 16  ;;  %v7524_v25 = vld [vmem:[%s7117_s10 + $0x68] ss:$0 sps:$4 sm:$0x11]   ;;  %v5529_v28 = vcombine.low %v280_v10, %v7427_v1 }
  0x4e   : > { %6511 = vmatpush3.bf16.msra.mxu1 %v6803_v2  ;;  %4022 = vmatprep.mubr.bf16.mxu1 %v5824_v19  ;;  %v627_v58 = vor.u32 %v626_v42, %v622_v23  ;;  %v803_v2 = vrot.slane %v7350_v12, 1  ;;  %v641_v12 = vshll.u32 %v7496_v36, 16  ;;  %v281_v19 = vld [vmem:[%s7117_s10 + $0x54] sm:$0xe]  ;;  %v5669_v23 = vcombine.low %v7479_v39, %v5369_v32  ;;  %v7539_v42 = vld [vmem:[%s7117_s10 + $0x40] sm:$0xf] }
  0x4f   : > { %6512 = vmatprep.subr.bf16.mxu1 %v6814_v11  ;;  %3893 = vmatprep.mubr.bf16.mxu0 %v5858_v53  ;;  %v634_v11 = vshrl.u32 %v5505_v30, 16  ;;  %v638_v29 = vrot.slane %v636_v15, 1  ;;  %v7529_v35 = vpack.c.b16 %v877_v13, %v1713_v61  ;;  %v653_v40 = vshll.u32 %v7524_v25, 16  ;;  %v7572_v15 = vld [vmem:[%s7117_s10 + $0x70] sm:$0xf]  ;;  %v7725_v13 = vld [vmem:[%s9567_s1 + $0x238] sm:$0xff]  }
  0x50   : > { %v632_v62 = vsel %vm548_vm0, %v627_v58, %v631_v4  ;;  %v643_v31 = vrot.slane %v641_v12, 1  ;;  %v7543_v47 = vsel %vm789_vm2, %v7371_v34, %v803_v2  ;;  %6409 = vmatpush3.bf16.msra.mxu0 %v6828_v26  ;;  %v6829_v4 = vld [vmem:[%s9567_s1 + $0x1a8] sm:$0xff]   ;;  %v7577_v12 = vrot.slane %v5529_v28, 1 }
  0x51   : > { %v5701_v3 = vcombine.low %v7417_v14, %v632_v62  ;;  %v5707_v5 = vsel %vm5640_vm1, %v7427_v1, %v632_v62  ;;  %v639_v1 = vor.u32 %v638_v29, %v634_v11  ;;  %v6834_v58 = vld [vmem:[%s9567_s1 + $0x148] sm:$0xff]   ;;  %v5842_v34 = vcombine.high %v5669_v23, %v7529_v35  ;;  %v7591_v29 = vld [vmem:[%s7117_s10 + $0x74] ss:$0 sps:$4 sm:$0x11]  }
  0x52   : > { %6513 = vmatpush3.bf16.msra.mxu1 %v6815_v18  ;;  %v5507_v18 = vcombine.low %v7510_v56, %v7513_v6  ;;  %v6983_v53 = vcombine.low %v7417_v14, %v5707_v5  ;;  %v655_v62 = vrot.slane %v653_v40, 1  ;;  %v1725_v61 = vunpack.c.h.b16 %v7543_v47  ;;  %6410 = vmatprep.subr.bf16.mxu0 %v6834_v58  ;;  %v7569_v11 = vld [vmem:[%s7117_s10 + $0x6c] sm:$0xf]  ;;  %v5373_v58 = vld [vmem:[%s7117_s10 + $0x48] sm:$0xf] }
  0x53   : > { %v5867_v17 = vcombine.high %v5701_v3, %v5707_v5  ;;  %6514 = vmatprep.subr.bf16.mxu1 %v6827_v9  ;;  %v644_v14 = vsel %vm548_vm0, %v639_v1, %v643_v31  ;;  %v5680_v10 = vcombine.low %v7543_v47, %v7534_v55  ;;  %v5509_v9 = vcombine.low %v7569_v11, %v7572_v15  ;;  %v6840_v31 = vld [vmem:[%s9567_s1 + $0x1e0] sm:$0xff]  }
  0x54   : > { %v648_v30 = vshll.u32 %v5507_v18, 16  ;;  %v5712_v2 = vcombine.low %v7473_v27, %v644_v14  ;;  %v5718_v3 = vsel %vm5640_vm1, %v7484_v59, %v644_v14  ;;  %v5531_v40 = vcombine.low %v282_v50, %v7513_v6 }
  0x55   : > { %3894 = vmatmul.mubr.bf16.gmra.mxu0 %v6981_v43  ;;  %4023 = vmatmul.mubr.bf16.gmra.mxu1 %v6982_v57  ;;  %v6984_v43 = vcombine.low %v7412_v54, %v7470_v51  ;;  %v5530_v57 = vcombine.low %v281_v19, %v7484_v59  ;;  %v7559_v54 = vcombine.low %v5369_v32, %v7502_v38  ;;  %v879_v51 = vunpack.c.l.b16 %v7539_v42  ;;  %v6835_v32 = vld [vmem:[%s9567_s1 + $0x108] sm:$0xff]  }
  0x56   : > { %4030 = vmatprep.mubr.bf16.mxu1 %v5833_v37  ;;  %3901 = vmatprep.mubr.bf16.mxu0 %v5867_v17  ;;  %v646_v37 = vshrl.u32 %v5507_v18, 16  ;;  %v650_v5 = vrot.slane %v648_v30, 1  ;;  %v7586_v17 = vrot.slane %v993_v63, 1  ;;  %v5876_v23 = vcombine.high %v5712_v2, %v5718_v3  ;;  %v6846_v30 = vld [vmem:[%s9567_s1 + $0x140] sm:$0xff]   ;;  %v7626_v2 = vld [vmem:[%s7117_s10 + $0x7c] sm:$0xf] }
  0x57   : > { %6515 = vmatpush3.bf16.msra.mxu1 %v6829_v4  ;;  %v7580_v59 = vpack.c.b16 %v879_v51, %v1725_v61  ;;  %v7588_v19 = vrot.slane %v5530_v57, 1  ;;  %v1005_v28 = vshll.u32 %v7559_v54, 16  ;;  %v6985_v63 = vcombine.low %v7479_v39, %v7529_v35  ;;  %v7602_v4 = vld [vmem:[%s7117_s10 + $0x4c] sm:$0xf]  ;;  %6411 = vmatpush3.bf16.msra.mxu0 %v6835_v32  ;;  %v6841_v39 = vld [vmem:[%s9567_s1 + $0x1a0] sm:$0xff]  }
  0x58   : > { %v651_v26 = vor.u32 %v650_v5, %v646_v37  ;;  %v660_v1 = vshll.u32 %v5509_v9, 16  ;;  %v665_v57 = vshll.u32 %v7591_v29, 16  ;;  %6516 = vmatprep.subr.bf16.mxu1 %v6840_v31  ;;  %v6986_v35 = vcombine.low %v7473_v27, %v5718_v3  ;;  %v7623_v27 = vld [vmem:[%s7117_s10 + $0x78] sm:$0xf]  ;;  %6412 = vmatprep.subr.bf16.mxu0 %v6846_v30  ;;  %v7669_v30 = vld [vmem:[%s7117_s10 + $0x84] sm:$0xf] }
  0x59   : > { %v806_v37 = vrot.slane %v7393_v46, 1  ;;  %v881_v61 = vunpack.c.l.b16 %v7602_v4  ;;  %v7631_v46 = vcombine.low %v7534_v55, %v7539_v42  ;;  %v5511_v5 = vcombine.low %v7623_v27, %v7626_v2  ;;  %v6847_v55 = vld [vmem:[%s9567_s1 + $0x100] sm:$0xff]  }
  0x5a   : > { %v662_v14 = vrot.slane %v660_v1, 1  ;;  %v667_v51 = vrot.slane %v665_v57, 1  ;;  %v7641_v32 = vrot.slane %v5531_v40, 1  ;;  %v7717_v40 = vld [vmem:[%s7117_s10 + $0x60] sm:$0xf]  ;;  %v812_v20 = vrot.slane %v7496_v36, 1 }
  0x5b   : > { %6517 = vmatpush3.bf16.msra.mxu1 %v6841_v39  ;;  %v7635_v3 = vsel %vm789_vm2, %v7468_v48, %v806_v37  ;;  %v670_v31 = vshrl.u32 %v5511_v5, 16  ;;  %v1017_v39 = vshll.u32 %v7631_v46, 16  ;;  %6413 = vmatpush3.bf16.msra.mxu0 %v6847_v55  ;;  %v7684_v55 = vld [vmem:[%s7117_s10 + $0x8c] ss:$0 sps:$4 sm:$0x11]   ;;  %v815_v36 = vrot.slane %v7524_v25, 1 }
  0x5c   : > { %v5691_v48 = vcombine.low %v7635_v3, %v5373_v58  ;;  %v7720_v18 = vld [vmem:[%s7117_s10 + $0x64] sm:$0xf]  ;;  %6646 = vmatprep.subr.bf16.mxu0 %v7725_v13 }
  0x5d   : > { %3902 = vmatmul.mubr.bf16.gmra.mxu0 %v6983_v53  ;;  %4031 = vmatmul.mubr.bf16.gmra.mxu1 %v6984_v43  ;;  %v656_v53 = vsel %vm548_vm0, %v651_v26, %v655_v62  ;;  %v658_v43 = vshrl.u32 %v5509_v9, 16  ;;  %v5851_v62 = vcombine.high %v5680_v10, %v7580_v59  ;;  %v7639_v10 = vrot.slane %v1005_v28, 1  ;;  %v7645_v26 = vld [vmem:[%s7117_s10 + $0x80] ss:$0 sps:$4 sm:$0x11]  }
  0x5e   : > { %4038 = vmatprep.mubr.bf16.mxu1 %v5842_v34  ;;  %3909 = vmatprep.mubr.bf16.mxu0 %v5876_v23  ;;  %v5723_v34 = vcombine.low %v7510_v56, %v656_v53  ;;  %v7614_v50 = vsel %vm5640_vm1, %v7513_v6, %v656_v53  ;;  %v1737_v23 = vunpack.c.h.b16 %v7635_v3  ;;  %v672_v28 = vshll.u32 %v5511_v5, 16  ;;  %v7652_v53 = vld [vmem:[%s7117_s10 + $0x58] sm:$0xf] }
  0x5f   : > { %v663_v9 = vor.u32 %v662_v14, %v658_v43  ;;  %v677_v57 = vshll.u32 %v7645_v26, 16  ;;  %v7680_v5 = vcombine.low %v5373_v58, %v7602_v4 }
  0x60   : > { %v5885_v6 = vcombine.high %v5723_v34, %v7614_v50  ;;  %v7656_v1 = vpack.c.b16 %v881_v61, %v1737_v23  ;;  %v674_v37 = vrot.slane %v672_v28, 1  ;;  %v7675_v61 = vld [vmem:[%s7117_s10 + $0x88] sm:$0xf]  ;;  %v883_v23 = vunpack.c.l.b16 %v7652_v53 }
  0x61   : > { %v668_v43 = vsel %vm548_vm0, %v663_v9, %v667_v51  ;;  %v679_v14 = vrot.slane %v677_v57, 1  ;;  %v809_v51 = vrot.slane %v7437_v8, 1  ;;  %v5513_v58 = vcombine.low %v7669_v30, %v7675_v61  ;;  %v284_v57 = vld [vmem:[%s7117_s10 + $0x78] sm:$0xe] }
  0x62   : > { %v7666_v34 = vsel %vm5640_vm1, %v7572_v15, %v668_v43  ;;  %v675_v9 = vor.u32 %v674_v37, %v670_v31 }
  0x65   : > { %3910 = vmatmul.mubr.bf16.gmra.mxu0 %v6986_v35  ;;  %4039 = vmatmul.mubr.bf16.gmra.mxu1 %v6985_v63  ;;  %v7660_v63 = vld [vmem:[%s7117_s10 + $0x54] sm:$0xf]  ;;  %v5734_v35 = vcombine.low %v7569_v11, %v668_v43  ;;  %v689_v43 = vshll.u32 %v7684_v55, 16 }
  0x66   : > { %3917 = vmatprep.mubr.bf16.mxu0 %v5885_v6  ;;  %4046 = vmatprep.mubr.bf16.mxu1 %v5851_v62  ;;  %v6987_v62 = vcombine.low %v7543_v47, %v7580_v59  ;;  %v6988_v6 = vcombine.low %v7510_v56, %v7614_v50  ;;  %v6851_v47 = vld [vmem:[%s9567_s1 + $0x1d8] sm:$0xff]   ;;  %v5860_v59 = vcombine.high %v5691_v48, %v7656_v1  ;;  %v283_v48 = vld [vmem:[%s7117_s10 + $0x6c] sm:$0xe] }
  0x67   : > { %v5894_v8 = vcombine.high %v5734_v35, %v7666_v34  ;;  %v7693_v56 = vsel %vm789_vm2, %v7577_v12, %v809_v51  ;;  %v680_v50 = vsel %vm548_vm0, %v675_v9, %v679_v14  ;;  %6518 = vmatprep.subr.bf16.mxu1 %v6851_v47  ;;  %v6852_v12 = vld [vmem:[%s9567_s1 + $0x198] sm:$0xff]   ;;  %v7712_v14 = vrot.slane %v1017_v39, 1 }
  0x68   : > { %v1749_v31 = vunpack.c.h.b16 %v7693_v56  ;;  %v5702_v28 = vcombine.low %v7693_v56, %v7660_v63  ;;  %v5745_v35 = vcombine.low %v7623_v27, %v680_v50  ;;  %v7710_v37 = vsel %vm5640_vm1, %v7626_v2, %v680_v50  ;;  %6519 = vmatpush3.bf16.msra.mxu1 %v6852_v12 }
  0x69   : > { %v682_v9 = vshrl.u32 %v5513_v58, 16  ;;  %v684_v47 = vshll.u32 %v5513_v58, 16  ;;  %v1029_v39 = vshll.u32 %v7680_v5, 16  ;;  %v5532_v58 = vcombine.low %v283_v48, %v7572_v15  ;;  %6520 = vmatprep.subr.bf16.mxu1 %v6860_v22  ;;  %v7773_v48 = vld [vmem:[%s7117_s10 + $0x84] sm:$0xe] }
  0x6a   : > { %v7714_v51 = vpack.c.b16 %v883_v23, %v1749_v31  ;;  %v7734_v23 = vor.u32 %v7419_v45, %v967_v33  ;;  %v5533_v50 = vcombine.low %v284_v57, %v7626_v2  ;;  %v6989_v33 = vcombine.low %v7569_v11, %v7666_v34  ;;  %v6861_v2 = vld [vmem:[%s9567_s1 + $0x190] sm:$0xff]  }
  0x6b   : > { %v686_v31 = vrot.slane %v684_v47, 1  ;;  %v6990_v45 = vcombine.low %v7635_v3, %v7656_v1  ;;  %v885_v15 = vunpack.c.l.b16 %v7720_v18  ;;  %v7761_v11 = vsel %vm789_vm2, %v7588_v19, %v812_v20 }
  0x6c   : > { %v974_v34 = vshll.u32 %v7740_v60, 16  ;;  %v5903_v3 = vcombine.high %v5745_v35, %v7710_v37  ;;  %v5869_v25 = vcombine.high %v5702_v28, %v7714_v51  ;;  %v1761_v1 = vunpack.c.h.b16 %v7761_v11  ;;  %6521 = vmatpush3.bf16.msra.mxu1 %v6861_v2  ;;  %v6855_v2 = vld [vmem:[%s7117_s10 + $0x20] ss:$0 sps:$4 sm:$0x11]  }
  0x6d   : > { %3918 = vmatmul.mubr.bf16.gmra.mxu0 %v6988_v6  ;;  %4047 = vmatmul.mubr.bf16.gmra.mxu1 %v6987_v62  ;;  %v691_v6 = vrot.slane %v689_v43, 1  ;;  %v7729_v62 = vld [vmem:[%s7117_s10 + $0x70] sm:$0xf]  ;;  %v5713_v43 = vcombine.low %v7761_v11, %v7717_v40  ;;  %v817_v12 = vrot.slane %v5532_v58, 1  ;;  %v7778_v19 = vsel %vm789_vm2, %v7641_v32, %v815_v36  ;;  %v6869_v32 = vld [vmem:[%s9567_s1 + $0x1c8] sm:$0xff]  }
  0x6e   : > { %3925 = vmatprep.mubr.bf16.mxu0 %v5894_v8  ;;  %4054 = vmatprep.mubr.bf16.mxu1 %v5860_v59  ;;  %v7757_v8 = vcombine.low %v7660_v63, %v7652_v53  ;;  %v687_v59 = vor.u32 %v686_v31, %v682_v9  ;;  %v7770_v63 = vld [vmem:[%s7117_s10 + $0x6c] sm:$0xf]  ;;  %v887_v57 = vunpack.c.l.b16 %v7729_v62  ;;  %v7787_v47 = vpack.c.b16 %v885_v15, %v1761_v1 }
  0x6f   : > { %v7793_v58 = vrot.slane %v1029_v39, 1  ;;  %v1773_v31 = vunpack.c.h.b16 %v7778_v19  ;;  %v976_v36 = vrot.slane %v974_v34, 1  ;;  %v6870_v15 = vld [vmem:[%s9567_s1 + $0x188] sm:$0xff]   ;;  %v5534_v39 = vcombine.low %v7773_v48, %v7675_v61  ;;  %6522 = vmatprep.subr.bf16.mxu1 %v6869_v32 }
  0x70   : > { %v692_v20 = vsel %vm548_vm0, %v687_v59, %v691_v6  ;;  %v5411_v6 = vld [vmem:[%s7117_s10 + $0xc] sm:$0xe]  ;;  %v820_v59 = vrot.slane %v5533_v50, 1  ;;  %v1041_v1 = vshll.u32 %v7757_v8, 16  ;;  %v6991_v28 = vcombine.low %v7623_v27, %v7710_v37  ;;  %6523 = vmatpush3.bf16.msra.mxu1 %v6870_v15 }
  0x71   : > { %v5756_v35 = vcombine.low %v7669_v30, %v692_v20  ;;  %v7785_v9 = vsel %vm5640_vm1, %v7675_v61, %v692_v20  ;;  %v9575_v20 = vshrl.u32 %v7424_v0, 16  ;;  %v7814_v22 = vpack.c.b16 %v887_v57, %v1773_v31  ;;  %v7825_v0 = vld [vmem:[%s7117_s10 + $0x78] sm:$0xf] }
  0x72   : > { %v5571_v50 = vcombine.low %v5411_v6, %v7353_v16  ;;  %v6992_v61 = vcombine.low %v7693_v56, %v7714_v51  ;;  %v986_v27 = vshll.u32 %v6855_v2, 16  ;;  %v6878_v16 = vld [vmem:[%s9567_s1 + $0x1c0] sm:$0xff]   ;;  %v5878_v48 = vcombine.high %v5713_v43, %v7787_v47  ;;  %v7854_v43 = vld [vmem:[%s7117_s10 + $0x88] sm:$0xf] }
  0x73   : > { %v984_v34 = vor.u32 %v7490_v52, %v9575_v20  ;;  %v818_v52 = vrot.slane %v7591_v29, 1  ;;  %v6879_v29 = vld [vmem:[%s9567_s1 + $0x180] sm:$0xff]   ;;  %v5912_v51 = vcombine.high %v5756_v35, %v7785_v9  ;;  %6524 = vmatprep.subr.bf16.mxu1 %v6878_v16  ;;  %v1039_v35 = vshrl.u32 %v7757_v8, 16  ;;  %v6882_v8 = vld [vmem:[%s7117_s10 + $0x68] ss:$0 sps:$4 sm:$0x11]  }
  0x74   : > { %v1206_v56 = vrot.slane %v5571_v50, 1  ;;  %v988_v6 = vrot.slane %v986_v27, 1  ;;  %v7851_v15 = vrot.slane %v1041_v1, 1  ;;  %6525 = vmatpush3.bf16.msra.mxu1 %v6879_v29  ;;  %v1210_v20 = vrot.slane %v6855_v2, 1 }
  0x75   : > { %3926 = vmatmul.mubr.bf16.gmra.mxu0 %v6989_v33  ;;  %4055 = vmatmul.mubr.bf16.gmra.mxu1 %v6990_v45  ;;  %v7806_v33 = vld [vmem:[%s7117_s10 + $0x7c] sm:$0xf]  ;;  %v5412_v45 = vld [vmem:[%s7117_s10 + $0x18] sm:$0xe]  ;;  %v7843_v57 = vsel %vm789_vm2, %v817_v12, %v818_v52  ;;  %v821_v50 = vrot.slane %v7645_v26, 1  ;;  %v7864_v1 = vcombine.low %v7770_v63, %v7729_v62  ;;  %v891_v16 = vunpack.c.l.b16 %v7854_v43 }
  0x76   : > { %3933 = vmatprep.mubr.bf16.mxu0 %v5903_v3  ;;  %4062 = vmatprep.mubr.bf16.mxu1 %v5869_v25  ;;  %v1207_v3 = vrot.slane %v7740_v60, 1  ;;  %v7822_v25 = vcombine.low %v7717_v40, %v7720_v18  ;;  %v7833_v60 = vsel %vm548_vm0, %v7734_v23, %v976_v36  ;;  %v889_v37 = vunpack.c.l.b16 %v7806_v33  ;;  %v6858_v23 = vld [vmem:[%s7117_s10 + $0x2c] ss:$0 sps:$4 sm:$0x11]   ;;  %v7867_v52 = vld [vmem:[%s7117_s10 + $0x84] sm:$0xf] }
  0x77   : > { %v5572_v40 = vcombine.low %v5412_v45, %v7399_v49  ;;  %v1785_v31 = vunpack.c.h.b16 %v7843_v57  ;;  %v5735_v49 = vcombine.low %v7843_v57, %v7825_v0  ;;  %v7859_v45 = vsel %vm548_vm0, %v984_v34, %v988_v6 }
  0x78   : > { %v1208_v32 = vsel %vm789_vm2, %v1206_v56, %v1207_v3  ;;  %v823_v3 = vrot.slane %v5534_v39, 1  ;;  %v998_v27 = vshll.u32 %v6858_v23, 16  ;;  %v1053_v2 = vshll.u32 %v7822_v25, 16 }
  0x79   : > { %v1209_v36 = vrot.slane %v5572_v40, 1  ;;  %v7856_v12 = vpack.c.b16 %v889_v37, %v1785_v31  ;;  %v7878_v39 = vsel %vm789_vm2, %v820_v59, %v821_v50  ;;  %v6993_v56 = vcombine.low %v7669_v30, %v7785_v9 }
  0x7a   : > { %v6994_v37 = vcombine.low %v7761_v11, %v7787_v47  ;;  %v1797_v40 = vunpack.c.h.b16 %v7878_v39  ;;  %v5746_v29 = vcombine.low %v7878_v39, %v7867_v52  ;;  %v9577_v30 = vcombine.low %v7778_v19, %v7770_v63 }
  0x7b   : > { %v7875_v26 = vsel %vm789_vm2, %v1209_v36, %v1210_v20  ;;  %v1213_v9 = vrot.slane %v6858_v23, 1  ;;  %v824_v36 = vrot.slane %v7684_v55, 1  ;;  %v7905_v20 = vrot.slane %v1053_v2, 1  ;;  %v7920_v2 = vld [vmem:[%s7117_s10 + $0xa0] sm:$0xf] }
  0x7c   : > { %v5887_v11 = vcombine.high %v9577_v30, %v7814_v22  ;;  %v7898_v47 = vpack.c.b16 %v891_v16, %v1797_v40  ;;  %v1063_v50 = vshrl.u32 %v7864_v1, 16  ;;  %v9578_v55 = vshrl.u32 %v7559_v54, 16 }
  0x7d   : > { %3934 = vmatmul.mubr.bf16.gmra.mxu0 %v6991_v28  ;;  %4063 = vmatmul.mubr.bf16.gmra.mxu1 %v6992_v61  ;;  %v5413_v28 = vld [vmem:[%s7117_s10 + $0x24] sm:$0xe]  ;;  %v9576_v61 = vshrl.u32 %v7463_v44, 16  ;;  %v7886_v44 = vld [vmem:[%s7117_s10 + $0x94] sm:$0xf]  ;;  %v1821_v16 = vunpack.c.h.b16 %v7388_v21 }
  0x7e   : > { %3941 = vmatprep.mubr.bf16.mxu0 %v5912_v51  ;;  %4070 = vmatprep.mubr.bf16.mxu1 %v5878_v48  ;;  %v1000_v51 = vrot.slane %v998_v27, 1  ;;  %v5573_v59 = vcombine.low %v5413_v28, %v7445_v24  ;;  %v1065_v48 = vshll.u32 %v7864_v1, 16  ;;  %v1051_v24 = vshrl.u32 %v7822_v25, 16  ;;  %v7909_v28 = vld [vmem:[%s7117_s10 + $0x90] sm:$0xf] }
  0x7f   : > { %v996_v34 = vor.u32 %v7586_v17, %v9576_v61  ;;  %v6864_v17 = vld [vmem:[%s7117_s10 + $0x38] ss:$0 sps:$4 sm:$0x11]   ;;  %v893_v61 = vunpack.c.l.b16 %v7886_v44  ;;  %v1008_v27 = vor.u32 %v7639_v10, %v9578_v55  ;;  %v9579_v55 = vshrl.u32 %v7631_v46, 16 }
  0x80   : > { %v1212_v31 = vrot.slane %v5573_v59, 1  ;;  %v1010_v63 = vshll.u32 %v6864_v17, 16  ;;  %v7923_v40 = vrot.slane %v1065_v48, 1  ;;  %v7936_v59 = vld [vmem:[%s7117_s10 + $0x9c] sm:$0xf]  ;;  %v6995_v48 = vcombine.low %v7778_v19, %v7814_v22 }
  0x81   : > { %v7901_v6 = vsel %vm548_vm0, %v996_v34, %v1000_v51  ;;  %v5414_v34 = vld [vmem:[%s7117_s10 + $0x30] sm:$0xe]  ;;  %v1216_v30 = vrot.slane %v6864_v17, 1 }
  0x82   : > { %v7912_v23 = vsel %vm789_vm2, %v1212_v31, %v1213_v9  ;;  %v1012_v51 = vrot.slane %v1010_v63, 1  ;;  %v5896_v9 = vcombine.high %v5735_v49, %v7856_v12  ;;  %v7949_v31 = vcombine.low %v7867_v52, %v7854_v43  ;;  %v5415_v63 = vld [vmem:[%s7117_s10 + $0x3c] sm:$0xe] }
  0x84   : > { %v7958_v19 = vsel %vm548_vm0, %v1008_v27, %v1012_v51  ;;  %v5575_v51 = vcombine.low %v5415_v63, %v7539_v42  ;;  %v6996_v42 = vcombine.low %v7843_v57, %v7856_v12  ;;  %v6873_v63 = vld [vmem:[%s7117_s10 + $0x50] ss:$0 sps:$4 sm:$0x11]   ;;  %v7996_v57 = vld [vmem:[%s7117_s10 + $0xa8] sm:$0xf] }
  0x85   : > { %3942 = vmatmul.mubr.bf16.gmra.mxu0 %v6993_v56  ;;  %4071 = vmatmul.mubr.bf16.gmra.mxu1 %v6994_v37  ;;  %v7926_v56 = vsel %vm789_vm2, %v823_v3, %v824_v36  ;;  %v7930_v37 = vcombine.low %v7825_v0, %v7806_v33  ;;  %v895_v3 = vunpack.c.l.b16 %v7920_v2  ;;  %v5768_v0 = vcombine.low %v7388_v21, %v7936_v59  ;;  %v5416_v12 = vld [vmem:[%s7117_s10 + $0x48] sm:$0xe] }
  0x86   : > { %4078 = vmatprep.mubr.bf16.mxu1 %v5887_v11  ;;  %4175 = vmatprep.mubr.bf16.mxu0 %v1208_v32  ;;  %v1809_v54 = vunpack.c.h.b16 %v7926_v56  ;;  %v5757_v10 = vcombine.low %v7926_v56, %v7909_v28  ;;  %v5574_v32 = vcombine.low %v5414_v34, %v7502_v38  ;;  %v6867_v11 = vld [vmem:[%s7117_s10 + $0x44] ss:$0 sps:$4 sm:$0x11]   ;;  %v6862_v38 = vld [vmem:[%s9567_s1 + $0x230] sm:$0xff]  }
  0x87   : > { %v7962_v49 = vpack.c.b16 %v895_v3, %v1821_v16  ;;  %v1075_v17 = vshrl.u32 %v7930_v37, 16  ;;  %v1022_v27 = vshll.u32 %v6867_v11, 16  ;;  %v1089_v16 = vshll.u32 %v7949_v31, 16  ;;  %v7979_v3 = vld [vmem:[%s7117_s10 + $0xac] sm:$0xf] }
  0x88   : > { %v7951_v36 = vpack.c.b16 %v893_v61, %v1809_v54  ;;  %v1215_v22 = vrot.slane %v5574_v32, 1  ;;  %v1077_v61 = vshll.u32 %v7930_v37, 16  ;;  %v1020_v54 = vor.u32 %v7712_v14, %v9579_v55 }
  0x89   : > { %v1219_v32 = vrot.slane %v6867_v11, 1  ;;  %v1024_v46 = vrot.slane %v1022_v27, 1  ;;  %v1218_v14 = vrot.slane %v5575_v51, 1  ;;  %v5905_v11 = vcombine.high %v5746_v29, %v7898_v47  ;;  %v8014_v27 = vld [vmem:[%s7117_s10 + $0x5c] ss:$0 sps:$4 sm:$0x11]  }
  0x8a   : > { %v7967_v34 = vsel %vm789_vm2, %v1215_v22, %v1216_v30  ;;  %v6871_v30 = vld [vmem:[%s9567_s1 + $0x228] sm:$0xff]   ;;  %v897_v52 = vunpack.c.l.b16 %v7979_v3  ;;  %v9580_v29 = vshrl.u32 %v7680_v5, 16  ;;  %v1222_v5 = vrot.slane %v6873_v63, 1  ;;  %v6880_v51 = vld [vmem:[%s9567_s1 + $0x220] sm:$0xff]  }
  0x8b   : > { %v8003_v22 = vsel %vm789_vm2, %v1218_v14, %v1219_v32  ;;  %v1034_v32 = vshll.u32 %v6873_v63, 16  ;;  %v8023_v14 = vrot.slane %v1077_v61, 1  ;;  %v8033_v61 = vrot.slane %v1089_v16, 1 }
  0x8c   : > { %v1032_v55 = vor.u32 %v7793_v58, %v9580_v29  ;;  %v6997_v63 = vcombine.low %v7878_v39, %v7898_v47  ;;  %v1044_v47 = vor.u32 %v7851_v15, %v1039_v35  ;;  %v5923_v25 = vcombine.high %v5768_v0, %v7962_v49 }
  0x8d   : > { %4079 = vmatmul.mubr.bf16.gmra.mxu1 %v6995_v48  ;;  %4176 = vmatmul.mubr.bf16.vlgmr.msra.gmra.mxu0 %v7833_v60  ;;  %v6968_v60 = vld [vmem:[%s7117_s10 + $0xa4] ss:$0 sps:$4 sm:$0x11]   ;;  %v1036_v58 = vrot.slane %v1034_v32, 1  ;;  %v5417_v32 = vld [vmem:[%s7117_s10 + $0x54] sm:$0xe]  ;;  %v6999_v1 = vcombine.low %v7388_v21, %v7962_v49 }
  0x8e   : > { %6647 = vmatpush3.bf16.msra.mxu0 %v7725_v13  ;;  %4086 = vmatprep.mubr.bf16.mxu1 %v5896_v9  ;;  %v830_v48 = vrot.slane %v6968_v60, 1  ;;  %v7993_v13 = vcombine.low %v7909_v28, %v7886_v44  ;;  %v8000_v9 = vsel %vm548_vm0, %v1020_v54, %v1024_v46  ;;  %v5576_v46 = vcombine.low %v5416_v12, %v7602_v4  ;;  %v8038_v12 = vld [vmem:[%s7117_s10 + $0xb4] sm:$0xf] }
  0x8f   : > { %4183 = vmatprep.mubr.bf16.mxu0 %v7875_v26  ;;  %6648 = vmatprep.subr.bf16.mxu0 %v6862_v38  ;;  %v1087_v4 = vshrl.u32 %v7949_v31, 16  ;;  %v5577_v15 = vcombine.low %v5417_v32, %v7652_v53 }
  0x90   : > { %v8007_v26 = vsel %vm789_vm2, %v7243_v41, %v830_v48  ;;  %v8021_v41 = vld [vmem:[%s7117_s10 + $0xb8] sm:$0xf]  ;;  %v1221_v48 = vrot.slane %v5576_v46, 1 }
  0x91   : > { %v1833_v54 = vunpack.c.h.b16 %v8007_v26  ;;  %v899_v16 = vunpack.c.l.b16 %v8021_v41  ;;  %v1224_v53 = vrot.slane %v5577_v15, 1  ;;  %v5419_v15 = vld [vmem:[%s7117_s10 + $0x6c] sm:$0xe] }
  0x92   : > { %6649 = vmatpush3.bf16.msra.mxu0 %v6862_v38  ;;  %v6969_v38 = vld [vmem:[%s7117_s10 + $0xb0] ss:$0 sps:$4 sm:$0x11]  }
  0x93   : > { %6650 = vmatprep.subr.bf16.mxu0 %v6871_v30  ;;  %v8025_v60 = vpack.c.b16 %v897_v52, %v1833_v54  ;;  %v833_v29 = vrot.slane %v6969_v38, 1  ;;  %v1046_v52 = vshll.u32 %v8014_v27, 16  ;;  %v8047_v54 = vsel %vm789_vm2, %v1221_v48, %v1222_v5  ;;  %v6970_v38 = vld [vmem:[%s7117_s10 + $0xbc] ss:$0 sps:$4 sm:$0x11]  }
  0x94   : > { %v1225_v5 = vrot.slane %v8014_v27, 1  ;;  %v8091_v27 = vld [vmem:[%s7117_s10 + $0xc0] sm:$0xf] }
  0x95   : > { %4087 = vmatmul.mubr.bf16.gmra.mxu1 %v6996_v42  ;;  %4184 = vmatmul.mubr.bf16.gmra.mxu0 %v7859_v45  ;;  %v1101_v42 = vshll.u32 %v7993_v13, 16  ;;  %v8044_v45 = vsel %vm548_vm0, %v1032_v55, %v1036_v58  ;;  %v8053_v39 = vsel %vm789_vm2, %v7272_v7, %v833_v29  ;;  %v1048_v35 = vrot.slane %v1046_v52, 1  ;;  %v6900_v55 = vld [vmem:[%s9567_s1 + $0x210] sm:$0xff]  }
  0x96   : > { %4094 = vmatprep.mubr.bf16.mxu1 %v5905_v11  ;;  %4191 = vmatprep.mubr.bf16.mxu0 %v7912_v23  ;;  %v8059_v23 = vld [vmem:[%s7117_s10 + $0xc4] sm:$0xf]  ;;  %v6889_v11 = vld [vmem:[%s9567_s1 + $0x218] sm:$0xff]   ;;  %v1845_v46 = vunpack.c.h.b16 %v8053_v39  ;;  %v5914_v58 = vcombine.high %v5757_v10, %v7951_v36  ;;  %v836_v29 = vrot.slane %v6970_v38, 1  ;;  %v5418_v10 = vld [vmem:[%s7117_s10 + $0x60] sm:$0xe]  ;;  %v9583_v31 = vcombine.low %v8053_v39, %v8038_v12 }
  0x97   : > { %6651 = vmatpush3.bf16.msra.mxu0 %v6871_v30  ;;  %v8067_v30 = vcombine.low %v7936_v59, %v7920_v2  ;;  %v8085_v7 = vrot.slane %v1101_v42, 1  ;;  %v8088_v52 = vsel %vm548_vm0, %v1044_v47, %v1048_v35  ;;  %v901_v28 = vunpack.c.l.b16 %v8059_v23  ;;  %v6884_v38 = vld [vmem:[%s7117_s10 + $0x74] ss:$0 sps:$4 sm:$0x11]   ;;  %v6911_v59 = vld [vmem:[%s9567_s1 + $0x208] sm:$0xff]  }
  0x98   : > { %6652 = vmatprep.subr.bf16.mxu0 %v6880_v51  ;;  %v8079_v48 = vpack.c.b16 %v899_v16, %v1845_v46  ;;  %v6998_v16 = vcombine.low %v7926_v56, %v7951_v36  ;;  %v9581_v46 = vld [vmem:[#allocation3_spill] sm:$0xff]  ;;  %v1058_v47 = vshll.u32 %v6882_v8, 16  ;;  %v8105_v35 = vsel %vm789_vm2, %v1224_v53, %v1225_v5 }
  0x99   : > { %v1113_v32 = vshll.u32 %v8067_v30, 16  ;;  %v8100_v42 = vsel %vm789_vm2, %v9581_v46, %v836_v29  ;;  %v1056_v36 = vor.u32 %v7905_v20, %v1051_v24  ;;  %v8117_v29 = vld [vmem:[%s7117_s10 + $0x18] sm:$0xf]  ;;  %v8120_v46 = vld [vmem:[%s7117_s10 + $0x20] ss:$0 sps:$4 sm:$0x11]   ;;  %v5578_v24 = vcombine.low %v5418_v10, %v7720_v18 }
  0x9a   : > { %v1857_v56 = vunpack.c.h.b16 %v8100_v42  ;;  %v1228_v20 = vrot.slane %v6882_v8, 1  ;;  %v8136_v53 = vcombine.low %v7996_v57, %v7979_v3  ;;  %v1070_v8 = vshll.u32 %v6884_v38, 16 }
  0x9b   : > { %6653 = vmatpush3.bf16.msra.mxu0 %v6880_v51  ;;  %v1227_v0 = vrot.slane %v5578_v24, 1  ;;  %v1231_v10 = vrot.slane %v6884_v38, 1  ;;  %v8163_v38 = vld [vmem:[%s7117_s10 + $0x24] sm:$0xf]  ;;  %v8167_v51 = vld [vmem:[%s7117_s10 + $0x28] sm:$0xf] }
  0x9c   : > { %6654 = vmatprep.subr.bf16.mxu0 %v6889_v11  ;;  %v8126_v5 = vpack.c.b16 %v901_v28, %v1857_v56  ;;  %v5579_v28 = vcombine.low %v5419_v15, %v7729_v62  ;;  %v6890_v56 = vld [vmem:[%s7117_s10 + $0x80] ss:$0 sps:$4 sm:$0x11]   ;;  %v1072_v62 = vrot.slane %v1070_v8, 1  ;;  %v5420_v15 = vld [vmem:[%s7117_s10 + $0x78] sm:$0xe]  ;;  %v5589_v37 = vcombine.low %v8163_v38, %v8167_v51 }
  0x9d   : > { %4095 = vmatmul.mubr.bf16.gmra.mxu1 %v6997_v63  ;;  %4192 = vmatmul.mubr.bf16.gmra.mxu0 %v7901_v6  ;;  %v5801_v6 = vcombine.low %v8100_v42, %v8091_v27  ;;  %v1060_v63 = vrot.slane %v1058_v47, 1  ;;  %v1390_v47 = vshll.u32 %v8120_v46, 16 }
  0x9e   : > { %4102 = vmatprep.mubr.bf16.mxu1 %v5914_v58  ;;  %4199 = vmatprep.mubr.bf16.mxu0 %v7967_v34  ;;  %v8130_v34 = vld [vmem:[%s7117_s10 + $0x1c] sm:$0xf]  ;;  %v8132_v58 = vrot.slane %v1113_v32, 1  ;;  %v1230_v24 = vrot.slane %v5579_v28, 1 }
  0x9f   : > { %6655 = vmatpush3.bf16.msra.mxu0 %v6889_v11  ;;  %v8142_v18 = vsel %vm548_vm0, %v1056_v36, %v1060_v63  ;;  %v1068_v11 = vor.u32 %v7923_v40, %v1063_v50  ;;  %v5587_v32 = vcombine.low %v8117_v29, %v8130_v34  ;;  %v6922_v36 = vld [vmem:[%s9567_s1 + $0x200] sm:$0xff]   ;;  %v1123_v50 = vshrl.u32 %v8136_v53, 16 }
  0xa0   : > { %6656 = vmatprep.subr.bf16.mxu0 %v6900_v55  ;;  %v8159_v40 = vsel %vm789_vm2, %v1227_v0, %v1228_v20  ;;  %v1125_v63 = vshll.u32 %v8136_v53, 16  ;;  %v6893_v0 = vld [vmem:[%s7117_s10 + $0x2c] ss:$0 sps:$4 sm:$0x11]   ;;  %v1392_v8 = vrot.slane %v1390_v47, 1 }
  0xa1   : > { %v8171_v21 = vsel %vm548_vm0, %v1068_v11, %v1072_v62  ;;  %v1383_v49 = vshrl.u32 %v5587_v32, 16  ;;  %v1385_v20 = vshll.u32 %v5587_v32, 16  ;;  %v5580_v11 = vcombine.low %v5420_v15, %v7806_v33  ;;  %v6895_v62 = vld [vmem:[%s7117_s10 + $0x8c] ss:$0 sps:$4 sm:$0x11]  }
  0xa2   : > { %v8184_v32 = vcombine.low %v8038_v12, %v8021_v41  ;;  %v1402_v47 = vshll.u32 %v6893_v0, 16 }
  0xa3   : > { %6657 = vmatpush3.bf16.msra.mxu0 %v6900_v55  ;;  %v8176_v55 = vsel %vm789_vm2, %v1230_v24, %v1231_v10  ;;  %v1387_v28 = vrot.slane %v1385_v20, 1  ;;  %v5476_v10 = vld [vmem:[%s7117_s10 + $0x24] sm:$0xe]  ;;  %v1397_v24 = vshll.u32 %v5589_v37, 16 }
  0xa4   : > { %6658 = vmatprep.subr.bf16.mxu0 %v6911_v59 }
  0xa5   : > { %4103 = vmatmul.mubr.bf16.gmra.mxu1 %v6998_v16  ;;  %4200 = vmatmul.mubr.bf16.gmra.mxu0 %v7958_v19  ;;  %v1080_v16 = vor.u32 %v8023_v14, %v1075_v17  ;;  %v1082_v19 = vshll.u32 %v6890_v56, 16  ;;  %v9582_v17 = vcombine.low %v8007_v26, %v7996_v57  ;;  %v1388_v33 = vor.u32 %v1387_v28, %v1383_v49  ;;  %v5421_v49 = vld [vmem:[%s7117_s10 + $0x84] sm:$0xe]  ;;  %v8206_v28 = vld [vmem:[%s7117_s10 + $0x30] sm:$0xf] }
  0xa6   : > { %4110 = vmatprep.mubr.bf16.mxu1 %v5923_v25  ;;  %4207 = vmatprep.mubr.bf16.mxu0 %v8003_v22  ;;  %v1234_v22 = vrot.slane %v6890_v56, 1  ;;  %v1395_v56 = vshrl.u32 %v5589_v37, 16  ;;  %v5620_v57 = vcombine.low %v5476_v10, %v8167_v51  ;;  %v1094_v10 = vshll.u32 %v6895_v62, 16 }
  0xa7   : > { %6659 = vmatpush3.bf16.msra.mxu0 %v6911_v59  ;;  %v1084_v25 = vrot.slane %v1082_v19, 1  ;;  %v5932_v14 = vcombine.high %v9582_v17, %v8025_v60  ;;  %v1233_v59 = vrot.slane %v5580_v11, 1  ;;  %v8198_v20 = vsel %vm548_vm0, %v1388_v33, %v1392_v8  ;;  %v8216_v8 = vld [vmem:[%s7117_s10 + $0x38] ss:$0 sps:$4 sm:$0x11]  }
  0xa8   : > { %6660 = vmatprep.subr.bf16.mxu0 %v6922_v36  ;;  %v1626_v17 = vrot.slane %v6893_v0, 1  ;;  %v8213_v11 = vsel %vm5640_vm1, %v8130_v34, %v8198_v20  ;;  %v1625_v0 = vrot.slane %v5620_v57, 1  ;;  %v7000_v37 = vcombine.low %v8007_v26, %v8025_v60  ;;  %v5422_v26 = vld [vmem:[%s7117_s10 + $0x90] sm:$0xe] }
  0xa9   : > { %v8195_v15 = vsel %vm548_vm0, %v1080_v16, %v1084_v25  ;;  %v8201_v19 = vsel %vm789_vm2, %v1233_v59, %v1234_v22  ;;  %v1399_v25 = vrot.slane %v1397_v24, 1  ;;  %v1404_v22 = vrot.slane %v1402_v47, 1  ;;  %v6901_v60 = vld [vmem:[%s7117_s10 + $0x98] ss:$0 sps:$4 sm:$0x11]  }
  0xaa   : > { %v1137_v33 = vshll.u32 %v8184_v32, 16  ;;  %v1627_v59 = vsel %vm789_vm2, %v1625_v0, %v1626_v17  ;;  %v1096_v47 = vrot.slane %v1094_v10, 1  ;;  %v1237_v24 = vrot.slane %v6895_v62, 1 }
  0xab   : > { %6661 = vmatpush3.bf16.msra.mxu0 %v6922_v36  ;;  %v8220_v36 = vld [vmem:[%s7117_s10 + $0x34] sm:$0xf]  ;;  %v5650_v57 = vcombine.low %v1627_v59, %v1627_v59  ;;  %v5656_v16 = vcombine.high %v1627_v59, %v1627_v59  ;;  %v1414_v62 = vshll.u32 %v8216_v8, 16  ;;  %v9584_v59 = vshrl.u32 %v7993_v13, 16 }
  0xad   : > { %4111 = vmatmul.mubr.bf16.gmra.mxu1 %v6999_v1  ;;  %4208 = vmatmul.mubr.bf16.gmra.mxu0 %v8000_v9  ;;  %v1092_v9 = vor.u32 %v8033_v61, %v1087_v4  ;;  %v1400_v1 = vor.u32 %v1399_v25, %v1395_v56  ;;  %v5941_v4 = vcombine.high %v9583_v31, %v8079_v48  ;;  %v6906_v31 = vld [vmem:[%s7117_s10 + $0xa4] ss:$0 sps:$4 sm:$0x11]  }
  0xae   : > { %4118 = vmatprep.mubr.bf16.mxu1 %v5932_v14  ;;  %4215 = vmatprep.mubr.bf16.mxu0 %v8047_v54  ;;  %v5581_v14 = vcombine.low %v5421_v49, %v7854_v43  ;;  %v5591_v54 = vcombine.low %v8206_v28, %v8220_v36  ;;  %2196 = vst [vmem:[#allocation2 + $0x68] sm:$0xf] %v5650_v57  ;;  %2201 = vst [vmem:[#allocation2 + $0x8c] sm:$0xf] %v5656_v16 }
  0xaf   : > { %v8240_v61 = vsel %vm548_vm0, %v1400_v1, %v1404_v22  ;;  %v8251_v17 = vsel %vm548_vm0, %v1092_v9, %v1096_v47  ;;  %v8254_v49 = vld [vmem:[%s7117_s10 + $0x44] ss:$0 sps:$4 sm:$0x11]   ;;  %v7001_v25 = vcombine.low %v8053_v39, %v8079_v48  ;;  %v8260_v22 = vcombine.low %v8091_v27, %v8059_v23  ;;  %v8263_v1 = vld [vmem:[%s7117_s10 + $0x3c] sm:$0xf] }
  0xb0   : > { %v8248_v56 = vsel %vm5640_vm1, %v8167_v51, %v8240_v61  ;;  %v1236_v12 = vrot.slane %v5581_v14, 1  ;;  %v1407_v0 = vshrl.u32 %v5591_v54, 16  ;;  %v1409_v10 = vshll.u32 %v5591_v54, 16  ;;  %v8266_v51 = vld [vmem:[%s7117_s10 + $0x40] sm:$0xf] }
  0xb1   : > { %v1416_v9 = vrot.slane %v1414_v62, 1  ;;  %v1104_v47 = vor.u32 %v8085_v7, %v9584_v59  ;;  %v1106_v39 = vshll.u32 %v6901_v60, 16  ;;  %v5582_v57 = vcombine.low %v5422_v26, %v7886_v44  ;;  %v8300_v59 = vld [vmem:[%s7117_s10 + $0x50] ss:$0 sps:$4 sm:$0x11]  }
  0xb2   : > { %v8269_v16 = vsel %vm789_vm2, %v1236_v12, %v1237_v24  ;;  %v1411_v48 = vrot.slane %v1409_v10, 1  ;;  %v1240_v24 = vrot.slane %v6901_v60, 1  ;;  %v5593_v13 = vcombine.low %v8263_v1, %v8266_v51  ;;  %v5423_v60 = vld [vmem:[%s7117_s10 + $0x9c] sm:$0xe]  ;;  %v8297_v10 = vld [vmem:[%s7117_s10 + $0x48] sm:$0xf] }
  0xb3   : > { %v1108_v14 = vrot.slane %v1106_v39, 1  ;;  %v1426_v7 = vshll.u32 %v8254_v49, 16  ;;  %v1239_v54 = vrot.slane %v5582_v57, 1  ;;  %v5950_v44 = vcombine.high %v5801_v6, %v8126_v5 }
  0xb4   : > { %v1421_v26 = vshll.u32 %v5593_v13, 16  ;;  %v1419_v12 = vshrl.u32 %v5593_v13, 16  ;;  %v9585_v39 = vshrl.u32 %v8067_v30, 16  ;;  %v1118_v57 = vshll.u32 %v6906_v31, 16 }
  0xb5   : > { %4119 = vmatmul.mubr.bf16.gmra.mxu1 %v7000_v37  ;;  %4216 = vmatmul.mubr.bf16.gmra.mxu0 %v8044_v45  ;;  %v1149_v37 = vshll.u32 %v8260_v22, 16  ;;  %v1412_v45 = vor.u32 %v1411_v48, %v1407_v0  ;;  %v8294_v62 = vsel %vm789_vm2, %v1239_v54, %v1240_v24  ;;  %v1428_v0 = vrot.slane %v1426_v7, 1  ;;  %v6912_v24 = vld [vmem:[%s7117_s10 + $0xb0] ss:$0 sps:$4 sm:$0x11]  }
  0xb6   : > { %4126 = vmatprep.mubr.bf16.mxu1 %v5941_v4  ;;  %4223 = vmatprep.mubr.bf16.mxu0 %v8105_v35  ;;  %v8287_v35 = vsel %vm548_vm0, %v1104_v47, %v1108_v14  ;;  %v8310_v47 = vld [vmem:[%s7117_s10 + $0x4c] sm:$0xf]  ;;  %v1116_v48 = vor.u32 %v8132_v58, %v9585_v39  ;;  %v5583_v14 = vcombine.low %v5423_v60, %v7920_v2  ;;  %v1127_v13 = vrot.slane %v1125_v63, 1 }
  0xb7   : > { %v8291_v4 = vsel %vm548_vm0, %v1412_v45, %v1416_v9  ;;  %v1423_v9 = vrot.slane %v1421_v26, 1  ;;  %v1135_v7 = vshrl.u32 %v8184_v32, 16  ;;  %v1139_v45 = vrot.slane %v1137_v33, 1  ;;  %v5475_v32 = vld [vmem:[%s7117_s10 + $0x18] sm:$0xe] }
  0xb8   : > { %v8307_v6 = vsel %vm5640_vm1, %v8220_v36, %v8291_v4  ;;  %v1120_v58 = vrot.slane %v1118_v57, 1  ;;  %v1242_v2 = vrot.slane %v5583_v14, 1  ;;  %v1243_v26 = vrot.slane %v6906_v31, 1  ;;  %v6917_v14 = vld [vmem:[%s7117_s10 + $0xbc] ss:$0 sps:$4 sm:$0x11]  }
  0xb9   : > { %v1424_v30 = vor.u32 %v1423_v9, %v1419_v12  ;;  %v8324_v60 = vrot.slane %v1149_v37, 1  ;;  %v7002_v63 = vcombine.low %v8100_v42, %v8126_v5  ;;  %v1438_v33 = vshll.u32 %v8300_v59, 16  ;;  %v8344_v12 = vld [vmem:[%s7117_s10 + $0x54] sm:$0xf] }
  0xba   : > { %v8338_v37 = vsel %vm548_vm0, %v1116_v48, %v1120_v58  ;;  %v8357_v9 = vld [vmem:[%s7117_s10 + $0x5c] ss:$0 sps:$4 sm:$0x11]   ;;  %v1128_v57 = vor.u32 %v1127_v13, %v1123_v50  ;;  %v9586_v58 = vcombine.low %v8117_v29, %v8198_v20  ;;  %v1246_v43 = vrot.slane %v6912_v24, 1  ;;  %v5425_v50 = vld [vmem:[%s7117_s10 + $0xb4] sm:$0xe] }
  0xbb   : > { %v8335_v31 = vsel %vm548_vm0, %v1424_v30, %v1428_v0  ;;  %v8354_v0 = vld [vmem:[%s7117_s10 + $0x58] sm:$0xf]  ;;  %v5619_v30 = vcombine.low %v5475_v32, %v8130_v34  ;;  %v1450_v53 = vshll.u32 %v8357_v9, 16  ;;  %v1140_v13 = vor.u32 %v1139_v45, %v1135_v7 }
  0xbc   : > { %v8351_v5 = vsel %vm5640_vm1, %v8266_v51, %v8335_v31 }
  0xbd   : > { %4127 = vmatmul.mubr.bf16.gmra.mxu1 %v7001_v25  ;;  %4224 = vmatmul.mubr.bf16.gmra.mxu0 %v8088_v52  ;;  %v5595_v52 = vcombine.low %v8297_v10, %v8310_v47  ;;  %v5424_v25 = vld [vmem:[%s7117_s10 + $0xa8] sm:$0xe] }
  0xbe   : > { %4134 = vmatprep.mubr.bf16.mxu1 %v5950_v44  ;;  %4231 = vmatprep.mubr.bf16.mxu0 %v8159_v40  ;;  %v8341_v44 = vsel %vm789_vm2, %v1242_v2, %v1243_v26  ;;  %v1130_v40 = vshll.u32 %v6912_v24, 16  ;;  %v5819_v2 = vcombine.high %v9586_v58, %v8213_v11  ;;  %v1440_v26 = vrot.slane %v1438_v33, 1  ;;  %v5477_v24 = vld [vmem:[%s7117_s10 + $0x30] sm:$0xe] }
  0xbf   : > { %v1431_v39 = vshrl.u32 %v5595_v52, 16  ;;  %v1433_v48 = vshll.u32 %v5595_v52, 16  ;;  %v5584_v54 = vcombine.low %v5424_v25, %v7979_v3  ;;  %v5597_v52 = vcombine.low %v8344_v12, %v8354_v0 }
  0xc0   : > { %v1132_v27 = vrot.slane %v1130_v40, 1  ;;  %v1142_v33 = vshll.u32 %v6917_v14, 16  ;;  %v7003_v3 = vcombine.low %v8117_v29, %v8213_v11  ;;  %v5585_v25 = vcombine.low %v5425_v50, %v8021_v41  ;;  %v8388_v40 = vld [vmem:[%s7117_s10 + $0x68] ss:$0 sps:$4 sm:$0x11]  }
  0xc1   : > { %v1435_v42 = vrot.slane %v1433_v48, 1  ;;  %v1245_v32 = vrot.slane %v5584_v54, 1  ;;  %v1443_v7 = vshrl.u32 %v5597_v52, 16  ;;  %v1445_v45 = vshll.u32 %v5597_v52, 16  ;;  %v8398_v11 = vld [vmem:[%s7117_s10 + $0x60] sm:$0xf] }
  0xc2   : > { %v8374_v20 = vsel %vm548_vm0, %v1128_v57, %v1132_v27  ;;  %v1144_v54 = vrot.slane %v1142_v33, 1  ;;  %v1249_v48 = vrot.slane %v6917_v14, 1  ;;  %v8406_v57 = vrot.slane %v5619_v30, 1  ;;  %v5478_v52 = vld [vmem:[%s7117_s10 + $0x3c] sm:$0xe] }
  0xc3   : > { %v1436_v34 = vor.u32 %v1435_v42, %v1431_v39  ;;  %v8384_v27 = vsel %vm789_vm2, %v1245_v32, %v1246_v43  ;;  %v8401_v42 = vld [vmem:[%s7117_s10 + $0x64] sm:$0xf]  ;;  %v1447_v43 = vrot.slane %v1445_v45, 1  ;;  %v1248_v39 = vrot.slane %v5585_v25, 1  ;;  %v5426_v30 = vld [vmem:[%s7117_s10 + $0xc0] sm:$0xe] }
  0xc4   : > { %v8404_v41 = vsel %vm548_vm0, %v1140_v13, %v1144_v54  ;;  %v9587_v58 = vcombine.low %v8163_v38, %v8240_v61  ;;  %v5599_v13 = vcombine.low %v8398_v11, %v8401_v42  ;;  %v1462_v14 = vshll.u32 %v8388_v40, 16  ;;  %v8425_v32 = vld [vmem:[%s7117_s10 + $0x6c] sm:$0xf]  ;;  %v8435_v45 = vld [vmem:[%s7117_s10 + $0x74] ss:$0 sps:$4 sm:$0x11]  }
  0xc5   : > { %4135 = vmatmul.mubr.bf16.gmra.mxu1 %v7002_v63  ;;  %4232 = vmatmul.mubr.bf16.gmra.mxu0 %v8142_v18  ;;  %v1452_v63 = vrot.slane %v1450_v53, 1  ;;  %v8381_v18 = vsel %vm548_vm0, %v1436_v34, %v1440_v26  ;;  %v5621_v26 = vcombine.low %v5477_v24, %v8220_v36  ;;  %v1448_v53 = vor.u32 %v1447_v43, %v1443_v7  ;;  %v6923_v34 = vld [vmem:[%s7117_s10 + $0xc8] ss:$0 sps:$4 sm:$0x11]   ;;  %v8428_v36 = vld [vmem:[%s7117_s10 + $0x70] sm:$0xf] }
  0xc6   : > { %4239 = vmatprep.mubr.bf16.mxu0 %v8176_v55  ;;  %4336 = vmatprep.mubr.bf16.mxu1 %v5819_v2  ;;  %v5682_v29 = vcombine.low %v8297_v10, %v8381_v18  ;;  %v8395_v55 = vsel %vm5640_vm1, %v8310_v47, %v8381_v18  ;;  %v5828_v2 = vcombine.high %v9587_v58, %v8248_v56  ;;  %v1455_v24 = vshrl.u32 %v5599_v13, 16  ;;  %v8452_v25 = vld [vmem:[%s7117_s10 + $0x78] sm:$0xf]  ;;  %v8456_v58 = vld [vmem:[%s7117_s10 + $0x7c] sm:$0xf] }
  0xc7   : > { %v8415_v50 = vsel %vm789_vm2, %v1248_v39, %v1249_v48  ;;  %v7004_v61 = vcombine.low %v8163_v38, %v8248_v56  ;;  %v8432_v33 = vsel %vm548_vm0, %v1448_v53, %v1452_v63  ;;  %v1457_v7 = vshll.u32 %v5599_v13, 16  ;;  %v5479_v56 = vld [vmem:[%s7117_s10 + $0x48] sm:$0xe] }
  0xc8   : > { %v8438_v38 = vrot.slane %v5621_v26, 1  ;;  %v1154_v39 = vshll.u32 %v6923_v34, 16  ;;  %v5586_v48 = vcombine.low %v5426_v30, %v8059_v23  ;;  %v1252_v26 = vrot.slane %v6923_v34, 1 }
  0xc9   : > { %v1459_v43 = vrot.slane %v1457_v7, 1  ;;  %v5601_v53 = vcombine.low %v8425_v32, %v8428_v36  ;;  %v1474_v7 = vshll.u32 %v8435_v45, 16  ;;  %v5623_v30 = vcombine.low %v5479_v56, %v8310_v47 }
  0xca   : > { %v1251_v13 = vrot.slane %v5586_v48, 1 }
  0xcb   : > { %v1476_v48 = vrot.slane %v1474_v7, 1  ;;  %v8503_v54 = vrot.slane %v5623_v30, 1  ;;  %v9590_v7 = vcombine.low %v8263_v1, %v8335_v31 }
  0xcd   : > { %4240 = vmatmul.mubr.bf16.gmra.mxu0 %v8171_v21  ;;  %4337 = vmatmul.mubr.bf16.vlgmr.msra.gmra.mxu1 %v7003_v3  ;;  %v8446_v21 = vsel %vm5640_vm1, %v8354_v0, %v8432_v33  ;;  %v9588_v3 = vshrl.u32 %v8260_v22, 16  ;;  %v1460_v22 = vor.u32 %v1459_v43, %v1455_v24  ;;  %v8479_v43 = vsel %vm789_vm2, %v1251_v13, %v1252_v26 }
  0xce   : > { %4247 = vmatprep.mubr.bf16.mxu0 %v8201_v19  ;;  %4344 = vmatprep.mubr.bf16.mxu1 %v5828_v2  ;;  %v1464_v19 = vrot.slane %v1462_v14, 1  ;;  %v5622_v2 = vcombine.low %v5478_v52, %v8266_v51  ;;  %v9589_v14 = vcombine.low %v8206_v28, %v8291_v4  ;;  %v5603_v51 = vcombine.low %v8452_v25, %v8456_v58  ;;  %v8470_v52 = vld [vmem:[%s7117_s10 + $0x80] ss:$0 sps:$4 sm:$0x11]  }
  0xcf   : > { %v1152_v63 = vor.u32 %v8324_v60, %v9588_v3  ;;  %v1156_v60 = vrot.slane %v1154_v39, 1  ;;  %v1469_v3 = vshll.u32 %v5601_v53, 16  ;;  %v1467_v4 = vshrl.u32 %v5601_v53, 16  ;;  %v8489_v39 = vld [vmem:[%s7117_s10 + $0x84] sm:$0xf] }
  0xd0   : > { %v5837_v23 = vcombine.high %v9589_v14, %v8307_v6  ;;  %v8473_v34 = vsel %vm548_vm0, %v1460_v22, %v1464_v19  ;;  %v8492_v19 = vld [vmem:[%s7117_s10 + $0x8c] ss:$0 sps:$4 sm:$0x11]   ;;  %v1479_v26 = vshrl.u32 %v5603_v51, 16  ;;  %v1481_v53 = vshll.u32 %v5603_v51, 16 }
  0xd1   : > { %v8476_v24 = vsel %vm548_vm0, %v1152_v63, %v1156_v60  ;;  %v8486_v56 = vsel %vm5640_vm1, %v8401_v42, %v8473_v34  ;;  %v1471_v63 = vrot.slane %v1469_v3, 1  ;;  %v8496_v22 = vld [vmem:[%s7117_s10 + $0x88] sm:$0xf]  ;;  %v7005_v60 = vcombine.low %v8206_v28, %v8307_v6  ;;  %v5480_v14 = vld [vmem:[%s7117_s10 + $0x54] sm:$0xe] }
  0xd2   : > { %v1631_v13 = vrot.slane %v5622_v2, 1  ;;  %v1486_v47 = vshll.u32 %v8470_v52, 16  ;;  %v5846_v3 = vcombine.high %v9590_v7, %v8351_v5  ;;  %v5605_v28 = vcombine.low %v8489_v39, %v8496_v22  ;;  %v5481_v7 = vld [vmem:[%s7117_s10 + $0x60] sm:$0xe] }
  0xd3   : > { %v5624_v6 = vcombine.low %v5480_v14, %v8354_v0  ;;  %v1498_v30 = vshll.u32 %v8492_v19, 16  ;;  %v8527_v0 = vld [vmem:[%s7117_s10 + $0x90] sm:$0xf]  ;;  %v8533_v14 = vld [vmem:[%s7117_s10 + $0x94] sm:$0xf] }
  0xd4   : > { %v1488_v51 = vrot.slane %v1486_v47, 1  ;;  %v1491_v47 = vshrl.u32 %v5605_v28, 16  ;;  %9591 = vst [vmem:[#allocation3_spill] sm:$0xff] %v8527_v0 }
  0xd5   : > { %4248 = vmatmul.mubr.bf16.gmra.mxu0 %v8195_v15  ;;  %4345 = vmatmul.mubr.bf16.gmra.mxu1 %v7004_v61  ;;  %v1472_v15 = vor.u32 %v1471_v63, %v1467_v4  ;;  %v1483_v61 = vrot.slane %v1481_v53, 1  ;;  %v1493_v53 = vshll.u32 %v5605_v28, 16  ;;  %v1500_v28 = vrot.slane %v1498_v30, 1 }
  0xd6   : > { %4255 = vmatprep.mubr.bf16.mxu0 %v8269_v16  ;;  %4352 = vmatprep.mubr.bf16.mxu1 %v5837_v23  ;;  %v1623_v16 = vrot.slane %v8120_v46, 1  ;;  %v5625_v30 = vcombine.low %v5481_v7, %v8401_v42 }
  0xd7   : > { %v8514_v2 = vsel %vm548_vm0, %v1472_v15, %v1476_v48  ;;  %v1484_v23 = vor.u32 %v1483_v61, %v1479_v26  ;;  %v8536_v15 = vld [vmem:[%s7117_s10 + $0x98] ss:$0 sps:$4 sm:$0x11]   ;;  %v7006_v61 = vcombine.low %v8263_v1, %v8351_v5  ;;  %v5855_v1 = vcombine.high %v5682_v29, %v8395_v55 }
  0xd8   : > { %v8522_v46 = vsel %vm5640_vm1, %v8428_v36, %v8514_v2  ;;  %v1624_v4 = vsel %vm789_vm2, %v8406_v57, %v1623_v16  ;;  %v1637_v5 = vrot.slane %v5624_v6, 1  ;;  %v8564_v6 = vld [vmem:[%s7117_s10 + $0x9c] sm:$0xf]  ;;  %v5484_v57 = vld [vmem:[%s7117_s10 + $0x84] sm:$0xe] }
  0xd9   : > { %v8530_v63 = vsel %vm548_vm0, %v1484_v23, %v1488_v51  ;;  %v5639_v48 = vcombine.low %v1624_v4, %v1624_v4  ;;  %v5645_v26 = vcombine.high %v1624_v4, %v1624_v4  ;;  %v1495_v51 = vrot.slane %v1493_v53, 1 }
  0xda   : > { %v8546_v16 = vsel %vm5640_vm1, %v8456_v58, %v8530_v63  ;;  %v1629_v23 = vrot.slane %v8216_v8, 1 }
  0xdb   : > { %2186 = vst [vmem:[#allocation2 + $0x20] sm:$0xf] %v5639_v48  ;;  %2191 = vst [vmem:[#allocation2 + $0x44] sm:$0xf] %v5645_v26  ;;  %v1496_v4 = vor.u32 %v1495_v51, %v1491_v47  ;;  %v5482_v26 = vld [vmem:[%s7117_s10 + $0x6c] sm:$0xe] }
  0xdc   : > { %v1630_v8 = vsel %vm789_vm2, %v8438_v38, %v1629_v23 }
  0xdd   : > { %4256 = vmatmul.mubr.bf16.gmra.mxu0 %v8251_v17  ;;  %4353 = vmatmul.mubr.bf16.gmra.mxu1 %v7005_v60  ;;  %v1632_v17 = vrot.slane %v8254_v49, 1  ;;  %v5607_v60 = vcombine.low %v8527_v0, %v8533_v14  ;;  %v5667_v48 = vcombine.high %v1630_v8, %v1630_v8  ;;  %v8567_v49 = vld [vmem:[%s7117_s10 + $0xa0] sm:$0xf]  ;;  %v8571_v42 = vsel %vm548_vm0, %v1496_v4, %v1500_v28  ;;  %v8583_v28 = vld [vmem:[%s7117_s10 + $0xa4] ss:$0 sps:$4 sm:$0x11]  }
  0xde   : > { %4263 = vmatprep.mubr.bf16.mxu0 %v8294_v62  ;;  %4360 = vmatprep.mubr.bf16.mxu1 %v5846_v3  ;;  %v1510_v62 = vshll.u32 %v8536_v15, 16  ;;  %v5661_v3 = vcombine.low %v1630_v8, %v1630_v8  ;;  %v8580_v51 = vsel %vm5640_vm1, %v8496_v22, %v8571_v42  ;;  %v1635_v4 = vrot.slane %v8300_v59, 1 }
  0xdf   : > { %v1633_v18 = vsel %vm789_vm2, %v1631_v13, %v1632_v17  ;;  %v1503_v29 = vshrl.u32 %v5607_v60, 16  ;;  %v1505_v38 = vshll.u32 %v5607_v60, 16  ;;  %2211 = vst [vmem:[#allocation2 + $0xd4] sm:$0xf] %v5667_v48  ;;  %v8586_v17 = vld [vmem:[%s7117_s10 + $0xa8] sm:$0xf] }
  0xe0   : > { %v5672_v47 = vcombine.low %v1633_v18, %v1633_v18  ;;  %v5678_v53 = vcombine.high %v1633_v18, %v1633_v18  ;;  %2206 = vst [vmem:[#allocation2 + $0xb0] sm:$0xf] %v5661_v3  ;;  %v1512_v23 = vrot.slane %v1510_v62, 1  ;;  %v1638_v8 = vrot.slane %v8357_v9, 1  ;;  %v8593_v13 = vld [vmem:[%s7117_s10 + $0xac] sm:$0xf] }
  0xe1   : > { %v1507_v60 = vrot.slane %v1505_v38, 1  ;;  %v5609_v18 = vcombine.low %v8564_v6, %v8567_v49  ;;  %v1640_v3 = vrot.slane %v5625_v30, 1  ;;  %v5626_v62 = vcombine.low %v5482_v26, %v8428_v36  ;;  %v5483_v30 = vld [vmem:[%s7117_s10 + $0x78] sm:$0xe] }
  0xe2   : > { %2216 = vst [vmem:[#allocation2 + $0xf8] sm:$0xf] %v5672_v47  ;;  %2221 = vst [vmem:[#allocation2 + $0x11c] sm:$0xf] %v5678_v53  ;;  %v1636_v47 = vsel %vm789_vm2, %v8503_v54, %v1635_v4  ;;  %v1639_v59 = vsel %vm789_vm2, %v1637_v5, %v1638_v8  ;;  %v1522_v5 = vshll.u32 %v8583_v28, 16 }
  0xe3   : > { %v1508_v48 = vor.u32 %v1507_v60, %v1503_v29  ;;  %v1515_v9 = vshrl.u32 %v5609_v18, 16  ;;  %v5683_v36 = vcombine.low %v1636_v47, %v1636_v47  ;;  %v5689_v26 = vcombine.high %v1636_v47, %v1636_v47 }
  0xe4   : > { %v5700_v54 = vcombine.high %v1639_v59, %v1639_v59  ;;  %v5611_v60 = vcombine.low %v8586_v17, %v8593_v13  ;;  %v9594_v47 = vcombine.low %v8344_v12, %v8432_v33 }
  0xe5   : > { %4264 = vmatmul.mubr.bf16.gmra.mxu0 %v8287_v35  ;;  %4361 = vmatmul.mubr.bf16.gmra.mxu1 %v7006_v61  ;;  %v5694_v35 = vcombine.low %v1639_v59, %v1639_v59  ;;  %v1517_v61 = vshll.u32 %v5609_v18, 16  ;;  %v8604_v29 = vsel %vm548_vm0, %v1508_v48, %v1512_v23  ;;  %2226 = vst [vmem:[#allocation2 + $0x140] sm:$0xf] %v5683_v36  ;;  %2231 = vst [vmem:[#allocation2 + $0x164] sm:$0xf] %v5689_v26 }
  0xe6   : > { %4271 = vmatprep.mubr.bf16.mxu0 %v8341_v44  ;;  %4368 = vmatprep.mubr.bf16.mxu1 %v5855_v1  ;;  %9592 = vst [vmem:[#allocation4_spill] sm:$0xff] %v8604_v29  ;;  %v8610_v44 = vld [vmem:[%s7117_s10 + $0xb4] sm:$0xf]  ;;  %v8613_v1 = vld [vmem:[%s7117_s10 + $0xb8] sm:$0xf]  ;;  %v8620_v23 = vsel %vm5640_vm1, %v8533_v14, %v8604_v29  ;;  %v1641_v48 = vrot.slane %v8388_v40, 1  ;;  %v5864_v0 = vcombine.high %v9594_v47, %v8446_v21 }
  0xe7   : > { %9593 = vst [vmem:[#allocation5_spill] sm:$0xff] %v8620_v23  ;;  %2236 = vst [vmem:[#allocation2 + $0x188] sm:$0xf] %v5694_v35  ;;  %v1519_v18 = vrot.slane %v1517_v61, 1  ;;  %v1643_v36 = vrot.slane %v5626_v62, 1  ;;  %v5627_v26 = vcombine.low %v5483_v30, %v8456_v58  ;;  %v1524_v61 = vrot.slane %v1522_v5, 1 }
  0xe8   : > { %v8624_v59 = vld [vmem:[%s7117_s10 + $0xb0] ss:$0 sps:$4 sm:$0x11]   ;;  %2241 = vst [vmem:[#allocation2 + $0x1ac] sm:$0xf] %v5700_v54  ;;  %v1642_v40 = vsel %vm789_vm2, %v1640_v3, %v1641_v48  ;;  %v1644_v62 = vrot.slane %v8435_v45, 1  ;;  %v9595_v3 = vcombine.low %v8297_v10, %v8395_v55 }
  0xe9   : > { %v1520_v35 = vor.u32 %v1519_v18, %v1515_v9  ;;  %v1527_v47 = vshrl.u32 %v5611_v60, 16  ;;  %v1529_v58 = vshll.u32 %v5611_v60, 16  ;;  %v5485_v9 = vld [vmem:[%s7117_s10 + $0x90] sm:$0xe]  ;;  %v1534_v45 = vshll.u32 %v8624_v59, 16 }
  0xea   : > { %v8666_v60 = vld [vmem:[%s7117_s10 + $0xbc] ss:$0 sps:$4 sm:$0x11]   ;;  %v1646_v18 = vrot.slane %v5627_v26, 1 }
  0xeb   : > { %v8652_v30 = vsel %vm548_vm0, %v1520_v35, %v1524_v61  ;;  %v1531_v5 = vrot.slane %v1529_v58, 1  ;;  %v9596_v61 = vcombine.low %v8398_v11, %v8473_v34  ;;  %v1536_v26 = vrot.slane %v1534_v45, 1  ;;  %v5487_v45 = vld [vmem:[%s7117_s10 + $0xa8] sm:$0xe] }
  0xec   : > { %v5759_v10 = vcombine.low %v8564_v6, %v8652_v30  ;;  %v8662_v55 = vsel %vm5640_vm1, %v8567_v49, %v8652_v30 }
  0xed   : > { %v6190_v53 = vpop.f32.mrf.mxu0  ;;  %v6262_v38 = vpop.f32.mrf.mxu1  ;;  %4272 = vmatmul.mubr.bf16.gmra.mxu0 %v8338_v37  ;;  %4369 = vmatmul.mubr.bf16.gmra.mxu1 %v9595_v3  ;;  %v5486_v37 = vld [vmem:[%s7117_s10 + $0x9c] sm:$0xe] }
  0xee   : > { %4279 = vmatprep.mubr.bf16.mxu0 %v8384_v27  ;;  %4376 = vmatprep.mubr.bf16.mxu1 %v5864_v0 }
  0xef   : > { %v6191_v4 = vpop.f32.mrf.mxu0  ;;  %v6263_v8 = vpop.f32.mrf.mxu1 }
  0xf0   : > { %v8626_v31 = vadd.f32 %v6191_v4, %v6190_v53  ;;  %v8628_v7 = vadd.f32 %v6263_v8, %v6262_v38  ;;  %v5628_v53 = vcombine.low %v5484_v57, %v8496_v22  ;;  %v5705_v38 = vcombine.low %v1642_v40, %v1642_v40 }
  0xf1   : > { %v6193_v29 = vpop.f32.mrf.mxu0  ;;  %v6265_v23 = vpop.f32.mrf.mxu1  ;;  %v8639_v4 = vcombine.low %v8610_v44, %v8613_v1  ;;  %v5711_v8 = vcombine.high %v1642_v40, %v1642_v40  ;;  %v7008_v40 = vcombine.low %v8344_v12, %v8446_v21 }
  0xf2   : > { %2246 = vst [vmem:[#allocation2 + $0x1d0] sm:$0xf] %v5705_v38  ;;  %v1649_v48 = vrot.slane %v5628_v53, 1  ;;  %v5873_v38 = vcombine.high %v9596_v61, %v8486_v56  ;;  %v1647_v53 = vrot.slane %v8470_v52, 1 }
  0xf3   : > { %v6194_v33 = vpop.f32.mrf.mxu0  ;;  %v6266_v54 = vpop.f32.mrf.mxu1  ;;  %2251 = vst [vmem:[#allocation2 + $0x1f4] sm:$0xf] %v5711_v8  ;;  %v5630_v8 = vcombine.low %v5486_v37, %v8567_v49  ;;  %v1539_v34 = vshrl.u32 %v8639_v4, 16 }
  0xf4   : > { %v8646_v22 = vadd.f32 %v6194_v33, %v6193_v29  ;;  %v8648_v57 = vadd.f32 %v6266_v54, %v6265_v23  ;;  %v1645_v29 = vsel %vm789_vm2, %v1643_v36, %v1644_v62  ;;  %v5629_v33 = vcombine.low %v5485_v9, %v8533_v14 }
  0xf5   : > { %v6196_v23 = vpop.f32.mrf.mxu0  ;;  %v5716_v27 = vcombine.low %v1645_v29, %v1645_v29  ;;  %v5722_v0 = vcombine.high %v1645_v29, %v1645_v29  ;;  %v6268_v35 = vpop.f32.mrf.mxu1  ;;  %v1532_v36 = vor.u32 %v1531_v5, %v1527_v47  ;;  %v1650_v62 = vrot.slane %v8492_v19, 1  ;;  %v8699_v5 = vld [vmem:[%s7117_s10 + $0xc0] sm:$0xf]  ;;  %4280 = vmatmul.mubr.bf16.gmra.mxu0 %v8374_v20  ;;  %4377 = vmatmul.mubr.bf16.gmra.mxu1 %v7008_v40  ;;  %v5488_v20 = vld [vmem:[%s7117_s10 + $0xb4] sm:$0xe] }
  0xf6   : > { %v1541_v14 = vshll.u32 %v8639_v4, 16  ;;  %v1546_v47 = vshll.u32 %v8666_v60, 16  ;;  %v1648_v52 = vsel %vm789_vm2, %v1646_v18, %v1647_v53  ;;  %v7009_v18 = vcombine.low %v8398_v11, %v8486_v56  ;;  %4287 = vmatprep.mubr.bf16.mxu0 %v8415_v50  ;;  %4384 = vmatprep.mubr.bf16.mxu1 %v5873_v38 }
  0xf7   : > { %v6197_v54 = vpop.f32.mrf.mxu0  ;;  %2256 = vst [vmem:[#allocation2 + $0x218] sm:$0xf] %v5716_v27  ;;  %2261 = vst [vmem:[#allocation2 + $0x23c] sm:$0xf] %v5722_v0  ;;  %v6269_v21 = vpop.f32.mrf.mxu1  ;;  %v8686_v3 = vsel %vm548_vm0, %v1532_v36, %v1536_v26  ;;  %v1651_v19 = vsel %vm789_vm2, %v1649_v48, %v1650_v62  ;;  %v5727_v29 = vcombine.low %v1648_v52, %v1648_v52  ;;  %v1655_v11 = vrot.slane %v5630_v8, 1 }
  0xf8   : > { %v8678_v12 = vadd.f32 %v6197_v54, %v6196_v23  ;;  %v8683_v58 = vadd.f32 %v6269_v21, %v6268_v35  ;;  %v5770_v37 = vcombine.low %v8586_v17, %v8686_v3  ;;  %v8696_v4 = vsel %vm5640_vm1, %v8593_v13, %v8686_v3  ;;  %v8705_v35 = vld [vmem:[%s7117_s10 + $0xc4] sm:$0xf]  ;;  %v8714_v21 = vld [vmem:[%s7117_s10 + $0xc8] ss:$0 sps:$4 sm:$0x11]  }
  0xf9   : > { %v6199_v49 = vpop.f32.mrf.mxu0  ;;  %v6271_v9 = vpop.f32.mrf.mxu1  ;;  %v5733_v48 = vcombine.high %v1648_v52, %v1648_v52  ;;  %v5738_v27 = vcombine.low %v1651_v19, %v1651_v19  ;;  %v1543_v0 = vrot.slane %v1541_v14, 1  ;;  %v1652_v54 = vrot.slane %v5629_v33, 1  ;;  %2266 = vst [vmem:[#allocation2 + $0x260] sm:$0xf] %v5727_v29 }
  0xfa   : > { %v1548_v40 = vrot.slane %v1546_v47, 1  ;;  %v5744_v56 = vcombine.high %v1651_v19, %v1651_v19  ;;  %v9597_v50 = vcombine.low %v8425_v32, %v8514_v2  ;;  %v5631_v33 = vcombine.low %v5487_v45, %v8593_v13  ;;  %v8730_v2 = vld [vmem:[%s7117_s10 + $0xcc] sm:$0xf] }
  0xfb   : > { %v6200_v23 = vpop.f32.mrf.mxu0  ;;  %v6272_v36 = vpop.f32.mrf.mxu1  ;;  %2271 = vst [vmem:[#allocation2 + $0x284] sm:$0xf] %v5733_v48  ;;  %2276 = vst [vmem:[#allocation2 + $0x2a8] sm:$0xf] %v5738_v27  ;;  %v1544_v62 = vor.u32 %v1543_v0, %v1539_v34  ;;  %v5615_v14 = vcombine.low %v8699_v5, %v8705_v35  ;;  %v5632_v34 = vcombine.low %v5488_v20, %v8613_v1  ;;  %v1656_v52 = vrot.slane %v8583_v28, 1 }
  0xfc   : > { %v8707_v61 = vadd.f32 %v6200_v23, %v6199_v49  ;;  %v8711_v26 = vadd.f32 %v6272_v36, %v6271_v9  ;;  %v5882_v38 = vcombine.high %v9597_v50, %v8522_v46  ;;  %2281 = vst [vmem:[#allocation2 + $0x2cc] sm:$0xf] %v5744_v56  ;;  %v1653_v49 = vrot.slane %v8536_v15, 1  ;;  %v8745_v0 = vld [vmem:[%s7117_s10 + $0xd0] sm:$0xf] }
  0xfd   : > { %v6202_v53 = vpop.f32.mrf.mxu0  ;;  %v8724_v8 = vsel %vm548_vm0, %v1544_v62, %v1548_v40  ;;  %v1551_v45 = vshrl.u32 %v5615_v14, 16  ;;  %v6274_v29 = vpop.f32.mrf.mxu1  ;;  %v1657_v28 = vsel %vm789_vm2, %v1655_v11, %v1656_v52  ;;  %v1553_v48 = vshll.u32 %v5615_v14, 16  ;;  %4288 = vmatmul.mubr.bf16.gmra.mxu0 %v8404_v41  ;;  %4385 = vmatmul.mubr.bf16.gmra.mxu1 %v7009_v18 }
  0xfe   : > { %v5781_v13 = vcombine.low %v8610_v44, %v8724_v8  ;;  %v8739_v9 = vsel %vm5640_vm1, %v8613_v1, %v8724_v8  ;;  %v1654_v15 = vsel %vm789_vm2, %v1652_v54, %v1653_v49  ;;  %v1558_v27 = vshll.u32 %v8714_v21, 16  ;;  %v5489_v1 = vld [vmem:[%s7117_s10 + $0xc0] sm:$0xe]  ;;  %4295 = vmatprep.mubr.bf16.mxu0 %v8479_v43  ;;  %4392 = vmatprep.mubr.bf16.mxu1 %v5882_v38 }
  0xff   : > { %v6203_v47 = vpop.f32.mrf.mxu0  ;;  %v7010_v36 = vcombine.low %v8425_v32, %v8522_v46  ;;  %v1658_v20 = vrot.slane %v5631_v33, 1  ;;  %v5749_v40 = vcombine.low %v1654_v15, %v1654_v15  ;;  %v6275_v54 = vpop.f32.mrf.mxu1  ;;  %v5755_v56 = vcombine.high %v1654_v15, %v1654_v15 }
 0x100   : > { %v8732_v19 = vadd.f32 %v6203_v47, %v6202_v53  ;;  %v5617_v53 = vcombine.low %v8730_v2, %v8745_v0  ;;  %v5760_v62 = vcombine.low %v1657_v28, %v1657_v28  ;;  %v5766_v50 = vcombine.high %v1657_v28, %v1657_v28  ;;  %v5490_v47 = vld [vmem:[%s7117_s10 + $0xcc] sm:$0xe] }
 0x101   : > { %v6205_v23 = vpop.f32.mrf.mxu0  ;;  %v1555_v14 = vrot.slane %v1553_v48, 1  ;;  %v8754_v49 = vadd.f32 %v6275_v54, %v6274_v29  ;;  %v9598_v41 = vcombine.low %v8452_v25, %v8530_v63  ;;  %2286 = vst [vmem:[#allocation2 + $0x2f0] sm:$0xf] %v5749_v40  ;;  %v6277_v18 = vpop.f32.mrf.mxu1  ;;  %v1661_v33 = vrot.slane %v5632_v34, 1  ;;  %2291 = vst [vmem:[#allocation2 + $0x314] sm:$0xf] %v5755_v56 }
 0x102   : > { %2296 = vst [vmem:[#allocation2 + $0x338] sm:$0xf] %v5760_v62  ;;  %2301 = vst [vmem:[#allocation2 + $0x35c] sm:$0xf] %v5766_v50  ;;  %v1560_v15 = vrot.slane %v1558_v27, 1  ;;  %v1659_v29 = vrot.slane %v8624_v59, 1  ;;  %v5633_v28 = vcombine.low %v5489_v1, %v8705_v35  ;;  %v5634_v48 = vcombine.low %v5490_v47, %v8745_v0 }
 0x103   : > { %v6206_v11 = vpop.f32.mrf.mxu0  ;;  %v5891_v46 = vcombine.high %v9598_v41, %v8546_v16  ;;  %v1556_v52 = vor.u32 %v1555_v14, %v1551_v45  ;;  %v1662_v43 = vrot.slane %v8666_v60, 1  ;;  %v1563_v38 = vshrl.u32 %v5617_v53, 16  ;;  %v6278_v63 = vpop.f32.mrf.mxu1  ;;  %v6931_v59 = vld [vmem:[#allocation2 + $0x20] ss:$36 sps:$4 sm:$0xff]  }
 0x104   : > { %v8756_v32 = vadd.f32 %v6206_v11, %v6205_v23  ;;  %v6964_v23 = vld [vmem:[%s7117_s10 + $0xd4] ss:$0 sps:$4 sm:$0x11]   ;;  %v1660_v34 = vsel %vm789_vm2, %v1658_v20, %v1659_v29  ;;  %v1565_v54 = vshll.u32 %v5617_v53, 16  ;;  %v8772_v45 = vadd.f32 %v6278_v63, %v6277_v18 }
 0x105   : > { %v8769_v40 = vsel %vm548_vm0, %v1556_v52, %v1560_v15  ;;  %v1570_v11 = vshll.u32 %v6964_v23, 16  ;;  %v6208_v27 = vpop.f32.mrf.mxu0  ;;  %v5771_v56 = vcombine.low %v1660_v34, %v1660_v34  ;;  %v5777_v62 = vcombine.high %v1660_v34, %v1660_v34  ;;  %v6280_v18 = vpop.f32.mrf.mxu1  ;;  %4296 = vmatmul.mubr.bf16.gmra.mxu0 %v8476_v24  ;;  %4393 = vmatmul.mubr.bf16.gmra.mxu1 %v7010_v36 }
 0x106   : > { %v5792_v1 = vcombine.low %v8699_v5, %v8769_v40  ;;  %v8779_v60 = vsel %vm5640_vm1, %v8705_v35, %v8769_v40  ;;  %v1663_v50 = vsel %vm789_vm2, %v1661_v33, %v1662_v43  ;;  %v1567_v14 = vrot.slane %v1565_v54, 1  ;;  %4400 = vmatprep.mubr.bf16.mxu1 %v5891_v46  ;;  %6662 = vmatprep.mubr.bf16.mxu0 %v6931_v59 }
 0x107   : > { %v1572_v20 = vrot.slane %v1570_v11, 1  ;;  %v6209_v53 = vpop.f32.mrf.mxu0  ;;  %v1664_v47 = vrot.slane %v5633_v28, 1  ;;  %2306 = vst [vmem:[#allocation2 + $0x380] sm:$0xf] %v5771_v56  ;;  %v5782_v41 = vcombine.low %v1663_v50, %v1663_v50  ;;  %2311 = vst [vmem:[#allocation2 + $0x3a4] sm:$0xf] %v5777_v62  ;;  %v5788_v15 = vcombine.high %v1663_v50, %v1663_v50  ;;  %v6281_v33 = vpop.f32.mrf.mxu1 }
 0x108   : > { %v8783_v52 = vadd.f32 %v6209_v53, %v6208_v27  ;;  %v1568_v35 = vor.u32 %v1567_v14, %v1563_v38  ;;  %v1667_v29 = vrot.slane %v5634_v48, 1  ;;  %v1665_v43 = vrot.slane %v8714_v21, 1  ;;  %v6932_v27 = vld [vmem:[#allocation2 + $0x68] ss:$36 sps:$4 sm:$0xff]   ;;  %v6936_v62 = vld [vmem:[#allocation2 + $0xb0] ss:$36 sps:$4 sm:$0xff]  }
 0x109   : > { %v6211_v63 = vpop.f32.mrf.mxu0  ;;  %2316 = vst [vmem:[#allocation2 + $0x3c8] sm:$0xf] %v5782_v41  ;;  %2321 = vst [vmem:[#allocation2 + $0x3ec] sm:$0xf] %v5788_v15  ;;  %v1668_v34 = vrot.slane %v6964_v23, 1  ;;  %v8789_v24 = vadd.f32 %v6281_v33, %v6280_v18  ;;  %v6283_v38 = vpop.f32.mrf.mxu1  ;;  %v7011_v11 = vcombine.low %v8452_v25, %v8546_v16  ;;  %v9599_v59 = vcombine.low %v8489_v39, %v8571_v42 }
 0x10a   : > { %v8786_v28 = vsel %vm548_vm0, %v1568_v35, %v1572_v20  ;;  %v1666_v21 = vsel %vm789_vm2, %v1664_v47, %v1665_v43  ;;  %v8813_v42 = vld [vmem:[%s9568_s2] ss:$0 sm:$0xff]  ;;  %v7012_v43 = vcombine.low %v8489_v39, %v8580_v51 }
 0x10b   : > { %v6212_v36 = vpop.f32.mrf.mxu0  ;;  %v5803_v54 = vcombine.low %v8730_v2, %v8786_v28  ;;  %v8796_v46 = vsel %vm5640_vm1, %v8745_v0, %v8786_v28  ;;  %v1669_v23 = vsel %vm789_vm2, %v1667_v29, %v1668_v34  ;;  %v5900_v56 = vcombine.high %v9599_v59, %v8580_v51  ;;  %v6284_v0 = vpop.f32.mrf.mxu1  ;;  %v6937_v34 = vld [vmem:[#allocation2 + $0xf8] ss:$36 sps:$4 sm:$0xff]   ;;  %v6941_v59 = vld [vmem:[#allocation2 + $0x140] ss:$36 sps:$4 sm:$0xff]  }
 0x10c   : > { %v8798_v48 = vadd.f32 %v6212_v36, %v6211_v63  ;;  %v5793_v50 = vcombine.low %v1666_v21, %v1666_v21  ;;  %v5799_v14 = vcombine.high %v1666_v21, %v1666_v21  ;;  %v5804_v20 = vcombine.low %v1669_v23, %v1669_v23 }
 0x10d   : > { %v5810_v53 = vcombine.high %v1669_v23, %v1669_v23  ;;  %v8808_v41 = vadd.f32 %v6284_v0, %v6283_v38  ;;  %v6214_v25 = vpop.f32.mrf.mxu0  ;;  %v6302_v16 = vpop.f32.mrf.mxu1  ;;  %4401 = vmatmul.mubr.bf16.gmra.mxu1 %v7011_v11  ;;  %6663 = vmatmul.mubr.bf16.vlgmr.msra.gmra.mxu0 %v6932_v27  ;;  %v3856_v15 = vadd.f32 %v8626_v31, %v8813_v42  ;;  %v9600_v38 = vld [vmem:[#allocation5_spill] sm:$0xff]  ;;  %v9601_v11 = vld [vmem:[#allocation3_spill] sm:$0xff]  ;;  %v9602_v27 = vld [vmem:[#allocation4_spill] sm:$0xff] }
 0x10e   : > { %2326 = vst [vmem:[#allocation2 + $0x410] sm:$0xf] %v5793_v50  ;;  %2331 = vst [vmem:[#allocation2 + $0x434] sm:$0xf] %v5799_v14  ;;  %4408 = vmatprep.mubr.bf16.mxu1 %v5900_v56  ;;  %6666 = vmatprep.mubr.bf16.mxu0 %v6936_v62  ;;  %v9603_v21 = vcombine.low %v9601_v11, %v9602_v27  ;;  %v3859_v31 = vadd.f32 %v8646_v22, %v8813_v42 }
 0x10f   : > { %2336 = vst [vmem:[#allocation2 + $0x458] sm:$0xf] %v5804_v20  ;;  %2341 = vst [vmem:[#allocation2 + $0x47c] sm:$0xf] %v5810_v53  ;;  %v6215_v47 = vpop.f32.mrf.mxu0  ;;  %v6303_v18 = vpop.f32.mrf.mxu1 }
 0x110   : > { %v8817_v35 = vadd.f32 %v6215_v47, %v6214_v25  ;;  %v6304_v29 = vadd.f32 %v6303_v18, %v6302_v16  ;;  %v5909_v23 = vcombine.high %v9603_v21, %v9600_v38  ;;  %v3864_v25 = vadd.f32 %v8678_v12, %v8813_v42 }
 0x111   : > { %v6217_v63 = vpop.f32.mrf.mxu0  ;;  %v6305_v33 = vpop.f32.mrf.mxu1  ;;  %v3867_v12 = vadd.f32 %v8707_v61, %v8813_v42 }
 0x112   : > { %v8821_v36 = vadd.f32 %v6304_v29, %v3856_v15  ;;  %v7013_v15 = vcombine.low %v9601_v11, %v9600_v38  ;;  %v6942_v29 = vld [vmem:[#allocation2 + $0x188] ss:$36 sps:$4 sm:$0xff]  }
 0x113   : > { %v6218_v56 = vpop.f32.mrf.mxu0  ;;  %v6306_v62 = vpop.f32.mrf.mxu1 }
 0x114   : > { %v8829_v50 = vadd.f32 %v6218_v56, %v6217_v63  ;;  %v6307_v0 = vadd.f32 %v6306_v62, %v6305_v33  ;;  %v5918_v33 = vcombine.high %v5759_v10, %v8662_v55  ;;  %v3872_v10 = vadd.f32 %v8732_v19, %v8813_v42 }
 0x115   : > { %v6220_v14 = vpop.f32.mrf.mxu0  ;;  %v6308_v20 = vpop.f32.mrf.mxu1  ;;  %4409 = vmatmul.mubr.bf16.gmra.mxu1 %v7012_v43  ;;  %6667 = vmatmul.mubr.bf16.gmra.mxu0 %v6937_v34  ;;  %v6946_v43 = vld [vmem:[#allocation2 + $0x1d0] ss:$36 sps:$4 sm:$0xff]   ;;  %v3875_v19 = vadd.f32 %v8756_v32, %v8813_v42 }
 0x116   : > { %v8831_v39 = vadd.f32 %v6307_v0, %v3859_v31  ;;  %4416 = vmatprep.mubr.bf16.mxu1 %v5909_v23  ;;  %6670 = vmatprep.mubr.bf16.mxu0 %v6941_v59 }
 0x117   : > { %v6221_v51 = vpop.f32.mrf.mxu0  ;;  %v6309_v53 = vpop.f32.mrf.mxu1 }
 0x118   : > { %v8835_v16 = vadd.f32 %v6221_v51, %v6220_v14  ;;  %v6310_v47 = vadd.f32 %v6309_v53, %v6308_v20  ;;  %v7014_v14 = vcombine.low %v8564_v6, %v8662_v55  ;;  %v6947_v20 = vld [vmem:[#allocation2 + $0x218] ss:$36 sps:$4 sm:$0xff]   ;;  %v5927_v53 = vcombine.high %v5770_v37, %v8696_v4 }
 0x119   : > { %v6223_v22 = vpop.f32.mrf.mxu0  ;;  %v6311_v18 = vpop.f32.mrf.mxu1  ;;  %v3880_v37 = vadd.f32 %v8783_v52, %v8813_v42  ;;  %v3883_v52 = vadd.f32 %v8798_v48, %v8813_v42 }
 0x11a   : > { %v8839_v63 = vadd.f32 %v6310_v47, %v3864_v25  ;;  %v6951_v25 = vld [vmem:[#allocation2 + $0x260] ss:$36 sps:$4 sm:$0xff]  }
 0x11b   : > { %v6224_v34 = vpop.f32.mrf.mxu0  ;;  %v6312_v27 = vpop.f32.mrf.mxu1 }
 0x11c   : > { %v8847_v21 = vadd.f32 %v6224_v34, %v6223_v22  ;;  %v6313_v23 = vadd.f32 %v6312_v27, %v6311_v18 }
 0x11d   : > { %v6226_v59 = vpop.f32.mrf.mxu0  ;;  %v6314_v56 = vpop.f32.mrf.mxu1  ;;  %4417 = vmatmul.mubr.bf16.gmra.mxu1 %v7013_v15  ;;  %6671 = vmatmul.mubr.bf16.gmra.mxu0 %v6942_v29 }
 0x11e   : > { %v8849_v38 = vadd.f32 %v6313_v23, %v3867_v12  ;;  %4424 = vmatprep.mubr.bf16.mxu1 %v5918_v33  ;;  %6674 = vmatprep.mubr.bf16.mxu0 %v6946_v43  ;;  %v7015_v12 = vcombine.low %v8586_v17, %v8696_v4  ;;  %v6952_v23 = vld [vmem:[#allocation2 + $0x2a8] ss:$36 sps:$4 sm:$0xff]  }
 0x11f   : > { %v6227_v11 = vpop.f32.mrf.mxu0  ;;  %v6315_v30 = vpop.f32.mrf.mxu1 }
 0x120   : > { %v8853_v62 = vadd.f32 %v6227_v11, %v6226_v59  ;;  %v6316_v31 = vadd.f32 %v6315_v30, %v6314_v56  ;;  %v5936_v56 = vcombine.high %v5781_v13, %v8739_v9  ;;  %v6956_v11 = vld [vmem:[#allocation2 + $0x2f0] ss:$36 sps:$4 sm:$0xff]   ;;  %v3888_v13 = vadd.f32 %v8817_v35, %v8813_v42 }
 0x121   : > { %v6229_v61 = vpop.f32.mrf.mxu0  ;;  %v6317_v0 = vpop.f32.mrf.mxu1  ;;  %v3891_v35 = vadd.f32 %v8829_v50, %v8813_v42 }
 0x122   : > { %v8857_v51 = vadd.f32 %v6316_v31, %v3872_v10 }
 0x123   : > { %v6230_v47 = vpop.f32.mrf.mxu0  ;;  %v6318_v22 = vpop.f32.mrf.mxu1 }
 0x124   : > { %v8865_v18 = vadd.f32 %v6230_v47, %v6229_v61  ;;  %v6319_v15 = vadd.f32 %v6318_v22, %v6317_v0  ;;  %v7016_v47 = vcombine.low %v8610_v44, %v8739_v9  ;;  %v6957_v22 = vld [vmem:[#allocation2 + $0x338] ss:$36 sps:$4 sm:$0xff]  }
 0x125   : > { %v6232_v29 = vpop.f32.mrf.mxu0  ;;  %v6320_v33 = vpop.f32.mrf.mxu1  ;;  %4425 = vmatmul.mubr.bf16.gmra.mxu1 %v7014_v14  ;;  %6675 = vmatmul.mubr.bf16.gmra.mxu0 %v6947_v20 }
 0x126   : > { %v8867_v6 = vadd.f32 %v6319_v15, %v3875_v19  ;;  %4432 = vmatprep.mubr.bf16.mxu1 %v5927_v53  ;;  %6678 = vmatprep.mubr.bf16.mxu0 %v6951_v25  ;;  %v5945_v15 = vcombine.high %v5792_v1, %v8779_v60  ;;  %v3896_v1 = vadd.f32 %v8835_v16, %v8813_v42 }
 0x127   : > { %v6233_v55 = vpop.f32.mrf.mxu0  ;;  %v6321_v3 = vpop.f32.mrf.mxu1  ;;  %v3899_v16 = vadd.f32 %v8847_v21, %v8813_v42 }
 0x128   : > { %v8871_v43 = vadd.f32 %v6233_v55, %v6232_v29  ;;  %v6322_v34 = vadd.f32 %v6321_v3, %v6320_v33  ;;  %v6961_v29 = vld [vmem:[#allocation2 + $0x380] ss:$36 sps:$4 sm:$0xff]  }
 0x129   : > { %v6235_v32 = vpop.f32.mrf.mxu0  ;;  %v6323_v27 = vpop.f32.mrf.mxu1 }
 0x12a   : > { %v8875_v59 = vadd.f32 %v6322_v34, %v3880_v37 }
 0x12b   : > { %v6236_v30 = vpop.f32.mrf.mxu0  ;;  %v6324_v10 = vpop.f32.mrf.mxu1 }
 0x12c   : > { %v8883_v31 = vadd.f32 %v6236_v30, %v6235_v32  ;;  %v6325_v61 = vadd.f32 %v6324_v10, %v6323_v27  ;;  %v5954_v10 = vcombine.high %v5803_v54, %v8796_v46  ;;  %v3904_v54 = vadd.f32 %v8853_v62, %v8813_v42 }
 0x12d   : > { %v6238_v0 = vpop.f32.mrf.mxu0  ;;  %v6326_v14 = vpop.f32.mrf.mxu1  ;;  %4433 = vmatmul.mubr.bf16.gmra.mxu1 %v7015_v12  ;;  %6679 = vmatmul.mubr.bf16.gmra.mxu0 %v6952_v23 }
 0x12e   : > { %v8885_v17 = vadd.f32 %v6325_v61, %v3883_v52  ;;  %4440 = vmatprep.mubr.bf16.mxu1 %v5936_v56  ;;  %6682 = vmatprep.mubr.bf16.mxu0 %v6956_v11  ;;  %v7017_v56 = vcombine.low %v8699_v5, %v8779_v60  ;;  %v6962_v11 = vld [vmem:[#allocation2 + $0x3c8] ss:$36 sps:$4 sm:$0xff]   ;;  %v6966_v52 = vld [vmem:[#allocation2 + $0x410] ss:$36 sps:$4 sm:$0xff]  }
 0x12f   : > { %v6239_v4 = vpop.f32.mrf.mxu0  ;;  %v6327_v8 = vpop.f32.mrf.mxu1 }
 0x130   : > { %v8889_v20 = vadd.f32 %v6239_v4, %v6238_v0  ;;  %v6328_v53 = vadd.f32 %v6327_v8, %v6326_v14 }
 0x131   : > { %v6241_v48 = vpop.f32.mrf.mxu0  ;;  %v6329_v25 = vpop.f32.mrf.mxu1 }
 0x132   : > { %v8893_v19 = vadd.f32 %v6328_v53, %v3888_v13 }
 0x133   : > { %v6242_v33 = vpop.f32.mrf.mxu0  ;;  %v6330_v55 = vpop.f32.mrf.mxu1 }
 0x134   : > { %v8901_v3 = vadd.f32 %v6242_v33, %v6241_v48  ;;  %v6331_v37 = vadd.f32 %v6330_v55, %v6329_v25  ;;  %v3907_v55 = vadd.f32 %v8865_v18, %v8813_v42 }
 0x135   : > { %v6244_v34 = vpop.f32.mrf.mxu0  ;;  %v6332_v32 = vpop.f32.mrf.mxu1  ;;  %4441 = vmatmul.mubr.bf16.gmra.mxu1 %v7016_v47  ;;  %6683 = vmatmul.mubr.bf16.gmra.mxu0 %v6957_v22  ;;  %v7018_v47 = vcombine.low %v8730_v2, %v8796_v46  ;;  %v6967_v22 = vld [vmem:[#allocation2 + $0x458] ss:$36 sps:$4 sm:$0xff]   ;;  %v3912_v46 = vadd.f32 %v8871_v43, %v8813_v42 }
 0x136   : > { %v8903_v44 = vadd.f32 %v6331_v37, %v3891_v35  ;;  %4448 = vmatprep.mubr.bf16.mxu1 %v5945_v15  ;;  %6686 = vmatprep.mubr.bf16.mxu0 %v6961_v29 }
 0x137   : > { %v6245_v9 = vpop.f32.mrf.mxu0  ;;  %v6333_v40 = vpop.f32.mrf.mxu1 }
 0x138   : > { %v8907_v27 = vadd.f32 %v6245_v9, %v6244_v34  ;;  %v6334_v12 = vadd.f32 %v6333_v40, %v6332_v32 }
 0x139   : > { %v6247_v50 = vpop.f32.mrf.mxu0  ;;  %v6335_v23 = vpop.f32.mrf.mxu1 }
 0x13a   : > { %v8911_v30 = vadd.f32 %v6334_v12, %v3896_v1 }
 0x13b   : > { %v6248_v61 = vpop.f32.mrf.mxu0  ;;  %v6336_v0 = vpop.f32.mrf.mxu1 }
 0x13c   : > { %v8919_v14 = vadd.f32 %v6248_v61, %v6247_v50  ;;  %v6337_v4 = vadd.f32 %v6336_v0, %v6335_v23 }
 0x13d   : > { %v6250_v8 = vpop.f32.mrf.mxu0  ;;  %v6338_v13 = vpop.f32.mrf.mxu1  ;;  %4449 = vmatmul.mubr.bf16.gmra.mxu1 %v7017_v56  ;;  %6687 = vmatmul.mubr.bf16.gmra.mxu0 %v6962_v11  ;;  %v3915_v11 = vadd.f32 %v8883_v31, %v8813_v42 }
 0x13e   : > { %v8921_v5 = vadd.f32 %v6337_v4, %v3899_v16  ;;  %4456 = vmatprep.mubr.bf16.mxu1 %v5954_v10  ;;  %6690 = vmatprep.mubr.bf16.mxu0 %v6966_v52  ;;  %v3920_v4 = vadd.f32 %v8889_v20, %v8813_v42 }
 0x13f   : > { %v6251_v60 = vpop.f32.mrf.mxu0  ;;  %v6339_v28 = vpop.f32.mrf.mxu1 }
 0x140   : > { %v8925_v53 = vadd.f32 %v6251_v60, %v6250_v8  ;;  %v6340_v48 = vadd.f32 %v6339_v28, %v6338_v13 }
 0x141   : > { %v6253_v21 = vpop.f32.mrf.mxu0  ;;  %v6341_v25 = vpop.f32.mrf.mxu1 }
 0x142   : > { %v8929_v15 = vadd.f32 %v6340_v48, %v3904_v54  ;;  %v7043_v54 = vmov 0  }
 0x143   : > { %v6254_v29 = vpop.f32.mrf.mxu0  ;;  %v6342_v33 = vpop.f32.mrf.mxu1  ;;  %4680 = vst [vmem:[%s8954_s18 + $0x18] sm:$0xf] %v7043_v54  ;;  %4674 = vst [vmem:[%s8954_s18] sm:$0xf] %v7043_v54 }
 0x144   : > { %v8933_v35 = vadd.f32 %v6254_v29, %v6253_v21  ;;  %v6343_v37 = vadd.f32 %v6342_v33, %v6341_v25  ;;  %4675 = vst [vmem:[%s8954_s18 + $0x4] sm:$0xf] %v7043_v54  ;;  %4676 = vst [vmem:[%s8954_s18 + $0x8] sm:$0x1] %v7043_v54 }
 0x145   : > { %v6256_v62 = vpop.f32.mrf.mxu0  ;;  %v6344_v34 = vpop.f32.mrf.mxu1  ;;  %4457 = vmatmul.mubr.bf16.gmra.mxu1 %v7018_v47  ;;  %6691 = vmatmul.mubr.bf16.gmra.mxu0 %v6967_v22  ;;  %4677 = vst [vmem:[%s8954_s18 + $0xc] sm:$0xf] %v7043_v54  ;;  %4678 = vst [vmem:[%s8954_s18 + $0x10] sm:$0xf] %v7043_v54  ;;  %v3923_v47 = vadd.f32 %v8901_v3, %v8813_v42 }
 0x146   : > { %v8935_v32 = vadd.f32 %v6343_v37, %v3907_v55  ;;  %4679 = vst [vmem:[%s8954_s18 + $0x14] sm:$0x1] %v7043_v54  ;;  %4681 = vst [vmem:[%s8954_s18 + $0x1c] sm:$0xf] %v7043_v54 }
 0x147   : > { %v6257_v9 = vpop.f32.mrf.mxu0  ;;  %v6345_v2 = vpop.f32.mrf.mxu1  ;;  %4682 = vst [vmem:[%s8954_s18 + $0x20] sm:$0x1] %v7043_v54  ;;  %4683 = vst [vmem:[%s8954_s18 + $0x24] sm:$0xf] %v7043_v54 }
 0x148   : > { %v8939_v40 = vadd.f32 %v6257_v9, %v6256_v62  ;;  %v6346_v1 = vadd.f32 %v6345_v2, %v6344_v34  ;;  %4684 = vst [vmem:[%s8954_s18 + $0x28] sm:$0xf] %v7043_v54  ;;  %4685 = vst [vmem:[%s8954_s18 + $0x2c] sm:$0x1] %v7043_v54 }
 0x149   : > { %v6259_v12 = vpop.f32.mrf.mxu0  ;;  %v6347_v18 = vpop.f32.mrf.mxu1  ;;  %4686 = vst [vmem:[%s8954_s18 + $0x30] sm:$0xf] %v7043_v54  ;;  %4687 = vst [vmem:[%s8954_s18 + $0x34] sm:$0xf] %v7043_v54 }
 0x14a   : > { %v8941_v50 = vadd.f32 %v6346_v1, %v3912_v46  ;;  %4688 = vst [vmem:[%s8954_s18 + $0x38] sm:$0x1] %v7043_v54  ;;  %4689 = vst [vmem:[%s8954_s18 + $0x3c] sm:$0xf] %v7043_v54 }
 0x14b   : > { %v6260_v23 = vpop.f32.mrf.mxu0  ;;  %v6348_v56 = vpop.f32.mrf.mxu1  ;;  %4690 = vst [vmem:[%s8954_s18 + $0x40] sm:$0xf] %v7043_v54  ;;  %4691 = vst [vmem:[%s8954_s18 + $0x44] sm:$0x1] %v7043_v54 }
 0x14c   : > { %v8945_v10 = vadd.f32 %v6260_v23, %v6259_v12  ;;  %v6349_v52 = vadd.f32 %v6348_v56, %v6347_v18  ;;  %4692 = vst [vmem:[%s8954_s18 + $0x48] sm:$0xf] %v7043_v54  ;;  %4693 = vst [vmem:[%s8954_s18 + $0x4c] sm:$0xf] %v7043_v54 }
 0x14d   : > { %v6350_v61 = vpop.f32.mrf.mxu1  ;;  %v6414_v0 = vpop.f32.mrf.mxu0  ;;  %4694 = vst [vmem:[%s8954_s18 + $0x50] sm:$0x1] %v7043_v54  ;;  %4695 = vst [vmem:[%s8954_s18 + $0x54] sm:$0xf] %v7043_v54 }
 0x14e   : > { %v8947_v16 = vadd.f32 %v6349_v52, %v3915_v11  ;;  %4696 = vst [vmem:[%s8954_s18 + $0x58] sm:$0xf] %v7043_v54  ;;  %4697 = vst [vmem:[%s8954_s18 + $0x5c] sm:$0x1] %v7043_v54 }
 0x14f   : > { %v6351_v43 = vpop.f32.mrf.mxu1  ;;  %v6415_v31 = vpop.f32.mrf.mxu0  ;;  %4698 = vst [vmem:[%s8954_s18 + $0x60] sm:$0xf] %v7043_v54  ;;  %4699 = vst [vmem:[%s8954_s18 + $0x64] sm:$0xf] %v7043_v54 }
 0x150   : > { %v6352_v8 = vadd.f32 %v6351_v43, %v6350_v61  ;;  %v6416_v13 = vadd.f32 %v6415_v31, %v6414_v0  ;;  %4700 = vst [vmem:[%s8954_s18 + $0x68] sm:$0x1] %v7043_v54  ;;  %4701 = vst [vmem:[%s8954_s18 + $0x6c] sm:$0xf] %v7043_v54 }
 0x151   : > { %v6353_v60 = vpop.f32.mrf.mxu1  ;;  %v6417_v28 = vpop.f32.mrf.mxu0  ;;  %4702 = vst [vmem:[%s8954_s18 + $0x70] sm:$0xf] %v7043_v54  ;;  %4703 = vst [vmem:[%s8954_s18 + $0x74] sm:$0x1] %v7043_v54 }
 0x152   : > { %4704 = vst [vmem:[%s8954_s18 + $0x78] sm:$0xf] %v7043_v54  ;;  %4705 = vst [vmem:[%s8954_s18 + $0x7c] sm:$0xf] %v7043_v54  ;;  %v9012_v20 = vadd.f32 %v6352_v8, %v3920_v4  ;;  %v9015_v48 = vadd.f32 %v6416_v13, %v8821_v36  ;;  %v3928_v36 = vadd.f32 %v8907_v27, %v8813_v42 }
 0x153   : > { %4706 = vst [vmem:[%s8954_s18 + $0x80] sm:$0x1] %v7043_v54  ;;  %4707 = vst [vmem:[%s8954_s18 + $0x84] sm:$0xf] %v7043_v54  ;;  %v6354_v21 = vpop.f32.mrf.mxu1  ;;  %v6418_v25 = vpop.f32.mrf.mxu0 }
 0x154   : > { %4708 = vst [vmem:[%s8954_s18 + $0x88] sm:$0xf] %v7043_v54  ;;  %4709 = vst [vmem:[%s8954_s18 + $0x8c] sm:$0x1] %v7043_v54  ;;  %v6355_v22 = vadd.f32 %v6354_v21, %v6353_v60  ;;  %v6419_v29 = vadd.f32 %v6418_v25, %v6417_v28 }
 0x155   : > { %4710 = vst [vmem:[%s8954_s18 + $0x90] sm:$0xf] %v7043_v54  ;;  %4711 = vst [vmem:[%s8954_s18 + $0x94] sm:$0xf] %v7043_v54  ;;  %v6356_v33 = vpop.f32.mrf.mxu1  ;;  %v6420_v55 = vpop.f32.mrf.mxu0 }
 0x156   : > { %4712 = vst [vmem:[%s8954_s18 + $0x98] sm:$0x1] %v7043_v54  ;;  %4713 = vst [vmem:[%s8954_s18 + $0x9c] sm:$0xf] %v7043_v54  ;;  %v9019_v37 = vadd.f32 %v6355_v22, %v3923_v47  ;;  %v9022_v62 = vadd.f32 %v6419_v29, %v8831_v39  ;;  %v3931_v39 = vadd.f32 %v8919_v14, %v8813_v42 }
 0x157   : > { %4714 = vst [vmem:[%s8954_s18 + $0xa0] sm:$0xf] %v7043_v54  ;;  %4715 = vst [vmem:[%s8954_s18 + $0xa4] sm:$0x1] %v7043_v54  ;;  %v6357_v34 = vpop.f32.mrf.mxu1  ;;  %v6421_v9 = vpop.f32.mrf.mxu0 }
 0x158   : > { %4716 = vst [vmem:[%s8954_s18 + $0xa8] sm:$0xf] %v7043_v54  ;;  %4717 = vst [vmem:[%s8954_s18 + $0xac] sm:$0xf] %v7043_v54  ;;  %v6358_v2 = vadd.f32 %v6357_v34, %v6356_v33  ;;  %v6422_v46 = vadd.f32 %v6421_v9, %v6420_v55 }
 0x159   : > { %4718 = vst [vmem:[%s8954_s18 + $0xb0] sm:$0x1] %v7043_v54  ;;  %4719 = vst [vmem:[%s8954_s18 + $0xb4] sm:$0xf] %v7043_v54  ;;  %v6359_v1 = vpop.f32.mrf.mxu1  ;;  %v6423_v12 = vpop.f32.mrf.mxu0 }
 0x15a   : > { %4720 = vst [vmem:[%s8954_s18 + $0xb8] sm:$0xf] %v7043_v54  ;;  %4721 = vst [vmem:[%s8954_s18 + $0xbc] sm:$0x1] %v7043_v54  ;;  %v9026_v18 = vadd.f32 %v6358_v2, %v3928_v36  ;;  %v9029_v3 = vadd.f32 %v6422_v46, %v8839_v63  ;;  %v3936_v63 = vadd.f32 %v8925_v53, %v8813_v42 }
 0x15b   : > { %4722 = vst [vmem:[%s8954_s18 + $0xc0] sm:$0xf] %v7043_v54  ;;  %4723 = vst [vmem:[%s8954_s18 + $0xc4] sm:$0xf] %v7043_v54  ;;  %v6360_v23 = vpop.f32.mrf.mxu1  ;;  %v6424_v56 = vpop.f32.mrf.mxu0 }
 0x15c   : > { %4724 = vst [vmem:[%s8954_s18 + $0xc8] sm:$0x1] %v7043_v54  ;;  %4725 = vst [vmem:[%s8954_s18 + $0xcc] sm:$0xf] %v7043_v54  ;;  %v6361_v11 = vadd.f32 %v6360_v23, %v6359_v1  ;;  %v6425_v52 = vadd.f32 %v6424_v56, %v6423_v12 }
 0x15d   : > { %4726 = vst [vmem:[%s8954_s18 + $0xd0] sm:$0xf] %v7043_v54  ;;  %4727 = vst [vmem:[%s8954_s18 + $0xd4] sm:$0x1] %v7043_v54  ;;  %v6362_v61 = vpop.f32.mrf.mxu1  ;;  %v6426_v0 = vpop.f32.mrf.mxu0 }
 0x15e   : > { %v9033_v43 = vadd.f32 %v6361_v11, %v3931_v39  ;;  %v9036_v27 = vadd.f32 %v6425_v52, %v8849_v38  ;;  %v3939_v38 = vadd.f32 %v8933_v35, %v8813_v42 }
 0x15f   : > { %v6363_v31 = vpop.f32.mrf.mxu1  ;;  %v6427_v4 = vpop.f32.mrf.mxu0 }
 0x160   : > { %v6364_v8 = vadd.f32 %v6363_v31, %v6362_v61  ;;  %v6428_v13 = vadd.f32 %v6427_v4, %v6426_v0 }
 0x161   : > { %v6365_v60 = vpop.f32.mrf.mxu1  ;;  %v6429_v28 = vpop.f32.mrf.mxu0 }
 0x162   : > { %v9040_v54 = vadd.f32 %v6364_v8, %v3936_v63  ;;  %v9043_v14 = vadd.f32 %v6428_v13, %v8857_v51  ;;  %v3944_v51 = vadd.f32 %v8939_v40, %v8813_v42 }
 0x163   : > { %v6366_v21 = vpop.f32.mrf.mxu1  ;;  %v6430_v25 = vpop.f32.mrf.mxu0 }
 0x164   : > { %v6367_v47 = vadd.f32 %v6366_v21, %v6365_v60  ;;  %v6431_v22 = vadd.f32 %v6430_v25, %v6429_v28 }
 0x165   : > { %v6368_v29 = vpop.f32.mrf.mxu1  ;;  %v6432_v33 = vpop.f32.mrf.mxu0 }
 0x166   : > { %v9047_v55 = vadd.f32 %v6367_v47, %v3939_v38  ;;  %v9050_v53 = vadd.f32 %v6431_v22, %v8867_v6  ;;  %v3947_v6 = vadd.f32 %v8945_v10, %v8813_v42 }
 0x167   : > { %v6369_v34 = vpop.f32.mrf.mxu1  ;;  %v6433_v9 = vpop.f32.mrf.mxu0 }
 0x168   : > { %v6370_v36 = vadd.f32 %v6369_v34, %v6368_v29  ;;  %v6434_v2 = vadd.f32 %v6433_v9, %v6432_v33 }
 0x169   : > { %v6371_v46 = vpop.f32.mrf.mxu1  ;;  %v6435_v1 = vpop.f32.mrf.mxu0 }
 0x16a   : > { %v9054_v12 = vadd.f32 %v6370_v36, %v3944_v51  ;;  %v9057_v35 = vadd.f32 %v6434_v2, %v8875_v59  ;;  %v3952_v59 = vadd.f32 %v8628_v7, %v8813_v42 }
 0x16b   : > { %v6372_v23 = vpop.f32.mrf.mxu1  ;;  %v6436_v56 = vpop.f32.mrf.mxu0 }
 0x16c   : > { %v6373_v39 = vadd.f32 %v6372_v23, %v6371_v46  ;;  %v6437_v11 = vadd.f32 %v6436_v56, %v6435_v1 }
 0x16d   : > { %v6374_v52 = vpop.f32.mrf.mxu1  ;;  %v6438_v61 = vpop.f32.mrf.mxu0 }
 0x16e   : > { %v9061_v0 = vadd.f32 %v6373_v39, %v3947_v6  ;;  %v9064_v40 = vadd.f32 %v6437_v11, %v8885_v17  ;;  %v3955_v17 = vadd.f32 %v8648_v57, %v8813_v42 }
 0x16f   : > { %v6375_v31 = vpop.f32.mrf.mxu1  ;;  %v6439_v4 = vpop.f32.mrf.mxu0 }
 0x170   : > { %v6376_v63 = vadd.f32 %v6375_v31, %v6374_v52  ;;  %v6440_v8 = vadd.f32 %v6439_v4, %v6438_v61 }
 0x171   : > { %v6377_v13 = vpop.f32.mrf.mxu1  ;;  %v6441_v60 = vpop.f32.mrf.mxu0 }
 0x172   : > { %v9068_v28 = vadd.f32 %v6376_v63, %v3952_v59  ;;  %v9071_v10 = vadd.f32 %v6440_v8, %v8893_v19  ;;  %v3960_v19 = vadd.f32 %v8683_v58, %v8813_v42 }
 0x173   : > { %v6378_v21 = vpop.f32.mrf.mxu1  ;;  %v6442_v25 = vpop.f32.mrf.mxu0 }
 0x174   : > { %v6379_v38 = vadd.f32 %v6378_v21, %v6377_v13  ;;  %v6443_v47 = vadd.f32 %v6442_v25, %v6441_v60 }
 0x175   : > { %v6380_v22 = vpop.f32.mrf.mxu1  ;;  %v6444_v29 = vpop.f32.mrf.mxu0 }
 0x176   : > { %v9075_v33 = vadd.f32 %v6379_v38, %v3955_v17  ;;  %v9078_v7 = vadd.f32 %v6443_v47, %v8903_v44  ;;  %v3963_v44 = vadd.f32 %v8711_v26, %v8813_v42 }
 0x177   : > { %v6381_v34 = vpop.f32.mrf.mxu1  ;;  %v6445_v9 = vpop.f32.mrf.mxu0 }
 0x178   : > { %v6382_v51 = vadd.f32 %v6381_v34, %v6380_v22  ;;  %v6446_v36 = vadd.f32 %v6445_v9, %v6444_v29 }
 0x179   : > { %v6383_v2 = vpop.f32.mrf.mxu1  ;;  %v6447_v46 = vpop.f32.mrf.mxu0 }
 0x17a   : > { %v9082_v1 = vadd.f32 %v6382_v51, %v3960_v19  ;;  %v9085_v57 = vadd.f32 %v6446_v36, %v8911_v30  ;;  %v3968_v30 = vadd.f32 %v8754_v49, %v8813_v42 }
 0x17b   : > { %v6384_v23 = vpop.f32.mrf.mxu1  ;;  %v6448_v56 = vpop.f32.mrf.mxu0 }
 0x17c   : > { %v6385_v6 = vadd.f32 %v6384_v23, %v6383_v2  ;;  %v6449_v39 = vadd.f32 %v6448_v56, %v6447_v46 }
 0x17d   : > { %v6386_v11 = vpop.f32.mrf.mxu1  ;;  %v6450_v52 = vpop.f32.mrf.mxu0 }
 0x17e   : > { %v9089_v61 = vadd.f32 %v6385_v6, %v3963_v44  ;;  %v9092_v58 = vadd.f32 %v6449_v39, %v8921_v5  ;;  %v3971_v5 = vadd.f32 %v8772_v45, %v8813_v42 }
 0x17f   : > { %v6387_v31 = vpop.f32.mrf.mxu1  ;;  %v6451_v4 = vpop.f32.mrf.mxu0 }
 0x180   : > { %v6388_v59 = vadd.f32 %v6387_v31, %v6386_v11  ;;  %v6452_v63 = vadd.f32 %v6451_v4, %v6450_v52 }
 0x181   : > { %v6389_v8 = vpop.f32.mrf.mxu1  ;;  %v6453_v13 = vpop.f32.mrf.mxu0 }
 0x182   : > { %v9096_v60 = vadd.f32 %v6388_v59, %v3968_v30  ;;  %v9099_v26 = vadd.f32 %v6452_v63, %v8929_v15  ;;  %v3976_v15 = vadd.f32 %v8789_v24, %v8813_v42 }
 0x183   : > { %v6390_v21 = vpop.f32.mrf.mxu1  ;;  %v6454_v25 = vpop.f32.mrf.mxu0 }
 0x184   : > { %v6391_v17 = vadd.f32 %v6390_v21, %v6389_v8  ;;  %v6455_v38 = vadd.f32 %v6454_v25, %v6453_v13 }
 0x185   : > { %v6392_v47 = vpop.f32.mrf.mxu1  ;;  %v6456_v22 = vpop.f32.mrf.mxu0 }
 0x186   : > { %v9103_v29 = vadd.f32 %v6391_v17, %v3971_v5  ;;  %v9106_v49 = vadd.f32 %v6455_v38, %v8935_v32  ;;  %v3979_v32 = vadd.f32 %v8808_v41, %v8813_v42 }
 0x187   : > { %v6393_v34 = vpop.f32.mrf.mxu1  ;;  %v6457_v9 = vpop.f32.mrf.mxu0 }
 0x188   : > { %v6394_v19 = vadd.f32 %v6393_v34, %v6392_v47  ;;  %v6458_v51 = vadd.f32 %v6457_v9, %v6456_v22 }
 0x189   : > { %v6395_v36 = vpop.f32.mrf.mxu1  ;;  %v6459_v2 = vpop.f32.mrf.mxu0 }
 0x18a   : > { %v9110_v46 = vadd.f32 %v6394_v19, %v3976_v15  ;;  %v9113_v45 = vadd.f32 %v6458_v51, %v8941_v50 }
 0x18b   : > { %v6396_v23 = vpop.f32.mrf.mxu1  ;;  %v6460_v56 = vpop.f32.mrf.mxu0 }
 0x18c   : > { %v6397_v44 = vadd.f32 %v6396_v23, %v6395_v36  ;;  %v6461_v6 = vadd.f32 %v6460_v56, %v6459_v2 }
 0x18d   : > { %v6462_v39 = vpop.f32.mrf.mxu0  ;;  %v9117_v11 = vpop.f32.mrf.mxu1 }
 0x18e   : > { %v9119_v24 = vadd.f32 %v6397_v44, %v3979_v32  ;;  %v9122_v52 = vadd.f32 %v6461_v6, %v8947_v16 }
 0x18f   : > { %v6463_v31 = vpop.f32.mrf.mxu0  ;;  %v9124_v4 = vpop.f32.mrf.mxu1 }
 0x190   : > { %v6464_v50 = vadd.f32 %v6463_v31, %v6462_v39 }
 0x191   : > { %v6465_v30 = vpop.f32.mrf.mxu0  ;;  %v9126_v59 = vpop.f32.mrf.mxu1 }
 0x192   : > { %v9129_v63 = vadd.f32 %v6464_v50, %v9012_v20 }
 0x193   : > { %v6466_v41 = vpop.f32.mrf.mxu0  ;;  %v9131_v42 = vpop.f32.mrf.mxu1 }
 0x194   : > { %v6467_v8 = vadd.f32 %v6466_v41, %v6465_v30 }
 0x195   : > { %v6468_v13 = vpop.f32.mrf.mxu0  ;;  %v9133_v21 = vpop.f32.mrf.mxu1 }
 0x196   : > { %v9136_v16 = vadd.f32 %v6467_v8, %v9019_v37 }
 0x197   : > { %v6469_v25 = vpop.f32.mrf.mxu0  ;;  %v9138_v5 = vpop.f32.mrf.mxu1 }
 0x198   : > { %9604 = vst [vmem:[#allocation5_spill] sm:$0xff] %v9136_v16  ;;  %v6470_v17 = vadd.f32 %v6469_v25, %v6468_v13 }
 0x199   : > { %v6471_v38 = vpop.f32.mrf.mxu0  ;;  %v9140_v47 = vpop.f32.mrf.mxu1 }
 0x19a   : > { %v9143_v20 = vadd.f32 %v6470_v17, %v9026_v18 }
 0x19b   : > { %v6472_v22 = vpop.f32.mrf.mxu0  ;;  %v9145_v34 = vpop.f32.mrf.mxu1 }
 0x19c   : > { %9605 = vst [vmem:[#allocation3_spill] sm:$0xff] %v9143_v20  ;;  %v6473_v9 = vadd.f32 %v6472_v22, %v6471_v38 }
 0x19d   : > { %v6474_v15 = vpop.f32.mrf.mxu0  ;;  %v9147_v19 = vpop.f32.mrf.mxu1 }
 0x19e   : > { %v9150_v37 = vadd.f32 %v6473_v9, %v9033_v43 }
 0x19f   : > { %v6475_v51 = vpop.f32.mrf.mxu0  ;;  %v9152_v36 = vpop.f32.mrf.mxu1 }
 0x1a0   : > { %9606 = vst [vmem:[#allocation4_spill] sm:$0xff] %v9150_v37  ;;  %v6476_v2 = vadd.f32 %v6475_v51, %v6474_v15 }
 0x1a1   : > { %v6477_v23 = vpop.f32.mrf.mxu0  ;;  %v9154_v56 = vpop.f32.mrf.mxu1 }
 0x1a2   : > { %v9157_v18 = vadd.f32 %v6476_v2, %v9040_v54 }
 0x1a3   : > { %v6478_v32 = vpop.f32.mrf.mxu0  ;;  %v9159_v44 = vpop.f32.mrf.mxu1 }
 0x1a4   : > { %9607 = vst [vmem:[#allocation6_spill] sm:$0xff] %v9157_v18  ;;  %v6479_v6 = vadd.f32 %v6478_v32, %v6477_v23 }
 0x1a5   : > { %v6480_v39 = vpop.f32.mrf.mxu0  ;;  %v9161_v31 = vpop.f32.mrf.mxu1 }
 0x1a6   : > { %v9164_v43 = vadd.f32 %v6479_v6, %v9047_v55 }
 0x1a7   : > { %v6481_v50 = vpop.f32.mrf.mxu0  ;;  %v6545_v30 = vpop.f32.mrf.mxu1 }
 0x1a8   : > { %9608 = vst [vmem:[#allocation7_spill] sm:$0xff] %v9164_v43  ;;  %v6482_v41 = vadd.f32 %v6481_v50, %v6480_v39 }
 0x1a9   : > { %v6483_v8 = vpop.f32.mrf.mxu0  ;;  %v9166_v13 = vpop.f32.mrf.mxu1 }
 0x1aa   : > { %v9169_v25 = vadd.f32 %v6482_v41, %v9054_v12 }
 0x1ab   : > { %v6484_v54 = vpop.f32.mrf.mxu0  ;;  %v6548_v17 = vpop.f32.mrf.mxu1 }
 0x1ac   : > { %9609 = vst [vmem:[#allocation8_spill] sm:$0xff] %v9169_v25  ;;  %v6485_v38 = vadd.f32 %v6484_v54, %v6483_v8 }
 0x1ad   : > { %v6486_v22 = vpop.f32.mrf.mxu0  ;;  %v6550_v9 = vpop.f32.mrf.mxu1 }
 0x1ae   : > { %v9172_v15 = vadd.f32 %v6485_v38, %v9061_v0 }
 0x1af   : > { %v6487_v51 = vpop.f32.mrf.mxu0  ;;  %v6551_v55 = vpop.f32.mrf.mxu1 }
 0x1b0   : > { %9610 = vst [vmem:[#allocation9_spill] sm:$0xff] %v9172_v15  ;;  %v6488_v2 = vadd.f32 %v6487_v51, %v6486_v22 }
 0x1b1   : > { %v6489_v23 = vpop.f32.mrf.mxu0  ;;  %v6553_v32 = vpop.f32.mrf.mxu1 }
 0x1b2   : > { %v9175_v6 = vadd.f32 %v6488_v2, %v9068_v28 }
 0x1b3   : > { %v6490_v39 = vpop.f32.mrf.mxu0  ;;  %v6554_v50 = vpop.f32.mrf.mxu1 }
 0x1b4   : > { %9611 = vst [vmem:[#allocation10_spill] sm:$0xff] %v9175_v6  ;;  %v6491_v12 = vadd.f32 %v6490_v39, %v6489_v23 }
 0x1b5   : > { %v6492_v41 = vpop.f32.mrf.mxu0  ;;  %v6556_v43 = vpop.f32.mrf.mxu1 }
 0x1b6   : > { %v9178_v8 = vadd.f32 %v6491_v12, %v9075_v33 }
 0x1b7   : > { %v6493_v54 = vpop.f32.mrf.mxu0  ;;  %v6557_v18 = vpop.f32.mrf.mxu1 }
 0x1b8   : > { %9612 = vst [vmem:[#allocation11_spill] sm:$0xff] %v9178_v8  ;;  %v6494_v0 = vadd.f32 %v6493_v54, %v6492_v41 }
 0x1b9   : > { %v6495_v38 = vpop.f32.mrf.mxu0  ;;  %v6559_v15 = vpop.f32.mrf.mxu1 }
 0x1ba   : > { %v9181_v22 = vadd.f32 %v6494_v0, %v9082_v1 }
 0x1bb   : > { %v6496_v51 = vpop.f32.mrf.mxu0  ;;  %v6560_v25 = vpop.f32.mrf.mxu1 }
 0x1bc   : > { %9613 = vst [vmem:[#allocation12_spill] sm:$0xff] %v9181_v22  ;;  %v6497_v28 = vadd.f32 %v6496_v51, %v6495_v38 }
 0x1bd   : > { %v6498_v2 = vpop.f32.mrf.mxu0  ;;  %v6562_v6 = vpop.f32.mrf.mxu1 }
 0x1be   : > { %v9184_v23 = vadd.f32 %v6497_v28, %v9089_v61  ;;  %v6528_v61 = vadd.f32 %v9124_v4, %v9117_v11  ;;  %v6534_v28 = vadd.f32 %v9138_v5, %v9133_v21  ;;  %v6543_v11 = vadd.f32 %v9159_v44, %v9154_v56 }
 0x1bf   : > { %v6499_v39 = vpop.f32.mrf.mxu0  ;;  %v6563_v37 = vpop.f32.mrf.mxu1  ;;  %v6546_v5 = vadd.f32 %v6545_v30, %v9161_v31  ;;  %v6555_v56 = vadd.f32 %v6554_v50, %v6553_v32 }
 0x1c0   : > { %v6500_v33 = vadd.f32 %v6499_v39, %v6498_v2  ;;  %v6537_v39 = vadd.f32 %v9145_v34, %v9140_v47  ;;  %v6549_v47 = vadd.f32 %v6548_v17, %v9166_v13  ;;  %v6552_v34 = vadd.f32 %v6551_v55, %v6550_v9 }
 0x1c1   : > { %v6501_v12 = vpop.f32.mrf.mxu0  ;;  %v6565_v8 = vpop.f32.mrf.mxu1  ;;  %v9220_v17 = vadd.f32 %v6543_v11, %v9050_v53  ;;  %v9228_v53 = vadd.f32 %v6555_v56, %v9078_v7 }
 0x1c2   : > { %v9187_v41 = vadd.f32 %v6500_v33, %v9096_v60  ;;  %v6531_v60 = vadd.f32 %v9131_v42, %v9126_v59  ;;  %v4347_v59 = vadd.f32 %v6534_v28, %v9029_v3  ;;  %v4339_v42 = vadd.f32 %v6528_v61, %v9015_v48 }
 0x1c3   : > { %v6502_v54 = vpop.f32.mrf.mxu0  ;;  %v6566_v20 = vpop.f32.mrf.mxu1  ;;  %v6558_v3 = vadd.f32 %v6557_v18, %v6556_v43  ;;  %v6564_v48 = vadd.f32 %v6563_v37, %v6562_v6  ;;  %v4366_v18 = vadd.f32 %v6549_v47, %v9064_v40  ;;  %v9225_v37 = vadd.f32 %v6552_v34, %v9071_v10 }
 0x1c4   : > { %v6503_v1 = vadd.f32 %v6502_v54, %v6501_v12 }
 0x1c5   : > { %v6504_v0 = vpop.f32.mrf.mxu0  ;;  %v6568_v22 = vpop.f32.mrf.mxu1  ;;  %v9237_v40 = vadd.f32 %v6564_v48, %v9099_v26 }
 0x1c6   : > { %v9190_v38 = vadd.f32 %v6503_v1, %v9103_v29  ;;  %v6540_v29 = vadd.f32 %v9152_v36, %v9147_v19 }
 0x1c7   : > { %v6505_v51 = vpop.f32.mrf.mxu0  ;;  %v6569_v16 = vpop.f32.mrf.mxu1 }
 0x1c8   : > { %v6506_v2 = vadd.f32 %v6505_v51, %v6504_v0  ;;  %v4342_v0 = vadd.f32 %v6531_v60, %v9022_v62  ;;  %v9217_v30 = vadd.f32 %v6540_v29, %v9043_v14  ;;  %v6561_v51 = vadd.f32 %v6560_v25, %v6559_v15 }
 0x1c9   : > { %v6507_v33 = vpop.f32.mrf.mxu0  ;;  %v6571_v12 = vpop.f32.mrf.mxu1  ;;  %v6570_v55 = vadd.f32 %v6569_v16, %v6568_v22 }
 0x1ca   : > { %v9203_v54 = vadd.f32 %v6506_v2, %v9110_v46  ;;  %v4350_v46 = vadd.f32 %v6537_v39, %v9036_v27  ;;  %v6567_v27 = vadd.f32 %v6566_v20, %v6565_v8  ;;  %v9234_v16 = vadd.f32 %v6561_v51, %v9092_v58 }
 0x1cb   : > { %v6508_v4 = vpop.f32.mrf.mxu0  ;;  %v6572_v21 = vpop.f32.mrf.mxu1 }
 0x1cc   : > { %v6509_v1 = vadd.f32 %v6508_v4, %v6507_v33  ;;  %v6573_v32 = vadd.f32 %v6572_v21, %v6571_v12  ;;  %v9240_v2 = vadd.f32 %v6567_v27, %v9106_v49  ;;  %v6065_v4 = vld [vmem:[%s8954_s18 + $0x18] sm:$0xf] }
 0x1cd   : > { %v6574_v19 = vpop.f32.mrf.mxu1  ;;  %v6664_v36 = vpop.f32.mrf.mxu0 }
 0x1ce   : > { %v9214_v44 = vadd.f32 %v6509_v1, %v9119_v24  ;;  %v4508_v31 = vadd.f32 %v6664_v36, %v4347_v59  ;;  %v4363_v24 = vadd.f32 %v6546_v5, %v9057_v35  ;;  %v9231_v35 = vadd.f32 %v6558_v3, %v9085_v57 }
 0x1cf   : > { %v6575_v61 = vpop.f32.mrf.mxu1  ;;  %v4499_v13 = vpop.f32.mrf.mxu0  ;;  %v9243_v57 = vadd.f32 %v6570_v55, %v9113_v45  ;;  %v9246_v58 = vadd.f32 %v6573_v32, %v9122_v52  ;;  %v6068_v55 = vld [vmem:[%s8954_s18 + $0x20] sm:$0x1] }
 0x1d0   : > { %v4628_v62 = vmax.f32 %v4508_v31, 0.0  ;;  %v4500_v9 = vadd.f32 %v4499_v13, %v4339_v42  ;;  %v6576_v20 = vadd.f32 %v6575_v61, %v6574_v19  ;;  %v9616_v19 = vld [vmem:[#allocation5_spill] sm:$0xff] }
 0x1d1   : > { %v6577_v14 = vpop.f32.mrf.mxu1  ;;  %v6665_v50 = vpop.f32.mrf.mxu0 }
 0x1d2   : > { %v6144_v43 = vpack.c.bf16 %v4628_v62, %v4628_v62  ;;  %v4626_v25 = vmax.f32 %v4500_v9, 0.0  ;;  %v4511_v15 = vadd.f32 %v6665_v50, %v4350_v46  ;;  %v9256_v52 = vadd.f32 %v6576_v20, %v9129_v63 }
 0x1d3   : > { %v6578_v6 = vpop.f32.mrf.mxu1  ;;  %v4502_v8 = vpop.f32.mrf.mxu0 }
 0x1d4   : > { %v4829_v10 = vshrl.u32 %v6144_v43, 16  ;;  %v6142_v22 = vpack.c.bf16 %v4626_v25, %v4626_v25  ;;  %v4629_v28 = vmax.f32 %v4511_v15, 0.0  ;;  %v6579_v7 = vadd.f32 %v6578_v6, %v6577_v14 }
 0x1d5   : > { %v4503_v60 = vadd.f32 %v4502_v8, %v4342_v0  ;;  %v6580_v39 = vpop.f32.mrf.mxu1  ;;  %v6668_v33 = vpop.f32.mrf.mxu0  ;;  %v4832_v26 = vshll.u32 %v6144_v43, 16  ;;  %v6060_v0 = vld [vmem:[%s8954_s18 + $0xc] sm:$0xf] }
 0x1d6   : > { %v4831_v12 = vrot.slane %v4829_v10, 7  ;;  %v4812_v29 = vshrl.u32 %v6142_v22, 16  ;;  %v6145_v11 = vpack.c.bf16 %v4629_v28, %v4629_v28  ;;  %v4815_v21 = vshll.u32 %v6142_v22, 16 }
 0x1d7   : > { %v4627_v5 = vmax.f32 %v4503_v60, 0.0  ;;  %v4524_v1 = vadd.f32 %v6668_v33, %v4363_v24  ;;  %v6581_v45 = vpop.f32.mrf.mxu1  ;;  %v4515_v59 = vpop.f32.mrf.mxu0  ;;  %v9259_v36 = vadd.f32 %v6579_v7, %v9616_v19 }
 0x1d8   : > { %v4834_v42 = vor.u32 %v4832_v26, %v4831_v12  ;;  %v4814_v47 = vrot.slane %v4812_v29, 7  ;;  %v4837_v34 = vshrl.u32 %v6145_v11, 16  ;;  %v4835_v46 = vrot.slane %v4831_v12, 4  ;;  %v6063_v12 = vld [vmem:[%s8954_s18 + $0x14] sm:$0x1] }
 0x1d9   : > { %v4840_v56 = vshll.u32 %v6145_v11, 16  ;;  %v6143_v31 = vpack.c.bf16 %v4627_v5, %v4627_v5  ;;  %v4632_v3 = vmax.f32 %v4524_v1, 0.0  ;;  %v6583_v51 = vpop.f32.mrf.mxu1  ;;  %v6669_v48 = vpop.f32.mrf.mxu0  ;;  %v9270_v62 = vadd.f32 %v6581_v45, %v6580_v39  ;;  %v6075_v45 = vld [vmem:[%s8954_s18 + $0x30] sm:$0xf] }
 0x1da   : > { %v5145_v61 = vsel %vm9250_vm7, %v4834_v42, %v6065_v4  ;;  %v4817_v63 = vor.u32 %v4815_v21, %v4814_v47  ;;  %v4839_v27 = vrot.slane %v4837_v34, 7  ;;  %v4818_v9 = vrot.slane %v4814_v47, 4 }
 0x1db   : > { %6066 = vst [vmem:[%s8954_s18 + $0x18] sm:$0xf] %v5145_v61  ;;  %v4820_v32 = vshrl.u32 %v6143_v31, 16  ;;  %v6148_v14 = vpack.c.bf16 %v4632_v3, %v4632_v3  ;;  %v4516_v50 = vadd.f32 %v4515_v59, %v9217_v30  ;;  %v6584_v43 = vpop.f32.mrf.mxu1  ;;  %v4518_v25 = vpop.f32.mrf.mxu0  ;;  %v4527_v8 = vadd.f32 %v6669_v48, %v4366_v18 }
 0x1dc   : > { %v5136_v15 = vsel %vm9250_vm7, %v4817_v63, %v6060_v0  ;;  %v4842_v20 = vor.u32 %v4840_v56, %v4839_v27  ;;  %v4844_v6 = vrot.slane %v4839_v27, 4  ;;  %v4823_v22 = vshll.u32 %v6143_v31, 16 }
 0x1dd   : > { %6061 = vst [vmem:[%s8954_s18 + $0xc] sm:$0xf] %v5136_v15  ;;  %v4822_v10 = vrot.slane %v4820_v32, 7  ;;  %v4863_v28 = vshrl.u32 %v6148_v14, 16  ;;  %v4630_v7 = vmax.f32 %v4516_v50, 0.0  ;;  %v6586_v60 = vpop.f32.mrf.mxu1  ;;  %v6672_v39 = vpop.f32.mrf.mxu0  ;;  %v4866_v26 = vshll.u32 %v6148_v14, 16 }
 0x1de   : > { %v4843_v30 = vsel %vm9266_vm8, %v4835_v46, %v4842_v20  ;;  %v5149_v33 = vsel %vm9275_vm9, %v4844_v6, %v6068_v55  ;;  %v4633_v29 = vmax.f32 %v4527_v8, 0.0  ;;  %v9292_v42 = vadd.f32 %v6584_v43, %v6583_v51  ;;  %v6070_v15 = vld [vmem:[%s8954_s18 + $0x24] sm:$0xf]  ;;  %v6078_v20 = vld [vmem:[%s8954_s18 + $0x38] sm:$0x1] }
 0x1df   : > { %6067 = vst [vmem:[%s8954_s18 + $0x1c] sm:$0xf] %v4843_v30  ;;  %6069 = vst [vmem:[%s8954_s18 + $0x20] sm:$0x1] %v5149_v33  ;;  %v4825_v18 = vor.u32 %v4823_v22, %v4822_v10  ;;  %v4827_v11 = vrot.slane %v4822_v10, 4  ;;  %v4865_v4 = vrot.slane %v4863_v28, 7  ;;  %v6146_v21 = vpack.c.bf16 %v4630_v7, %v4630_v7  ;;  %v6587_v5 = vpop.f32.mrf.mxu1  ;;  %v4531_v1 = vpop.f32.mrf.mxu0 }
 0x1e0   : > { %v6149_v59 = vpack.c.bf16 %v4633_v29, %v4633_v29  ;;  %v4519_v47 = vadd.f32 %v4518_v25, %v9220_v17  ;;  %v4540_v34 = vadd.f32 %v6672_v39, %v9231_v35  ;;  %v9300_v56 = vadd.f32 %v6587_v5, %v6586_v60 }
 0x1e1   : > { %v4826_v19 = vsel %vm9266_vm8, %v4818_v9, %v4825_v18  ;;  %v5142_v46 = vsel %vm9275_vm9, %v4827_v11, %v6063_v12  ;;  %v4868_v0 = vor.u32 %v4866_v26, %v4865_v4  ;;  %v6589_v31 = vpop.f32.mrf.mxu1  ;;  %v6673_v3 = vpop.f32.mrf.mxu0  ;;  %v4869_v51 = vrot.slane %v4865_v4, 4 }
 0x1e2   : > { %6062 = vst [vmem:[%s8954_s18 + $0x10] sm:$0xf] %v4826_v19  ;;  %6064 = vst [vmem:[%s8954_s18 + $0x14] sm:$0x1] %v5142_v46  ;;  %v4846_v17 = vshrl.u32 %v6146_v21, 16  ;;  %v4849_v48 = vshll.u32 %v6146_v21, 16  ;;  %v4532_v9 = vadd.f32 %v4531_v1, %v9225_v37  ;;  %v4543_v25 = vadd.f32 %v6673_v3, %v9234_v16 }
 0x1e3   : > { %v4871_v35 = vshrl.u32 %v6149_v59, 16  ;;  %v5159_v61 = vsel %vm9250_vm7, %v4868_v0, %v6075_v45  ;;  %v4631_v63 = vmax.f32 %v4519_v47, 0.0  ;;  %v4636_v27 = vmax.f32 %v4540_v34, 0.0  ;;  %v6590_v55 = vpop.f32.mrf.mxu1  ;;  %v4534_v32 = vpop.f32.mrf.mxu0  ;;  %v6073_v1 = vld [vmem:[%s8954_s18 + $0x2c] sm:$0x1] }
 0x1e4   : > { %6076 = vst [vmem:[%s8954_s18 + $0x30] sm:$0xf] %v5159_v61  ;;  %v4848_v14 = vrot.slane %v4846_v17, 7  ;;  %v4874_v43 = vshll.u32 %v6149_v59, 16  ;;  %v4634_v10 = vmax.f32 %v4532_v9, 0.0  ;;  %v4535_v22 = vadd.f32 %v4534_v32, %v9228_v53 }
 0x1e5   : > { %v4873_v50 = vrot.slane %v4871_v35, 7  ;;  %v6147_v6 = vpack.c.bf16 %v4631_v63, %v4631_v63  ;;  %v6152_v8 = vpack.c.bf16 %v4636_v27, %v4636_v27  ;;  %v6592_v28 = vpop.f32.mrf.mxu1  ;;  %v6676_v7 = vpop.f32.mrf.mxu0  ;;  %v9312_v30 = vadd.f32 %v6590_v55, %v6589_v31  ;;  %v6085_v0 = vld [vmem:[%s8954_s18 + $0x48] sm:$0xf] }
 0x1e6   : > { %v4851_v37 = vor.u32 %v4849_v48, %v4848_v14  ;;  %v6150_v21 = vpack.c.bf16 %v4634_v10, %v4634_v10  ;;  %v4637_v59 = vmax.f32 %v4543_v25, 0.0  ;;  %v4635_v47 = vmax.f32 %v4535_v22, 0.0  ;;  %v6080_v25 = vld [vmem:[%s8954_s18 + $0x3c] sm:$0xf] }
 0x1e7   : > { %v4876_v60 = vor.u32 %v4874_v43, %v4873_v50  ;;  %v4878_v39 = vrot.slane %v4873_v50, 4  ;;  %v4854_v33 = vshrl.u32 %v6147_v6, 16  ;;  %v4857_v16 = vshll.u32 %v6147_v6, 16  ;;  %v6593_v29 = vpop.f32.mrf.mxu1  ;;  %v4547_v18 = vpop.f32.mrf.mxu0 }
 0x1e8   : > { %v4897_v12 = vshrl.u32 %v6152_v8, 16  ;;  %v4900_v26 = vshll.u32 %v6152_v8, 16  ;;  %v5152_v53 = vsel %vm9250_vm7, %v4851_v37, %v6070_v15  ;;  %v4852_v46 = vrot.slane %v4848_v14, 4 }
 0x1e9   : > { %v4877_v11 = vsel %vm9266_vm8, %v4869_v51, %v4876_v60  ;;  %v5163_v4 = vsel %vm9275_vm9, %v4878_v39, %v6078_v20  ;;  %6071 = vst [vmem:[%s8954_s18 + $0x24] sm:$0xf] %v5152_v53  ;;  %v4856_v5 = vrot.slane %v4854_v33, 7  ;;  %v9326_v34 = vpop.f32.mrf.mxu1  ;;  %v6677_v19 = vpop.f32.mrf.mxu0  ;;  %v4880_v31 = vshrl.u32 %v6150_v21, 16 }
 0x1ea   : > { %6077 = vst [vmem:[%s8954_s18 + $0x34] sm:$0xf] %v4877_v11  ;;  %6079 = vst [vmem:[%s8954_s18 + $0x38] sm:$0x1] %v5163_v4  ;;  %v9324_v45 = vrot.slane %v4897_v12, 7  ;;  %v4883_v3 = vshll.u32 %v6150_v21, 16  ;;  %v4556_v51 = vadd.f32 %v6676_v7, %v9243_v57  ;;  %v9331_v61 = vadd.f32 %v6593_v29, %v6592_v28 }
 0x1eb   : > { %v4859_v17 = vor.u32 %v4857_v16, %v4856_v5  ;;  %v4861_v48 = vrot.slane %v4856_v5, 4  ;;  %v6596_v63 = vpop.f32.mrf.mxu1  ;;  %v4550_v27 = vpop.f32.mrf.mxu0  ;;  %v4882_v9 = vrot.slane %v4880_v31, 7  ;;  %v6153_v55 = vpack.c.bf16 %v4637_v59, %v4637_v59 }
 0x1ec   : > { %v4902_v35 = vor.u32 %v4900_v26, %v9324_v45  ;;  %v6151_v32 = vpack.c.bf16 %v4635_v47, %v4635_v47  ;;  %v4640_v14 = vmax.f32 %v4556_v51, 0.0  ;;  %v4548_v15 = vadd.f32 %v4547_v18, %v9237_v40  ;;  %v6088_v18 = vld [vmem:[%s8954_s18 + $0x50] sm:$0x1]  ;;  %v6083_v47 = vld [vmem:[%s8954_s18 + $0x44] sm:$0x1] }
 0x1ed   : > { %v4860_v50 = vsel %vm9266_vm8, %v4852_v46, %v4859_v17  ;;  %v5156_v57 = vsel %vm9275_vm9, %v4861_v48, %v6073_v1  ;;  %v9341_v20 = vpop.f32.mrf.mxu1  ;;  %v9343_v6 = vpop.f32.mrf.mxu0  ;;  %v4903_v8 = vrot.slane %v9324_v45, 4  ;;  %v4885_v10 = vor.u32 %v4883_v3, %v4882_v9 }
 0x1ee   : > { %v5173_v43 = vsel %vm9250_vm7, %v4902_v35, %v6085_v0  ;;  %6072 = vst [vmem:[%s8954_s18 + $0x28] sm:$0xf] %v4860_v50  ;;  %6074 = vst [vmem:[%s8954_s18 + $0x2c] sm:$0x1] %v5156_v57  ;;  %v4886_v22 = vrot.slane %v4882_v9, 4  ;;  %v4905_v28 = vshrl.u32 %v6153_v55, 16  ;;  %v6156_v60 = vpack.c.bf16 %v4640_v14, %v4640_v14 }
 0x1ef   : > { %6086 = vst [vmem:[%s8954_s18 + $0x48] sm:$0xf] %v5173_v43  ;;  %v4908_v7 = vshll.u32 %v6153_v55, 16  ;;  %v4888_v37 = vshrl.u32 %v6151_v32, 16  ;;  %v4638_v39 = vmax.f32 %v4548_v15, 0.0  ;;  %v6599_v33 = vpop.f32.mrf.mxu1  ;;  %v4563_v40 = vpop.f32.mrf.mxu0  ;;  %v5166_v16 = vsel %vm9250_vm7, %v4885_v10, %v6080_v25 }
 0x1f0   : > { %v4907_v12 = vrot.slane %v4905_v28, 7  ;;  %v4891_v26 = vshll.u32 %v6151_v32, 16  ;;  %v4559_v29 = vadd.f32 %v6677_v19, %v9246_v58  ;;  %6081 = vst [vmem:[%s8954_s18 + $0x3c] sm:$0xf] %v5166_v16  ;;  %v4931_v11 = vshrl.u32 %v6156_v60, 16  ;;  %v9621_v28 = vld [vmem:[#allocation3_spill] sm:$0xff] }
 0x1f1   : > { %v4890_v53 = vrot.slane %v4888_v37, 7  ;;  %v4934_v4 = vshll.u32 %v6156_v60, 16  ;;  %v6154_v21 = vpack.c.bf16 %v4638_v39, %v4638_v39  ;;  %v9354_v5 = vpop.f32.mrf.mxu1  ;;  %v6681_v1 = vpop.f32.mrf.mxu0  ;;  %v4551_v0 = vadd.f32 %v4550_v27, %v9240_v2  ;;  %v6095_v9 = vld [vmem:[%s8954_s18 + $0x60] sm:$0xf]  ;;  %v6090_v10 = vld [vmem:[%s8954_s18 + $0x54] sm:$0xf] }
 0x1f2   : > { %v4910_v45 = vor.u32 %v4908_v7, %v4907_v12  ;;  %v4912_v59 = vrot.slane %v4907_v12, 4  ;;  %v4641_v46 = vmax.f32 %v4559_v29, 0.0  ;;  %v4933_v19 = vrot.slane %v4931_v11, 7 }
 0x1f3   : > { %v4893_v31 = vor.u32 %v4891_v26, %v4890_v53  ;;  %v4895_v58 = vrot.slane %v4890_v53, 4  ;;  %v4914_v3 = vshrl.u32 %v6154_v21, 16  ;;  %v9358_v51 = vpop.f32.mrf.mxu1  ;;  %v4566_v17 = vpop.f32.mrf.mxu0  ;;  %v9366_v32 = vadd.f32 %v6596_v63, %v9326_v34  ;;  %v6098_v53 = vld [vmem:[%s8954_s18 + $0x68] sm:$0x1] }
 0x1f4   : > { %v4911_v48 = vsel %vm9266_vm8, %v4903_v8, %v4910_v45  ;;  %v5177_v35 = vsel %vm9275_vm9, %v4912_v59, %v6088_v18  ;;  %v6157_v55 = vpack.c.bf16 %v4641_v46, %v4641_v46  ;;  %v4936_v14 = vor.u32 %v4934_v4, %v4933_v19 }
 0x1f5   : > { %6087 = vst [vmem:[%s8954_s18 + $0x4c] sm:$0xf] %v4911_v48  ;;  %6089 = vst [vmem:[%s8954_s18 + $0x50] sm:$0x1] %v5177_v35  ;;  %v4894_v2 = vsel %vm9266_vm8, %v4886_v22, %v4893_v31  ;;  %v5170_v27 = vsel %vm9275_vm9, %v4895_v58, %v6083_v47  ;;  %v4917_v50 = vshll.u32 %v6154_v21, 16  ;;  %v9374_v57 = vpop.f32.mrf.mxu1  ;;  %v9376_v43 = vpop.f32.mrf.mxu0  ;;  %v4937_v34 = vrot.slane %v4933_v19, 4 }
 0x1f6   : > { %6082 = vst [vmem:[%s8954_s18 + $0x40] sm:$0xf] %v4894_v2  ;;  %6084 = vst [vmem:[%s8954_s18 + $0x44] sm:$0x1] %v5170_v27  ;;  %v4916_v63 = vrot.slane %v4914_v3, 7  ;;  %v4939_v25 = vshrl.u32 %v6157_v55, 16  ;;  %v5187_v8 = vsel %vm9250_vm7, %v4936_v14, %v6095_v9  ;;  %v4411_v7 = vadd.f32 %v9270_v62, %v9621_v28 }
 0x1f7   : > { %v4639_v15 = vmax.f32 %v4551_v0, 0.0  ;;  %v4942_v22 = vshll.u32 %v6157_v55, 16  ;;  %v4564_v37 = vadd.f32 %v4563_v40, %v9256_v52  ;;  %v9386_v60 = vpop.f32.mrf.mxu1  ;;  %v9388_v39 = vpop.f32.mrf.mxu0  ;;  %6096 = vst [vmem:[%s8954_s18 + $0x60] sm:$0xf] %v5187_v8  ;;  %v9392_v29 = vadd.f32 %v6599_v33, %v9341_v20  ;;  %v9622_v62 = vld [vmem:[#allocation4_spill] sm:$0xff] }
 0x1f8   : > { %v4919_v16 = vor.u32 %v4917_v50, %v4916_v63  ;;  %v4941_v12 = vrot.slane %v4939_v25, 7  ;;  %v4920_v18 = vrot.slane %v4916_v63, 4  ;;  %v4572_v11 = vadd.f32 %v9343_v6, %v4411_v7  ;;  %v6093_v35 = vld [vmem:[%s8954_s18 + $0x5c] sm:$0x1]  ;;  %v9623_v25 = vld [vmem:[#allocation8_spill] sm:$0xff] }
 0x1f9   : > { %v6155_v26 = vpack.c.bf16 %v4639_v15, %v4639_v15  ;;  %v4642_v4 = vmax.f32 %v4564_v37, 0.0  ;;  %v4414_v52 = vadd.f32 %v9292_v42, %v9622_v62  ;;  %v9398_v40 = vpop.f32.mrf.mxu1  ;;  %v9400_v21 = vpop.f32.mrf.mxu0  ;;  %v4567_v48 = vadd.f32 %v4566_v17, %v9259_v36  ;;  %v6100_v37 = vld [vmem:[%s8954_s18 + $0x6c] sm:$0xf]  ;;  %v6105_v62 = vld [vmem:[%s8954_s18 + $0x78] sm:$0xf] }
 0x1fa   : > { %v5180_v45 = vsel %vm9250_vm7, %v4919_v16, %v6090_v10  ;;  %v4944_v59 = vor.u32 %v4942_v22, %v4941_v12  ;;  %v4946_v20 = vrot.slane %v4941_v12, 4  ;;  %v4644_v6 = vmax.f32 %v4572_v11, 0.0 }
 0x1fb   : > { %v4922_v33 = vshrl.u32 %v6155_v26, 16  ;;  %6091 = vst [vmem:[%s8954_s18 + $0x54] sm:$0xf] %v5180_v45  ;;  %v4925_v47 = vshll.u32 %v6155_v26, 16  ;;  %v6158_v46 = vpack.c.bf16 %v4642_v4, %v4642_v4  ;;  %v4575_v0 = vadd.f32 %v6681_v1, %v4414_v52  ;;  %v9405_v31 = vpop.f32.mrf.mxu1  ;;  %v9407_v42 = vpop.f32.mrf.mxu0 }
 0x1fc   : > { %v4945_v58 = vsel %vm9266_vm8, %v4937_v34, %v4944_v59  ;;  %v5191_v19 = vsel %vm9275_vm9, %v4946_v20, %v6098_v53  ;;  %v6160_v9 = vpack.c.bf16 %v4644_v6, %v4644_v6  ;;  %v4643_v63 = vmax.f32 %v4567_v48, 0.0 }
 0x1fd   : > { %v4924_v3 = vrot.slane %v4922_v33, 7  ;;  %6097 = vst [vmem:[%s8954_s18 + $0x64] sm:$0xf] %v4945_v58  ;;  %6099 = vst [vmem:[%s8954_s18 + $0x68] sm:$0x1] %v5191_v19  ;;  %v4948_v55 = vshrl.u32 %v6158_v46, 16  ;;  %v9417_v27 = vpop.f32.mrf.mxu1  ;;  %v9419_v14 = vpop.f32.mrf.mxu0  ;;  %v4427_v36 = vadd.f32 %v9331_v61, %v9623_v25  ;;  %v6606_v19 = vadd.f32 %v9386_v60, %v9374_v57 }
 0x1fe   : > { %v4951_v1 = vshll.u32 %v6158_v46, 16  ;;  %v4645_v2 = vmax.f32 %v4575_v0, 0.0  ;;  %v4965_v17 = vshrl.u32 %v6160_v9, 16  ;;  %v4968_v15 = vshll.u32 %v6160_v9, 16  ;;  %v6108_v46 = vld [vmem:[%s8954_s18 + $0x80] sm:$0x1] }
 0x1ff   : > { %v4927_v50 = vor.u32 %v4925_v47, %v4924_v3  ;;  %v4929_v34 = vrot.slane %v4924_v3, 4  ;;  %v4950_v8 = vrot.slane %v4948_v55, 7  ;;  %v9423_v22 = vpop.f32.mrf.mxu1  ;;  %v6159_v16 = vpack.c.bf16 %v4643_v63, %v4643_v63  ;;  %v4595_v4 = vpop.f32.mrf.mxu0  ;;  %v9624_v3 = vld [vmem:[#allocation6_spill] sm:$0xff] }
 0x200   : > { %v6161_v10 = vpack.c.bf16 %v4645_v2, %v4645_v2  ;;  %v4588_v12 = vadd.f32 %v9376_v43, %v4427_v36  ;;  %v4967_v61 = vrot.slane %v4965_v17, 7  ;;  %v4419_v48 = vadd.f32 %v9300_v56, %v9624_v3  ;;  %v9625_v2 = vld [vmem:[#allocation9_spill] sm:$0xff] }
 0x201   : > { %v4928_v28 = vsel %vm9266_vm8, %v4920_v18, %v4927_v50  ;;  %v5184_v7 = vsel %vm9275_vm9, %v4929_v34, %v6093_v35  ;;  %v4953_v26 = vor.u32 %v4951_v1, %v4950_v8  ;;  %v4954_v53 = vrot.slane %v4950_v8, 4  ;;  %v6613_v20 = vpop.f32.mrf.mxu1  ;;  %v6103_v1 = vld [vmem:[%s8954_s18 + $0x74] sm:$0x1]  ;;  %v6689_v34 = vpop.f32.mrf.mxu0 }
 0x202   : > { %6092 = vst [vmem:[%s8954_s18 + $0x58] sm:$0xf] %v4928_v28  ;;  %6094 = vst [vmem:[%s8954_s18 + $0x5c] sm:$0x1] %v5184_v7  ;;  %v4973_v11 = vshrl.u32 %v6161_v10, 16  ;;  %v4976_v52 = vshll.u32 %v6161_v10, 16  ;;  %v4970_v33 = vor.u32 %v4968_v15, %v4967_v61  ;;  %v4430_v50 = vadd.f32 %v9366_v32, %v9625_v2 }
 0x203   : > { %v4956_v45 = vshrl.u32 %v6159_v16, 16  ;;  %v4959_v18 = vshll.u32 %v6159_v16, 16  ;;  %v4648_v59 = vmax.f32 %v4588_v12, 0.0  ;;  %v4971_v47 = vrot.slane %v4967_v61, 4  ;;  %v6614_v25 = vpop.f32.mrf.mxu1  ;;  %v9627_v61 = vld [vmem:[#allocation12_spill] sm:$0xff] }
 0x204   : > { %v5194_v43 = vsel %vm9250_vm7, %v4953_v26, %v6100_v37  ;;  %v4975_v6 = vrot.slane %v4973_v11, 7  ;;  %v5201_v35 = vsel %vm9250_vm7, %v4970_v33, %v6105_v62  ;;  %v4580_v15 = vadd.f32 %v9388_v39, %v4419_v48  ;;  %v6115_v37 = vld [vmem:[%s8954_s18 + $0x90] sm:$0xf]  ;;  %v9626_v39 = vld [vmem:[#allocation7_spill] sm:$0xff]  ;;  %v4598_v11 = vpop.f32.mrf.mxu0 }
 0x205   : > { %6101 = vst [vmem:[%s8954_s18 + $0x6c] sm:$0xf] %v5194_v43  ;;  %v4958_v0 = vrot.slane %v4956_v45, 7  ;;  %v6164_v58 = vpack.c.bf16 %v4648_v59, %v4648_v59  ;;  %6106 = vst [vmem:[%s8954_s18 + $0x78] sm:$0xf] %v5201_v35  ;;  %v4591_v32 = vadd.f32 %v9400_v21, %v4430_v50  ;;  %v6609_v7 = vadd.f32 %v9405_v31, %v9398_v40  ;;  %v6616_v40 = vpop.f32.mrf.mxu1 }
 0x206   : > { %v4978_v9 = vor.u32 %v4976_v52, %v4975_v6  ;;  %v4980_v55 = vrot.slane %v4975_v6, 4  ;;  %v4646_v16 = vmax.f32 %v4580_v15, 0.0  ;;  %v4422_v21 = vadd.f32 %v9312_v30, %v9626_v39  ;;  %v9628_v52 = vld [vmem:[#allocation10_spill] sm:$0xff]  ;;  %v6113_v39 = vld [vmem:[%s8954_s18 + $0x8c] sm:$0x1] }
 0x207   : > { %v4961_v63 = vor.u32 %v4959_v18, %v4958_v0  ;;  %v4963_v57 = vrot.slane %v4958_v0, 4  ;;  %v4999_v60 = vshrl.u32 %v6164_v58, 16  ;;  %v5002_v56 = vshll.u32 %v6164_v58, 16  ;;  %v6617_v3 = vpop.f32.mrf.mxu1 }
 0x208   : > { %v4979_v36 = vsel %vm9266_vm8, %v4971_v47, %v4978_v9  ;;  %v5205_v17 = vsel %vm9275_vm9, %v4980_v55, %v6108_v46  ;;  %v4649_v12 = vmax.f32 %v4591_v32, 0.0  ;;  %v4443_v26 = vadd.f32 %v6606_v19, %v9627_v61  ;;  %v6110_v9 = vld [vmem:[%s8954_s18 + $0x84] sm:$0xf]  ;;  %v6118_v55 = vld [vmem:[%s8954_s18 + $0x98] sm:$0x1] }
 0x209   : > { %6107 = vst [vmem:[%s8954_s18 + $0x7c] sm:$0xf] %v4979_v36  ;;  %6109 = vst [vmem:[%s8954_s18 + $0x80] sm:$0x1] %v5205_v17  ;;  %v4962_v8 = vsel %vm9266_vm8, %v4954_v53, %v4961_v63  ;;  %v5198_v10 = vsel %vm9275_vm9, %v4963_v57, %v6103_v1  ;;  %v5001_v28 = vrot.slane %v4999_v60, 7  ;;  %v6603_v53 = vadd.f32 %v9358_v51, %v9354_v5  ;;  %v9629_v36 = vld [vmem:[#allocation11_spill] sm:$0xff] }
 0x20a   : > { %6102 = vst [vmem:[%s8954_s18 + $0x70] sm:$0xf] %v4962_v8  ;;  %6104 = vst [vmem:[%s8954_s18 + $0x74] sm:$0x1] %v5198_v10  ;;  %v4435_v45 = vadd.f32 %v9392_v29, %v9628_v52  ;;  %v6162_v31 = vpack.c.bf16 %v4646_v16, %v4646_v16  ;;  %v6165_v18 = vpack.c.bf16 %v4649_v12, %v4649_v12 }
 0x20b   : > { %v5004_v62 = vor.u32 %v5002_v56, %v5001_v28  ;;  %v4583_v59 = vadd.f32 %v9407_v42, %v4422_v21  ;;  %v4604_v33 = vadd.f32 %v9419_v14, %v4443_v26  ;;  %v5005_v47 = vrot.slane %v5001_v28, 4  ;;  %v9482_v42 = vpop.f32.mrf.mxu0  ;;  %v6619_v28 = vpop.f32.mrf.mxu1  ;;  %v6125_v21 = vld [vmem:[%s8954_s18 + $0xa8] sm:$0xf] }
 0x20c   : > { %v4596_v43 = vadd.f32 %v4595_v4, %v4435_v45  ;;  %v4446_v6 = vadd.f32 %v6609_v7, %v9184_v23  ;;  %v4982_v5 = vshrl.u32 %v6162_v31, 16  ;;  %v5007_v51 = vshrl.u32 %v6165_v18, 16 }
 0x20d   : > { %v5215_v30 = vsel %vm9250_vm7, %v5004_v62, %v6115_v37  ;;  %v6612_v29 = vadd.f32 %v9423_v22, %v9417_v27  ;;  %v9480_v46 = vadd.f32 %v6614_v25, %v6613_v20  ;;  %v4647_v14 = vmax.f32 %v4583_v59, 0.0  ;;  %v4611_v60 = vpop.f32.mrf.mxu0  ;;  %v6120_v59 = vld [vmem:[%s8954_s18 + $0x9c] sm:$0xf] }
 0x20e   : > { %6116 = vst [vmem:[%s8954_s18 + $0x90] sm:$0xf] %v5215_v30  ;;  %v4652_v0 = vmax.f32 %v4604_v33, 0.0  ;;  %v4650_v58 = vmax.f32 %v4596_v43, 0.0  ;;  %v4607_v19 = vadd.f32 %v6689_v34, %v4446_v6  ;;  %v4984_v4 = vrot.slane %v4982_v5, 7 }
 0x20f   : > { %v4985_v48 = vshll.u32 %v6162_v31, 16  ;;  %v5009_v23 = vrot.slane %v5007_v51, 7  ;;  %v5010_v35 = vshll.u32 %v6165_v18, 16  ;;  %v6163_v1 = vpack.c.bf16 %v4647_v14, %v4647_v14  ;;  %v6693_v52 = vpop.f32.mrf.mxu0 }
 0x210   : > { %v6168_v2 = vpack.c.bf16 %v4652_v0, %v4652_v0  ;;  %v6166_v50 = vpack.c.bf16 %v4650_v58, %v4650_v58  ;;  %v4653_v27 = vmax.f32 %v4607_v19, 0.0  ;;  %v6618_v57 = vadd.f32 %v6617_v3, %v6616_v40  ;;  %v6128_v3 = vld [vmem:[%s8954_s18 + $0xb0] sm:$0x1] }
 0x211   : > { %v4987_v22 = vor.u32 %v4985_v48, %v4984_v4  ;;  %v5012_v20 = vor.u32 %v5010_v35, %v5009_v23  ;;  %v5014_v63 = vrot.slane %v5009_v23, 4  ;;  %v4990_v34 = vshrl.u32 %v6163_v1, 16  ;;  %v4614_v58 = vpop.f32.mrf.mxu0 }
 0x212   : > { %v4993_v56 = vshll.u32 %v6163_v1, 16  ;;  %v5033_v25 = vshrl.u32 %v6168_v2, 16  ;;  %v4438_v17 = vadd.f32 %v6603_v53, %v9629_v36  ;;  %v5016_v10 = vshrl.u32 %v6166_v50, 16 }
 0x213   : > { %v5208_v15 = vsel %vm9250_vm7, %v4987_v22, %v6110_v9  ;;  %v5013_v32 = vsel %vm9266_vm8, %v5005_v47, %v5012_v20  ;;  %v5219_v8 = vsel %vm9275_vm9, %v5014_v63, %v6118_v55  ;;  %v4992_v7 = vrot.slane %v4990_v34, 7 }
 0x214   : > { %6111 = vst [vmem:[%s8954_s18 + $0x84] sm:$0xf] %v5208_v15  ;;  %6117 = vst [vmem:[%s8954_s18 + $0x94] sm:$0xf] %v5013_v32  ;;  %v5035_v37 = vrot.slane %v5033_v25, 7  ;;  %v5036_v16 = vshll.u32 %v6168_v2, 16  ;;  %v6169_v12 = vpack.c.bf16 %v4653_v27, %v4653_v27  ;;  %v4599_v53 = vadd.f32 %v4598_v11, %v4438_v17  ;;  %v6620_v11 = vpop.f32.mrf.mxu1 }
 0x215   : > { %6119 = vst [vmem:[%s8954_s18 + $0x98] sm:$0x1] %v5219_v8  ;;  %v9498_v61 = vrot.slane %v5016_v10, 7  ;;  %v5019_v26 = vshll.u32 %v6166_v50, 16  ;;  %v4459_v62 = vadd.f32 %v6618_v57, %v9203_v54  ;;  %v4988_v45 = vrot.slane %v4984_v4, 4 }
 0x216   : > { %v4995_v40 = vor.u32 %v4993_v56, %v4992_v7  ;;  %v4997_v31 = vrot.slane %v4992_v7, 4  ;;  %v5038_v18 = vor.u32 %v5036_v16, %v5035_v37  ;;  %v5041_v47 = vshrl.u32 %v6169_v12, 16 }
 0x217   : > { %v5021_v33 = vor.u32 %v5019_v26, %v9498_v61  ;;  %v5044_v30 = vshll.u32 %v6169_v12, 16  ;;  %v4451_v43 = vadd.f32 %v6612_v29, %v9187_v41  ;;  %v4651_v51 = vmax.f32 %v4599_v53, 0.0  ;;  %v6135_v12 = vld [vmem:[%s8954_s18 + $0xc0] sm:$0xf] }
 0x218   : > { %v4996_v54 = vsel %vm9266_vm8, %v4988_v45, %v4995_v40  ;;  %v5212_v6 = vsel %vm9275_vm9, %v4997_v31, %v6113_v39  ;;  %v5229_v5 = vsel %vm9250_vm7, %v5038_v18, %v6125_v21  ;;  %v5043_v0 = vrot.slane %v5041_v47, 7  ;;  %v6130_v39 = vld [vmem:[%s8954_s18 + $0xb4] sm:$0xf] }
 0x219   : > { %6112 = vst [vmem:[%s8954_s18 + $0x88] sm:$0xf] %v4996_v54  ;;  %6114 = vst [vmem:[%s8954_s18 + $0x8c] sm:$0x1] %v5212_v6  ;;  %v5222_v14 = vsel %vm9250_vm7, %v5021_v33, %v6120_v59  ;;  %v4620_v41 = vadd.f32 %v9482_v42, %v4459_v62  ;;  %v4612_v29 = vadd.f32 %v4611_v60, %v4451_v43  ;;  %v5039_v19 = vrot.slane %v5035_v37, 4 }
 0x21a   : > { %6126 = vst [vmem:[%s8954_s18 + $0xa8] sm:$0xf] %v5229_v5  ;;  %6121 = vst [vmem:[%s8954_s18 + $0x9c] sm:$0xf] %v5222_v14  ;;  %v6167_v4 = vpack.c.bf16 %v4651_v51, %v4651_v51  ;;  %v6621_v48 = vadd.f32 %v6620_v11, %v6619_v28  ;;  %v4454_v23 = vadd.f32 %v9480_v46, %v9190_v38  ;;  %v5048_v9 = vrot.slane %v5043_v0, 4 }
 0x21b   : > { %v5046_v35 = vor.u32 %v5044_v30, %v5043_v0  ;;  %v4656_v55 = vmax.f32 %v4620_v41, 0.0  ;;  %v4654_v1 = vmax.f32 %v4612_v29, 0.0  ;;  %v5022_v34 = vrot.slane %v9498_v61, 4  ;;  %v6133_v59 = vld [vmem:[%s8954_s18 + $0xbc] sm:$0x1] }
 0x21c   : > { %v5024_v2 = vshrl.u32 %v6167_v4, 16  ;;  %v4462_v42 = vadd.f32 %v6621_v48, %v9214_v44  ;;  %v4615_v50 = vadd.f32 %v4614_v58, %v4454_v23  ;;  %v5233_v22 = vsel %vm9275_vm9, %v5048_v9, %v6128_v3  ;;  %v6123_v44 = vld [vmem:[%s8954_s18 + $0xa4] sm:$0x1]  ;;  %v6138_v54 = vld [vmem:[%s8954_s18 + $0xc8] sm:$0x1] }
 0x21d   : > { %v5047_v27 = vsel %vm9266_vm8, %v5039_v19, %v5046_v35  ;;  %v6172_v20 = vpack.c.bf16 %v4656_v55, %v4656_v55  ;;  %v6170_v63 = vpack.c.bf16 %v4654_v1, %v4654_v1  ;;  %6129 = vst [vmem:[%s8954_s18 + $0xb0] sm:$0x1] %v5233_v22  ;;  %v5027_v46 = vshll.u32 %v6167_v4, 16 }
 0x21e   : > { %6127 = vst [vmem:[%s8954_s18 + $0xac] sm:$0xf] %v5047_v27  ;;  %v5026_v38 = vrot.slane %v5024_v2, 7  ;;  %v4623_v57 = vadd.f32 %v6693_v52, %v4462_v42  ;;  %v4655_v60 = vmax.f32 %v4615_v50, 0.0 }
 0x21f   : > { %v5067_v56 = vshrl.u32 %v6172_v20, 16  ;;  %v5050_v25 = vshrl.u32 %v6170_v63, 16  ;;  %v5070_v10 = vshll.u32 %v6172_v20, 16  ;;  %v5053_v7 = vshll.u32 %v6170_v63, 16 }
 0x220   : > { %v5029_v36 = vor.u32 %v5027_v46, %v5026_v38  ;;  %v5031_v17 = vrot.slane %v5026_v38, 4  ;;  %v4657_v15 = vmax.f32 %v4623_v57, 0.0  ;;  %v6171_v32 = vpack.c.bf16 %v4655_v60, %v4655_v60 }
 0x221   : > { %v5069_v8 = vrot.slane %v5067_v56, 7  ;;  %v5052_v28 = vrot.slane %v5050_v25, 7 }
 0x222   : > { %v5030_v37 = vsel %vm9266_vm8, %v5022_v34, %v5029_v36  ;;  %v5226_v16 = vsel %vm9275_vm9, %v5031_v17, %v6123_v44  ;;  %v6173_v21 = vpack.c.bf16 %v4657_v15, %v4657_v15  ;;  %v5058_v61 = vshrl.u32 %v6171_v32, 16 }
 0x223   : > { %6122 = vst [vmem:[%s8954_s18 + $0xa0] sm:$0xf] %v5030_v37  ;;  %6124 = vst [vmem:[%s8954_s18 + $0xa4] sm:$0x1] %v5226_v16  ;;  %v5072_v26 = vor.u32 %v5070_v10, %v5069_v8  ;;  %v5055_v53 = vor.u32 %v5053_v7, %v5052_v28  ;;  %v5061_v45 = vshll.u32 %v6171_v32, 16  ;;  %v5056_v31 = vrot.slane %v5052_v28, 4 }
 0x224   : > { %v5075_v62 = vshrl.u32 %v6173_v21, 16  ;;  %v5060_v52 = vrot.slane %v5058_v61, 7  ;;  %v5078_v47 = vshll.u32 %v6173_v21, 16  ;;  %v5073_v11 = vrot.slane %v5069_v8, 4 }
 0x225   : > { %v5243_v40 = vsel %vm9250_vm7, %v5072_v26, %v6135_v12  ;;  %v5236_v18 = vsel %vm9250_vm7, %v5055_v53, %v6130_v39 }
 0x226   : > { %6136 = vst [vmem:[%s8954_s18 + $0xc0] sm:$0xf] %v5243_v40  ;;  %6131 = vst [vmem:[%s8954_s18 + $0xb4] sm:$0xf] %v5236_v18  ;;  %v5077_v33 = vrot.slane %v5075_v62, 7  ;;  %v5063_v30 = vor.u32 %v5061_v45, %v5060_v52  ;;  %v5065_v43 = vrot.slane %v5060_v52, 4 }
 0x228   : > { %v5080_v6 = vor.u32 %v5078_v47, %v5077_v33  ;;  %v5082_v5 = vrot.slane %v5077_v33, 4  ;;  %v5064_v51 = vsel %vm9266_vm8, %v5056_v31, %v5063_v30  ;;  %v5240_v49 = vsel %vm9275_vm9, %v5065_v43, %v6133_v59 }
 0x229   : > { %6132 = vst [vmem:[%s8954_s18 + $0xb8] sm:$0xf] %v5064_v51  ;;  %6134 = vst [vmem:[%s8954_s18 + $0xbc] sm:$0x1] %v5240_v49 }
 0x22a   : > { %v5081_v14 = vsel %vm9266_vm8, %v5073_v11, %v5080_v6  ;;  %v5247_v0 = vsel %vm9275_vm9, %v5082_v5, %v6138_v54 }
 0x22b   : > { %6137 = vst [vmem:[%s8954_s18 + $0xc4] sm:$0xf] %v5081_v14  ;;  %6139 = vst [vmem:[%s8954_s18 + $0xc8] sm:$0x1] %v5247_v0 }
 0x22c PF: > { %s13_s14 = sadd.s32 1, %s7041_s14   ;;  %s9630_s12 = smov %s7037_s13 }
 0x22d   : > { %p10_p5 = scmp.ge.s32.totalorder %s13_s14, 4   ;;  %s9631_s13 = smov %s9633_s15 }
 0x22f   :  { %12 = sbr.rel (!%p10_p5) target bundleno = 2 (0x2), region = 71 }

// kernel: basic_block_forward.3
= control target key start
LH: loop header
LB: loop body
LE: loop exit
PB: predicated region body
PF: predicated region fallthrough
CT: control target
= control target key end

     0   :  { %s6361_s12 = smov 0   ;;  %s6363_s13 = smov 0   ;;  %s8609_s0 = inlined_call_operand.vmem [shape: bf16[2,18,18,128], index: 0, kind: input, shape index: {}]   ;;  %s8610_s1 = inlined_call_operand.vmem [shape: bf16[1,1152,128], index: 1, kind: input, shape index: {}]   ;;  %s8611_s2 = inlined_call_operand.vmem [shape: f32[1,128], index: 2, kind: input, shape index: {}]   ;;  %s8612_s3 = inlined_call_operand.vmem [shape: f32[2,16,16,128], index: 3, kind: output, shape index: {}]  }
   0x1   :  { %s6365_s14 = smov 0  }
   0x2 LB: > { %s25_s15 = sadd.s32 1, %s6335_s13  ;;  %p4801_p0 = scmp.ge.s32.totalorder %s6339_s14, 1  ;;  %s6339_s14 = sphi %s6365_s14, %s13_s14   ;;  %s6335_s13 = sphi %s6363_s13, %s8668_s13   ;;  %s6331_s12 = sphi %s6361_s12, %s8667_s12  }
   0x3   : > { %p27_p1 = scmp.ge.s32.totalorder %s25_s15, 2  ;;  %p169_p2 = scmp.lt.s32.totalorder %s6339_s14, 3 }
   0x5   : > { %s8670_s15 = smov (%p27_p1, %s25_s15), 0  ;;  %p170_p3 = pnand %p4801_p0, %p169_p2 }
   0x7   : > { %173 = sbr.rel (%p170_p3) target bundleno = 533 (0x215), region = 32 }
   0xc   : > { %v6034_v0 = vld [vmem:[%s8610_s1 + $0x78] sm:$0xff]   ;;  %p204_p4 = scmp.lt.s32.totalorder %s6331_s12, 1  ;;  %v6036_v2 = vld [vmem:[%s8610_s1 + $0x70] sm:$0xff]   ;;  %v6038_v4 = vld [vmem:[%s8610_s1 + $0x68] sm:$0xff]   ;;  %vm548_vm0 = vsmask.f32 7424 }
   0xd   : > { %v6035_v1 = vld [vmem:[%s8610_s1 + $0x38] sm:$0xff]   ;;  %5473 = vmatprep.subr.bf16.mxu0 %v6034_v0  ;;  %5993 = vmatprep.subr.bf16.mxu1 %v6034_v0  ;;  %v6037_v3 = vld [vmem:[%s8610_s1 + $0x30] sm:$0xff]   ;;  %v6039_v5 = vld [vmem:[%s8610_s1 + $0x28] sm:$0xff]   ;;  %vm5082_vm1 = vcmask 1043456  ;;  %vm789_vm2 = vcmask 1046528  }
   0xe   : > { %5474 = vmatpush3.bf16.msra.mxu0 %v6035_v1  ;;  %6001 = vmatpush3.bf16.msra.mxu1 %v6035_v1  ;;  %s8672_s12 = smov (!%p204_p4, %s6331_s12), 1  ;;  %v6040_v6 = vld [vmem:[%s8610_s1 + $0x60] sm:$0xff]   ;;  %v6042_v8 = vld [vmem:[%s8610_s1 + $0x58] sm:$0xff]   ;;  %v6044_v10 = vld [vmem:[%s8610_s1 + $0x50] sm:$0xff]  }
   0xf   : > { %5475 = vmatprep.subr.bf16.mxu0 %v6036_v2  ;;  %5994 = vmatprep.subr.bf16.mxu1 %v6036_v2  ;;  %s6009_s30 = smul.u32 216, %s8672_s12  ;;  %v6041_v7 = vld [vmem:[%s8610_s1 + $0x20] sm:$0xff]   ;;  %v6043_v9 = vld [vmem:[%s8610_s1 + $0x18] sm:$0xff]   ;;  %v6045_v17 = vld [vmem:[%s8610_s1 + $0x10] sm:$0xff]   ;;  %s5472_s5 = sshll.u32 %s8672_s12, 8 }
  0x10   : > { %v6046_v23 = vld [vmem:[%s8610_s1 + $0x48] sm:$0xff]   ;;  %v6048_v34 = vld [vmem:[%s8610_s1 + $0x40] sm:$0xff]   ;;  %v6056_v49 = vld [vmem:[%s8610_s1 + $0xf8] sm:$0xff]   ;;  %s8484_s8 = scalar_lea.vmem %s8612_s3, %s5472_s5 }
  0x11   : > { %s6412_s10 = scalar_lea.vmem %s8609_s0, %s6009_s30  ;;  %v6047_v30 = vld [vmem:[%s8610_s1 + $0x8] sm:$0xff]   ;;  %v6049_v41 = vld [vmem:[%s8610_s1] sm:$0xff]   ;;  %v6057_v52 = vld [vmem:[%s8610_s1 + $0xb8] sm:$0xff]  }
  0x12   : > { %5476 = vmatpush3.bf16.msra.mxu0 %v6037_v3  ;;  %6002 = vmatpush3.bf16.msra.mxu1 %v6037_v3  ;;  %v6421_v11 = vld [vmem:[%s6412_s10] sm:$0xf]  ;;  %v227_v12 = vld [vmem:[%s6412_s10 + $0x4] sm:$0xf]  ;;  %v6429_v15 = vld [vmem:[%s6412_s10 + $0x90] sm:$0xf] }
  0x13   : > { %5477 = vmatprep.subr.bf16.mxu0 %v6038_v4  ;;  %5995 = vmatprep.subr.bf16.mxu1 %v6038_v4  ;;  %v4933_v13 = vcombine.low %v6421_v11, %v227_v12  ;;  %v6426_v14 = vld [vmem:[%s6412_s10 + $0x8] ss:$0 sps:$4 sm:$0x11]   ;;  %v6432_v16 = vld [vmem:[%s6412_s10 + $0x94] sm:$0xf]  ;;  %v6059_v53 = vld [vmem:[%s8610_s1 + $0x178] sm:$0xff]  }
  0x14   : > { %v274_v18 = vld [vmem:[%s6412_s10] sm:$0xe]  ;;  %v557_v21 = vshll.u32 %v6426_v14, 16  ;;  %v4957_v22 = vcombine.low %v6429_v15, %v6432_v16  ;;  %v6445_v24 = vld [vmem:[%s6412_s10 + $0x98] ss:$0 sps:$4 sm:$0x11]  }
  0x15   : > { %v550_v19 = vshrl.u32 %v4933_v13, 16  ;;  %v552_v20 = vshll.u32 %v4933_v13, 16  ;;  %v701_v29 = vshll.u32 %v6445_v24, 16  ;;  %v286_v32 = vld [vmem:[%s6412_s10 + $0x90] sm:$0xe]  ;;  %v4965_v35 = vcombine.low %v274_v18, %v227_v12  ;;  %v6061_v63 = vld [vmem:[%s8610_s1 + $0x138] sm:$0xff]  }
  0x16   : > { %5478 = vmatpush3.bf16.msra.mxu0 %v6039_v5  ;;  %6003 = vmatpush3.bf16.msra.mxu1 %v6039_v5  ;;  %v559_v26 = vrot.slane %v557_v21, 1  ;;  %v694_v27 = vshrl.u32 %v4957_v22, 16  ;;  %v696_v28 = vshll.u32 %v4957_v22, 16  ;;  %v6463_v43 = vld [vmem:[%s6412_s10 + $0xc] sm:$0xf]  ;;  %v4977_v47 = vcombine.low %v286_v32, %v6432_v16  ;;  %v6058_v60 = vld [vmem:[%s8610_s1 + $0xf0] sm:$0xff]  }
  0x17   : > { %5479 = vmatprep.subr.bf16.mxu0 %v6040_v6  ;;  %5996 = vmatprep.subr.bf16.mxu1 %v6040_v6  ;;  %v554_v25 = vrot.slane %v552_v20, 1  ;;  %v703_v36 = vrot.slane %v701_v29, 1  ;;  %v229_v44 = vld [vmem:[%s6412_s10 + $0x10] sm:$0xf]  ;;  %v6466_v45 = vrot.slane %v4965_v35, 1  ;;  %v6068_v20 = vld [vmem:[%s8610_s1 + $0xe8] sm:$0xff]  }
  0x18   : > { %v698_v33 = vrot.slane %v696_v28, 1  ;;  %v6474_v50 = vld [vmem:[%s6412_s10 + $0x9c] sm:$0xf]  ;;  %v4935_v54 = vcombine.low %v6463_v43, %v229_v44  ;;  %v6486_v55 = vld [vmem:[%s6412_s10 + $0x14] ss:$0 sps:$4 sm:$0x11]  }
  0x19   : > { %v555_v31 = vor.u32 %v554_v25, %v550_v19  ;;  %v253_v56 = vld [vmem:[%s6412_s10 + $0xa0] sm:$0xf]  ;;  %v275_v61 = vld [vmem:[%s6412_s10 + $0xc] sm:$0xe]  ;;  %v569_v2 = vshll.u32 %v6486_v55, 16  ;;  %v6501_v4 = vrot.slane %v4977_v47, 1 }
  0x1a   : > { %5480 = vmatpush3.bf16.msra.mxu0 %v6041_v7  ;;  %6004 = vmatpush3.bf16.msra.mxu1 %v6041_v7  ;;  %v699_v38 = vor.u32 %v698_v33, %v694_v27  ;;  %v4959_v62 = vcombine.low %v6474_v50, %v253_v56  ;;  %v562_v0 = vshrl.u32 %v4935_v54, 16  ;;  %v564_v1 = vshll.u32 %v4935_v54, 16  ;;  %v287_v3 = vld [vmem:[%s6412_s10 + $0x9c] sm:$0xe]  ;;  %v6512_v21 = vld [vmem:[%s6412_s10 + $0x18] sm:$0xf] }
  0x1b   : > { %5481 = vmatprep.subr.bf16.mxu0 %v6042_v8  ;;  %5997 = vmatprep.subr.bf16.mxu1 %v6042_v8  ;;  %v560_v37 = vsel %vm548_vm0, %v555_v31, %v559_v26  ;;  %v6066_v5 = vld [vmem:[%s6412_s10 + $0xa4] ss:$0 sps:$4 sm:$0x11]   ;;  %v4978_v19 = vcombine.low %v287_v3, %v253_v56  ;;  %v231_v22 = vld [vmem:[%s6412_s10 + $0x1c] sm:$0xf]  ;;  %v6079_v47 = vld [vmem:[%s8610_s1 + $0x170] sm:$0xff]  }
  0x1c   : > { %v5077_v39 = vcombine.low %v6421_v11, %v560_v37  ;;  %v5083_v40 = vsel %vm5082_vm1, %v227_v12, %v560_v37  ;;  %v704_v42 = vsel %vm548_vm0, %v699_v38, %v703_v36  ;;  %v706_v6 = vshrl.u32 %v4959_v62, 16  ;;  %v276_v25 = vld [vmem:[%s6412_s10 + $0x18] sm:$0xe]  ;;  %v6519_v27 = vld [vmem:[%s6412_s10 + $0xa8] sm:$0xf] }
  0x1d   : > { %v5209_v48 = vcombine.low %v6429_v15, %v704_v42  ;;  %v5215_v51 = vsel %vm5082_vm1, %v6432_v16, %v704_v42  ;;  %v6269_v57 = vcombine.low %v6421_v11, %v5083_v40  ;;  %v708_v7 = vshll.u32 %v4959_v62, 16  ;;  %v6527_v32 = vld [vmem:[%s6412_s10 + $0x20] ss:$0 sps:$4 sm:$0x11]   ;;  %v6530_v33 = vld [vmem:[%s6412_s10 + $0xac] sm:$0xf] }
  0x1e   : > { %5482 = vmatpush3.bf16.msra.mxu0 %v6043_v9  ;;  %6005 = vmatpush3.bf16.msra.mxu1 %v6043_v9  ;;  %v5255_v46 = vcombine.high %v5077_v39, %v5083_v40  ;;  %v6270_v58 = vcombine.low %v6429_v15, %v5215_v51  ;;  %v566_v8 = vrot.slane %v564_v1, 1  ;;  %v571_v9 = vrot.slane %v569_v2, 1  ;;  %v6069_v36 = vld [vmem:[%s8610_s1 + $0xa8] sm:$0xff]  }
  0x1f   : > { %5483 = vmatprep.subr.bf16.mxu0 %v6044_v10  ;;  %5998 = vmatprep.subr.bf16.mxu1 %v6044_v10  ;;  %v5363_v59 = vcombine.high %v5209_v48, %v5215_v51  ;;  %v6060_v10 = vld [vmem:[%s8610_s1 + $0xb0] sm:$0xff]   ;;  %v4966_v11 = vcombine.low %v275_v61, %v229_v44  ;;  %v710_v12 = vrot.slane %v708_v7, 1  ;;  %v713_v13 = vshll.u32 %v6066_v5, 16  ;;  %v288_v39 = vld [vmem:[%s6412_s10 + $0xa8] sm:$0xe]  ;;  %v6070_v51 = vld [vmem:[%s8610_s1 + $0xe0] sm:$0xff]  }
  0x20   : > { %3853 = vmatprep.mubr.bf16.mxu0 %v5255_v46  ;;  %v791_v15 = vrot.slane %v6426_v14, 1  ;;  %v567_v16 = vor.u32 %v566_v8, %v562_v0  ;;  %v4937_v26 = vcombine.low %v6512_v21, %v231_v22  ;;  %v6076_v46 = vld [vmem:[%s6412_s10 + $0xb0] ss:$0 sps:$4 sm:$0x11]   ;;  %v4967_v54 = vcombine.low %v276_v25, %v231_v22  ;;  %v6078_v5 = vld [vmem:[%s8610_s1 + $0xd8] sm:$0xff]   ;;  %v6092_v14 = vld [vmem:[%s8610_s1 + $0xc0] sm:$0xff]  }
  0x21   : > { %3949 = vmatprep.mubr.bf16.mxu1 %v5363_v59  ;;  %v715_v18 = vrot.slane %v713_v13, 1  ;;  %v6521_v28 = vrot.slane %v4966_v11, 1  ;;  %v6081_v0 = vld [vmem:[%s8610_s1 + $0x130] sm:$0xff]   ;;  %v6080_v8 = vld [vmem:[%s8610_s1 + $0x98] sm:$0xff]  }
  0x22   : > { %5484 = vmatpush3.bf16.msra.mxu0 %v6045_v17  ;;  %6006 = vmatpush3.bf16.msra.mxu1 %v6045_v17  ;;  %v711_v17 = vor.u32 %v710_v12, %v706_v6  ;;  %v574_v37 = vshrl.u32 %v4937_v26, 16  ;;  %v576_v38 = vshll.u32 %v4937_v26, 16  ;;  %v6560_v1 = vrot.slane %v4967_v54, 1  ;;  %v6082_v13 = vld [vmem:[%s8610_s1 + $0xd0] sm:$0xff]   ;;  %v6091_v54 = vld [vmem:[%s8610_s1 + $0x88] sm:$0xff]  }
  0x23   : > { %5485 = vmatprep.subr.bf16.mxu0 %v6046_v23  ;;  %5999 = vmatprep.subr.bf16.mxu1 %v6046_v23  ;;  %v572_v23 = vsel %vm548_vm0, %v567_v16, %v571_v9  ;;  %v6573_v9 = vld [vmem:[%s6412_s10 + $0x24] sm:$0xf] }
  0x24   : > { %v5088_v29 = vcombine.low %v6463_v43, %v572_v23  ;;  %v716_v31 = vsel %vm548_vm0, %v711_v17, %v715_v18  ;;  %v277_v16 = vld [vmem:[%s6412_s10 + $0x24] sm:$0xe]  ;;  %v6583_v18 = vld [vmem:[%s6412_s10 + $0xb4] sm:$0xf] }
  0x25   : > { %v5226_v35 = vsel %vm5082_vm1, %v253_v56, %v716_v31  ;;  %v725_v56 = vshll.u32 %v6076_v46, 16 }
  0x26   : > { %5486 = vmatpush3.bf16.msra.mxu0 %v6047_v30  ;;  %6007 = vmatpush3.bf16.msra.mxu1 %v6047_v30  ;;  %v5094_v30 = vsel %vm5082_vm1, %v229_v44, %v572_v23  ;;  %v581_v44 = vshll.u32 %v6527_v32, 16  ;;  %v257_v23 = vld [vmem:[%s6412_s10 + $0xb8] sm:$0xf] }
  0x27   : > { %5487 = vmatprep.subr.bf16.mxu0 %v6048_v34  ;;  %6000 = vmatprep.subr.bf16.mxu1 %v6048_v34  ;;  %v5220_v34 = vcombine.low %v6474_v50, %v716_v31  ;;  %v5264_v40 = vcombine.high %v5088_v29, %v5094_v30  ;;  %v6271_v42 = vcombine.low %v6463_v43, %v5094_v30  ;;  %v727_v61 = vrot.slane %v725_v56, 1  ;;  %v289_v31 = vld [vmem:[%s6412_s10 + $0xb4] sm:$0xe] }
  0x28   : > { %v583_v43 = vrot.slane %v581_v44, 1  ;;  %v6090_v44 = vld [vmem:[%s8610_s1 + $0xc8] sm:$0xff]   ;;  %v6618_v56 = vsel %vm789_vm2, %v6466_v45, %v791_v15  ;;  %v6632_v15 = vld [vmem:[%s6412_s10 + $0x30] sm:$0xf] }
  0x29   : > { %v5372_v48 = vcombine.high %v5220_v34, %v5226_v35  ;;  %v6083_v34 = vld [vmem:[%s8610_s1 + $0x90] sm:$0xff]   ;;  %v6095_v45 = vld [vmem:[%s8610_s1 + $0x128] sm:$0xff]  }
  0x2a   : > { %5488 = vmatpush3.bf16.msra.mxu0 %v6049_v41  ;;  %6008 = vmatpush3.bf16.msra.mxu1 %v6049_v41  ;;  %v6538_v41 = vrot.slane %v4978_v19, 1 }
  0x2b   : > { %5585 = vmatprep.subr.bf16.mxu1 %v6056_v49  ;;  %5697 = vmatprep.subr.bf16.mxu0 %v6059_v53  ;;  %v6272_v49 = vcombine.low %v6474_v50, %v5226_v35  ;;  %v4961_v53 = vcombine.low %v6519_v27, %v6530_v33  ;;  %v4979_v50 = vcombine.low %v288_v39, %v6530_v33 }
  0x2d   : > { %3854 = vmatmul.mubr.bf16.vlgmr.msra.gmra.mxu0 %v6269_v57  ;;  %3950 = vmatmul.mubr.bf16.vlgmr.msra.gmra.mxu1 %v6270_v58  ;;  %v718_v58 = vshrl.u32 %v4961_v53, 16  ;;  %v720_v59 = vshll.u32 %v4961_v53, 16  ;;  %v6567_v7 = vrot.slane %v4979_v50, 1 }
  0x2e   : > { %5586 = vmatpush3.bf16.msra.mxu1 %v6057_v52  ;;  %5698 = vmatpush3.bf16.msra.mxu0 %v6061_v63  ;;  %v578_v52 = vrot.slane %v576_v38, 1  ;;  %v797_v38 = vrot.slane %v6527_v32, 1 }
  0x2f   : > { %5587 = vmatprep.subr.bf16.mxu1 %v6058_v60  ;;  %3861 = vmatprep.mubr.bf16.mxu0 %v5264_v40  ;;  %v6071_v60 = vld [vmem:[%s8610_s1 + $0xa0] sm:$0xff]   ;;  %v722_v63 = vrot.slane %v720_v59, 1 }
  0x30   : > { %5699 = vmatprep.subr.bf16.mxu0 %v6079_v47  ;;  %3957 = vmatprep.mubr.bf16.mxu1 %v5372_v48  ;;  %v579_v57 = vor.u32 %v578_v52, %v574_v37  ;;  %v6088_v37 = vld [vmem:[%s6412_s10 + $0xbc] ss:$0 sps:$4 sm:$0x11]  }
  0x31   : > { %v723_v6 = vor.u32 %v722_v63, %v718_v58  ;;  %v827_v63 = vrot.slane %v6445_v24, 1 }
  0x32   : > { %5588 = vmatpush3.bf16.msra.mxu1 %v6060_v10  ;;  %v584_v62 = vsel %vm548_vm0, %v579_v57, %v583_v43  ;;  %5700 = vmatpush3.bf16.msra.mxu0 %v6081_v0  ;;  %v233_v10 = vld [vmem:[%s6412_s10 + $0x28] sm:$0xf] }
  0x33   : > { %5589 = vmatprep.subr.bf16.mxu1 %v6068_v20  ;;  %v5099_v2 = vcombine.low %v6512_v21, %v584_v62  ;;  %v5105_v3 = vsel %vm5082_vm1, %v231_v22, %v584_v62  ;;  %v4939_v17 = vcombine.low %v6573_v9, %v233_v10  ;;  %v728_v19 = vsel %vm548_vm0, %v723_v6, %v727_v61  ;;  %v6587_v20 = vld [vmem:[%s6412_s10 + $0x2c] ss:$0 sps:$4 sm:$0x11]   ;;  %v235_v61 = vld [vmem:[%s6412_s10 + $0x34] sm:$0xf] }
  0x34   : > { %v6273_v12 = vcombine.low %v6512_v21, %v5105_v3  ;;  %v4968_v22 = vcombine.low %v277_v16, %v233_v10  ;;  %v794_v21 = vrot.slane %v6486_v55, 1  ;;  %v5231_v25 = vcombine.low %v6519_v27, %v728_v19  ;;  %v6648_v16 = vld [vmem:[%s6412_s10 + $0x10] sm:$0xf] }
  0x35   : > { %3862 = vmatmul.mubr.bf16.gmra.mxu0 %v6271_v42  ;;  %3958 = vmatmul.mubr.bf16.gmra.mxu1 %v6272_v49  ;;  %v5273_v11 = vcombine.high %v5099_v2, %v5105_v3  ;;  %v5237_v26 = vsel %vm5082_vm1, %v6530_v33, %v728_v19  ;;  %v586_v29 = vshrl.u32 %v4939_v17, 16  ;;  %v588_v30 = vshll.u32 %v4939_v17, 16 }
  0x36   : > { %5590 = vmatpush3.bf16.msra.mxu1 %v6069_v36  ;;  %v593_v35 = vshll.u32 %v6587_v20, 16  ;;  %v4963_v36 = vcombine.low %v6583_v18, %v257_v23  ;;  %v5381_v39 = vcombine.high %v5231_v25, %v5237_v26  ;;  %v6274_v40 = vcombine.low %v6519_v27, %v5237_v26  ;;  %v6093_v27 = vld [vmem:[%s8610_s1 + $0x168] sm:$0xff]   ;;  %v6094_v26 = vld [vmem:[%s8610_s1 + $0x80] sm:$0xff]  }
  0x37   : > { %5591 = vmatprep.subr.bf16.mxu1 %v6070_v51  ;;  %3869 = vmatprep.mubr.bf16.mxu0 %v5273_v11  ;;  %v590_v33 = vrot.slane %v588_v30, 1  ;;  %v4980_v42 = vcombine.low %v289_v31, %v257_v23  ;;  %v737_v49 = vshll.u32 %v6088_v37, 16  ;;  %v6606_v52 = vrot.slane %v4968_v22, 1 }
  0x38   : > { %v595_v46 = vrot.slane %v593_v35, 1  ;;  %v730_v47 = vshrl.u32 %v4963_v36, 16  ;;  %v732_v48 = vshll.u32 %v4963_v36, 16  ;;  %3965 = vmatprep.mubr.bf16.mxu1 %v5381_v39  ;;  %5701 = vmatprep.subr.bf16.mxu0 %v6093_v27  ;;  %v1677_v62 = vunpack.c.h.b16 %v6618_v56  ;;  %v6672_v36 = vld [vmem:[%s6412_s10 + $0x3c] sm:$0xf] }
  0x39   : > { %v591_v51 = vor.u32 %v590_v33, %v586_v29  ;;  %v739_v43 = vrot.slane %v737_v49, 1  ;;  %v4941_v6 = vcombine.low %v6632_v15, %v235_v61  ;;  %5702 = vmatpush3.bf16.msra.mxu0 %v6095_v45  ;;  %v871_v19 = vunpack.c.l.b16 %v6648_v16  ;;  %v6676_v39 = vld [vmem:[%s6412_s10 + $0x40] sm:$0xf]  ;;  %v6694_v49 = vld [vmem:[%s6412_s10 + $0x1c] sm:$0xf] }
  0x3a   : > { %5592 = vmatpush3.bf16.msra.mxu1 %v6071_v60  ;;  %v734_v53 = vrot.slane %v732_v48, 1  ;;  %v6623_v60 = vrot.slane %v4980_v42, 1  ;;  %v6664_v30 = vsel %vm789_vm2, %v6521_v28, %v794_v21  ;;  %v800_v37 = vrot.slane %v6587_v20, 1  ;;  %v6106_v28 = vld [vmem:[%s8610_s1 + $0x160] sm:$0xff]   ;;  %v4807_v48 = vld [vmem:[%s6412_s10 + $0x18] sm:$0xf] }
  0x3b   : > { %5593 = vmatprep.subr.bf16.mxu1 %v6078_v5  ;;  %v596_v57 = vsel %vm548_vm0, %v591_v51, %v595_v46  ;;  %v278_v5 = vld [vmem:[%s6412_s10 + $0x30] sm:$0xe]  ;;  %v600_v17 = vshll.u32 %v4941_v6, 16  ;;  %v1868_v35 = vpack.c.b16 %v871_v19, %v1677_v62  ;;  %v6683_v21 = vsel %vm789_vm2, %v6501_v4, %v827_v63  ;;  %v6688_v46 = vld [vmem:[%s6412_s10 + $0x44] ss:$0 sps:$4 sm:$0x11]   ;;  %5703 = vmatprep.subr.bf16.mxu0 %v6106_v28 }
  0x3c   : > { %v5110_v58 = vcombine.low %v6573_v9, %v596_v57  ;;  %v5116_v59 = vsel %vm5082_vm1, %v233_v10, %v596_v57  ;;  %v735_v50 = vor.u32 %v734_v53, %v730_v47  ;;  %8617 = vst [vmem:[#allocation3_spill] sm:$0xff] %v6623_v60  ;;  %v4943_v47 = vcombine.low %v6672_v36, %v6676_v39  ;;  %v279_v63 = vld [vmem:[%s6412_s10 + $0x3c] sm:$0xe]  ;;  %v7035_v60 = vld [vmem:[%s6412_s10 + $0x14] ss:$0 sps:$4 sm:$0x11]  }
  0x3d   : > { %3870 = vmatmul.mubr.bf16.gmra.mxu0 %v6273_v12  ;;  %3966 = vmatmul.mubr.bf16.gmra.mxu1 %v6274_v40  ;;  %v6275_v3 = vcombine.low %v6573_v9, %v5116_v59  ;;  %v6645_v12 = vld [vmem:[%s6412_s10 + $0x38] ss:$0 sps:$4 sm:$0x11]   ;;  %v598_v9 = vshrl.u32 %v4941_v6, 16  ;;  %v602_v31 = vrot.slane %v600_v17, 1  ;;  %v1689_v4 = vunpack.c.h.b16 %v6664_v30 }
  0x3e   : > { %5594 = vmatpush3.bf16.msra.mxu1 %v6080_v8  ;;  %v5282_v0 = vcombine.high %v5110_v58, %v5116_v59  ;;  %v740_v2 = vsel %vm548_vm0, %v735_v50, %v739_v43  ;;  %v4805_v8 = vld [vmem:[%s6412_s10 + $0xc] sm:$0xf]  ;;  %v605_v29 = vshll.u32 %v6645_v12, 16  ;;  %v617_v27 = vshll.u32 %v6688_v46, 16  ;;  %v6107_v43 = vld [vmem:[%s8610_s1 + $0x120] sm:$0xff]  }
  0x3f   : > { %5595 = vmatprep.subr.bf16.mxu1 %v6082_v13  ;;  %v5242_v10 = vcombine.low %v6583_v18, %v740_v2  ;;  %v5248_v11 = vsel %vm5082_vm1, %v257_v23, %v740_v2  ;;  %v4969_v13 = vcombine.low %v278_v5, %v235_v61  ;;  %v5078_v24 = vcombine.low %v6618_v56, %v4805_v8  ;;  %v6101_v2 = vld [vmem:[%s8610_s1 + $0x1b8] sm:$0xff]  }
  0x40   : > { %3877 = vmatprep.mubr.bf16.mxu0 %v5282_v0  ;;  %v6653_v22 = vcombine.low %v4805_v8, %v6648_v16  ;;  %v6276_v25 = vcombine.low %v6583_v18, %v5248_v11  ;;  %v6100_v18 = vld [vmem:[%s8610_s1 + $0x1f8] sm:$0xff]   ;;  %v607_v55 = vrot.slane %v605_v29, 1  ;;  %v603_v40 = vor.u32 %v602_v31, %v598_v9  ;;  %5704 = vmatpush3.bf16.msra.mxu0 %v6107_v43  ;;  %v6732_v8 = vld [vmem:[%s6412_s10 + $0x50] ss:$0 sps:$4 sm:$0x11]  }
  0x41   : > { %v5390_v23 = vcombine.high %v5242_v10, %v5248_v11  ;;  %v873_v53 = vunpack.c.l.b16 %v6694_v49  ;;  %v610_v59 = vshrl.u32 %v4943_v47, 16  ;;  %v612_v50 = vshll.u32 %v4943_v47, 16  ;;  %v4809_v10 = vld [vmem:[%s6412_s10 + $0x24] sm:$0xf]  ;;  %v6112_v11 = vld [vmem:[%s8610_s1 + $0x1f0] sm:$0xff]   ;;  %v6115_v47 = vld [vmem:[%s8610_s1 + $0x118] sm:$0xff]  }
  0x42   : > { %5596 = vmatpush3.bf16.msra.mxu1 %v6083_v34  ;;  %v6666_v34 = vrot.slane %v4969_v13, 1  ;;  %v967_v33 = vshrl.u32 %v6653_v22, 16  ;;  %v969_v42 = vshll.u32 %v6653_v22, 16  ;;  %v608_v51 = vsel %vm548_vm0, %v603_v40, %v607_v55  ;;  %v6114_v55 = vld [vmem:[%s8610_s1 + $0x158] sm:$0xff]   ;;  %v6158_v22 = vld [vmem:[%s8610_s1 + $0x1d0] sm:$0xff]  }
  0x43   : > { %5597 = vmatprep.subr.bf16.mxu1 %v6090_v44  ;;  %3973 = vmatprep.mubr.bf16.mxu1 %v5390_v23  ;;  %v5257_v44 = vcombine.high %v5078_v24, %v1868_v35  ;;  %v5121_v57 = vcombine.low %v6632_v15, %v608_v51  ;;  %v5127_v58 = vsel %vm5082_vm1, %v235_v61, %v608_v51  ;;  %v619_v32 = vrot.slane %v617_v27, 1  ;;  %v6740_v24 = vld [vmem:[%s6412_s10 + $0x28] sm:$0xf]  ;;  %v6768_v27 = vld [vmem:[%s6412_s10 + $0x54] sm:$0xf] }
  0x44   : > { %v6714_v45 = vrot.slane %v969_v42, 1  ;;  %v6277_v62 = vcombine.low %v6618_v56, %v1868_v35  ;;  %v6719_v0 = vcombine.low %v4807_v48, %v6694_v49  ;;  %v6278_v61 = vcombine.low %v6632_v15, %v5127_v58  ;;  %5705 = vmatprep.subr.bf16.mxu0 %v6114_v55  ;;  %v6829_v55 = vld [vmem:[%s6412_s10 + $0x3c] sm:$0xf] }
  0x45   : > { %3878 = vmatmul.mubr.bf16.gmra.mxu0 %v6275_v3  ;;  %3974 = vmatmul.mubr.bf16.gmra.mxu1 %v6276_v25  ;;  %v614_v3 = vrot.slane %v612_v50, 1  ;;  %v5089_v5 = vcombine.low %v6664_v30, %v4807_v48  ;;  %v1878_v56 = vpack.c.b16 %v873_v53, %v1689_v4  ;;  %v4970_v13 = vcombine.low %v279_v63, %v6676_v39  ;;  %v6124_v50 = vld [vmem:[%s8610_s1 + $0x150] sm:$0xff]  }
  0x46   : > { %5598 = vmatpush3.bf16.msra.mxu1 %v6091_v54  ;;  %4014 = vmatprep.mubr.bf16.mxu1 %v5257_v44  ;;  %v6707_v54 = vsel %vm789_vm2, %v6560_v1, %v797_v38  ;;  %v6722_v1 = vld [vmem:[%s6412_s10 + $0x4c] sm:$0xf]  ;;  %v5291_v38 = vcombine.high %v5121_v57, %v5127_v58  ;;  %v981_v29 = vshll.u32 %v6719_v0, 16  ;;  %v629_v31 = vshll.u32 %v6732_v8, 16 }
  0x47   : > { %5599 = vmatprep.subr.bf16.mxu1 %v6092_v14  ;;  %v6712_v14 = vld [vmem:[%s6412_s10 + $0x48] sm:$0xf]  ;;  %v615_v15 = vor.u32 %v614_v3, %v610_v59  ;;  %v1701_v9 = vunpack.c.h.b16 %v6707_v54  ;;  %v5100_v17 = vcombine.low %v6707_v54, %v4809_v10  ;;  %v5266_v19 = vcombine.high %v5089_v5, %v1878_v56  ;;  %5706 = vmatpush3.bf16.msra.mxu0 %v6115_v47  ;;  %v6779_v59 = vld [vmem:[%s6412_s10 + $0x58] sm:$0xf] }
  0x48   : > { %v4945_v6 = vcombine.low %v6712_v14, %v6722_v1  ;;  %3885 = vmatprep.mubr.bf16.mxu0 %v5291_v38  ;;  %v875_v35 = vunpack.c.l.b16 %v6740_v24  ;;  %v6758_v44 = vcombine.low %v4809_v10, %v6740_v24  ;;  %v6763_v48 = vrot.slane %v4970_v13, 1  ;;  %v6797_v38 = vld [vmem:[%s6412_s10 + $0x34] sm:$0xf]  ;;  %5707 = vmatprep.subr.bf16.mxu0 %v6124_v50  ;;  %v280_v10 = vld [vmem:[%s6412_s10 + $0x48] sm:$0xe] }
  0x49   : > { %v631_v4 = vrot.slane %v629_v31, 1  ;;  %v6280_v57 = vcombine.low %v6664_v30, %v1878_v56  ;;  %v4947_v30 = vcombine.low %v6768_v27, %v6779_v59  ;;  %v6805_v56 = vld [vmem:[%s6412_s10 + $0x60] sm:$0xf]  ;;  %v877_v13 = vunpack.c.l.b16 %v6797_v38 }
  0x4a   : > { %5600 = vmatpush3.bf16.msra.mxu1 %v6094_v26  ;;  %v622_v23 = vshrl.u32 %v4945_v6, 16  ;;  %v624_v25 = vshll.u32 %v4945_v6, 16  ;;  %v620_v26 = vsel %vm548_vm0, %v615_v15, %v619_v32  ;;  %v6765_v51 = vpack.c.b16 %v875_v35, %v1701_v9  ;;  %v4811_v32 = vld [vmem:[%s6412_s10 + $0x30] sm:$0xf]  ;;  %v6808_v6 = vld [vmem:[%s6412_s10 + $0x64] sm:$0xf] }
  0x4b   : > { %5809 = vmatprep.subr.bf16.mxu1 %v6100_v18  ;;  %v6113_v18 = vld [vmem:[%s8610_s1 + $0x1b0] sm:$0xff]   ;;  %v5132_v28 = vcombine.low %v6672_v36, %v620_v26  ;;  %v5138_v40 = vsel %vm5082_vm1, %v6676_v39, %v620_v26  ;;  %v6774_v39 = vsel %vm789_vm2, %v6606_v52, %v800_v37  ;;  %v6785_v52 = vrot.slane %v981_v29, 1  ;;  %v6125_v9 = vld [vmem:[%s8610_s1 + $0x1e8] sm:$0xff]   ;;  %v282_v50 = vld [vmem:[%s6412_s10 + $0x60] sm:$0xe] }
  0x4c   : > { %v626_v42 = vrot.slane %v624_v25, 1  ;;  %v6279_v43 = vcombine.low %v6672_v36, %v5138_v40  ;;  %v5275_v37 = vcombine.high %v5100_v17, %v6765_v51  ;;  %v6791_v36 = vld [vmem:[%s6412_s10 + $0x5c] ss:$0 sps:$4 sm:$0x11]   ;;  %v993_v63 = vshll.u32 %v6758_v44, 16  ;;  %v6126_v26 = vld [vmem:[%s8610_s1 + $0x110] sm:$0xff]  }
  0x4d   : > { %3886 = vmatmul.mubr.bf16.gmra.mxu0 %v6278_v61  ;;  %4015 = vmatmul.mubr.bf16.vlgmr.msra.gmra.mxu1 %v6277_v62  ;;  %v5300_v53 = vcombine.high %v5132_v28, %v5138_v40  ;;  %v1713_v61 = vunpack.c.h.b16 %v6774_v39  ;;  %v636_v15 = vshll.u32 %v4947_v30, 16  ;;  %v6819_v25 = vld [vmem:[%s6412_s10 + $0x68] ss:$0 sps:$4 sm:$0x11]   ;;  %v4971_v28 = vcombine.low %v280_v10, %v6722_v1 }
  0x4e   : > { %5810 = vmatpush3.bf16.msra.mxu1 %v6101_v2  ;;  %4022 = vmatprep.mubr.bf16.mxu1 %v5266_v19  ;;  %v627_v58 = vor.u32 %v626_v42, %v622_v23  ;;  %v803_v2 = vrot.slane %v6645_v12, 1  ;;  %v641_v12 = vshll.u32 %v6791_v36, 16  ;;  %v281_v19 = vld [vmem:[%s6412_s10 + $0x54] sm:$0xe]  ;;  %v5111_v23 = vcombine.low %v6774_v39, %v4811_v32  ;;  %v6834_v42 = vld [vmem:[%s6412_s10 + $0x40] sm:$0xf] }
  0x4f   : > { %5811 = vmatprep.subr.bf16.mxu1 %v6112_v11  ;;  %3893 = vmatprep.mubr.bf16.mxu0 %v5300_v53  ;;  %v634_v11 = vshrl.u32 %v4947_v30, 16  ;;  %v638_v29 = vrot.slane %v636_v15, 1  ;;  %v6824_v35 = vpack.c.b16 %v877_v13, %v1713_v61  ;;  %v653_v40 = vshll.u32 %v6819_v25, 16  ;;  %v6867_v15 = vld [vmem:[%s6412_s10 + $0x70] sm:$0xf]  ;;  %v7020_v13 = vld [vmem:[%s8610_s1 + $0x238] sm:$0xff]  }
  0x50   : > { %v632_v62 = vsel %vm548_vm0, %v627_v58, %v631_v4  ;;  %v643_v31 = vrot.slane %v641_v12, 1  ;;  %v6838_v47 = vsel %vm789_vm2, %v6666_v34, %v803_v2  ;;  %5708 = vmatpush3.bf16.msra.mxu0 %v6126_v26  ;;  %v6127_v4 = vld [vmem:[%s8610_s1 + $0x1a8] sm:$0xff]   ;;  %v6872_v12 = vrot.slane %v4971_v28, 1 }
  0x51   : > { %v5143_v3 = vcombine.low %v6712_v14, %v632_v62  ;;  %v5149_v5 = vsel %vm5082_vm1, %v6722_v1, %v632_v62  ;;  %v639_v1 = vor.u32 %v638_v29, %v634_v11  ;;  %v6132_v58 = vld [vmem:[%s8610_s1 + $0x148] sm:$0xff]   ;;  %v5284_v34 = vcombine.high %v5111_v23, %v6824_v35  ;;  %v6886_v29 = vld [vmem:[%s6412_s10 + $0x74] ss:$0 sps:$4 sm:$0x11]  }
  0x52   : > { %5812 = vmatpush3.bf16.msra.mxu1 %v6113_v18  ;;  %v4949_v18 = vcombine.low %v6805_v56, %v6808_v6  ;;  %v6281_v53 = vcombine.low %v6712_v14, %v5149_v5  ;;  %v655_v62 = vrot.slane %v653_v40, 1  ;;  %v1725_v61 = vunpack.c.h.b16 %v6838_v47  ;;  %5709 = vmatprep.subr.bf16.mxu0 %v6132_v58  ;;  %v6864_v11 = vld [vmem:[%s6412_s10 + $0x6c] sm:$0xf]  ;;  %v4815_v58 = vld [vmem:[%s6412_s10 + $0x48] sm:$0xf] }
  0x53   : > { %v5309_v17 = vcombine.high %v5143_v3, %v5149_v5  ;;  %5813 = vmatprep.subr.bf16.mxu1 %v6125_v9  ;;  %v644_v14 = vsel %vm548_vm0, %v639_v1, %v643_v31  ;;  %v5122_v10 = vcombine.low %v6838_v47, %v6829_v55  ;;  %v4951_v9 = vcombine.low %v6864_v11, %v6867_v15  ;;  %v6138_v31 = vld [vmem:[%s8610_s1 + $0x1e0] sm:$0xff]  }
  0x54   : > { %v648_v30 = vshll.u32 %v4949_v18, 16  ;;  %v5154_v2 = vcombine.low %v6768_v27, %v644_v14  ;;  %v5160_v3 = vsel %vm5082_vm1, %v6779_v59, %v644_v14  ;;  %v4973_v40 = vcombine.low %v282_v50, %v6808_v6 }
  0x55   : > { %3894 = vmatmul.mubr.bf16.gmra.mxu0 %v6279_v43  ;;  %4023 = vmatmul.mubr.bf16.gmra.mxu1 %v6280_v57  ;;  %v6282_v43 = vcombine.low %v6707_v54, %v6765_v51  ;;  %v4972_v57 = vcombine.low %v281_v19, %v6779_v59  ;;  %v6854_v54 = vcombine.low %v4811_v32, %v6797_v38  ;;  %v879_v51 = vunpack.c.l.b16 %v6834_v42  ;;  %v6133_v32 = vld [vmem:[%s8610_s1 + $0x108] sm:$0xff]  }
  0x56   : > { %4030 = vmatprep.mubr.bf16.mxu1 %v5275_v37  ;;  %3901 = vmatprep.mubr.bf16.mxu0 %v5309_v17  ;;  %v646_v37 = vshrl.u32 %v4949_v18, 16  ;;  %v650_v5 = vrot.slane %v648_v30, 1  ;;  %v6881_v17 = vrot.slane %v993_v63, 1  ;;  %v5318_v23 = vcombine.high %v5154_v2, %v5160_v3  ;;  %v6144_v30 = vld [vmem:[%s8610_s1 + $0x140] sm:$0xff]   ;;  %v6921_v2 = vld [vmem:[%s6412_s10 + $0x7c] sm:$0xf] }
  0x57   : > { %5814 = vmatpush3.bf16.msra.mxu1 %v6127_v4  ;;  %v6875_v59 = vpack.c.b16 %v879_v51, %v1725_v61  ;;  %v6883_v19 = vrot.slane %v4972_v57, 1  ;;  %v1005_v28 = vshll.u32 %v6854_v54, 16  ;;  %v6283_v63 = vcombine.low %v6774_v39, %v6824_v35  ;;  %v6897_v4 = vld [vmem:[%s6412_s10 + $0x4c] sm:$0xf]  ;;  %5710 = vmatpush3.bf16.msra.mxu0 %v6133_v32  ;;  %v6139_v39 = vld [vmem:[%s8610_s1 + $0x1a0] sm:$0xff]  }
  0x58   : > { %v651_v26 = vor.u32 %v650_v5, %v646_v37  ;;  %v660_v1 = vshll.u32 %v4951_v9, 16  ;;  %v665_v57 = vshll.u32 %v6886_v29, 16  ;;  %5815 = vmatprep.subr.bf16.mxu1 %v6138_v31  ;;  %v6284_v35 = vcombine.low %v6768_v27, %v5160_v3  ;;  %v6918_v27 = vld [vmem:[%s6412_s10 + $0x78] sm:$0xf]  ;;  %5711 = vmatprep.subr.bf16.mxu0 %v6144_v30  ;;  %v6964_v30 = vld [vmem:[%s6412_s10 + $0x84] sm:$0xf] }
  0x59   : > { %v806_v37 = vrot.slane %v6688_v46, 1  ;;  %v881_v61 = vunpack.c.l.b16 %v6897_v4  ;;  %v6926_v46 = vcombine.low %v6829_v55, %v6834_v42  ;;  %v4953_v5 = vcombine.low %v6918_v27, %v6921_v2  ;;  %v6145_v55 = vld [vmem:[%s8610_s1 + $0x100] sm:$0xff]  }
  0x5a   : > { %v662_v14 = vrot.slane %v660_v1, 1  ;;  %v667_v51 = vrot.slane %v665_v57, 1  ;;  %v6936_v32 = vrot.slane %v4973_v40, 1  ;;  %v7012_v40 = vld [vmem:[%s6412_s10 + $0x60] sm:$0xf]  ;;  %v812_v20 = vrot.slane %v6791_v36, 1 }
  0x5b   : > { %5816 = vmatpush3.bf16.msra.mxu1 %v6139_v39  ;;  %v6930_v3 = vsel %vm789_vm2, %v6763_v48, %v806_v37  ;;  %v670_v31 = vshrl.u32 %v4953_v5, 16  ;;  %v1017_v39 = vshll.u32 %v6926_v46, 16  ;;  %5712 = vmatpush3.bf16.msra.mxu0 %v6145_v55  ;;  %v6979_v55 = vld [vmem:[%s6412_s10 + $0x8c] ss:$0 sps:$4 sm:$0x11]   ;;  %v815_v36 = vrot.slane %v6819_v25, 1 }
  0x5c   : > { %v5133_v48 = vcombine.low %v6930_v3, %v4815_v58  ;;  %v7015_v18 = vld [vmem:[%s6412_s10 + $0x64] sm:$0xf]  ;;  %5945 = vmatprep.subr.bf16.mxu0 %v7020_v13 }
  0x5d   : > { %3902 = vmatmul.mubr.bf16.gmra.mxu0 %v6281_v53  ;;  %4031 = vmatmul.mubr.bf16.gmra.mxu1 %v6282_v43  ;;  %v656_v53 = vsel %vm548_vm0, %v651_v26, %v655_v62  ;;  %v658_v43 = vshrl.u32 %v4951_v9, 16  ;;  %v5293_v62 = vcombine.high %v5122_v10, %v6875_v59  ;;  %v6934_v10 = vrot.slane %v1005_v28, 1  ;;  %v6940_v26 = vld [vmem:[%s6412_s10 + $0x80] ss:$0 sps:$4 sm:$0x11]  }
  0x5e   : > { %4038 = vmatprep.mubr.bf16.mxu1 %v5284_v34  ;;  %3909 = vmatprep.mubr.bf16.mxu0 %v5318_v23  ;;  %v5165_v34 = vcombine.low %v6805_v56, %v656_v53  ;;  %v6909_v50 = vsel %vm5082_vm1, %v6808_v6, %v656_v53  ;;  %v1737_v23 = vunpack.c.h.b16 %v6930_v3  ;;  %v672_v28 = vshll.u32 %v4953_v5, 16  ;;  %v6947_v53 = vld [vmem:[%s6412_s10 + $0x58] sm:$0xf] }
  0x5f   : > { %v663_v9 = vor.u32 %v662_v14, %v658_v43  ;;  %v677_v57 = vshll.u32 %v6940_v26, 16  ;;  %v6975_v5 = vcombine.low %v4815_v58, %v6897_v4 }
  0x60   : > { %v5327_v6 = vcombine.high %v5165_v34, %v6909_v50  ;;  %v6951_v1 = vpack.c.b16 %v881_v61, %v1737_v23  ;;  %v674_v37 = vrot.slane %v672_v28, 1  ;;  %v6970_v61 = vld [vmem:[%s6412_s10 + $0x88] sm:$0xf]  ;;  %v883_v23 = vunpack.c.l.b16 %v6947_v53 }
  0x61   : > { %v668_v43 = vsel %vm548_vm0, %v663_v9, %v667_v51  ;;  %v679_v14 = vrot.slane %v677_v57, 1  ;;  %v809_v51 = vrot.slane %v6732_v8, 1  ;;  %v4955_v58 = vcombine.low %v6964_v30, %v6970_v61  ;;  %v284_v57 = vld [vmem:[%s6412_s10 + $0x78] sm:$0xe] }
  0x62   : > { %v6961_v34 = vsel %vm5082_vm1, %v6867_v15, %v668_v43  ;;  %v675_v9 = vor.u32 %v674_v37, %v670_v31 }
  0x65   : > { %3910 = vmatmul.mubr.bf16.gmra.mxu0 %v6284_v35  ;;  %4039 = vmatmul.mubr.bf16.gmra.mxu1 %v6283_v63  ;;  %v6955_v63 = vld [vmem:[%s6412_s10 + $0x54] sm:$0xf]  ;;  %v5176_v35 = vcombine.low %v6864_v11, %v668_v43  ;;  %v689_v43 = vshll.u32 %v6979_v55, 16 }
  0x66   : > { %3917 = vmatprep.mubr.bf16.mxu0 %v5327_v6  ;;  %4046 = vmatprep.mubr.bf16.mxu1 %v5293_v62  ;;  %v6285_v62 = vcombine.low %v6838_v47, %v6875_v59  ;;  %v6286_v6 = vcombine.low %v6805_v56, %v6909_v50  ;;  %v6149_v47 = vld [vmem:[%s8610_s1 + $0x1d8] sm:$0xff]   ;;  %v5302_v59 = vcombine.high %v5133_v48, %v6951_v1  ;;  %v283_v48 = vld [vmem:[%s6412_s10 + $0x6c] sm:$0xe] }
  0x67   : > { %v5336_v8 = vcombine.high %v5176_v35, %v6961_v34  ;;  %v6988_v56 = vsel %vm789_vm2, %v6872_v12, %v809_v51  ;;  %v680_v50 = vsel %vm548_vm0, %v675_v9, %v679_v14  ;;  %5817 = vmatprep.subr.bf16.mxu1 %v6149_v47  ;;  %v6150_v12 = vld [vmem:[%s8610_s1 + $0x198] sm:$0xff]   ;;  %v7007_v14 = vrot.slane %v1017_v39, 1 }
  0x68   : > { %v1749_v31 = vunpack.c.h.b16 %v6988_v56  ;;  %v5144_v28 = vcombine.low %v6988_v56, %v6955_v63  ;;  %v5187_v35 = vcombine.low %v6918_v27, %v680_v50  ;;  %v7005_v37 = vsel %vm5082_vm1, %v6921_v2, %v680_v50  ;;  %5818 = vmatpush3.bf16.msra.mxu1 %v6150_v12 }
  0x69   : > { %v682_v9 = vshrl.u32 %v4955_v58, 16  ;;  %v684_v47 = vshll.u32 %v4955_v58, 16  ;;  %v1029_v39 = vshll.u32 %v6975_v5, 16  ;;  %v4974_v58 = vcombine.low %v283_v48, %v6867_v15  ;;  %5819 = vmatprep.subr.bf16.mxu1 %v6158_v22  ;;  %v7068_v48 = vld [vmem:[%s6412_s10 + $0x84] sm:$0xe] }
  0x6a   : > { %v7009_v51 = vpack.c.b16 %v883_v23, %v1749_v31  ;;  %v7029_v23 = vor.u32 %v6714_v45, %v967_v33  ;;  %v4975_v50 = vcombine.low %v284_v57, %v6921_v2  ;;  %v6287_v33 = vcombine.low %v6864_v11, %v6961_v34  ;;  %v6159_v2 = vld [vmem:[%s8610_s1 + $0x190] sm:$0xff]  }
  0x6b   : > { %v686_v31 = vrot.slane %v684_v47, 1  ;;  %v6288_v45 = vcombine.low %v6930_v3, %v6951_v1  ;;  %v885_v15 = vunpack.c.l.b16 %v7015_v18  ;;  %v7056_v11 = vsel %vm789_vm2, %v6883_v19, %v812_v20 }
  0x6c   : > { %v974_v34 = vshll.u32 %v7035_v60, 16  ;;  %v5345_v3 = vcombine.high %v5187_v35, %v7005_v37  ;;  %v5311_v25 = vcombine.high %v5144_v28, %v7009_v51  ;;  %v1761_v1 = vunpack.c.h.b16 %v7056_v11  ;;  %5820 = vmatpush3.bf16.msra.mxu1 %v6159_v2  ;;  %v6153_v2 = vld [vmem:[%s6412_s10 + $0x20] ss:$0 sps:$4 sm:$0x11]  }
  0x6d   : > { %3918 = vmatmul.mubr.bf16.gmra.mxu0 %v6286_v6  ;;  %4047 = vmatmul.mubr.bf16.gmra.mxu1 %v6285_v62  ;;  %v691_v6 = vrot.slane %v689_v43, 1  ;;  %v7024_v62 = vld [vmem:[%s6412_s10 + $0x70] sm:$0xf]  ;;  %v5155_v43 = vcombine.low %v7056_v11, %v7012_v40  ;;  %v817_v12 = vrot.slane %v4974_v58, 1  ;;  %v7073_v19 = vsel %vm789_vm2, %v6936_v32, %v815_v36  ;;  %v6167_v32 = vld [vmem:[%s8610_s1 + $0x1c8] sm:$0xff]  }
  0x6e   : > { %3925 = vmatprep.mubr.bf16.mxu0 %v5336_v8  ;;  %4054 = vmatprep.mubr.bf16.mxu1 %v5302_v59  ;;  %v7052_v8 = vcombine.low %v6955_v63, %v6947_v53  ;;  %v687_v59 = vor.u32 %v686_v31, %v682_v9  ;;  %v7065_v63 = vld [vmem:[%s6412_s10 + $0x6c] sm:$0xf]  ;;  %v887_v57 = vunpack.c.l.b16 %v7024_v62  ;;  %v7082_v47 = vpack.c.b16 %v885_v15, %v1761_v1 }
  0x6f   : > { %v7088_v58 = vrot.slane %v1029_v39, 1  ;;  %v1773_v31 = vunpack.c.h.b16 %v7073_v19  ;;  %v976_v36 = vrot.slane %v974_v34, 1  ;;  %v6168_v15 = vld [vmem:[%s8610_s1 + $0x188] sm:$0xff]   ;;  %v4976_v39 = vcombine.low %v7068_v48, %v6970_v61  ;;  %5821 = vmatprep.subr.bf16.mxu1 %v6167_v32 }
  0x70   : > { %v692_v20 = vsel %vm548_vm0, %v687_v59, %v691_v6  ;;  %v4853_v6 = vld [vmem:[%s6412_s10 + $0xc] sm:$0xe]  ;;  %v820_v59 = vrot.slane %v4975_v50, 1  ;;  %v1041_v1 = vshll.u32 %v7052_v8, 16  ;;  %v6289_v28 = vcombine.low %v6918_v27, %v7005_v37  ;;  %5822 = vmatpush3.bf16.msra.mxu1 %v6168_v15 }
  0x71   : > { %v5198_v35 = vcombine.low %v6964_v30, %v692_v20  ;;  %v7080_v9 = vsel %vm5082_vm1, %v6970_v61, %v692_v20  ;;  %v8618_v20 = vshrl.u32 %v6719_v0, 16  ;;  %v7109_v22 = vpack.c.b16 %v887_v57, %v1773_v31  ;;  %v7120_v0 = vld [vmem:[%s6412_s10 + $0x78] sm:$0xf] }
  0x72   : > { %v5013_v50 = vcombine.low %v4853_v6, %v6648_v16  ;;  %v6290_v61 = vcombine.low %v6988_v56, %v7009_v51  ;;  %v986_v27 = vshll.u32 %v6153_v2, 16  ;;  %v6176_v16 = vld [vmem:[%s8610_s1 + $0x1c0] sm:$0xff]   ;;  %v5320_v48 = vcombine.high %v5155_v43, %v7082_v47  ;;  %v7149_v43 = vld [vmem:[%s6412_s10 + $0x88] sm:$0xf] }
  0x73   : > { %v984_v34 = vor.u32 %v6785_v52, %v8618_v20  ;;  %v818_v52 = vrot.slane %v6886_v29, 1  ;;  %v6177_v29 = vld [vmem:[%s8610_s1 + $0x180] sm:$0xff]   ;;  %v5354_v51 = vcombine.high %v5198_v35, %v7080_v9  ;;  %5823 = vmatprep.subr.bf16.mxu1 %v6176_v16  ;;  %v1039_v35 = vshrl.u32 %v7052_v8, 16  ;;  %v6180_v8 = vld [vmem:[%s6412_s10 + $0x68] ss:$0 sps:$4 sm:$0x11]  }
  0x74   : > { %v1206_v56 = vrot.slane %v5013_v50, 1  ;;  %v988_v6 = vrot.slane %v986_v27, 1  ;;  %v7146_v15 = vrot.slane %v1041_v1, 1  ;;  %5824 = vmatpush3.bf16.msra.mxu1 %v6177_v29  ;;  %v1210_v20 = vrot.slane %v6153_v2, 1 }
  0x75   : > { %3926 = vmatmul.mubr.bf16.gmra.mxu0 %v6287_v33  ;;  %4055 = vmatmul.mubr.bf16.gmra.mxu1 %v6288_v45  ;;  %v7101_v33 = vld [vmem:[%s6412_s10 + $0x7c] sm:$0xf]  ;;  %v4854_v45 = vld [vmem:[%s6412_s10 + $0x18] sm:$0xe]  ;;  %v7138_v57 = vsel %vm789_vm2, %v817_v12, %v818_v52  ;;  %v821_v50 = vrot.slane %v6940_v26, 1  ;;  %v7159_v1 = vcombine.low %v7065_v63, %v7024_v62  ;;  %v891_v16 = vunpack.c.l.b16 %v7149_v43 }
  0x76   : > { %3933 = vmatprep.mubr.bf16.mxu0 %v5345_v3  ;;  %4062 = vmatprep.mubr.bf16.mxu1 %v5311_v25  ;;  %v1207_v3 = vrot.slane %v7035_v60, 1  ;;  %v7117_v25 = vcombine.low %v7012_v40, %v7015_v18  ;;  %v7128_v60 = vsel %vm548_vm0, %v7029_v23, %v976_v36  ;;  %v889_v37 = vunpack.c.l.b16 %v7101_v33  ;;  %v6156_v23 = vld [vmem:[%s6412_s10 + $0x2c] ss:$0 sps:$4 sm:$0x11]   ;;  %v7162_v52 = vld [vmem:[%s6412_s10 + $0x84] sm:$0xf] }
  0x77   : > { %v5014_v40 = vcombine.low %v4854_v45, %v6694_v49  ;;  %v1785_v31 = vunpack.c.h.b16 %v7138_v57  ;;  %v5177_v49 = vcombine.low %v7138_v57, %v7120_v0  ;;  %v7154_v45 = vsel %vm548_vm0, %v984_v34, %v988_v6 }
  0x78   : > { %v1208_v32 = vsel %vm789_vm2, %v1206_v56, %v1207_v3  ;;  %v823_v3 = vrot.slane %v4976_v39, 1  ;;  %v998_v27 = vshll.u32 %v6156_v23, 16  ;;  %v1053_v2 = vshll.u32 %v7117_v25, 16 }
  0x79   : > { %v1209_v36 = vrot.slane %v5014_v40, 1  ;;  %v7151_v12 = vpack.c.b16 %v889_v37, %v1785_v31  ;;  %v7173_v39 = vsel %vm789_vm2, %v820_v59, %v821_v50  ;;  %v6291_v56 = vcombine.low %v6964_v30, %v7080_v9 }
  0x7a   : > { %v6292_v37 = vcombine.low %v7056_v11, %v7082_v47  ;;  %v1797_v40 = vunpack.c.h.b16 %v7173_v39  ;;  %v5188_v29 = vcombine.low %v7173_v39, %v7162_v52  ;;  %v8620_v30 = vcombine.low %v7073_v19, %v7065_v63 }
  0x7b   : > { %v7170_v26 = vsel %vm789_vm2, %v1209_v36, %v1210_v20  ;;  %v1213_v9 = vrot.slane %v6156_v23, 1  ;;  %v824_v36 = vrot.slane %v6979_v55, 1  ;;  %v7200_v20 = vrot.slane %v1053_v2, 1  ;;  %v7215_v2 = vld [vmem:[%s6412_s10 + $0xa0] sm:$0xf] }
  0x7c   : > { %v5329_v11 = vcombine.high %v8620_v30, %v7109_v22  ;;  %v7193_v47 = vpack.c.b16 %v891_v16, %v1797_v40  ;;  %v1063_v50 = vshrl.u32 %v7159_v1, 16  ;;  %v8621_v55 = vshrl.u32 %v6854_v54, 16 }
  0x7d   : > { %3934 = vmatmul.mubr.bf16.gmra.mxu0 %v6289_v28  ;;  %4063 = vmatmul.mubr.bf16.gmra.mxu1 %v6290_v61  ;;  %v4855_v28 = vld [vmem:[%s6412_s10 + $0x24] sm:$0xe]  ;;  %v8619_v61 = vshrl.u32 %v6758_v44, 16  ;;  %v7181_v44 = vld [vmem:[%s6412_s10 + $0x94] sm:$0xf]  ;;  %v1821_v16 = vunpack.c.h.b16 %v6683_v21 }
  0x7e   : > { %3941 = vmatprep.mubr.bf16.mxu0 %v5354_v51  ;;  %4070 = vmatprep.mubr.bf16.mxu1 %v5320_v48  ;;  %v1000_v51 = vrot.slane %v998_v27, 1  ;;  %v5015_v59 = vcombine.low %v4855_v28, %v6740_v24  ;;  %v1065_v48 = vshll.u32 %v7159_v1, 16  ;;  %v1051_v24 = vshrl.u32 %v7117_v25, 16  ;;  %v7204_v28 = vld [vmem:[%s6412_s10 + $0x90] sm:$0xf] }
  0x7f   : > { %v996_v34 = vor.u32 %v6881_v17, %v8619_v61  ;;  %v6162_v17 = vld [vmem:[%s6412_s10 + $0x38] ss:$0 sps:$4 sm:$0x11]   ;;  %v893_v61 = vunpack.c.l.b16 %v7181_v44  ;;  %v1008_v27 = vor.u32 %v6934_v10, %v8621_v55  ;;  %v8622_v55 = vshrl.u32 %v6926_v46, 16 }
  0x80   : > { %v1212_v31 = vrot.slane %v5015_v59, 1  ;;  %v1010_v63 = vshll.u32 %v6162_v17, 16  ;;  %v7218_v40 = vrot.slane %v1065_v48, 1  ;;  %v7231_v59 = vld [vmem:[%s6412_s10 + $0x9c] sm:$0xf]  ;;  %v6293_v48 = vcombine.low %v7073_v19, %v7109_v22 }
  0x81   : > { %v7196_v6 = vsel %vm548_vm0, %v996_v34, %v1000_v51  ;;  %v4856_v34 = vld [vmem:[%s6412_s10 + $0x30] sm:$0xe]  ;;  %v1216_v30 = vrot.slane %v6162_v17, 1 }
  0x82   : > { %v7207_v23 = vsel %vm789_vm2, %v1212_v31, %v1213_v9  ;;  %v1012_v51 = vrot.slane %v1010_v63, 1  ;;  %v5338_v9 = vcombine.high %v5177_v49, %v7151_v12  ;;  %v7244_v31 = vcombine.low %v7162_v52, %v7149_v43  ;;  %v4857_v63 = vld [vmem:[%s6412_s10 + $0x3c] sm:$0xe] }
  0x84   : > { %v7253_v19 = vsel %vm548_vm0, %v1008_v27, %v1012_v51  ;;  %v5017_v51 = vcombine.low %v4857_v63, %v6834_v42  ;;  %v6294_v42 = vcombine.low %v7138_v57, %v7151_v12  ;;  %v6171_v63 = vld [vmem:[%s6412_s10 + $0x50] ss:$0 sps:$4 sm:$0x11]   ;;  %v7291_v57 = vld [vmem:[%s6412_s10 + $0xa8] sm:$0xf] }
  0x85   : > { %3942 = vmatmul.mubr.bf16.gmra.mxu0 %v6291_v56  ;;  %4071 = vmatmul.mubr.bf16.gmra.mxu1 %v6292_v37  ;;  %v7221_v56 = vsel %vm789_vm2, %v823_v3, %v824_v36  ;;  %v7225_v37 = vcombine.low %v7120_v0, %v7101_v33  ;;  %v895_v3 = vunpack.c.l.b16 %v7215_v2  ;;  %v5210_v0 = vcombine.low %v6683_v21, %v7231_v59  ;;  %v4858_v12 = vld [vmem:[%s6412_s10 + $0x48] sm:$0xe] }
  0x86   : > { %4078 = vmatprep.mubr.bf16.mxu1 %v5329_v11  ;;  %4175 = vmatprep.mubr.bf16.mxu0 %v1208_v32  ;;  %v1809_v54 = vunpack.c.h.b16 %v7221_v56  ;;  %v5199_v10 = vcombine.low %v7221_v56, %v7204_v28  ;;  %v5016_v32 = vcombine.low %v4856_v34, %v6797_v38  ;;  %v6165_v11 = vld [vmem:[%s6412_s10 + $0x44] ss:$0 sps:$4 sm:$0x11]   ;;  %v6160_v38 = vld [vmem:[%s8610_s1 + $0x230] sm:$0xff]  }
  0x87   : > { %v7257_v49 = vpack.c.b16 %v895_v3, %v1821_v16  ;;  %v1075_v17 = vshrl.u32 %v7225_v37, 16  ;;  %v1022_v27 = vshll.u32 %v6165_v11, 16  ;;  %v1089_v16 = vshll.u32 %v7244_v31, 16  ;;  %v7274_v3 = vld [vmem:[%s6412_s10 + $0xac] sm:$0xf] }
  0x88   : > { %v7246_v36 = vpack.c.b16 %v893_v61, %v1809_v54  ;;  %v1215_v22 = vrot.slane %v5016_v32, 1  ;;  %v1077_v61 = vshll.u32 %v7225_v37, 16  ;;  %v1020_v54 = vor.u32 %v7007_v14, %v8622_v55 }
  0x89   : > { %v1219_v32 = vrot.slane %v6165_v11, 1  ;;  %v1024_v46 = vrot.slane %v1022_v27, 1  ;;  %v1218_v14 = vrot.slane %v5017_v51, 1  ;;  %v5347_v11 = vcombine.high %v5188_v29, %v7193_v47  ;;  %v7309_v27 = vld [vmem:[%s6412_s10 + $0x5c] ss:$0 sps:$4 sm:$0x11]  }
  0x8a   : > { %v7262_v34 = vsel %vm789_vm2, %v1215_v22, %v1216_v30  ;;  %v6169_v30 = vld [vmem:[%s8610_s1 + $0x228] sm:$0xff]   ;;  %v897_v52 = vunpack.c.l.b16 %v7274_v3  ;;  %v8623_v29 = vshrl.u32 %v6975_v5, 16  ;;  %v1222_v5 = vrot.slane %v6171_v63, 1  ;;  %v6178_v51 = vld [vmem:[%s8610_s1 + $0x220] sm:$0xff]  }
  0x8b   : > { %v7298_v22 = vsel %vm789_vm2, %v1218_v14, %v1219_v32  ;;  %v1034_v32 = vshll.u32 %v6171_v63, 16  ;;  %v7318_v14 = vrot.slane %v1077_v61, 1  ;;  %v7328_v61 = vrot.slane %v1089_v16, 1 }
  0x8c   : > { %v1032_v55 = vor.u32 %v7088_v58, %v8623_v29  ;;  %v6295_v63 = vcombine.low %v7173_v39, %v7193_v47  ;;  %v1044_v47 = vor.u32 %v7146_v15, %v1039_v35  ;;  %v5365_v25 = vcombine.high %v5210_v0, %v7257_v49 }
  0x8d   : > { %4079 = vmatmul.mubr.bf16.gmra.mxu1 %v6293_v48  ;;  %4176 = vmatmul.mubr.bf16.vlgmr.msra.gmra.mxu0 %v7128_v60  ;;  %v6266_v60 = vld [vmem:[%s6412_s10 + $0xa4] ss:$0 sps:$4 sm:$0x11]   ;;  %v1036_v58 = vrot.slane %v1034_v32, 1  ;;  %v4859_v32 = vld [vmem:[%s6412_s10 + $0x54] sm:$0xe]  ;;  %v6297_v1 = vcombine.low %v6683_v21, %v7257_v49 }
  0x8e   : > { %5946 = vmatpush3.bf16.msra.mxu0 %v7020_v13  ;;  %4086 = vmatprep.mubr.bf16.mxu1 %v5338_v9  ;;  %v830_v48 = vrot.slane %v6266_v60, 1  ;;  %v7288_v13 = vcombine.low %v7204_v28, %v7181_v44  ;;  %v7295_v9 = vsel %vm548_vm0, %v1020_v54, %v1024_v46  ;;  %v5018_v46 = vcombine.low %v4858_v12, %v6897_v4  ;;  %v7333_v12 = vld [vmem:[%s6412_s10 + $0xb4] sm:$0xf] }
  0x8f   : > { %4183 = vmatprep.mubr.bf16.mxu0 %v7170_v26  ;;  %5947 = vmatprep.subr.bf16.mxu0 %v6160_v38  ;;  %v1087_v4 = vshrl.u32 %v7244_v31, 16  ;;  %v5019_v15 = vcombine.low %v4859_v32, %v6947_v53 }
  0x90   : > { %v7302_v26 = vsel %vm789_vm2, %v6538_v41, %v830_v48  ;;  %v7316_v41 = vld [vmem:[%s6412_s10 + $0xb8] sm:$0xf]  ;;  %v1221_v48 = vrot.slane %v5018_v46, 1 }
  0x91   : > { %v1833_v54 = vunpack.c.h.b16 %v7302_v26  ;;  %v899_v16 = vunpack.c.l.b16 %v7316_v41  ;;  %v1224_v53 = vrot.slane %v5019_v15, 1  ;;  %v4861_v15 = vld [vmem:[%s6412_s10 + $0x6c] sm:$0xe] }
  0x92   : > { %5948 = vmatpush3.bf16.msra.mxu0 %v6160_v38  ;;  %v6267_v38 = vld [vmem:[%s6412_s10 + $0xb0] ss:$0 sps:$4 sm:$0x11]  }
  0x93   : > { %5949 = vmatprep.subr.bf16.mxu0 %v6169_v30  ;;  %v7320_v60 = vpack.c.b16 %v897_v52, %v1833_v54  ;;  %v833_v29 = vrot.slane %v6267_v38, 1  ;;  %v1046_v52 = vshll.u32 %v7309_v27, 16  ;;  %v7342_v54 = vsel %vm789_vm2, %v1221_v48, %v1222_v5  ;;  %v6268_v38 = vld [vmem:[%s6412_s10 + $0xbc] ss:$0 sps:$4 sm:$0x11]  }
  0x94   : > { %v1225_v5 = vrot.slane %v7309_v27, 1  ;;  %v7386_v27 = vld [vmem:[%s6412_s10 + $0xc0] sm:$0xf] }
  0x95   : > { %4087 = vmatmul.mubr.bf16.gmra.mxu1 %v6294_v42  ;;  %4184 = vmatmul.mubr.bf16.gmra.mxu0 %v7154_v45  ;;  %v1101_v42 = vshll.u32 %v7288_v13, 16  ;;  %v7339_v45 = vsel %vm548_vm0, %v1032_v55, %v1036_v58  ;;  %v7348_v39 = vsel %vm789_vm2, %v6567_v7, %v833_v29  ;;  %v1048_v35 = vrot.slane %v1046_v52, 1  ;;  %v6198_v55 = vld [vmem:[%s8610_s1 + $0x210] sm:$0xff]  }
  0x96   : > { %4094 = vmatprep.mubr.bf16.mxu1 %v5347_v11  ;;  %4191 = vmatprep.mubr.bf16.mxu0 %v7207_v23  ;;  %v7354_v23 = vld [vmem:[%s6412_s10 + $0xc4] sm:$0xf]  ;;  %v6187_v11 = vld [vmem:[%s8610_s1 + $0x218] sm:$0xff]   ;;  %v1845_v46 = vunpack.c.h.b16 %v7348_v39  ;;  %v5356_v58 = vcombine.high %v5199_v10, %v7246_v36  ;;  %v836_v29 = vrot.slane %v6268_v38, 1  ;;  %v4860_v10 = vld [vmem:[%s6412_s10 + $0x60] sm:$0xe]  ;;  %v8626_v31 = vcombine.low %v7348_v39, %v7333_v12 }
  0x97   : > { %5950 = vmatpush3.bf16.msra.mxu0 %v6169_v30  ;;  %v7362_v30 = vcombine.low %v7231_v59, %v7215_v2  ;;  %v7380_v7 = vrot.slane %v1101_v42, 1  ;;  %v7383_v52 = vsel %vm548_vm0, %v1044_v47, %v1048_v35  ;;  %v901_v28 = vunpack.c.l.b16 %v7354_v23  ;;  %v6182_v38 = vld [vmem:[%s6412_s10 + $0x74] ss:$0 sps:$4 sm:$0x11]   ;;  %v6209_v59 = vld [vmem:[%s8610_s1 + $0x208] sm:$0xff]  }
  0x98   : > { %5951 = vmatprep.subr.bf16.mxu0 %v6178_v51  ;;  %v7374_v48 = vpack.c.b16 %v899_v16, %v1845_v46  ;;  %v6296_v16 = vcombine.low %v7221_v56, %v7246_v36  ;;  %v8624_v46 = vld [vmem:[#allocation3_spill] sm:$0xff]  ;;  %v1058_v47 = vshll.u32 %v6180_v8, 16  ;;  %v7400_v35 = vsel %vm789_vm2, %v1224_v53, %v1225_v5 }
  0x99   : > { %v1113_v32 = vshll.u32 %v7362_v30, 16  ;;  %v7395_v42 = vsel %vm789_vm2, %v8624_v46, %v836_v29  ;;  %v1056_v36 = vor.u32 %v7200_v20, %v1051_v24  ;;  %v7412_v29 = vld [vmem:[%s6412_s10 + $0x18] sm:$0xf]  ;;  %v7415_v46 = vld [vmem:[%s6412_s10 + $0x20] ss:$0 sps:$4 sm:$0x11]   ;;  %v5020_v24 = vcombine.low %v4860_v10, %v7015_v18 }
  0x9a   : > { %v1857_v56 = vunpack.c.h.b16 %v7395_v42  ;;  %v1228_v20 = vrot.slane %v6180_v8, 1  ;;  %v7431_v53 = vcombine.low %v7291_v57, %v7274_v3  ;;  %v1070_v8 = vshll.u32 %v6182_v38, 16 }
  0x9b   : > { %5952 = vmatpush3.bf16.msra.mxu0 %v6178_v51  ;;  %v1227_v0 = vrot.slane %v5020_v24, 1  ;;  %v1231_v10 = vrot.slane %v6182_v38, 1  ;;  %v7458_v38 = vld [vmem:[%s6412_s10 + $0x24] sm:$0xf]  ;;  %v7462_v51 = vld [vmem:[%s6412_s10 + $0x28] sm:$0xf] }
  0x9c   : > { %5953 = vmatprep.subr.bf16.mxu0 %v6187_v11  ;;  %v7421_v5 = vpack.c.b16 %v901_v28, %v1857_v56  ;;  %v5021_v28 = vcombine.low %v4861_v15, %v7024_v62  ;;  %v6188_v56 = vld [vmem:[%s6412_s10 + $0x80] ss:$0 sps:$4 sm:$0x11]   ;;  %v1072_v62 = vrot.slane %v1070_v8, 1  ;;  %v4862_v15 = vld [vmem:[%s6412_s10 + $0x78] sm:$0xe]  ;;  %v5031_v37 = vcombine.low %v7458_v38, %v7462_v51 }
  0x9d   : > { %4095 = vmatmul.mubr.bf16.gmra.mxu1 %v6295_v63  ;;  %4192 = vmatmul.mubr.bf16.gmra.mxu0 %v7196_v6  ;;  %v5243_v6 = vcombine.low %v7395_v42, %v7386_v27  ;;  %v1060_v63 = vrot.slane %v1058_v47, 1  ;;  %v1390_v47 = vshll.u32 %v7415_v46, 16 }
  0x9e   : > { %4102 = vmatprep.mubr.bf16.mxu1 %v5356_v58  ;;  %4199 = vmatprep.mubr.bf16.mxu0 %v7262_v34  ;;  %v7425_v34 = vld [vmem:[%s6412_s10 + $0x1c] sm:$0xf]  ;;  %v7427_v58 = vrot.slane %v1113_v32, 1  ;;  %v1230_v24 = vrot.slane %v5021_v28, 1 }
  0x9f   : > { %5954 = vmatpush3.bf16.msra.mxu0 %v6187_v11  ;;  %v7437_v18 = vsel %vm548_vm0, %v1056_v36, %v1060_v63  ;;  %v1068_v11 = vor.u32 %v7218_v40, %v1063_v50  ;;  %v5029_v32 = vcombine.low %v7412_v29, %v7425_v34  ;;  %v6220_v36 = vld [vmem:[%s8610_s1 + $0x200] sm:$0xff]   ;;  %v1123_v50 = vshrl.u32 %v7431_v53, 16 }
  0xa0   : > { %5955 = vmatprep.subr.bf16.mxu0 %v6198_v55  ;;  %v7454_v40 = vsel %vm789_vm2, %v1227_v0, %v1228_v20  ;;  %v1125_v63 = vshll.u32 %v7431_v53, 16  ;;  %v6191_v0 = vld [vmem:[%s6412_s10 + $0x2c] ss:$0 sps:$4 sm:$0x11]   ;;  %v1392_v8 = vrot.slane %v1390_v47, 1 }
  0xa1   : > { %v7466_v21 = vsel %vm548_vm0, %v1068_v11, %v1072_v62  ;;  %v1383_v49 = vshrl.u32 %v5029_v32, 16  ;;  %v1385_v20 = vshll.u32 %v5029_v32, 16  ;;  %v5022_v11 = vcombine.low %v4862_v15, %v7101_v33  ;;  %v6193_v62 = vld [vmem:[%s6412_s10 + $0x8c] ss:$0 sps:$4 sm:$0x11]  }
  0xa2   : > { %v7479_v32 = vcombine.low %v7333_v12, %v7316_v41  ;;  %v1402_v47 = vshll.u32 %v6191_v0, 16 }
  0xa3   : > { %5956 = vmatpush3.bf16.msra.mxu0 %v6198_v55  ;;  %v7471_v55 = vsel %vm789_vm2, %v1230_v24, %v1231_v10  ;;  %v1387_v28 = vrot.slane %v1385_v20, 1  ;;  %v4918_v10 = vld [vmem:[%s6412_s10 + $0x24] sm:$0xe]  ;;  %v1397_v24 = vshll.u32 %v5031_v37, 16 }
  0xa4   : > { %5957 = vmatprep.subr.bf16.mxu0 %v6209_v59 }
  0xa5   : > { %4103 = vmatmul.mubr.bf16.gmra.mxu1 %v6296_v16  ;;  %4200 = vmatmul.mubr.bf16.gmra.mxu0 %v7253_v19  ;;  %v1080_v16 = vor.u32 %v7318_v14, %v1075_v17  ;;  %v1082_v19 = vshll.u32 %v6188_v56, 16  ;;  %v8625_v17 = vcombine.low %v7302_v26, %v7291_v57  ;;  %v1388_v33 = vor.u32 %v1387_v28, %v1383_v49  ;;  %v4863_v49 = vld [vmem:[%s6412_s10 + $0x84] sm:$0xe]  ;;  %v7501_v28 = vld [vmem:[%s6412_s10 + $0x30] sm:$0xf] }
  0xa6   : > { %4110 = vmatprep.mubr.bf16.mxu1 %v5365_v25  ;;  %4207 = vmatprep.mubr.bf16.mxu0 %v7298_v22  ;;  %v1234_v22 = vrot.slane %v6188_v56, 1  ;;  %v1395_v56 = vshrl.u32 %v5031_v37, 16  ;;  %v5062_v57 = vcombine.low %v4918_v10, %v7462_v51  ;;  %v1094_v10 = vshll.u32 %v6193_v62, 16 }
  0xa7   : > { %5958 = vmatpush3.bf16.msra.mxu0 %v6209_v59  ;;  %v1084_v25 = vrot.slane %v1082_v19, 1  ;;  %v5374_v14 = vcombine.high %v8625_v17, %v7320_v60  ;;  %v1233_v59 = vrot.slane %v5022_v11, 1  ;;  %v7493_v20 = vsel %vm548_vm0, %v1388_v33, %v1392_v8  ;;  %v7511_v8 = vld [vmem:[%s6412_s10 + $0x38] ss:$0 sps:$4 sm:$0x11]  }
  0xa8   : > { %5959 = vmatprep.subr.bf16.mxu0 %v6220_v36  ;;  %v1626_v17 = vrot.slane %v6191_v0, 1  ;;  %v7508_v11 = vsel %vm5082_vm1, %v7425_v34, %v7493_v20  ;;  %v1625_v0 = vrot.slane %v5062_v57, 1  ;;  %v6298_v37 = vcombine.low %v7302_v26, %v7320_v60  ;;  %v4864_v26 = vld [vmem:[%s6412_s10 + $0x90] sm:$0xe] }
  0xa9   : > { %v7490_v15 = vsel %vm548_vm0, %v1080_v16, %v1084_v25  ;;  %v7496_v19 = vsel %vm789_vm2, %v1233_v59, %v1234_v22  ;;  %v1399_v25 = vrot.slane %v1397_v24, 1  ;;  %v1404_v22 = vrot.slane %v1402_v47, 1  ;;  %v6199_v60 = vld [vmem:[%s6412_s10 + $0x98] ss:$0 sps:$4 sm:$0x11]  }
  0xaa   : > { %v1137_v33 = vshll.u32 %v7479_v32, 16  ;;  %v1627_v59 = vsel %vm789_vm2, %v1625_v0, %v1626_v17  ;;  %v1096_v47 = vrot.slane %v1094_v10, 1  ;;  %v1237_v24 = vrot.slane %v6193_v62, 1 }
  0xab   : > { %5960 = vmatpush3.bf16.msra.mxu0 %v6220_v36  ;;  %v7515_v36 = vld [vmem:[%s6412_s10 + $0x34] sm:$0xf]  ;;  %v5092_v57 = vcombine.low %v1627_v59, %v1627_v59  ;;  %v5098_v16 = vcombine.high %v1627_v59, %v1627_v59  ;;  %v1414_v62 = vshll.u32 %v7511_v8, 16  ;;  %v8627_v59 = vshrl.u32 %v7288_v13, 16 }
  0xad   : > { %4111 = vmatmul.mubr.bf16.gmra.mxu1 %v6297_v1  ;;  %4208 = vmatmul.mubr.bf16.gmra.mxu0 %v7295_v9  ;;  %v1092_v9 = vor.u32 %v7328_v61, %v1087_v4  ;;  %v1400_v1 = vor.u32 %v1399_v25, %v1395_v56  ;;  %v5383_v4 = vcombine.high %v8626_v31, %v7374_v48  ;;  %v6204_v31 = vld [vmem:[%s6412_s10 + $0xa4] ss:$0 sps:$4 sm:$0x11]  }
  0xae   : > { %4118 = vmatprep.mubr.bf16.mxu1 %v5374_v14  ;;  %4215 = vmatprep.mubr.bf16.mxu0 %v7342_v54  ;;  %v5023_v14 = vcombine.low %v4863_v49, %v7149_v43  ;;  %v5033_v54 = vcombine.low %v7501_v28, %v7515_v36  ;;  %2196 = vst [vmem:[#allocation2 + $0x68] sm:$0xf] %v5092_v57  ;;  %2201 = vst [vmem:[#allocation2 + $0x8c] sm:$0xf] %v5098_v16 }
  0xaf   : > { %v7535_v61 = vsel %vm548_vm0, %v1400_v1, %v1404_v22  ;;  %v7546_v17 = vsel %vm548_vm0, %v1092_v9, %v1096_v47  ;;  %v7549_v49 = vld [vmem:[%s6412_s10 + $0x44] ss:$0 sps:$4 sm:$0x11]   ;;  %v6299_v25 = vcombine.low %v7348_v39, %v7374_v48  ;;  %v7555_v22 = vcombine.low %v7386_v27, %v7354_v23  ;;  %v7558_v1 = vld [vmem:[%s6412_s10 + $0x3c] sm:$0xf] }
  0xb0   : > { %v7543_v56 = vsel %vm5082_vm1, %v7462_v51, %v7535_v61  ;;  %v1236_v12 = vrot.slane %v5023_v14, 1  ;;  %v1407_v0 = vshrl.u32 %v5033_v54, 16  ;;  %v1409_v10 = vshll.u32 %v5033_v54, 16  ;;  %v7561_v51 = vld [vmem:[%s6412_s10 + $0x40] sm:$0xf] }
  0xb1   : > { %v1416_v9 = vrot.slane %v1414_v62, 1  ;;  %v1104_v47 = vor.u32 %v7380_v7, %v8627_v59  ;;  %v1106_v39 = vshll.u32 %v6199_v60, 16  ;;  %v5024_v57 = vcombine.low %v4864_v26, %v7181_v44  ;;  %v7595_v59 = vld [vmem:[%s6412_s10 + $0x50] ss:$0 sps:$4 sm:$0x11]  }
  0xb2   : > { %v7564_v16 = vsel %vm789_vm2, %v1236_v12, %v1237_v24  ;;  %v1411_v48 = vrot.slane %v1409_v10, 1  ;;  %v1240_v24 = vrot.slane %v6199_v60, 1  ;;  %v5035_v13 = vcombine.low %v7558_v1, %v7561_v51  ;;  %v4865_v60 = vld [vmem:[%s6412_s10 + $0x9c] sm:$0xe]  ;;  %v7592_v10 = vld [vmem:[%s6412_s10 + $0x48] sm:$0xf] }
  0xb3   : > { %v1108_v14 = vrot.slane %v1106_v39, 1  ;;  %v1426_v7 = vshll.u32 %v7549_v49, 16  ;;  %v1239_v54 = vrot.slane %v5024_v57, 1  ;;  %v5392_v44 = vcombine.high %v5243_v6, %v7421_v5 }
  0xb4   : > { %v1421_v26 = vshll.u32 %v5035_v13, 16  ;;  %v1419_v12 = vshrl.u32 %v5035_v13, 16  ;;  %v8628_v39 = vshrl.u32 %v7362_v30, 16  ;;  %v1118_v57 = vshll.u32 %v6204_v31, 16 }
  0xb5   : > { %4119 = vmatmul.mubr.bf16.gmra.mxu1 %v6298_v37  ;;  %4216 = vmatmul.mubr.bf16.gmra.mxu0 %v7339_v45  ;;  %v1149_v37 = vshll.u32 %v7555_v22, 16  ;;  %v1412_v45 = vor.u32 %v1411_v48, %v1407_v0  ;;  %v7589_v62 = vsel %vm789_vm2, %v1239_v54, %v1240_v24  ;;  %v1428_v0 = vrot.slane %v1426_v7, 1  ;;  %v6210_v24 = vld [vmem:[%s6412_s10 + $0xb0] ss:$0 sps:$4 sm:$0x11]  }
  0xb6   : > { %4126 = vmatprep.mubr.bf16.mxu1 %v5383_v4  ;;  %4223 = vmatprep.mubr.bf16.mxu0 %v7400_v35  ;;  %v7582_v35 = vsel %vm548_vm0, %v1104_v47, %v1108_v14  ;;  %v7605_v47 = vld [vmem:[%s6412_s10 + $0x4c] sm:$0xf]  ;;  %v1116_v48 = vor.u32 %v7427_v58, %v8628_v39  ;;  %v5025_v14 = vcombine.low %v4865_v60, %v7215_v2  ;;  %v1127_v13 = vrot.slane %v1125_v63, 1 }
  0xb7   : > { %v7586_v4 = vsel %vm548_vm0, %v1412_v45, %v1416_v9  ;;  %v1423_v9 = vrot.slane %v1421_v26, 1  ;;  %v1135_v7 = vshrl.u32 %v7479_v32, 16  ;;  %v1139_v45 = vrot.slane %v1137_v33, 1  ;;  %v4917_v32 = vld [vmem:[%s6412_s10 + $0x18] sm:$0xe] }
  0xb8   : > { %v7602_v6 = vsel %vm5082_vm1, %v7515_v36, %v7586_v4  ;;  %v1120_v58 = vrot.slane %v1118_v57, 1  ;;  %v1242_v2 = vrot.slane %v5025_v14, 1  ;;  %v1243_v26 = vrot.slane %v6204_v31, 1  ;;  %v6215_v14 = vld [vmem:[%s6412_s10 + $0xbc] ss:$0 sps:$4 sm:$0x11]  }
  0xb9   : > { %v1424_v30 = vor.u32 %v1423_v9, %v1419_v12  ;;  %v7619_v60 = vrot.slane %v1149_v37, 1  ;;  %v6300_v63 = vcombine.low %v7395_v42, %v7421_v5  ;;  %v1438_v33 = vshll.u32 %v7595_v59, 16  ;;  %v7639_v12 = vld [vmem:[%s6412_s10 + $0x54] sm:$0xf] }
  0xba   : > { %v7633_v37 = vsel %vm548_vm0, %v1116_v48, %v1120_v58  ;;  %v7652_v9 = vld [vmem:[%s6412_s10 + $0x5c] ss:$0 sps:$4 sm:$0x11]   ;;  %v1128_v57 = vor.u32 %v1127_v13, %v1123_v50  ;;  %v8629_v58 = vcombine.low %v7412_v29, %v7493_v20  ;;  %v1246_v43 = vrot.slane %v6210_v24, 1  ;;  %v4867_v50 = vld [vmem:[%s6412_s10 + $0xb4] sm:$0xe] }
  0xbb   : > { %v7630_v31 = vsel %vm548_vm0, %v1424_v30, %v1428_v0  ;;  %v7649_v0 = vld [vmem:[%s6412_s10 + $0x58] sm:$0xf]  ;;  %v5061_v30 = vcombine.low %v4917_v32, %v7425_v34  ;;  %v1450_v53 = vshll.u32 %v7652_v9, 16  ;;  %v1140_v13 = vor.u32 %v1139_v45, %v1135_v7 }
  0xbc   : > { %v7646_v5 = vsel %vm5082_vm1, %v7561_v51, %v7630_v31 }
  0xbd   : > { %4127 = vmatmul.mubr.bf16.gmra.mxu1 %v6299_v25  ;;  %4224 = vmatmul.mubr.bf16.gmra.mxu0 %v7383_v52  ;;  %v5037_v52 = vcombine.low %v7592_v10, %v7605_v47  ;;  %v4866_v25 = vld [vmem:[%s6412_s10 + $0xa8] sm:$0xe] }
  0xbe   : > { %4134 = vmatprep.mubr.bf16.mxu1 %v5392_v44  ;;  %4231 = vmatprep.mubr.bf16.mxu0 %v7454_v40  ;;  %v7636_v44 = vsel %vm789_vm2, %v1242_v2, %v1243_v26  ;;  %v1130_v40 = vshll.u32 %v6210_v24, 16  ;;  %v5261_v2 = vcombine.high %v8629_v58, %v7508_v11  ;;  %v1440_v26 = vrot.slane %v1438_v33, 1  ;;  %v4919_v24 = vld [vmem:[%s6412_s10 + $0x30] sm:$0xe] }
  0xbf   : > { %v1431_v39 = vshrl.u32 %v5037_v52, 16  ;;  %v1433_v48 = vshll.u32 %v5037_v52, 16  ;;  %v5026_v54 = vcombine.low %v4866_v25, %v7274_v3  ;;  %v5039_v52 = vcombine.low %v7639_v12, %v7649_v0 }
  0xc0   : > { %v1132_v27 = vrot.slane %v1130_v40, 1  ;;  %v1142_v33 = vshll.u32 %v6215_v14, 16  ;;  %v6301_v3 = vcombine.low %v7412_v29, %v7508_v11  ;;  %v5027_v25 = vcombine.low %v4867_v50, %v7316_v41  ;;  %v7683_v40 = vld [vmem:[%s6412_s10 + $0x68] ss:$0 sps:$4 sm:$0x11]  }
  0xc1   : > { %v1435_v42 = vrot.slane %v1433_v48, 1  ;;  %v1245_v32 = vrot.slane %v5026_v54, 1  ;;  %v1443_v7 = vshrl.u32 %v5039_v52, 16  ;;  %v1445_v45 = vshll.u32 %v5039_v52, 16  ;;  %v7693_v11 = vld [vmem:[%s6412_s10 + $0x60] sm:$0xf] }
  0xc2   : > { %v7669_v20 = vsel %vm548_vm0, %v1128_v57, %v1132_v27  ;;  %v1144_v54 = vrot.slane %v1142_v33, 1  ;;  %v1249_v48 = vrot.slane %v6215_v14, 1  ;;  %v7701_v57 = vrot.slane %v5061_v30, 1  ;;  %v4920_v52 = vld [vmem:[%s6412_s10 + $0x3c] sm:$0xe] }
  0xc3   : > { %v1436_v34 = vor.u32 %v1435_v42, %v1431_v39  ;;  %v7679_v27 = vsel %vm789_vm2, %v1245_v32, %v1246_v43  ;;  %v7696_v42 = vld [vmem:[%s6412_s10 + $0x64] sm:$0xf]  ;;  %v1447_v43 = vrot.slane %v1445_v45, 1  ;;  %v1248_v39 = vrot.slane %v5027_v25, 1  ;;  %v4868_v30 = vld [vmem:[%s6412_s10 + $0xc0] sm:$0xe] }
  0xc4   : > { %v7699_v41 = vsel %vm548_vm0, %v1140_v13, %v1144_v54  ;;  %v8630_v58 = vcombine.low %v7458_v38, %v7535_v61  ;;  %v5041_v13 = vcombine.low %v7693_v11, %v7696_v42  ;;  %v1462_v14 = vshll.u32 %v7683_v40, 16  ;;  %v7720_v32 = vld [vmem:[%s6412_s10 + $0x6c] sm:$0xf]  ;;  %v7730_v45 = vld [vmem:[%s6412_s10 + $0x74] ss:$0 sps:$4 sm:$0x11]  }
  0xc5   : > { %4135 = vmatmul.mubr.bf16.gmra.mxu1 %v6300_v63  ;;  %4232 = vmatmul.mubr.bf16.gmra.mxu0 %v7437_v18  ;;  %v1452_v63 = vrot.slane %v1450_v53, 1  ;;  %v7676_v18 = vsel %vm548_vm0, %v1436_v34, %v1440_v26  ;;  %v5063_v26 = vcombine.low %v4919_v24, %v7515_v36  ;;  %v1448_v53 = vor.u32 %v1447_v43, %v1443_v7  ;;  %v6221_v34 = vld [vmem:[%s6412_s10 + $0xc8] ss:$0 sps:$4 sm:$0x11]   ;;  %v7723_v36 = vld [vmem:[%s6412_s10 + $0x70] sm:$0xf] }
  0xc6   : > { %4239 = vmatprep.mubr.bf16.mxu0 %v7471_v55  ;;  %4336 = vmatprep.mubr.bf16.mxu1 %v5261_v2  ;;  %v5124_v29 = vcombine.low %v7592_v10, %v7676_v18  ;;  %v7690_v55 = vsel %vm5082_vm1, %v7605_v47, %v7676_v18  ;;  %v5270_v2 = vcombine.high %v8630_v58, %v7543_v56  ;;  %v1455_v24 = vshrl.u32 %v5041_v13, 16  ;;  %v7747_v25 = vld [vmem:[%s6412_s10 + $0x78] sm:$0xf]  ;;  %v7751_v58 = vld [vmem:[%s6412_s10 + $0x7c] sm:$0xf] }
  0xc7   : > { %v7710_v50 = vsel %vm789_vm2, %v1248_v39, %v1249_v48  ;;  %v6302_v61 = vcombine.low %v7458_v38, %v7543_v56  ;;  %v7727_v33 = vsel %vm548_vm0, %v1448_v53, %v1452_v63  ;;  %v1457_v7 = vshll.u32 %v5041_v13, 16  ;;  %v4921_v56 = vld [vmem:[%s6412_s10 + $0x48] sm:$0xe] }
  0xc8   : > { %v7733_v38 = vrot.slane %v5063_v26, 1  ;;  %v1154_v39 = vshll.u32 %v6221_v34, 16  ;;  %v5028_v48 = vcombine.low %v4868_v30, %v7354_v23  ;;  %v1252_v26 = vrot.slane %v6221_v34, 1 }
  0xc9   : > { %v1459_v43 = vrot.slane %v1457_v7, 1  ;;  %v5043_v53 = vcombine.low %v7720_v32, %v7723_v36  ;;  %v1474_v7 = vshll.u32 %v7730_v45, 16  ;;  %v5065_v30 = vcombine.low %v4921_v56, %v7605_v47 }
  0xca   : > { %v1251_v13 = vrot.slane %v5028_v48, 1 }
  0xcb   : > { %v1476_v48 = vrot.slane %v1474_v7, 1  ;;  %v7798_v54 = vrot.slane %v5065_v30, 1  ;;  %v8633_v7 = vcombine.low %v7558_v1, %v7630_v31 }
  0xcd   : > { %4240 = vmatmul.mubr.bf16.gmra.mxu0 %v7466_v21  ;;  %4337 = vmatmul.mubr.bf16.vlgmr.msra.gmra.mxu1 %v6301_v3  ;;  %v7741_v21 = vsel %vm5082_vm1, %v7649_v0, %v7727_v33  ;;  %v8631_v3 = vshrl.u32 %v7555_v22, 16  ;;  %v1460_v22 = vor.u32 %v1459_v43, %v1455_v24  ;;  %v7774_v43 = vsel %vm789_vm2, %v1251_v13, %v1252_v26 }
  0xce   : > { %4247 = vmatprep.mubr.bf16.mxu0 %v7496_v19  ;;  %4344 = vmatprep.mubr.bf16.mxu1 %v5270_v2  ;;  %v1464_v19 = vrot.slane %v1462_v14, 1  ;;  %v5064_v2 = vcombine.low %v4920_v52, %v7561_v51  ;;  %v8632_v14 = vcombine.low %v7501_v28, %v7586_v4  ;;  %v5045_v51 = vcombine.low %v7747_v25, %v7751_v58  ;;  %v7765_v52 = vld [vmem:[%s6412_s10 + $0x80] ss:$0 sps:$4 sm:$0x11]  }
  0xcf   : > { %v1152_v63 = vor.u32 %v7619_v60, %v8631_v3  ;;  %v1156_v60 = vrot.slane %v1154_v39, 1  ;;  %v1469_v3 = vshll.u32 %v5043_v53, 16  ;;  %v1467_v4 = vshrl.u32 %v5043_v53, 16  ;;  %v7784_v39 = vld [vmem:[%s6412_s10 + $0x84] sm:$0xf] }
  0xd0   : > { %v5279_v23 = vcombine.high %v8632_v14, %v7602_v6  ;;  %v7768_v34 = vsel %vm548_vm0, %v1460_v22, %v1464_v19  ;;  %v7787_v19 = vld [vmem:[%s6412_s10 + $0x8c] ss:$0 sps:$4 sm:$0x11]   ;;  %v1479_v26 = vshrl.u32 %v5045_v51, 16  ;;  %v1481_v53 = vshll.u32 %v5045_v51, 16 }
  0xd1   : > { %v7771_v24 = vsel %vm548_vm0, %v1152_v63, %v1156_v60  ;;  %v7781_v56 = vsel %vm5082_vm1, %v7696_v42, %v7768_v34  ;;  %v1471_v63 = vrot.slane %v1469_v3, 1  ;;  %v7791_v22 = vld [vmem:[%s6412_s10 + $0x88] sm:$0xf]  ;;  %v6303_v60 = vcombine.low %v7501_v28, %v7602_v6  ;;  %v4922_v14 = vld [vmem:[%s6412_s10 + $0x54] sm:$0xe] }
  0xd2   : > { %v1631_v13 = vrot.slane %v5064_v2, 1  ;;  %v1486_v47 = vshll.u32 %v7765_v52, 16  ;;  %v5288_v3 = vcombine.high %v8633_v7, %v7646_v5  ;;  %v5047_v28 = vcombine.low %v7784_v39, %v7791_v22  ;;  %v4923_v7 = vld [vmem:[%s6412_s10 + $0x60] sm:$0xe] }
  0xd3   : > { %v5066_v6 = vcombine.low %v4922_v14, %v7649_v0  ;;  %v1498_v30 = vshll.u32 %v7787_v19, 16  ;;  %v7822_v0 = vld [vmem:[%s6412_s10 + $0x90] sm:$0xf]  ;;  %v7828_v14 = vld [vmem:[%s6412_s10 + $0x94] sm:$0xf] }
  0xd4   : > { %v1488_v51 = vrot.slane %v1486_v47, 1  ;;  %v1491_v47 = vshrl.u32 %v5047_v28, 16  ;;  %8634 = vst [vmem:[#allocation3_spill] sm:$0xff] %v7822_v0 }
  0xd5   : > { %4248 = vmatmul.mubr.bf16.gmra.mxu0 %v7490_v15  ;;  %4345 = vmatmul.mubr.bf16.gmra.mxu1 %v6302_v61  ;;  %v1472_v15 = vor.u32 %v1471_v63, %v1467_v4  ;;  %v1483_v61 = vrot.slane %v1481_v53, 1  ;;  %v1493_v53 = vshll.u32 %v5047_v28, 16  ;;  %v1500_v28 = vrot.slane %v1498_v30, 1 }
  0xd6   : > { %4255 = vmatprep.mubr.bf16.mxu0 %v7564_v16  ;;  %4352 = vmatprep.mubr.bf16.mxu1 %v5279_v23  ;;  %v1623_v16 = vrot.slane %v7415_v46, 1  ;;  %v5067_v30 = vcombine.low %v4923_v7, %v7696_v42 }
  0xd7   : > { %v7809_v2 = vsel %vm548_vm0, %v1472_v15, %v1476_v48  ;;  %v1484_v23 = vor.u32 %v1483_v61, %v1479_v26  ;;  %v7831_v15 = vld [vmem:[%s6412_s10 + $0x98] ss:$0 sps:$4 sm:$0x11]   ;;  %v6304_v61 = vcombine.low %v7558_v1, %v7646_v5  ;;  %v5297_v1 = vcombine.high %v5124_v29, %v7690_v55 }
  0xd8   : > { %v7817_v46 = vsel %vm5082_vm1, %v7723_v36, %v7809_v2  ;;  %v1624_v4 = vsel %vm789_vm2, %v7701_v57, %v1623_v16  ;;  %v1637_v5 = vrot.slane %v5066_v6, 1  ;;  %v7859_v6 = vld [vmem:[%s6412_s10 + $0x9c] sm:$0xf]  ;;  %v4926_v57 = vld [vmem:[%s6412_s10 + $0x84] sm:$0xe] }
  0xd9   : > { %v7825_v63 = vsel %vm548_vm0, %v1484_v23, %v1488_v51  ;;  %v5081_v48 = vcombine.low %v1624_v4, %v1624_v4  ;;  %v5087_v26 = vcombine.high %v1624_v4, %v1624_v4  ;;  %v1495_v51 = vrot.slane %v1493_v53, 1 }
  0xda   : > { %v7841_v16 = vsel %vm5082_vm1, %v7751_v58, %v7825_v63  ;;  %v1629_v23 = vrot.slane %v7511_v8, 1 }
  0xdb   : > { %2186 = vst [vmem:[#allocation2 + $0x20] sm:$0xf] %v5081_v48  ;;  %2191 = vst [vmem:[#allocation2 + $0x44] sm:$0xf] %v5087_v26  ;;  %v1496_v4 = vor.u32 %v1495_v51, %v1491_v47  ;;  %v4924_v26 = vld [vmem:[%s6412_s10 + $0x6c] sm:$0xe] }
  0xdc   : > { %v1630_v8 = vsel %vm789_vm2, %v7733_v38, %v1629_v23 }
  0xdd   : > { %4256 = vmatmul.mubr.bf16.gmra.mxu0 %v7546_v17  ;;  %4353 = vmatmul.mubr.bf16.gmra.mxu1 %v6303_v60  ;;  %v1632_v17 = vrot.slane %v7549_v49, 1  ;;  %v5049_v60 = vcombine.low %v7822_v0, %v7828_v14  ;;  %v5109_v48 = vcombine.high %v1630_v8, %v1630_v8  ;;  %v7862_v49 = vld [vmem:[%s6412_s10 + $0xa0] sm:$0xf]  ;;  %v7866_v42 = vsel %vm548_vm0, %v1496_v4, %v1500_v28  ;;  %v7878_v28 = vld [vmem:[%s6412_s10 + $0xa4] ss:$0 sps:$4 sm:$0x11]  }
  0xde   : > { %4263 = vmatprep.mubr.bf16.mxu0 %v7589_v62  ;;  %4360 = vmatprep.mubr.bf16.mxu1 %v5288_v3  ;;  %v1510_v62 = vshll.u32 %v7831_v15, 16  ;;  %v5103_v3 = vcombine.low %v1630_v8, %v1630_v8  ;;  %v7875_v51 = vsel %vm5082_vm1, %v7791_v22, %v7866_v42  ;;  %v1635_v4 = vrot.slane %v7595_v59, 1 }
  0xdf   : > { %v1633_v18 = vsel %vm789_vm2, %v1631_v13, %v1632_v17  ;;  %v1503_v29 = vshrl.u32 %v5049_v60, 16  ;;  %v1505_v38 = vshll.u32 %v5049_v60, 16  ;;  %2211 = vst [vmem:[#allocation2 + $0xd4] sm:$0xf] %v5109_v48  ;;  %v7881_v17 = vld [vmem:[%s6412_s10 + $0xa8] sm:$0xf] }
  0xe0   : > { %v5114_v47 = vcombine.low %v1633_v18, %v1633_v18  ;;  %v5120_v53 = vcombine.high %v1633_v18, %v1633_v18  ;;  %2206 = vst [vmem:[#allocation2 + $0xb0] sm:$0xf] %v5103_v3  ;;  %v1512_v23 = vrot.slane %v1510_v62, 1  ;;  %v1638_v8 = vrot.slane %v7652_v9, 1  ;;  %v7888_v13 = vld [vmem:[%s6412_s10 + $0xac] sm:$0xf] }
  0xe1   : > { %v1507_v60 = vrot.slane %v1505_v38, 1  ;;  %v5051_v18 = vcombine.low %v7859_v6, %v7862_v49  ;;  %v1640_v3 = vrot.slane %v5067_v30, 1  ;;  %v5068_v62 = vcombine.low %v4924_v26, %v7723_v36  ;;  %v4925_v30 = vld [vmem:[%s6412_s10 + $0x78] sm:$0xe] }
  0xe2   : > { %2216 = vst [vmem:[#allocation2 + $0xf8] sm:$0xf] %v5114_v47  ;;  %2221 = vst [vmem:[#allocation2 + $0x11c] sm:$0xf] %v5120_v53  ;;  %v1636_v47 = vsel %vm789_vm2, %v7798_v54, %v1635_v4  ;;  %v1639_v59 = vsel %vm789_vm2, %v1637_v5, %v1638_v8  ;;  %v1522_v5 = vshll.u32 %v7878_v28, 16 }
  0xe3   : > { %v1508_v48 = vor.u32 %v1507_v60, %v1503_v29  ;;  %v1515_v9 = vshrl.u32 %v5051_v18, 16  ;;  %v5125_v36 = vcombine.low %v1636_v47, %v1636_v47  ;;  %v5131_v26 = vcombine.high %v1636_v47, %v1636_v47 }
  0xe4   : > { %v5142_v54 = vcombine.high %v1639_v59, %v1639_v59  ;;  %v5053_v60 = vcombine.low %v7881_v17, %v7888_v13  ;;  %v8637_v47 = vcombine.low %v7639_v12, %v7727_v33 }
  0xe5   : > { %4264 = vmatmul.mubr.bf16.gmra.mxu0 %v7582_v35  ;;  %4361 = vmatmul.mubr.bf16.gmra.mxu1 %v6304_v61  ;;  %v5136_v35 = vcombine.low %v1639_v59, %v1639_v59  ;;  %v1517_v61 = vshll.u32 %v5051_v18, 16  ;;  %v7899_v29 = vsel %vm548_vm0, %v1508_v48, %v1512_v23  ;;  %2226 = vst [vmem:[#allocation2 + $0x140] sm:$0xf] %v5125_v36  ;;  %2231 = vst [vmem:[#allocation2 + $0x164] sm:$0xf] %v5131_v26 }
  0xe6   : > { %4271 = vmatprep.mubr.bf16.mxu0 %v7636_v44  ;;  %4368 = vmatprep.mubr.bf16.mxu1 %v5297_v1  ;;  %8635 = vst [vmem:[#allocation4_spill] sm:$0xff] %v7899_v29  ;;  %v7905_v44 = vld [vmem:[%s6412_s10 + $0xb4] sm:$0xf]  ;;  %v7908_v1 = vld [vmem:[%s6412_s10 + $0xb8] sm:$0xf]  ;;  %v7915_v23 = vsel %vm5082_vm1, %v7828_v14, %v7899_v29  ;;  %v1641_v48 = vrot.slane %v7683_v40, 1  ;;  %v5306_v0 = vcombine.high %v8637_v47, %v7741_v21 }
  0xe7   : > { %8636 = vst [vmem:[#allocation5_spill] sm:$0xff] %v7915_v23  ;;  %2236 = vst [vmem:[#allocation2 + $0x188] sm:$0xf] %v5136_v35  ;;  %v1519_v18 = vrot.slane %v1517_v61, 1  ;;  %v1643_v36 = vrot.slane %v5068_v62, 1  ;;  %v5069_v26 = vcombine.low %v4925_v30, %v7751_v58  ;;  %v1524_v61 = vrot.slane %v1522_v5, 1 }
  0xe8   : > { %v7919_v59 = vld [vmem:[%s6412_s10 + $0xb0] ss:$0 sps:$4 sm:$0x11]   ;;  %2241 = vst [vmem:[#allocation2 + $0x1ac] sm:$0xf] %v5142_v54  ;;  %v1642_v40 = vsel %vm789_vm2, %v1640_v3, %v1641_v48  ;;  %v1644_v62 = vrot.slane %v7730_v45, 1  ;;  %v8638_v3 = vcombine.low %v7592_v10, %v7690_v55 }
  0xe9   : > { %v1520_v35 = vor.u32 %v1519_v18, %v1515_v9  ;;  %v1527_v47 = vshrl.u32 %v5053_v60, 16  ;;  %v1529_v58 = vshll.u32 %v5053_v60, 16  ;;  %v4927_v9 = vld [vmem:[%s6412_s10 + $0x90] sm:$0xe]  ;;  %v1534_v45 = vshll.u32 %v7919_v59, 16 }
  0xea   : > { %v7961_v60 = vld [vmem:[%s6412_s10 + $0xbc] ss:$0 sps:$4 sm:$0x11]   ;;  %v1646_v18 = vrot.slane %v5069_v26, 1 }
  0xeb   : > { %v7947_v30 = vsel %vm548_vm0, %v1520_v35, %v1524_v61  ;;  %v1531_v5 = vrot.slane %v1529_v58, 1  ;;  %v8639_v61 = vcombine.low %v7693_v11, %v7768_v34  ;;  %v1536_v26 = vrot.slane %v1534_v45, 1  ;;  %v4929_v45 = vld [vmem:[%s6412_s10 + $0xa8] sm:$0xe] }
  0xec   : > { %v5201_v10 = vcombine.low %v7859_v6, %v7947_v30  ;;  %v7957_v55 = vsel %vm5082_vm1, %v7862_v49, %v7947_v30 }
  0xed   : > { %v5489_v53 = vpop.f32.mrf.mxu0  ;;  %v5561_v38 = vpop.f32.mrf.mxu1  ;;  %4272 = vmatmul.mubr.bf16.gmra.mxu0 %v7633_v37  ;;  %4369 = vmatmul.mubr.bf16.gmra.mxu1 %v8638_v3  ;;  %v4928_v37 = vld [vmem:[%s6412_s10 + $0x9c] sm:$0xe] }
  0xee   : > { %4279 = vmatprep.mubr.bf16.mxu0 %v7679_v27  ;;  %4376 = vmatprep.mubr.bf16.mxu1 %v5306_v0 }
  0xef   : > { %v5490_v4 = vpop.f32.mrf.mxu0  ;;  %v5562_v8 = vpop.f32.mrf.mxu1 }
  0xf0   : > { %v7921_v31 = vadd.f32 %v5490_v4, %v5489_v53  ;;  %v7923_v7 = vadd.f32 %v5562_v8, %v5561_v38  ;;  %v5070_v53 = vcombine.low %v4926_v57, %v7791_v22  ;;  %v5147_v38 = vcombine.low %v1642_v40, %v1642_v40 }
  0xf1   : > { %v5492_v29 = vpop.f32.mrf.mxu0  ;;  %v5564_v23 = vpop.f32.mrf.mxu1  ;;  %v7934_v4 = vcombine.low %v7905_v44, %v7908_v1  ;;  %v5153_v8 = vcombine.high %v1642_v40, %v1642_v40  ;;  %v6306_v40 = vcombine.low %v7639_v12, %v7741_v21 }
  0xf2   : > { %2246 = vst [vmem:[#allocation2 + $0x1d0] sm:$0xf] %v5147_v38  ;;  %v1649_v48 = vrot.slane %v5070_v53, 1  ;;  %v5315_v38 = vcombine.high %v8639_v61, %v7781_v56  ;;  %v1647_v53 = vrot.slane %v7765_v52, 1 }
  0xf3   : > { %v5493_v33 = vpop.f32.mrf.mxu0  ;;  %v5565_v54 = vpop.f32.mrf.mxu1  ;;  %2251 = vst [vmem:[#allocation2 + $0x1f4] sm:$0xf] %v5153_v8  ;;  %v5072_v8 = vcombine.low %v4928_v37, %v7862_v49  ;;  %v1539_v34 = vshrl.u32 %v7934_v4, 16 }
  0xf4   : > { %v7941_v22 = vadd.f32 %v5493_v33, %v5492_v29  ;;  %v7943_v57 = vadd.f32 %v5565_v54, %v5564_v23  ;;  %v1645_v29 = vsel %vm789_vm2, %v1643_v36, %v1644_v62  ;;  %v5071_v33 = vcombine.low %v4927_v9, %v7828_v14 }
  0xf5   : > { %v5495_v23 = vpop.f32.mrf.mxu0  ;;  %v5158_v27 = vcombine.low %v1645_v29, %v1645_v29  ;;  %v5164_v0 = vcombine.high %v1645_v29, %v1645_v29  ;;  %v5567_v35 = vpop.f32.mrf.mxu1  ;;  %v1532_v36 = vor.u32 %v1531_v5, %v1527_v47  ;;  %v1650_v62 = vrot.slane %v7787_v19, 1  ;;  %v7994_v5 = vld [vmem:[%s6412_s10 + $0xc0] sm:$0xf]  ;;  %4280 = vmatmul.mubr.bf16.gmra.mxu0 %v7669_v20  ;;  %4377 = vmatmul.mubr.bf16.gmra.mxu1 %v6306_v40  ;;  %v4930_v20 = vld [vmem:[%s6412_s10 + $0xb4] sm:$0xe] }
  0xf6   : > { %v1541_v14 = vshll.u32 %v7934_v4, 16  ;;  %v1546_v47 = vshll.u32 %v7961_v60, 16  ;;  %v1648_v52 = vsel %vm789_vm2, %v1646_v18, %v1647_v53  ;;  %v6307_v18 = vcombine.low %v7693_v11, %v7781_v56  ;;  %4287 = vmatprep.mubr.bf16.mxu0 %v7710_v50  ;;  %4384 = vmatprep.mubr.bf16.mxu1 %v5315_v38 }
  0xf7   : > { %v5496_v54 = vpop.f32.mrf.mxu0  ;;  %2256 = vst [vmem:[#allocation2 + $0x218] sm:$0xf] %v5158_v27  ;;  %2261 = vst [vmem:[#allocation2 + $0x23c] sm:$0xf] %v5164_v0  ;;  %v5568_v21 = vpop.f32.mrf.mxu1  ;;  %v7981_v3 = vsel %vm548_vm0, %v1532_v36, %v1536_v26  ;;  %v1651_v19 = vsel %vm789_vm2, %v1649_v48, %v1650_v62  ;;  %v5169_v29 = vcombine.low %v1648_v52, %v1648_v52  ;;  %v1655_v11 = vrot.slane %v5072_v8, 1 }
  0xf8   : > { %v7973_v12 = vadd.f32 %v5496_v54, %v5495_v23  ;;  %v7978_v58 = vadd.f32 %v5568_v21, %v5567_v35  ;;  %v5212_v37 = vcombine.low %v7881_v17, %v7981_v3  ;;  %v7991_v4 = vsel %vm5082_vm1, %v7888_v13, %v7981_v3  ;;  %v8000_v35 = vld [vmem:[%s6412_s10 + $0xc4] sm:$0xf]  ;;  %v8009_v21 = vld [vmem:[%s6412_s10 + $0xc8] ss:$0 sps:$4 sm:$0x11]  }
  0xf9   : > { %v5498_v49 = vpop.f32.mrf.mxu0  ;;  %v5570_v9 = vpop.f32.mrf.mxu1  ;;  %v5175_v48 = vcombine.high %v1648_v52, %v1648_v52  ;;  %v5180_v27 = vcombine.low %v1651_v19, %v1651_v19  ;;  %v1543_v0 = vrot.slane %v1541_v14, 1  ;;  %v1652_v54 = vrot.slane %v5071_v33, 1  ;;  %2266 = vst [vmem:[#allocation2 + $0x260] sm:$0xf] %v5169_v29 }
  0xfa   : > { %v1548_v40 = vrot.slane %v1546_v47, 1  ;;  %v5186_v56 = vcombine.high %v1651_v19, %v1651_v19  ;;  %v8640_v50 = vcombine.low %v7720_v32, %v7809_v2  ;;  %v5073_v33 = vcombine.low %v4929_v45, %v7888_v13  ;;  %v8025_v2 = vld [vmem:[%s6412_s10 + $0xcc] sm:$0xf] }
  0xfb   : > { %v5499_v23 = vpop.f32.mrf.mxu0  ;;  %v5571_v36 = vpop.f32.mrf.mxu1  ;;  %2271 = vst [vmem:[#allocation2 + $0x284] sm:$0xf] %v5175_v48  ;;  %2276 = vst [vmem:[#allocation2 + $0x2a8] sm:$0xf] %v5180_v27  ;;  %v1544_v62 = vor.u32 %v1543_v0, %v1539_v34  ;;  %v5057_v14 = vcombine.low %v7994_v5, %v8000_v35  ;;  %v5074_v34 = vcombine.low %v4930_v20, %v7908_v1  ;;  %v1656_v52 = vrot.slane %v7878_v28, 1 }
  0xfc   : > { %v8002_v61 = vadd.f32 %v5499_v23, %v5498_v49  ;;  %v8006_v26 = vadd.f32 %v5571_v36, %v5570_v9  ;;  %v5324_v38 = vcombine.high %v8640_v50, %v7817_v46  ;;  %2281 = vst [vmem:[#allocation2 + $0x2cc] sm:$0xf] %v5186_v56  ;;  %v1653_v49 = vrot.slane %v7831_v15, 1  ;;  %v8040_v0 = vld [vmem:[%s6412_s10 + $0xd0] sm:$0xf] }
  0xfd   : > { %v5501_v53 = vpop.f32.mrf.mxu0  ;;  %v8019_v8 = vsel %vm548_vm0, %v1544_v62, %v1548_v40  ;;  %v1551_v45 = vshrl.u32 %v5057_v14, 16  ;;  %v5573_v29 = vpop.f32.mrf.mxu1  ;;  %v1657_v28 = vsel %vm789_vm2, %v1655_v11, %v1656_v52  ;;  %v1553_v48 = vshll.u32 %v5057_v14, 16  ;;  %4288 = vmatmul.mubr.bf16.gmra.mxu0 %v7699_v41  ;;  %4385 = vmatmul.mubr.bf16.gmra.mxu1 %v6307_v18 }
  0xfe   : > { %v5223_v13 = vcombine.low %v7905_v44, %v8019_v8  ;;  %v8034_v9 = vsel %vm5082_vm1, %v7908_v1, %v8019_v8  ;;  %v1654_v15 = vsel %vm789_vm2, %v1652_v54, %v1653_v49  ;;  %v1558_v27 = vshll.u32 %v8009_v21, 16  ;;  %v4931_v1 = vld [vmem:[%s6412_s10 + $0xc0] sm:$0xe]  ;;  %4295 = vmatprep.mubr.bf16.mxu0 %v7774_v43  ;;  %4392 = vmatprep.mubr.bf16.mxu1 %v5324_v38 }
  0xff   : > { %v5502_v47 = vpop.f32.mrf.mxu0  ;;  %v6308_v36 = vcombine.low %v7720_v32, %v7817_v46  ;;  %v1658_v20 = vrot.slane %v5073_v33, 1  ;;  %v5191_v40 = vcombine.low %v1654_v15, %v1654_v15  ;;  %v5574_v54 = vpop.f32.mrf.mxu1  ;;  %v5197_v56 = vcombine.high %v1654_v15, %v1654_v15 }
 0x100   : > { %v8027_v19 = vadd.f32 %v5502_v47, %v5501_v53  ;;  %v5059_v53 = vcombine.low %v8025_v2, %v8040_v0  ;;  %v5202_v62 = vcombine.low %v1657_v28, %v1657_v28  ;;  %v5208_v50 = vcombine.high %v1657_v28, %v1657_v28  ;;  %v4932_v47 = vld [vmem:[%s6412_s10 + $0xcc] sm:$0xe] }
 0x101   : > { %v5504_v23 = vpop.f32.mrf.mxu0  ;;  %v1555_v14 = vrot.slane %v1553_v48, 1  ;;  %v8049_v49 = vadd.f32 %v5574_v54, %v5573_v29  ;;  %v8641_v41 = vcombine.low %v7747_v25, %v7825_v63  ;;  %2286 = vst [vmem:[#allocation2 + $0x2f0] sm:$0xf] %v5191_v40  ;;  %v5576_v18 = vpop.f32.mrf.mxu1  ;;  %v1661_v33 = vrot.slane %v5074_v34, 1  ;;  %2291 = vst [vmem:[#allocation2 + $0x314] sm:$0xf] %v5197_v56 }
 0x102   : > { %2296 = vst [vmem:[#allocation2 + $0x338] sm:$0xf] %v5202_v62  ;;  %2301 = vst [vmem:[#allocation2 + $0x35c] sm:$0xf] %v5208_v50  ;;  %v1560_v15 = vrot.slane %v1558_v27, 1  ;;  %v1659_v29 = vrot.slane %v7919_v59, 1  ;;  %v5075_v28 = vcombine.low %v4931_v1, %v8000_v35  ;;  %v5076_v48 = vcombine.low %v4932_v47, %v8040_v0 }
 0x103   : > { %v5505_v11 = vpop.f32.mrf.mxu0  ;;  %v5333_v46 = vcombine.high %v8641_v41, %v7841_v16  ;;  %v1556_v52 = vor.u32 %v1555_v14, %v1551_v45  ;;  %v1662_v43 = vrot.slane %v7961_v60, 1  ;;  %v1563_v38 = vshrl.u32 %v5059_v53, 16  ;;  %v5577_v63 = vpop.f32.mrf.mxu1  ;;  %v6229_v59 = vld [vmem:[#allocation2 + $0x20] ss:$36 sps:$4 sm:$0xff]  }
 0x104   : > { %v8051_v32 = vadd.f32 %v5505_v11, %v5504_v23  ;;  %v6262_v23 = vld [vmem:[%s6412_s10 + $0xd4] ss:$0 sps:$4 sm:$0x11]   ;;  %v1660_v34 = vsel %vm789_vm2, %v1658_v20, %v1659_v29  ;;  %v1565_v54 = vshll.u32 %v5059_v53, 16  ;;  %v8067_v45 = vadd.f32 %v5577_v63, %v5576_v18 }
 0x105   : > { %v8064_v40 = vsel %vm548_vm0, %v1556_v52, %v1560_v15  ;;  %v1570_v11 = vshll.u32 %v6262_v23, 16  ;;  %v5507_v27 = vpop.f32.mrf.mxu0  ;;  %v5213_v56 = vcombine.low %v1660_v34, %v1660_v34  ;;  %v5219_v62 = vcombine.high %v1660_v34, %v1660_v34  ;;  %v5579_v18 = vpop.f32.mrf.mxu1  ;;  %4296 = vmatmul.mubr.bf16.gmra.mxu0 %v7771_v24  ;;  %4393 = vmatmul.mubr.bf16.gmra.mxu1 %v6308_v36 }
 0x106   : > { %v5234_v1 = vcombine.low %v7994_v5, %v8064_v40  ;;  %v8074_v60 = vsel %vm5082_vm1, %v8000_v35, %v8064_v40  ;;  %v1663_v50 = vsel %vm789_vm2, %v1661_v33, %v1662_v43  ;;  %v1567_v14 = vrot.slane %v1565_v54, 1  ;;  %4400 = vmatprep.mubr.bf16.mxu1 %v5333_v46  ;;  %5961 = vmatprep.mubr.bf16.mxu0 %v6229_v59 }
 0x107   : > { %v1572_v20 = vrot.slane %v1570_v11, 1  ;;  %v5508_v53 = vpop.f32.mrf.mxu0  ;;  %v1664_v47 = vrot.slane %v5075_v28, 1  ;;  %2306 = vst [vmem:[#allocation2 + $0x380] sm:$0xf] %v5213_v56  ;;  %v5224_v41 = vcombine.low %v1663_v50, %v1663_v50  ;;  %2311 = vst [vmem:[#allocation2 + $0x3a4] sm:$0xf] %v5219_v62  ;;  %v5230_v15 = vcombine.high %v1663_v50, %v1663_v50  ;;  %v5580_v33 = vpop.f32.mrf.mxu1 }
 0x108   : > { %v8078_v52 = vadd.f32 %v5508_v53, %v5507_v27  ;;  %v1568_v35 = vor.u32 %v1567_v14, %v1563_v38  ;;  %v1667_v29 = vrot.slane %v5076_v48, 1  ;;  %v1665_v43 = vrot.slane %v8009_v21, 1  ;;  %v6230_v27 = vld [vmem:[#allocation2 + $0x68] ss:$36 sps:$4 sm:$0xff]   ;;  %v6234_v62 = vld [vmem:[#allocation2 + $0xb0] ss:$36 sps:$4 sm:$0xff]  }
 0x109   : > { %v5510_v63 = vpop.f32.mrf.mxu0  ;;  %2316 = vst [vmem:[#allocation2 + $0x3c8] sm:$0xf] %v5224_v41  ;;  %2321 = vst [vmem:[#allocation2 + $0x3ec] sm:$0xf] %v5230_v15  ;;  %v1668_v34 = vrot.slane %v6262_v23, 1  ;;  %v8084_v24 = vadd.f32 %v5580_v33, %v5579_v18  ;;  %v5582_v38 = vpop.f32.mrf.mxu1  ;;  %v6309_v11 = vcombine.low %v7747_v25, %v7841_v16  ;;  %v8642_v59 = vcombine.low %v7784_v39, %v7866_v42 }
 0x10a   : > { %v8081_v28 = vsel %vm548_vm0, %v1568_v35, %v1572_v20  ;;  %v1666_v21 = vsel %vm789_vm2, %v1664_v47, %v1665_v43  ;;  %v8108_v42 = vld [vmem:[%s8611_s2] ss:$0 sm:$0xff]  ;;  %v6310_v43 = vcombine.low %v7784_v39, %v7875_v51 }
 0x10b   : > { %v5511_v36 = vpop.f32.mrf.mxu0  ;;  %v5245_v54 = vcombine.low %v8025_v2, %v8081_v28  ;;  %v8091_v46 = vsel %vm5082_vm1, %v8040_v0, %v8081_v28  ;;  %v1669_v23 = vsel %vm789_vm2, %v1667_v29, %v1668_v34  ;;  %v5342_v56 = vcombine.high %v8642_v59, %v7875_v51  ;;  %v5583_v0 = vpop.f32.mrf.mxu1  ;;  %v6235_v34 = vld [vmem:[#allocation2 + $0xf8] ss:$36 sps:$4 sm:$0xff]   ;;  %v6239_v59 = vld [vmem:[#allocation2 + $0x140] ss:$36 sps:$4 sm:$0xff]  }
 0x10c   : > { %v8093_v48 = vadd.f32 %v5511_v36, %v5510_v63  ;;  %v5235_v50 = vcombine.low %v1666_v21, %v1666_v21  ;;  %v5241_v14 = vcombine.high %v1666_v21, %v1666_v21  ;;  %v5246_v20 = vcombine.low %v1669_v23, %v1669_v23 }
 0x10d   : > { %v5252_v53 = vcombine.high %v1669_v23, %v1669_v23  ;;  %v8103_v41 = vadd.f32 %v5583_v0, %v5582_v38  ;;  %v5513_v25 = vpop.f32.mrf.mxu0  ;;  %v5601_v16 = vpop.f32.mrf.mxu1  ;;  %4401 = vmatmul.mubr.bf16.gmra.mxu1 %v6309_v11  ;;  %5962 = vmatmul.mubr.bf16.vlgmr.msra.gmra.mxu0 %v6230_v27  ;;  %v3856_v15 = vadd.f32 %v7921_v31, %v8108_v42  ;;  %v8643_v38 = vld [vmem:[#allocation5_spill] sm:$0xff]  ;;  %v8644_v11 = vld [vmem:[#allocation3_spill] sm:$0xff]  ;;  %v8645_v27 = vld [vmem:[#allocation4_spill] sm:$0xff] }
 0x10e   : > { %2326 = vst [vmem:[#allocation2 + $0x410] sm:$0xf] %v5235_v50  ;;  %2331 = vst [vmem:[#allocation2 + $0x434] sm:$0xf] %v5241_v14  ;;  %4408 = vmatprep.mubr.bf16.mxu1 %v5342_v56  ;;  %5965 = vmatprep.mubr.bf16.mxu0 %v6234_v62  ;;  %v8646_v21 = vcombine.low %v8644_v11, %v8645_v27  ;;  %v3859_v31 = vadd.f32 %v7941_v22, %v8108_v42 }
 0x10f   : > { %2336 = vst [vmem:[#allocation2 + $0x458] sm:$0xf] %v5246_v20  ;;  %2341 = vst [vmem:[#allocation2 + $0x47c] sm:$0xf] %v5252_v53  ;;  %v5514_v47 = vpop.f32.mrf.mxu0  ;;  %v5602_v18 = vpop.f32.mrf.mxu1 }
 0x110   : > { %v8112_v35 = vadd.f32 %v5514_v47, %v5513_v25  ;;  %v5603_v29 = vadd.f32 %v5602_v18, %v5601_v16  ;;  %v5351_v23 = vcombine.high %v8646_v21, %v8643_v38  ;;  %v3864_v25 = vadd.f32 %v7973_v12, %v8108_v42 }
 0x111   : > { %v5516_v63 = vpop.f32.mrf.mxu0  ;;  %v5604_v33 = vpop.f32.mrf.mxu1  ;;  %v3867_v12 = vadd.f32 %v8002_v61, %v8108_v42 }
 0x112   : > { %v8116_v36 = vadd.f32 %v5603_v29, %v3856_v15  ;;  %v6311_v15 = vcombine.low %v8644_v11, %v8643_v38  ;;  %v6240_v29 = vld [vmem:[#allocation2 + $0x188] ss:$36 sps:$4 sm:$0xff]  }
 0x113   : > { %v5517_v56 = vpop.f32.mrf.mxu0  ;;  %v5605_v62 = vpop.f32.mrf.mxu1 }
 0x114   : > { %v8124_v50 = vadd.f32 %v5517_v56, %v5516_v63  ;;  %v5606_v0 = vadd.f32 %v5605_v62, %v5604_v33  ;;  %v5360_v33 = vcombine.high %v5201_v10, %v7957_v55  ;;  %v3872_v10 = vadd.f32 %v8027_v19, %v8108_v42 }
 0x115   : > { %v5519_v14 = vpop.f32.mrf.mxu0  ;;  %v5607_v20 = vpop.f32.mrf.mxu1  ;;  %4409 = vmatmul.mubr.bf16.gmra.mxu1 %v6310_v43  ;;  %5966 = vmatmul.mubr.bf16.gmra.mxu0 %v6235_v34  ;;  %v6244_v43 = vld [vmem:[#allocation2 + $0x1d0] ss:$36 sps:$4 sm:$0xff]   ;;  %v3875_v19 = vadd.f32 %v8051_v32, %v8108_v42 }
 0x116   : > { %v8126_v39 = vadd.f32 %v5606_v0, %v3859_v31  ;;  %4416 = vmatprep.mubr.bf16.mxu1 %v5351_v23  ;;  %5969 = vmatprep.mubr.bf16.mxu0 %v6239_v59 }
 0x117   : > { %v5520_v51 = vpop.f32.mrf.mxu0  ;;  %v5608_v53 = vpop.f32.mrf.mxu1 }
 0x118   : > { %v8130_v16 = vadd.f32 %v5520_v51, %v5519_v14  ;;  %v5609_v47 = vadd.f32 %v5608_v53, %v5607_v20  ;;  %v6312_v14 = vcombine.low %v7859_v6, %v7957_v55  ;;  %v6245_v20 = vld [vmem:[#allocation2 + $0x218] ss:$36 sps:$4 sm:$0xff]   ;;  %v5369_v53 = vcombine.high %v5212_v37, %v7991_v4 }
 0x119   : > { %v5522_v22 = vpop.f32.mrf.mxu0  ;;  %v5610_v18 = vpop.f32.mrf.mxu1  ;;  %v3880_v37 = vadd.f32 %v8078_v52, %v8108_v42  ;;  %v3883_v52 = vadd.f32 %v8093_v48, %v8108_v42 }
 0x11a   : > { %v8134_v63 = vadd.f32 %v5609_v47, %v3864_v25  ;;  %v6249_v25 = vld [vmem:[#allocation2 + $0x260] ss:$36 sps:$4 sm:$0xff]  }
 0x11b   : > { %v5523_v34 = vpop.f32.mrf.mxu0  ;;  %v5611_v27 = vpop.f32.mrf.mxu1 }
 0x11c   : > { %v8142_v21 = vadd.f32 %v5523_v34, %v5522_v22  ;;  %v5612_v23 = vadd.f32 %v5611_v27, %v5610_v18 }
 0x11d   : > { %v5525_v59 = vpop.f32.mrf.mxu0  ;;  %v5613_v56 = vpop.f32.mrf.mxu1  ;;  %4417 = vmatmul.mubr.bf16.gmra.mxu1 %v6311_v15  ;;  %5970 = vmatmul.mubr.bf16.gmra.mxu0 %v6240_v29 }
 0x11e   : > { %v8144_v38 = vadd.f32 %v5612_v23, %v3867_v12  ;;  %4424 = vmatprep.mubr.bf16.mxu1 %v5360_v33  ;;  %5973 = vmatprep.mubr.bf16.mxu0 %v6244_v43  ;;  %v6313_v12 = vcombine.low %v7881_v17, %v7991_v4  ;;  %v6250_v23 = vld [vmem:[#allocation2 + $0x2a8] ss:$36 sps:$4 sm:$0xff]  }
 0x11f   : > { %v5526_v11 = vpop.f32.mrf.mxu0  ;;  %v5614_v30 = vpop.f32.mrf.mxu1 }
 0x120   : > { %v8148_v62 = vadd.f32 %v5526_v11, %v5525_v59  ;;  %v5615_v31 = vadd.f32 %v5614_v30, %v5613_v56  ;;  %v5378_v56 = vcombine.high %v5223_v13, %v8034_v9  ;;  %v6254_v11 = vld [vmem:[#allocation2 + $0x2f0] ss:$36 sps:$4 sm:$0xff]   ;;  %v3888_v13 = vadd.f32 %v8112_v35, %v8108_v42 }
 0x121   : > { %v5528_v61 = vpop.f32.mrf.mxu0  ;;  %v5616_v0 = vpop.f32.mrf.mxu1  ;;  %v3891_v35 = vadd.f32 %v8124_v50, %v8108_v42 }
 0x122   : > { %v8152_v51 = vadd.f32 %v5615_v31, %v3872_v10 }
 0x123   : > { %v5529_v47 = vpop.f32.mrf.mxu0  ;;  %v5617_v22 = vpop.f32.mrf.mxu1 }
 0x124   : > { %v8160_v18 = vadd.f32 %v5529_v47, %v5528_v61  ;;  %v5618_v15 = vadd.f32 %v5617_v22, %v5616_v0  ;;  %v6314_v47 = vcombine.low %v7905_v44, %v8034_v9  ;;  %v6255_v22 = vld [vmem:[#allocation2 + $0x338] ss:$36 sps:$4 sm:$0xff]  }
 0x125   : > { %v5531_v29 = vpop.f32.mrf.mxu0  ;;  %v5619_v33 = vpop.f32.mrf.mxu1  ;;  %4425 = vmatmul.mubr.bf16.gmra.mxu1 %v6312_v14  ;;  %5974 = vmatmul.mubr.bf16.gmra.mxu0 %v6245_v20 }
 0x126   : > { %v8162_v6 = vadd.f32 %v5618_v15, %v3875_v19  ;;  %4432 = vmatprep.mubr.bf16.mxu1 %v5369_v53  ;;  %5977 = vmatprep.mubr.bf16.mxu0 %v6249_v25  ;;  %v5387_v15 = vcombine.high %v5234_v1, %v8074_v60  ;;  %v3896_v1 = vadd.f32 %v8130_v16, %v8108_v42 }
 0x127   : > { %v5532_v55 = vpop.f32.mrf.mxu0  ;;  %v5620_v3 = vpop.f32.mrf.mxu1  ;;  %v3899_v16 = vadd.f32 %v8142_v21, %v8108_v42 }
 0x128   : > { %v8166_v43 = vadd.f32 %v5532_v55, %v5531_v29  ;;  %v5621_v34 = vadd.f32 %v5620_v3, %v5619_v33  ;;  %v6259_v29 = vld [vmem:[#allocation2 + $0x380] ss:$36 sps:$4 sm:$0xff]  }
 0x129   : > { %v5534_v32 = vpop.f32.mrf.mxu0  ;;  %v5622_v27 = vpop.f32.mrf.mxu1 }
 0x12a   : > { %v8170_v59 = vadd.f32 %v5621_v34, %v3880_v37 }
 0x12b   : > { %v5535_v30 = vpop.f32.mrf.mxu0  ;;  %v5623_v10 = vpop.f32.mrf.mxu1 }
 0x12c   : > { %v8178_v31 = vadd.f32 %v5535_v30, %v5534_v32  ;;  %v5624_v61 = vadd.f32 %v5623_v10, %v5622_v27  ;;  %v5396_v10 = vcombine.high %v5245_v54, %v8091_v46  ;;  %v3904_v54 = vadd.f32 %v8148_v62, %v8108_v42 }
 0x12d   : > { %v5537_v0 = vpop.f32.mrf.mxu0  ;;  %v5625_v14 = vpop.f32.mrf.mxu1  ;;  %4433 = vmatmul.mubr.bf16.gmra.mxu1 %v6313_v12  ;;  %5978 = vmatmul.mubr.bf16.gmra.mxu0 %v6250_v23 }
 0x12e   : > { %v8180_v17 = vadd.f32 %v5624_v61, %v3883_v52  ;;  %4440 = vmatprep.mubr.bf16.mxu1 %v5378_v56  ;;  %5981 = vmatprep.mubr.bf16.mxu0 %v6254_v11  ;;  %v6315_v56 = vcombine.low %v7994_v5, %v8074_v60  ;;  %v6260_v11 = vld [vmem:[#allocation2 + $0x3c8] ss:$36 sps:$4 sm:$0xff]   ;;  %v6264_v52 = vld [vmem:[#allocation2 + $0x410] ss:$36 sps:$4 sm:$0xff]  }
 0x12f   : > { %v5538_v4 = vpop.f32.mrf.mxu0  ;;  %v5626_v8 = vpop.f32.mrf.mxu1 }
 0x130   : > { %v8184_v20 = vadd.f32 %v5538_v4, %v5537_v0  ;;  %v5627_v53 = vadd.f32 %v5626_v8, %v5625_v14 }
 0x131   : > { %v5540_v48 = vpop.f32.mrf.mxu0  ;;  %v5628_v25 = vpop.f32.mrf.mxu1 }
 0x132   : > { %v8188_v19 = vadd.f32 %v5627_v53, %v3888_v13 }
 0x133   : > { %v5541_v33 = vpop.f32.mrf.mxu0  ;;  %v5629_v55 = vpop.f32.mrf.mxu1 }
 0x134   : > { %v8196_v3 = vadd.f32 %v5541_v33, %v5540_v48  ;;  %v5630_v37 = vadd.f32 %v5629_v55, %v5628_v25  ;;  %v3907_v55 = vadd.f32 %v8160_v18, %v8108_v42 }
 0x135   : > { %v5543_v34 = vpop.f32.mrf.mxu0  ;;  %v5631_v32 = vpop.f32.mrf.mxu1  ;;  %4441 = vmatmul.mubr.bf16.gmra.mxu1 %v6314_v47  ;;  %5982 = vmatmul.mubr.bf16.gmra.mxu0 %v6255_v22  ;;  %v6316_v47 = vcombine.low %v8025_v2, %v8091_v46  ;;  %v6265_v22 = vld [vmem:[#allocation2 + $0x458] ss:$36 sps:$4 sm:$0xff]   ;;  %v3912_v2 = vadd.f32 %v8166_v43, %v8108_v42 }
 0x136   : > { %v8198_v44 = vadd.f32 %v5630_v37, %v3891_v35  ;;  %4448 = vmatprep.mubr.bf16.mxu1 %v5387_v15  ;;  %5985 = vmatprep.mubr.bf16.mxu0 %v6259_v29 }
 0x137   : > { %v5544_v9 = vpop.f32.mrf.mxu0  ;;  %v5632_v40 = vpop.f32.mrf.mxu1 }
 0x138   : > { %v8202_v27 = vadd.f32 %v5544_v9, %v5543_v34  ;;  %v5633_v12 = vadd.f32 %v5632_v40, %v5631_v32 }
 0x139   : > { %v5546_v50 = vpop.f32.mrf.mxu0  ;;  %v5634_v23 = vpop.f32.mrf.mxu1 }
 0x13a   : > { %v8206_v30 = vadd.f32 %v5633_v12, %v3896_v1 }
 0x13b   : > { %v5547_v61 = vpop.f32.mrf.mxu0  ;;  %v5635_v0 = vpop.f32.mrf.mxu1 }
 0x13c   : > { %v8214_v14 = vadd.f32 %v5547_v61, %v5546_v50  ;;  %v5636_v4 = vadd.f32 %v5635_v0, %v5634_v23 }
 0x13d   : > { %v5549_v8 = vpop.f32.mrf.mxu0  ;;  %v5637_v13 = vpop.f32.mrf.mxu1  ;;  %4449 = vmatmul.mubr.bf16.gmra.mxu1 %v6315_v56  ;;  %5986 = vmatmul.mubr.bf16.gmra.mxu0 %v6260_v11  ;;  %v3915_v11 = vadd.f32 %v8178_v31, %v8108_v42 }
 0x13e   : > { %v8216_v5 = vadd.f32 %v5636_v4, %v3899_v16  ;;  %4456 = vmatprep.mubr.bf16.mxu1 %v5396_v10  ;;  %5989 = vmatprep.mubr.bf16.mxu0 %v6264_v52 }
 0x13f   : > { %v5550_v60 = vpop.f32.mrf.mxu0  ;;  %v5638_v28 = vpop.f32.mrf.mxu1 }
 0x140   : > { %v8220_v53 = vadd.f32 %v5550_v60, %v5549_v8  ;;  %v5639_v48 = vadd.f32 %v5638_v28, %v5637_v13  ;;  %v3920_v8 = vadd.f32 %v8184_v20, %v8108_v42 }
 0x141   : > { %v5552_v21 = vpop.f32.mrf.mxu0  ;;  %v5640_v25 = vpop.f32.mrf.mxu1 }
 0x142   : > { %v8224_v15 = vadd.f32 %v5639_v48, %v3904_v54 }
 0x143   : > { %v5553_v29 = vpop.f32.mrf.mxu0  ;;  %v5641_v33 = vpop.f32.mrf.mxu1 }
 0x144   : > { %v8228_v35 = vadd.f32 %v5553_v29, %v5552_v21  ;;  %v5642_v37 = vadd.f32 %v5641_v33, %v5640_v25 }
 0x145   : > { %v5555_v62 = vpop.f32.mrf.mxu0  ;;  %v5643_v34 = vpop.f32.mrf.mxu1  ;;  %4457 = vmatmul.mubr.bf16.gmra.mxu1 %v6316_v47  ;;  %5990 = vmatmul.mubr.bf16.gmra.mxu0 %v6265_v22  ;;  %v3923_v47 = vadd.f32 %v8196_v3, %v8108_v42 }
 0x146   : > { %v8230_v32 = vadd.f32 %v5642_v37, %v3907_v55 }
 0x147   : > { %v5556_v9 = vpop.f32.mrf.mxu0  ;;  %v5644_v40 = vpop.f32.mrf.mxu1 }
 0x148   : > { %v8234_v46 = vadd.f32 %v5556_v9, %v5555_v62  ;;  %v5645_v1 = vadd.f32 %v5644_v40, %v5643_v34 }
 0x149   : > { %v5558_v12 = vpop.f32.mrf.mxu0  ;;  %v5646_v50 = vpop.f32.mrf.mxu1 }
 0x14a   : > { %v8236_v18 = vadd.f32 %v5645_v1, %v3912_v2 }
 0x14b   : > { %v5559_v23 = vpop.f32.mrf.mxu0  ;;  %v5647_v56 = vpop.f32.mrf.mxu1 }
 0x14c   : > { %v8240_v10 = vadd.f32 %v5559_v23, %v5558_v12  ;;  %v5648_v52 = vadd.f32 %v5647_v56, %v5646_v50 }
 0x14d   : > { %v5649_v61 = vpop.f32.mrf.mxu1  ;;  %v5713_v0 = vpop.f32.mrf.mxu0 }
 0x14e   : > { %v8242_v16 = vadd.f32 %v5648_v52, %v3915_v11 }
 0x14f   : > { %v5650_v43 = vpop.f32.mrf.mxu1  ;;  %v5714_v4 = vpop.f32.mrf.mxu0 }
 0x150   : > { %v5651_v13 = vadd.f32 %v5650_v43, %v5649_v61  ;;  %v5715_v60 = vadd.f32 %v5714_v4, %v5713_v0 }
 0x151   : > { %v5652_v28 = vpop.f32.mrf.mxu1  ;;  %v5716_v54 = vpop.f32.mrf.mxu0 }
 0x152   : > { %v8246_v48 = vadd.f32 %v5651_v13, %v3920_v8  ;;  %v8249_v31 = vadd.f32 %v5715_v60, %v8116_v36  ;;  %v3928_v36 = vadd.f32 %v8202_v27, %v8108_v42 }
 0x153   : > { %v5653_v21 = vpop.f32.mrf.mxu1  ;;  %v5717_v25 = vpop.f32.mrf.mxu0 }
 0x154   : > { %v5654_v22 = vadd.f32 %v5653_v21, %v5652_v28  ;;  %v5718_v29 = vadd.f32 %v5717_v25, %v5716_v54 }
 0x155   : > { %v5655_v33 = vpop.f32.mrf.mxu1  ;;  %v5719_v55 = vpop.f32.mrf.mxu0 }
 0x156   : > { %v8253_v37 = vadd.f32 %v5654_v22, %v3923_v47  ;;  %v8256_v20 = vadd.f32 %v5718_v29, %v8126_v39  ;;  %v3931_v39 = vadd.f32 %v8214_v14, %v8108_v42 }
 0x157   : > { %v5656_v62 = vpop.f32.mrf.mxu1  ;;  %v5720_v34 = vpop.f32.mrf.mxu0 }
 0x158   : > { %v5657_v9 = vadd.f32 %v5656_v62, %v5655_v33  ;;  %v5721_v40 = vadd.f32 %v5720_v34, %v5719_v55 }
 0x159   : > { %v5658_v2 = vpop.f32.mrf.mxu1  ;;  %v5722_v1 = vpop.f32.mrf.mxu0 }
 0x15a   : > { %v8260_v12 = vadd.f32 %v5657_v9, %v3928_v36  ;;  %v8263_v3 = vadd.f32 %v5721_v40, %v8134_v63  ;;  %v3936_v63 = vadd.f32 %v8220_v53, %v8108_v42 }
 0x15b   : > { %v5659_v50 = vpop.f32.mrf.mxu1  ;;  %v5723_v23 = vpop.f32.mrf.mxu0 }
 0x15c   : > { %v5660_v56 = vadd.f32 %v5659_v50, %v5658_v2  ;;  %v5724_v11 = vadd.f32 %v5723_v23, %v5722_v1 }
 0x15d   : > { %v5661_v52 = vpop.f32.mrf.mxu1  ;;  %v5725_v61 = vpop.f32.mrf.mxu0 }
 0x15e   : > { %v8267_v0 = vadd.f32 %v5660_v56, %v3931_v39  ;;  %v8270_v27 = vadd.f32 %v5724_v11, %v8144_v38  ;;  %v3939_v38 = vadd.f32 %v8228_v35, %v8108_v42 }
 0x15f   : > { %v5662_v43 = vpop.f32.mrf.mxu1  ;;  %v5726_v4 = vpop.f32.mrf.mxu0 }
 0x160   : > { %v5663_v8 = vadd.f32 %v5662_v43, %v5661_v52  ;;  %v5727_v13 = vadd.f32 %v5726_v4, %v5725_v61 }
 0x161   : > { %v5664_v60 = vpop.f32.mrf.mxu1  ;;  %v5728_v28 = vpop.f32.mrf.mxu0 }
 0x162   : > { %v8274_v54 = vadd.f32 %v5663_v8, %v3936_v63  ;;  %v8277_v14 = vadd.f32 %v5727_v13, %v8152_v51  ;;  %v3944_v51 = vadd.f32 %v8234_v46, %v8108_v42 }
 0x163   : > { %v5665_v21 = vpop.f32.mrf.mxu1  ;;  %v5729_v25 = vpop.f32.mrf.mxu0 }
 0x164   : > { %v5666_v47 = vadd.f32 %v5665_v21, %v5664_v60  ;;  %v5730_v22 = vadd.f32 %v5729_v25, %v5728_v28 }
 0x165   : > { %v5667_v29 = vpop.f32.mrf.mxu1  ;;  %v5731_v33 = vpop.f32.mrf.mxu0 }
 0x166   : > { %v8281_v55 = vadd.f32 %v5666_v47, %v3939_v38  ;;  %v8284_v53 = vadd.f32 %v5730_v22, %v8162_v6  ;;  %v3947_v6 = vadd.f32 %v8240_v10, %v8108_v42 }
 0x167   : > { %v5668_v62 = vpop.f32.mrf.mxu1  ;;  %v5732_v34 = vpop.f32.mrf.mxu0 }
 0x168   : > { %v5669_v36 = vadd.f32 %v5668_v62, %v5667_v29  ;;  %v5733_v9 = vadd.f32 %v5732_v34, %v5731_v33 }
 0x169   : > { %v5670_v40 = vpop.f32.mrf.mxu1  ;;  %v5734_v2 = vpop.f32.mrf.mxu0 }
 0x16a   : > { %v8288_v1 = vadd.f32 %v5669_v36, %v3944_v51  ;;  %v8291_v35 = vadd.f32 %v5733_v9, %v8170_v59  ;;  %v3952_v59 = vadd.f32 %v7923_v7, %v8108_v42 }
 0x16b   : > { %v5671_v50 = vpop.f32.mrf.mxu1  ;;  %v5735_v23 = vpop.f32.mrf.mxu0 }
 0x16c   : > { %v5672_v39 = vadd.f32 %v5671_v50, %v5670_v40  ;;  %v5736_v56 = vadd.f32 %v5735_v23, %v5734_v2 }
 0x16d   : > { %v5673_v11 = vpop.f32.mrf.mxu1  ;;  %v5737_v52 = vpop.f32.mrf.mxu0 }
 0x16e   : > { %v8295_v61 = vadd.f32 %v5672_v39, %v3947_v6  ;;  %v8298_v46 = vadd.f32 %v5736_v56, %v8180_v17  ;;  %v3955_v17 = vadd.f32 %v7943_v57, %v8108_v42 }
 0x16f   : > { %v5674_v43 = vpop.f32.mrf.mxu1  ;;  %v5738_v4 = vpop.f32.mrf.mxu0 }
 0x170   : > { %v5675_v63 = vadd.f32 %v5674_v43, %v5673_v11  ;;  %v5739_v8 = vadd.f32 %v5738_v4, %v5737_v52 }
 0x171   : > { %v5676_v13 = vpop.f32.mrf.mxu1  ;;  %v5740_v60 = vpop.f32.mrf.mxu0 }
 0x172   : > { %v8302_v28 = vadd.f32 %v5675_v63, %v3952_v59  ;;  %v8305_v10 = vadd.f32 %v5739_v8, %v8188_v19  ;;  %v3960_v19 = vadd.f32 %v7978_v58, %v8108_v42 }
 0x173   : > { %v5677_v21 = vpop.f32.mrf.mxu1  ;;  %v5741_v25 = vpop.f32.mrf.mxu0 }
 0x174   : > { %v5678_v38 = vadd.f32 %v5677_v21, %v5676_v13  ;;  %v5742_v47 = vadd.f32 %v5741_v25, %v5740_v60 }
 0x175   : > { %v5679_v22 = vpop.f32.mrf.mxu1  ;;  %v5743_v29 = vpop.f32.mrf.mxu0 }
 0x176   : > { %v8309_v33 = vadd.f32 %v5678_v38, %v3955_v17  ;;  %v8312_v7 = vadd.f32 %v5742_v47, %v8198_v44  ;;  %v3963_v44 = vadd.f32 %v8006_v26, %v8108_v42 }
 0x177   : > { %v5680_v62 = vpop.f32.mrf.mxu1  ;;  %v5744_v34 = vpop.f32.mrf.mxu0 }
 0x178   : > { %v5681_v51 = vadd.f32 %v5680_v62, %v5679_v22  ;;  %v5745_v36 = vadd.f32 %v5744_v34, %v5743_v29 }
 0x179   : > { %v5682_v9 = vpop.f32.mrf.mxu1  ;;  %v5746_v40 = vpop.f32.mrf.mxu0 }
 0x17a   : > { %v8316_v2 = vadd.f32 %v5681_v51, %v3960_v19  ;;  %v8319_v57 = vadd.f32 %v5745_v36, %v8206_v30  ;;  %v3968_v30 = vadd.f32 %v8049_v49, %v8108_v42 }
 0x17b   : > { %v5683_v50 = vpop.f32.mrf.mxu1  ;;  %v5747_v23 = vpop.f32.mrf.mxu0 }
 0x17c   : > { %v5684_v6 = vadd.f32 %v5683_v50, %v5682_v9  ;;  %v5748_v39 = vadd.f32 %v5747_v23, %v5746_v40 }
 0x17d   : > { %v5685_v56 = vpop.f32.mrf.mxu1  ;;  %v5749_v11 = vpop.f32.mrf.mxu0 }
 0x17e   : > { %v8323_v52 = vadd.f32 %v5684_v6, %v3963_v44  ;;  %v8326_v58 = vadd.f32 %v5748_v39, %v8216_v5  ;;  %v3971_v5 = vadd.f32 %v8067_v45, %v8108_v42 }
 0x17f   : > { %v5686_v43 = vpop.f32.mrf.mxu1  ;;  %v5750_v4 = vpop.f32.mrf.mxu0 }
 0x180   : > { %v5687_v59 = vadd.f32 %v5686_v43, %v5685_v56  ;;  %v5751_v63 = vadd.f32 %v5750_v4, %v5749_v11 }
 0x181   : > { %v5688_v8 = vpop.f32.mrf.mxu1  ;;  %v5752_v13 = vpop.f32.mrf.mxu0 }
 0x182   : > { %v8330_v60 = vadd.f32 %v5687_v59, %v3968_v30  ;;  %v8333_v26 = vadd.f32 %v5751_v63, %v8224_v15  ;;  %v3976_v15 = vadd.f32 %v8084_v24, %v8108_v42 }
 0x183   : > { %v5689_v21 = vpop.f32.mrf.mxu1  ;;  %v5753_v25 = vpop.f32.mrf.mxu0 }
 0x184   : > { %v5690_v17 = vadd.f32 %v5689_v21, %v5688_v8  ;;  %v5754_v38 = vadd.f32 %v5753_v25, %v5752_v13 }
 0x185   : > { %v5691_v47 = vpop.f32.mrf.mxu1  ;;  %v5755_v22 = vpop.f32.mrf.mxu0 }
 0x186   : > { %v8337_v29 = vadd.f32 %v5690_v17, %v3971_v5  ;;  %v8340_v49 = vadd.f32 %v5754_v38, %v8230_v32  ;;  %v3979_v32 = vadd.f32 %v8103_v41, %v8108_v42 }
 0x187   : > { %v5692_v62 = vpop.f32.mrf.mxu1  ;;  %v5756_v34 = vpop.f32.mrf.mxu0 }
 0x188   : > { %v5693_v19 = vadd.f32 %v5692_v62, %v5691_v47  ;;  %v5757_v51 = vadd.f32 %v5756_v34, %v5755_v22 }
 0x189   : > { %v5694_v36 = vpop.f32.mrf.mxu1  ;;  %v5758_v9 = vpop.f32.mrf.mxu0 }
 0x18a   : > { %v8344_v40 = vadd.f32 %v5693_v19, %v3976_v15  ;;  %v8347_v45 = vadd.f32 %v5757_v51, %v8236_v18 }
 0x18b   : > { %v5695_v50 = vpop.f32.mrf.mxu1  ;;  %v5759_v23 = vpop.f32.mrf.mxu0 }
 0x18c   : > { %v5696_v44 = vadd.f32 %v5695_v50, %v5694_v36  ;;  %v5760_v6 = vadd.f32 %v5759_v23, %v5758_v9 }
 0x18d   : > { %v5761_v39 = vpop.f32.mrf.mxu0  ;;  %v8351_v56 = vpop.f32.mrf.mxu1 }
 0x18e   : > { %v8353_v24 = vadd.f32 %v5696_v44, %v3979_v32  ;;  %v8356_v11 = vadd.f32 %v5760_v6, %v8242_v16 }
 0x18f   : > { %v5762_v43 = vpop.f32.mrf.mxu0  ;;  %v8358_v4 = vpop.f32.mrf.mxu1 }
 0x190   : > { %v5763_v18 = vadd.f32 %v5762_v43, %v5761_v39 }
 0x191   : > { %v5764_v30 = vpop.f32.mrf.mxu0  ;;  %v8360_v59 = vpop.f32.mrf.mxu1 }
 0x192   : > { %v8363_v63 = vadd.f32 %v5763_v18, %v8246_v48 }
 0x193   : > { %v5765_v41 = vpop.f32.mrf.mxu0  ;;  %v8365_v42 = vpop.f32.mrf.mxu1 }
 0x194   : > { %v5766_v8 = vadd.f32 %v5765_v41, %v5764_v30 }
 0x195   : > { %v5767_v13 = vpop.f32.mrf.mxu0  ;;  %v8367_v21 = vpop.f32.mrf.mxu1 }
 0x196   : > { %v8370_v16 = vadd.f32 %v5766_v8, %v8253_v37 }
 0x197   : > { %v5768_v25 = vpop.f32.mrf.mxu0  ;;  %v8372_v5 = vpop.f32.mrf.mxu1 }
 0x198   : > { %8647 = vst [vmem:[#allocation5_spill] sm:$0xff] %v8370_v16  ;;  %v5769_v17 = vadd.f32 %v5768_v25, %v5767_v13 }
 0x199   : > { %v5770_v38 = vpop.f32.mrf.mxu0  ;;  %v8374_v47 = vpop.f32.mrf.mxu1 }
 0x19a   : > { %v8377_v48 = vadd.f32 %v5769_v17, %v8260_v12 }
 0x19b   : > { %v5771_v22 = vpop.f32.mrf.mxu0  ;;  %v8379_v62 = vpop.f32.mrf.mxu1 }
 0x19c   : > { %v5772_v34 = vadd.f32 %v5771_v22, %v5770_v38 }
 0x19d   : > { %v5773_v15 = vpop.f32.mrf.mxu0  ;;  %v8381_v19 = vpop.f32.mrf.mxu1 }
 0x19e   : > { %v8384_v37 = vadd.f32 %v5772_v34, %v8267_v0 }
 0x19f   : > { %v5774_v51 = vpop.f32.mrf.mxu0  ;;  %v8386_v36 = vpop.f32.mrf.mxu1 }
 0x1a0   : > { %v5775_v9 = vadd.f32 %v5774_v51, %v5773_v15 }
 0x1a1   : > { %v5776_v50 = vpop.f32.mrf.mxu0  ;;  %v8388_v23 = vpop.f32.mrf.mxu1 }
 0x1a2   : > { %v8391_v12 = vadd.f32 %v5775_v9, %v8274_v54 }
 0x1a3   : > { %v5777_v32 = vpop.f32.mrf.mxu0  ;;  %v8393_v44 = vpop.f32.mrf.mxu1 }
 0x1a4   : > { %8648 = vst [vmem:[#allocation3_spill] sm:$0xff] %v8391_v12  ;;  %v5778_v6 = vadd.f32 %v5777_v32, %v5776_v50 }
 0x1a5   : > { %v5779_v39 = vpop.f32.mrf.mxu0  ;;  %v8395_v43 = vpop.f32.mrf.mxu1 }
 0x1a6   : > { %v8398_v0 = vadd.f32 %v5778_v6, %v8281_v55 }
 0x1a7   : > { %v5780_v18 = vpop.f32.mrf.mxu0  ;;  %v8400_v30 = vpop.f32.mrf.mxu1 }
 0x1a8   : > { %8649 = vst [vmem:[#allocation4_spill] sm:$0xff] %v8398_v0  ;;  %v5781_v41 = vadd.f32 %v5780_v18, %v5779_v39 }
 0x1a9   : > { %v5782_v8 = vpop.f32.mrf.mxu0  ;;  %v8402_v13 = vpop.f32.mrf.mxu1 }
 0x1aa   : > { %v8405_v54 = vadd.f32 %v5781_v41, %v8288_v1 }
 0x1ab   : > { %v5783_v25 = vpop.f32.mrf.mxu0  ;;  %v8407_v17 = vpop.f32.mrf.mxu1 }
 0x1ac   : > { %8650 = vst [vmem:[#allocation6_spill] sm:$0xff] %v8405_v54  ;;  %v5784_v38 = vadd.f32 %v5783_v25, %v5782_v8 }
 0x1ad   : > { %v5785_v22 = vpop.f32.mrf.mxu0  ;;  %v8409_v34 = vpop.f32.mrf.mxu1 }
 0x1ae   : > { %v8412_v55 = vadd.f32 %v5784_v38, %v8295_v61 }
 0x1af   : > { %v5786_v15 = vpop.f32.mrf.mxu0  ;;  %v8414_v51 = vpop.f32.mrf.mxu1 }
 0x1b0   : > { %8651 = vst [vmem:[#allocation7_spill] sm:$0xff] %v8412_v55  ;;  %v5787_v9 = vadd.f32 %v5786_v15, %v5785_v22 }
 0x1b1   : > { %v5788_v50 = vpop.f32.mrf.mxu0  ;;  %v8416_v32 = vpop.f32.mrf.mxu1 }
 0x1b2   : > { %v8419_v1 = vadd.f32 %v5787_v9, %v8302_v28 }
 0x1b3   : > { %v5789_v6 = vpop.f32.mrf.mxu0  ;;  %v8421_v39 = vpop.f32.mrf.mxu1 }
 0x1b4   : > { %8652 = vst [vmem:[#allocation8_spill] sm:$0xff] %v8419_v1  ;;  %v5790_v18 = vadd.f32 %v5789_v6, %v5788_v50 }
 0x1b5   : > { %v5791_v41 = vpop.f32.mrf.mxu0  ;;  %v8423_v8 = vpop.f32.mrf.mxu1 }
 0x1b6   : > { %v8426_v61 = vadd.f32 %v5790_v18, %v8309_v33 }
 0x1b7   : > { %v5792_v25 = vpop.f32.mrf.mxu0  ;;  %v8428_v38 = vpop.f32.mrf.mxu1 }
 0x1b8   : > { %8653 = vst [vmem:[#allocation9_spill] sm:$0xff] %v8426_v61  ;;  %v5793_v22 = vadd.f32 %v5792_v25, %v5791_v41 }
 0x1b9   : > { %v5794_v15 = vpop.f32.mrf.mxu0  ;;  %v8430_v0 = vpop.f32.mrf.mxu1 }
 0x1ba   : > { %v8433_v28 = vadd.f32 %v5793_v22, %v8316_v2 }
 0x1bb   : > { %v5795_v9 = vpop.f32.mrf.mxu0  ;;  %v8435_v1 = vpop.f32.mrf.mxu1 }
 0x1bc   : > { %8654 = vst [vmem:[#allocation10_spill] sm:$0xff] %v8433_v28  ;;  %v5796_v50 = vadd.f32 %v5795_v9, %v5794_v15 }
 0x1bd   : > { %v5797_v6 = vpop.f32.mrf.mxu0  ;;  %v8437_v55 = vpop.f32.mrf.mxu1 }
 0x1be   : > { %v8440_v33 = vadd.f32 %v5796_v50, %v8323_v52 }
 0x1bf   : > { %v5798_v18 = vpop.f32.mrf.mxu0  ;;  %v8442_v61 = vpop.f32.mrf.mxu1 }
 0x1c0   : > { %8655 = vst [vmem:[#allocation11_spill] sm:$0xff] %v8440_v33  ;;  %v5799_v41 = vadd.f32 %v5798_v18, %v5797_v6  ;;  %v5833_v6 = vadd.f32 %v8372_v5, %v8367_v21 }
 0x1c1   : > { %v5800_v25 = vpop.f32.mrf.mxu0  ;;  %v8444_v12 = vpop.f32.mrf.mxu1 }
 0x1c2   : > { %v8447_v2 = vadd.f32 %v5799_v41, %v8330_v60  ;;  %v4347_v21 = vadd.f32 %v5833_v6, %v8263_v3  ;;  %v5839_v6 = vadd.f32 %v8386_v36, %v8381_v19  ;;  %v5842_v36 = vadd.f32 %v8393_v44, %v8388_v23 }
 0x1c3   : > { %v5801_v22 = vpop.f32.mrf.mxu0  ;;  %v8449_v28 = vpop.f32.mrf.mxu1  ;;  %v5851_v23 = vadd.f32 %v8414_v51, %v8409_v34  ;;  %v5854_v34 = vadd.f32 %v8421_v39, %v8416_v32  ;;  %v5863_v39 = vadd.f32 %v8442_v61, %v8437_v55 }
 0x1c4   : > { %8656 = vst [vmem:[#allocation12_spill] sm:$0xff] %v8447_v2  ;;  %v5802_v15 = vadd.f32 %v5801_v22, %v5800_v25  ;;  %v5827_v25 = vadd.f32 %v8358_v4, %v8351_v56  ;;  %v5866_v55 = vadd.f32 %v8449_v28, %v8444_v12 }
 0x1c5   : > { %v5803_v9 = vpop.f32.mrf.mxu0  ;;  %v8451_v54 = vpop.f32.mrf.mxu1 }
 0x1c6   : > { %v8454_v52 = vadd.f32 %v5802_v15, %v8337_v29  ;;  %v5836_v29 = vadd.f32 %v8379_v62, %v8374_v47  ;;  %v4339_v4 = vadd.f32 %v5827_v25, %v8249_v31  ;;  %v5845_v62 = vadd.f32 %v8400_v30, %v8395_v43 }
 0x1c7   : > { %v5804_v50 = vpop.f32.mrf.mxu0  ;;  %v8456_v33 = vpop.f32.mrf.mxu1  ;;  %v5848_v43 = vadd.f32 %v8407_v17, %v8402_v13  ;;  %v5857_v13 = vadd.f32 %v8428_v38, %v8423_v8  ;;  %v5860_v8 = vadd.f32 %v8435_v1, %v8430_v0 }
 0x1c8   : > { %v5805_v18 = vadd.f32 %v5804_v50, %v5803_v9  ;;  %v5830_v50 = vadd.f32 %v8365_v42, %v8360_v59  ;;  %v5869_v1 = vadd.f32 %v8456_v33, %v8451_v54 }
 0x1c9   : > { %v5806_v60 = vpop.f32.mrf.mxu0  ;;  %v8460_v41 = vpop.f32.mrf.mxu1 }
 0x1ca   : > { %v8465_v22 = vadd.f32 %v5805_v18, %v8344_v40  ;;  %v4342_v25 = vadd.f32 %v5830_v50, %v8256_v20 }
 0x1cb   : > { %v5807_v2 = vpop.f32.mrf.mxu0  ;;  %v8467_v16 = vpop.f32.mrf.mxu1 }
 0x1cc   : > { %v5808_v15 = vadd.f32 %v5807_v2, %v5806_v60  ;;  %v5872_v33 = vadd.f32 %v8467_v16, %v8460_v41 }
 0x1cd   : > { %v8473_v5 = vpop.f32.mrf.mxu1  ;;  %v5963_v9 = vpop.f32.mrf.mxu0 }
 0x1ce   : > { %v8478_v56 = vadd.f32 %v5808_v15, %v8353_v24  ;;  %v4508_v40 = vadd.f32 %v5963_v9, %v4347_v21  ;;  %v4350_v24 = vadd.f32 %v5836_v29, %v8270_v27  ;;  %v4363_v29 = vadd.f32 %v5845_v62, %v8291_v35 }
 0x1cf   : > { %v8486_v47 = vpop.f32.mrf.mxu1  ;;  %v4499_v3 = vpop.f32.mrf.mxu0  ;;  %v4366_v62 = vadd.f32 %v5848_v43, %v8298_v46 }
 0x1d0   : > { %v4628_v59 = vmax.f32 %v4508_v40, 0.0  ;;  %v4500_v42 = vadd.f32 %v4499_v3, %v4339_v4  ;;  %v4355_v40 = vadd.f32 %v5839_v6, %v8277_v14  ;;  %v5875_v12 = vadd.f32 %v8486_v47, %v8473_v5 }
 0x1d1   : > { %v8491_v2 = vpop.f32.mrf.mxu1  ;;  %v5964_v31 = vpop.f32.mrf.mxu0 }
 0x1d2   : > { %4660 = vst [vmem:[%s8484_s8 + $0x10] sm:$0xff] %v4628_v59  ;;  %v4626_v18 = vmax.f32 %v4500_v42, 0.0  ;;  %v4511_v60 = vadd.f32 %v5964_v31, %v4350_v24  ;;  %v4358_v24 = vadd.f32 %v5842_v36, %v8284_v53  ;;  %v4374_v36 = vadd.f32 %v5854_v34, %v8312_v7 }
 0x1d3   : > { %v8497_v15 = vpop.f32.mrf.mxu1  ;;  %v4502_v21 = vpop.f32.mrf.mxu0 }
 0x1d4   : > { %4658 = vst [vmem:[%s8484_s8] sm:$0xff] %v4626_v18  ;;  %v4629_v27 = vmax.f32 %v4511_v60, 0.0  ;;  %v4503_v30 = vadd.f32 %v4502_v21, %v4342_v25  ;;  %v4379_v18 = vadd.f32 %v5857_v13, %v8319_v57  ;;  %v4371_v21 = vadd.f32 %v5851_v23, %v8305_v10 }
 0x1d5   : > { %v8503_v9 = vpop.f32.mrf.mxu1  ;;  %v5967_v19 = vpop.f32.mrf.mxu0  ;;  %v5878_v5 = vadd.f32 %v8497_v15, %v8491_v2 }
 0x1d6   : > { %4661 = vst [vmem:[%s8484_s8 + $0x18] sm:$0xff] %v4629_v27  ;;  %v4627_v20 = vmax.f32 %v4503_v30, 0.0  ;;  %v4524_v50 = vadd.f32 %v5967_v19, %v4363_v29  ;;  %v4382_v30 = vadd.f32 %v5860_v8, %v8326_v58 }
 0x1d7   : > { %v5880_v4 = vpop.f32.mrf.mxu1  ;;  %v4515_v3 = vpop.f32.mrf.mxu0 }
 0x1d8   : > { %4659 = vst [vmem:[%s8484_s8 + $0x8] sm:$0xff] %v4627_v20  ;;  %v4632_v35 = vmax.f32 %v4524_v50, 0.0  ;;  %v4516_v17 = vadd.f32 %v4515_v3, %v4355_v40  ;;  %v4395_v40 = vadd.f32 %v5869_v1, %v8347_v45  ;;  %v5881_v16 = vadd.f32 %v5880_v4, %v8503_v9  ;;  %v8657_v1 = vld [vmem:[#allocation5_spill] sm:$0xff] }
 0x1d9   : > { %v8513_v59 = vpop.f32.mrf.mxu1  ;;  %v5968_v42 = vpop.f32.mrf.mxu0  ;;  %v4398_v45 = vadd.f32 %v5872_v33, %v8356_v11  ;;  %v8659_v33 = vld [vmem:[#allocation3_spill] sm:$0xff] }
 0x1da   : > { %4664 = vst [vmem:[%s8484_s8 + $0x30] sm:$0xff] %v4632_v35  ;;  %v4630_v14 = vmax.f32 %v4516_v17, 0.0  ;;  %v4527_v44 = vadd.f32 %v5968_v42, %v4366_v62  ;;  %v4387_v35 = vadd.f32 %v5863_v39, %v8333_v26  ;;  %v4390_v26 = vadd.f32 %v5866_v55, %v8340_v49 }
 0x1db   : > { %v5883_v31 = vpop.f32.mrf.mxu1  ;;  %v4518_v6 = vpop.f32.mrf.mxu0  ;;  %v4411_v11 = vadd.f32 %v5881_v16, %v8377_v48  ;;  %v4403_v49 = vadd.f32 %v5875_v12, %v8363_v63  ;;  %v4406_v63 = vadd.f32 %v5878_v5, %v8657_v1  ;;  %v8661_v16 = vld [vmem:[#allocation4_spill] sm:$0xff] }
 0x1dc   : > { %4662 = vst [vmem:[%s8484_s8 + $0x20] sm:$0xff] %v4630_v14  ;;  %v4633_v46 = vmax.f32 %v4527_v44, 0.0  ;;  %v4519_v38 = vadd.f32 %v4518_v6, %v4358_v24  ;;  %v5884_v9 = vadd.f32 %v5883_v31, %v8513_v59 }
 0x1dd   : > { %v8523_v60 = vpop.f32.mrf.mxu1  ;;  %v5971_v25 = vpop.f32.mrf.mxu0 }
 0x1de   : > { %4665 = vst [vmem:[%s8484_s8 + $0x38] sm:$0xff] %v4633_v46  ;;  %v4631_v53 = vmax.f32 %v4519_v38, 0.0  ;;  %v4540_v51 = vadd.f32 %v5971_v25, %v4379_v18  ;;  %v4414_v48 = vadd.f32 %v5884_v9, %v8384_v37 }
 0x1df   : > { %v8529_v43 = vpop.f32.mrf.mxu1  ;;  %v4531_v0 = vpop.f32.mrf.mxu0 }
 0x1e0   : > { %4663 = vst [vmem:[%s8484_s8 + $0x28] sm:$0xff] %v4631_v53  ;;  %v4636_v57 = vmax.f32 %v4540_v51, 0.0  ;;  %v4532_v27 = vadd.f32 %v4531_v0, %v4371_v21  ;;  %v5887_v2 = vadd.f32 %v8529_v43, %v8523_v60 }
 0x1e1   : > { %v8535_v29 = vpop.f32.mrf.mxu1  ;;  %v5972_v32 = vpop.f32.mrf.mxu0 }
 0x1e2   : > { %4668 = vst [vmem:[%s8484_s8 + $0x50] sm:$0xff] %v4636_v57  ;;  %v4634_v10 = vmax.f32 %v4532_v27, 0.0  ;;  %v4543_v19 = vadd.f32 %v5972_v32, %v4382_v30 }
 0x1e3   : > { %v8541_v20 = vpop.f32.mrf.mxu1  ;;  %v4534_v54 = vpop.f32.mrf.mxu0 }
 0x1e4   : > { %4666 = vst [vmem:[%s8484_s8 + $0x40] sm:$0xff] %v4634_v10  ;;  %v4637_v58 = vmax.f32 %v4543_v19, 0.0  ;;  %v4535_v50 = vadd.f32 %v4534_v54, %v4374_v36  ;;  %v8658_v10 = vld [vmem:[#allocation6_spill] sm:$0xff]  ;;  %v5890_v60 = vadd.f32 %v8541_v20, %v8535_v29 }
 0x1e5   : > { %v5891_v3 = vpop.f32.mrf.mxu1  ;;  %v5975_v13 = vpop.f32.mrf.mxu0 }
 0x1e6   : > { %4669 = vst [vmem:[%s8484_s8 + $0x58] sm:$0xff] %v4637_v58  ;;  %v4635_v7 = vmax.f32 %v4535_v50, 0.0  ;;  %v4556_v61 = vadd.f32 %v5975_v13, %v4395_v40  ;;  %v4419_v58 = vadd.f32 %v5887_v2, %v8659_v33 }
 0x1e7   : > { %v5892_v17 = vpop.f32.mrf.mxu1  ;;  %v4547_v62 = vpop.f32.mrf.mxu0 }
 0x1e8   : > { %4667 = vst [vmem:[%s8484_s8 + $0x48] sm:$0xff] %v4635_v7  ;;  %v4640_v41 = vmax.f32 %v4556_v61, 0.0  ;;  %v4548_v42 = vadd.f32 %v4547_v62, %v4387_v35  ;;  %v5893_v59 = vadd.f32 %v5892_v17, %v5891_v3  ;;  %v8660_v7 = vld [vmem:[#allocation7_spill] sm:$0xff] }
 0x1e9   : > { %v5894_v23 = vpop.f32.mrf.mxu1  ;;  %v5976_v14 = vpop.f32.mrf.mxu0 }
 0x1ea   : > { %4672 = vst [vmem:[%s8484_s8 + $0x70] sm:$0xff] %v4640_v41  ;;  %v4638_v28 = vmax.f32 %v4548_v42, 0.0  ;;  %v4559_v44 = vadd.f32 %v5976_v14, %v4398_v45  ;;  %v4427_v37 = vadd.f32 %v5893_v59, %v8658_v10  ;;  %v4422_v41 = vadd.f32 %v5890_v60, %v8661_v16 }
 0x1eb   : > { %v5895_v24 = vpop.f32.mrf.mxu1  ;;  %v4550_v6 = vpop.f32.mrf.mxu0 }
 0x1ec   : > { %4670 = vst [vmem:[%s8484_s8 + $0x60] sm:$0xff] %v4638_v28  ;;  %v4641_v4 = vmax.f32 %v4559_v44, 0.0  ;;  %v4551_v8 = vadd.f32 %v4550_v6, %v4390_v26  ;;  %v5896_v30 = vadd.f32 %v5895_v24, %v5894_v23  ;;  %v8662_v28 = vld [vmem:[#allocation10_spill] sm:$0xff] }
 0x1ed   : > { %v5897_v46 = vpop.f32.mrf.mxu1  ;;  %v5979_v38 = vpop.f32.mrf.mxu0 }
 0x1ee   : > { %4673 = vst [vmem:[%s8484_s8 + $0x78] sm:$0xff] %v4641_v4  ;;  %v4639_v47 = vmax.f32 %v4551_v8, 0.0  ;;  %v4572_v18 = vadd.f32 %v5979_v38, %v4411_v11  ;;  %v4430_v61 = vadd.f32 %v5896_v30, %v8660_v7  ;;  %v8663_v8 = vld [vmem:[#allocation8_spill] sm:$0xff] }
 0x1ef   : > { %v5898_v25 = vpop.f32.mrf.mxu1  ;;  %v4563_v34 = vpop.f32.mrf.mxu0  ;;  %v8666_v30 = vld [vmem:[#allocation12_spill] sm:$0xff] }
 0x1f0   : > { %4671 = vst [vmem:[%s8484_s8 + $0x68] sm:$0xff] %v4639_v47  ;;  %v4644_v31 = vmax.f32 %v4572_v18, 0.0  ;;  %v4564_v53 = vadd.f32 %v4563_v34, %v4403_v49  ;;  %v5899_v62 = vadd.f32 %v5898_v25, %v5897_v46  ;;  %v8664_v18 = vld [vmem:[#allocation11_spill] sm:$0xff] }
 0x1f1   : > { %v5900_v51 = vpop.f32.mrf.mxu1  ;;  %v5980_v21 = vpop.f32.mrf.mxu0 }
 0x1f2   : > { %4676 = vst [vmem:[%s8484_s8 + $0x90] sm:$0xff] %v4644_v31  ;;  %v4642_v15 = vmax.f32 %v4564_v53, 0.0  ;;  %v4575_v0 = vadd.f32 %v5980_v21, %v4414_v48  ;;  %v4435_v11 = vadd.f32 %v5899_v62, %v8663_v8  ;;  %v8665_v48 = vld [vmem:[#allocation9_spill] sm:$0xff] }
 0x1f3   : > { %v5901_v57 = vpop.f32.mrf.mxu1  ;;  %v4566_v27 = vpop.f32.mrf.mxu0 }
 0x1f4   : > { %4674 = vst [vmem:[%s8484_s8 + $0x80] sm:$0xff] %v4642_v15  ;;  %v4645_v32 = vmax.f32 %v4575_v0, 0.0  ;;  %v4567_v39 = vadd.f32 %v4566_v27, %v4406_v63  ;;  %v5902_v6 = vadd.f32 %v5901_v57, %v5900_v51 }
 0x1f5   : > { %v5903_v19 = vpop.f32.mrf.mxu1  ;;  %v5983_v36 = vpop.f32.mrf.mxu0 }
 0x1f6   : > { %4677 = vst [vmem:[%s8484_s8 + $0x98] sm:$0xff] %v4645_v32  ;;  %v4643_v43 = vmax.f32 %v4567_v39, 0.0  ;;  %v4588_v54 = vadd.f32 %v5983_v36, %v4427_v37  ;;  %v4438_v51 = vadd.f32 %v5902_v6, %v8665_v48 }
 0x1f7   : > { %v5904_v50 = vpop.f32.mrf.mxu1  ;;  %v4579_v40 = vpop.f32.mrf.mxu0 }
 0x1f8   : > { %4675 = vst [vmem:[%s8484_s8 + $0x88] sm:$0xff] %v4643_v43  ;;  %v4648_v3 = vmax.f32 %v4588_v54, 0.0  ;;  %v5905_v13 = vadd.f32 %v5904_v50, %v5903_v19  ;;  %v4580_v55 = vadd.f32 %v4579_v40, %v4419_v58 }
 0x1f9   : > { %v5906_v35 = vpop.f32.mrf.mxu1  ;;  %v5984_v17 = vpop.f32.mrf.mxu0 }
 0x1fa   : > { %4680 = vst [vmem:[%s8484_s8 + $0xb0] sm:$0xff] %v4648_v3  ;;  %v4646_v29 = vmax.f32 %v4580_v55, 0.0  ;;  %v4591_v20 = vadd.f32 %v5984_v17, %v4430_v61  ;;  %v4443_v44 = vadd.f32 %v5905_v13, %v8662_v28 }
 0x1fb   : > { %v5907_v42 = vpop.f32.mrf.mxu1  ;;  %v4582_v45 = vpop.f32.mrf.mxu0 }
 0x1fc   : > { %4678 = vst [vmem:[%s8484_s8 + $0xa0] sm:$0xff] %v4646_v29  ;;  %v4649_v23 = vmax.f32 %v4591_v20, 0.0  ;;  %v5908_v14 = vadd.f32 %v5907_v42, %v5906_v35  ;;  %v4583_v12 = vadd.f32 %v4582_v45, %v4422_v41 }
 0x1fd   : > { %v5909_v26 = vpop.f32.mrf.mxu1  ;;  %v5987_v24 = vpop.f32.mrf.mxu0 }
 0x1fe   : > { %4681 = vst [vmem:[%s8484_s8 + $0xb8] sm:$0xff] %v4649_v23  ;;  %v4647_v9 = vmax.f32 %v4583_v12, 0.0  ;;  %v4604_v4 = vadd.f32 %v5987_v24, %v4443_v44  ;;  %v4446_v49 = vadd.f32 %v5908_v14, %v8664_v18 }
 0x1ff   : > { %v5910_v46 = vpop.f32.mrf.mxu1  ;;  %v4595_v38 = vpop.f32.mrf.mxu0 }
 0x200   : > { %4679 = vst [vmem:[%s8484_s8 + $0xa8] sm:$0xff] %v4647_v9  ;;  %v4652_v5 = vmax.f32 %v4604_v4, 0.0  ;;  %v4596_v47 = vadd.f32 %v4595_v38, %v4435_v11  ;;  %v5911_v59 = vadd.f32 %v5910_v46, %v5909_v26 }
 0x201   : > { %v5912_v25 = vpop.f32.mrf.mxu1  ;;  %v5988_v34 = vpop.f32.mrf.mxu0 }
 0x202   : > { %4684 = vst [vmem:[%s8484_s8 + $0xd0] sm:$0xff] %v4652_v5  ;;  %v4650_v31 = vmax.f32 %v4596_v47, 0.0  ;;  %v4607_v53 = vadd.f32 %v5988_v34, %v4446_v49  ;;  %v4451_v32 = vadd.f32 %v5911_v59, %v8666_v30 }
 0x203   : > { %v5913_v21 = vpop.f32.mrf.mxu1  ;;  %v4598_v2 = vpop.f32.mrf.mxu0 }
 0x204   : > { %4682 = vst [vmem:[%s8484_s8 + $0xc0] sm:$0xff] %v4650_v31  ;;  %v4653_v15 = vmax.f32 %v4607_v53, 0.0  ;;  %v4599_v0 = vadd.f32 %v4598_v2, %v4438_v51  ;;  %v5914_v57 = vadd.f32 %v5913_v21, %v5912_v25 }
 0x205   : > { %v5915_v1 = vpop.f32.mrf.mxu1  ;;  %v5991_v63 = vpop.f32.mrf.mxu0 }
 0x206   : > { %4685 = vst [vmem:[%s8484_s8 + $0xd8] sm:$0xff] %v4653_v15  ;;  %v4651_v27 = vmax.f32 %v4599_v0, 0.0  ;;  %v4454_v33 = vadd.f32 %v5914_v57, %v8454_v52 }
 0x207   : > { %v5916_v39 = vpop.f32.mrf.mxu1  ;;  %v4611_v10 = vpop.f32.mrf.mxu0 }
 0x208   : > { %4683 = vst [vmem:[%s8484_s8 + $0xc8] sm:$0xff] %v4651_v27  ;;  %v5917_v37 = vadd.f32 %v5916_v39, %v5915_v1  ;;  %v4612_v19 = vadd.f32 %v4611_v10, %v4451_v32 }
 0x209   : > { %v5918_v36 = vpop.f32.mrf.mxu1  ;;  %v5992_v60 = vpop.f32.mrf.mxu0 }
 0x20a   : > { %v4459_v43 = vadd.f32 %v5917_v37, %v8465_v22  ;;  %v4654_v54 = vmax.f32 %v4612_v19, 0.0 }
 0x20b   : > { %v5919_v58 = vpop.f32.mrf.mxu1  ;;  %v4614_v50 = vpop.f32.mrf.mxu0 }
 0x20c   : > { %v4620_v40 = vadd.f32 %v5991_v63, %v4459_v43  ;;  %4686 = vst [vmem:[%s8484_s8 + $0xe0] sm:$0xff] %v4654_v54  ;;  %v5920_v3 = vadd.f32 %v5919_v58, %v5918_v36  ;;  %v4615_v13 = vadd.f32 %v4614_v50, %v4454_v33 }
 0x20e   : > { %v4656_v55 = vmax.f32 %v4620_v40, 0.0  ;;  %v4462_v7 = vadd.f32 %v5920_v3, %v8478_v56  ;;  %v4655_v61 = vmax.f32 %v4615_v13, 0.0 }
 0x210   : > { %4688 = vst [vmem:[%s8484_s8 + $0xf0] sm:$0xff] %v4656_v55  ;;  %v4623_v35 = vadd.f32 %v5992_v60, %v4462_v7  ;;  %4687 = vst [vmem:[%s8484_s8 + $0xe8] sm:$0xff] %v4655_v61 }
 0x212   : > { %v4657_v17 = vmax.f32 %v4623_v35, 0.0 }
 0x214   : > { %4689 = vst [vmem:[%s8484_s8 + $0xf8] sm:$0xff] %v4657_v17 }
 0x215 PF: > { %s13_s14 = sadd.s32 1, %s6339_s14   ;;  %s8667_s12 = smov %s6335_s13 }
 0x216   : > { %p10_p5 = scmp.ge.s32.totalorder %s13_s14, 4   ;;  %s8668_s13 = smov %s8670_s15 }
 0x218   :  { %12 = sbr.rel (!%p10_p5) target bundleno = 2 (0x2), region = 70 }

</bundles_post_ra>
